<compile_context>
chip_gen: v7x
topology: tpu7x:2x2x1
jax: 0.10.0
libtpu: 0.0.40
codegen_flags: <defaults>
</compile_context>

<pallas_src>
import jax
import jax.numpy as jnp
from jax.experimental import pallas as pl
from jax.experimental.pallas import tpu as pltpu


IMAGENET_MEAN = jnp.array([0.485, 0.456, 0.406], jnp.float32)
IMAGENET_STD = jnp.array([0.229, 0.224, 0.225], jnp.float32)


# ------------------------- in-kernel building block -------------------------

def _conv3x3(xv, pad_ref, w_ref, b_ref):
    """3x3 / stride-1 / pad-1 conv of one VMEM-resident feature map.

    xv: (H, W, Cin) f32 value; pad_ref: (H+2, W+2, Cin) VMEM scratch (halo);
    w_ref: (9, Cin, Cout) ref; b_ref: (1, Cout) ref.
    Returns the pre-activation (H*W, Cout) f32 value.
    """
    H, W, Cin = xv.shape
    Cout = b_ref.shape[-1]
    pad_ref[...] = jnp.zeros(pad_ref.shape, jnp.float32)
    pad_ref[1:H + 1, 1:W + 1, :] = xv
    xp = pad_ref[...]
    acc = jnp.zeros((H * W, Cout), jnp.float32)
    for k in range(9):                       # statically unrolled 3x3 taps
        ky, kx = divmod(k, 3)
        patch = xp[ky:ky + H, kx:kx + W, :].reshape(H * W, Cin)
        acc = acc + jnp.dot(patch, w_ref[k],
                            preferred_element_type=jnp.float32)
    return acc + b_ref[...]


# ------------------------------- kernel A ----------------------------------

def _trunk_kernel(x_ref, mean_ref, w1_ref, b1_ref, w2_ref, b2_ref, o_ref,
                  pad1_ref, pad2_ref, half_ref):
    _, H, W, _ = x_ref.shape
    _, Hh, Wh, c2 = o_ref.shape
    c1 = b1_ref.shape[-1]

    # conv_1 (+ fused ImageNet normalization: 1/std is pre-folded into w1, the
    # mean is subtracted here so the implicit zero halo matches the reference
    # "normalize -> zero-pad") + fused ReLU.
    x0 = x_ref[0] - mean_ref[...]
    a = jnp.maximum(_conv3x3(x0, pad1_ref, w1_ref, b1_ref), 0.0)      # (H*W,c1)

    # conv_2 + fused ReLU.
    a = jnp.maximum(_conv3x3(a.reshape(H, W, c1), pad2_ref, w2_ref, b2_ref),
                    0.0)                                              # (H*W,c2)

    # fused MaxPool2d(2, 2): pair rows via a layout-trivial major regroup,
    # pair columns via stride-2 loads from a VMEM scratch (lane-preserving).
    a = a.reshape(Hh, 2, W, c2)
    half_ref[...] = jnp.maximum(a[:, 0], a[:, 1]).reshape(Hh * W, c2)
    pooled = jnp.maximum(half_ref[pl.ds(0, Hh * Wh, 2), :],
                         half_ref[pl.ds(1, Hh * Wh, 2), :])           # (Hh*Wh,c2)
    o_ref[...] = pooled.reshape(1, Hh, Wh, c2).astype(o_ref.dtype)


def _trunk(x, mean_row, w1, b1, w2, b2):
    B, H, W, _ = x.shape
    assert H % 2 == 0 and W % 2 == 0
    Hh, Wh = H // 2, W // 2
    c1, c2 = w1.shape[-1], w2.shape[-1]
    return pl.pallas_call(
        _trunk_kernel,
        out_shape=jax.ShapeDtypeStruct((B, Hh, Wh, c2), jnp.float32),
        grid=(B,),
        in_specs=[
            pl.BlockSpec((1, H, W, 3), lambda n: (n, 0, 0, 0)),
            pl.BlockSpec((1, 3), lambda n: (0, 0)),
            pl.BlockSpec(w1.shape, lambda n: (0, 0, 0)),
            pl.BlockSpec((1, c1), lambda n: (0, 0)),
            pl.BlockSpec(w2.shape, lambda n: (0, 0, 0)),
            pl.BlockSpec((1, c2), lambda n: (0, 0)),
        ],
        out_specs=pl.BlockSpec((1, Hh, Wh, c2), lambda n: (n, 0, 0, 0)),
        scratch_shapes=[
            pltpu.VMEM((H + 2, W + 2, 3), jnp.float32),    # conv1 halo
            pltpu.VMEM((H + 2, W + 2, c1), jnp.float32),   # conv2 halo
            pltpu.VMEM((Hh * W, c2), jnp.float32),         # row-pooled rows
        ],
        compiler_params=pltpu.CompilerParams(
            dimension_semantics=("parallel",),
            vmem_limit_bytes=32 * 1024 * 1024),
    )(x, mean_row, w1, b1.reshape(1, -1), w2, b2.reshape(1, -1))


# ------------------------------- kernel B ----------------------------------

def _head_kernel(p_ref, t_ref, w3_ref, b3_ref, w4_ref, b4_ref,
                 sse3_ref, sse4_ref, pad3_ref, pad4_ref):
    n = pl.program_id(0)
    _, Hh, Wh, _ = p_ref.shape
    c3 = b3_ref.shape[-1]

    # conv_3 on both streams; the first loss term uses the *pre-ReLU* output.
    a3p = _conv3x3(p_ref[0], pad3_ref, w3_ref, b3_ref)      # (Hh*Wh, c3)
    a3t = _conv3x3(t_ref[0], pad3_ref, w3_ref, b3_ref)
    d3 = a3p - a3t
    sse3_ref[n] = jnp.sum(d3 * d3)

    # ReLU -> conv_4; only the squared-error partial sums leave the chip.
    a4p = _conv3x3(jnp.maximum(a3p, 0.0).reshape(Hh, Wh, c3),
                   pad4_ref, w4_ref, b4_ref)
    a4t = _conv3x3(jnp.maximum(a3t, 0.0).reshape(Hh, Wh, c3),
                   pad4_ref, w4_ref, b4_ref)
    d4 = a4p - a4t
    sse4_ref[n] = jnp.sum(d4 * d4)


def _head(feat, w3, b3, w4, b4, n_pairs):
    _, Hh, Wh, cin = feat.shape
    c3, c4 = w3.shape[-1], w4.shape[-1]
    return pl.pallas_call(
        _head_kernel,
        out_shape=(jax.ShapeDtypeStruct((n_pairs,), jnp.float32),
                   jax.ShapeDtypeStruct((n_pairs,), jnp.float32)),
        grid=(n_pairs,),
        in_specs=[
            pl.BlockSpec((1, Hh, Wh, cin), lambda n: (n, 0, 0, 0)),
            pl.BlockSpec((1, Hh, Wh, cin),
                         lambda n: (n + n_pairs, 0, 0, 0)),
            pl.BlockSpec(w3.shape, lambda n: (0, 0, 0)),
            pl.BlockSpec((1, c3), lambda n: (0, 0)),
            pl.BlockSpec(w4.shape, lambda n: (0, 0, 0)),
            pl.BlockSpec((1, c4), lambda n: (0, 0)),
        ],
        out_specs=(
            pl.BlockSpec((n_pairs,), lambda n: (0,),
                         memory_space=pltpu.MemorySpace.SMEM),
            pl.BlockSpec((n_pairs,), lambda n: (0,),
                         memory_space=pltpu.MemorySpace.SMEM),
        ),
        scratch_shapes=[
            pltpu.VMEM((Hh + 2, Wh + 2, cin), jnp.float32),  # conv3 halo
            pltpu.VMEM((Hh + 2, Wh + 2, c3), jnp.float32),   # conv4 halo
        ],
        compiler_params=pltpu.CompilerParams(
            dimension_semantics=("arbitrary",),   # SMEM partial sums resident
            vmem_limit_bytes=32 * 1024 * 1024),
    )(feat, feat, w3, b3.reshape(1, -1), w4, b4.reshape(1, -1))


# --------------------------------- model -----------------------------------

def init_params(key):
    # VGG19 features up to conv_4 (conv2_2): 3->64, 64->64, 64->128, 128->128
    shapes = [(3, 64), (64, 64), (64, 128), (128, 128)]
    params = []
    for i, (cin, cout) in enumerate(shapes):
        kw, kb = jax.random.split(jax.random.fold_in(key, i))
        w = jax.random.normal(kw, (9, cin, cout), jnp.float32) / jnp.sqrt(9.0 * cin)
        b = 0.01 * jax.random.normal(kb, (cout,), jnp.float32)
        params.append((w, b))
    return params


def perceptual_loss(pred, target, params):
    """pred, target: (N, 3, H, W) float32 (NCHW, like the PyTorch module)."""
    n_pairs, _, H, W = pred.shape
    (w1, b1), (w2, b2), (w3, b3), (w4, b4) = params

    # Batch pred & target through the trunk together; NCHW -> NHWC once.
    x = jnp.concatenate([pred, target], axis=0)
    x = jnp.transpose(x, (0, 2, 3, 1)).astype(jnp.float32)

    # Fold 1/std of the ImageNet normalization into conv1's weights; the mean
    # subtraction happens inside the kernel (on the VMEM tile, no HBM pass).
    w1f = (w1 / IMAGENET_STD.reshape(1, 3, 1)).astype(jnp.float32)
    mean_row = IMAGENET_MEAN.reshape(1, 3)

    feat = _trunk(x, mean_row, w1f, b1, w2, b2)          # (2N, H/2, W/2, 64)
    sse3, sse4 = _head(feat, w3, b3, w4, b4, n_pairs)    # (N,), (N,)

    hh, wh = H // 2, W // 2
    loss = (jnp.sum(sse3) / (n_pairs * w3.shape[-1] * hh * wh)
            + jnp.sum(sse4) / (n_pairs * w4.shape[-1] * hh * wh))
    return loss


# -------------------------- pure-JAX reference -----------------------------

def _reference_loss(pred, target, params):
    mean = IMAGENET_MEAN.reshape(1, 3, 1, 1)
    std = IMAGENET_STD.reshape(1, 3, 1, 1)

    def conv(x, w, b):  # x: NCHW, w: (9, cin, cout)
        wk = jnp.transpose(w.reshape(3, 3, w.shape[1], w.shape[2]),
                           (3, 2, 0, 1))  # OIHW
        y = jax.lax.conv_general_dilated(
            x, wk, window_strides=(1, 1), padding=((1, 1), (1, 1)),
            dimension_numbers=("NCHW", "OIHW", "NCHW"),
            precision=jax.lax.Precision.HIGHEST)
        return y + b.reshape(1, -1, 1, 1)

    def pool(x):
        return jax.lax.reduce_window(x, -jnp.inf, jax.lax.max,
                                     (1, 1, 2, 2), (1, 1, 2, 2), "VALID")

    (w1, b1), (w2, b2), (w3, b3), (w4, b4) = params

    def trunk(x):
        x = (x - mean) / std
        x = jnp.maximum(conv(x, w1, b1), 0.0)
        x = jnp.maximum(conv(x, w2, b2), 0.0)
        return pool(x)

    p, t = trunk(pred), trunk(target)
    p3, t3 = conv(p, w3, b3), conv(t, w3, b3)
    loss = jnp.mean((p3 - t3) ** 2)
    p4 = conv(jnp.maximum(p3, 0.0), w4, b4)
    t4 = conv(jnp.maximum(t3, 0.0), w4, b4)
    return loss + jnp.mean((p4 - t4) ** 2)


if __name__ == "__main__":
    key = jax.random.PRNGKey(0)
    kp, kt, kw = jax.random.split(key, 3)
    pred = jax.random.uniform(kp, (2, 3, 16, 16), jnp.float32)
    target = jax.random.uniform(kt, (2, 3, 16, 16), jnp.float32)
    params = init_params(kw)

    loss = jax.jit(perceptual_loss)(pred, target, params)
    jax.block_until_ready(loss)
    assert loss.shape == () and bool(jnp.isfinite(loss))

    ref = _reference_loss(pred, target, params)
    assert abs(float(loss) - float(ref)) <= 5e-2 * abs(float(ref)) + 1e-4, (loss, ref)
    print("KERNEL_OK")
</pallas_src>

<mosaic_0001>
module attributes {stable_mosaic.version = 11 : i64} {
  func.func @_trunk_kernel(%arg0: i32, %arg1: memref<1x16x16x3xf32, #tpu.memory_space<vmem>>, %arg2: memref<1x3xf32, #tpu.memory_space<vmem>>, %arg3: memref<9x3x64xf32, #tpu.memory_space<vmem>>, %arg4: memref<1x64xf32, #tpu.memory_space<vmem>>, %arg5: memref<9x64x64xf32, #tpu.memory_space<vmem>>, %arg6: memref<1x64xf32, #tpu.memory_space<vmem>>, %arg7: memref<1x8x8x64xf32, #tpu.memory_space<vmem>>, %arg8: memref<18x18x3xf32, #tpu.memory_space<vmem>>, %arg9: memref<18x18x64xf32, #tpu.memory_space<vmem>>, %arg10: memref<128x64xf32, #tpu.memory_space<vmem>>) attributes {dimension_semantics = [#tpu.dimension_semantics<parallel>], iteration_bounds = array<i64: 4>, scalar_prefetch = 0 : i64, scratch_operands = 3 : i64, tpu.core_type = #tpu.core_type<tc>, window_params = [{transform_indices = @transform_0, window_bounds = array<i64: 1, 16, 16, 3>}, {pipeline_mode = #tpu.pipeline_mode<synchronous>, transform_indices = @transform_1, window_bounds = array<i64: 1, 3>}, {pipeline_mode = #tpu.pipeline_mode<synchronous>, transform_indices = @transform_2, window_bounds = array<i64: 9, 3, 64>}, {pipeline_mode = #tpu.pipeline_mode<synchronous>, transform_indices = @transform_3, window_bounds = array<i64: 1, 64>}, {pipeline_mode = #tpu.pipeline_mode<synchronous>, transform_indices = @transform_4, window_bounds = array<i64: 9, 64, 64>}, {pipeline_mode = #tpu.pipeline_mode<synchronous>, transform_indices = @transform_5, window_bounds = array<i64: 1, 64>}, {transform_indices = @transform_6, window_bounds = array<i64: 1, 8, 8, 64>}]} {
    %c0 = arith.constant 0 : index
    %c0_0 = arith.constant 0 : index
    %c0_1 = arith.constant 0 : index
    %c0_2 = arith.constant 0 : index
    %0 = vector.load %arg1[%c0, %c0_0, %c0_1, %c0_2] : memref<1x16x16x3xf32, #tpu.memory_space<vmem>>, vector<1x16x16x3xf32>
    %1 = vector.shape_cast %0 : vector<1x16x16x3xf32> to vector<16x16x3xf32>
    %c0_3 = arith.constant 0 : index
    %c0_4 = arith.constant 0 : index
    %2 = vector.load %arg2[%c0_3, %c0_4] : memref<1x3xf32, #tpu.memory_space<vmem>>, vector<1x3xf32>
    %3 = vector.shape_cast %2 : vector<1x3xf32> to vector<1x1x3xf32>
    %4 = vector.broadcast %3 : vector<1x1x3xf32> to vector<16x16x3xf32>
    %5 = arith.subf %1, %4 : vector<16x16x3xf32>
    %cst = arith.constant 0.000000e+00 : f32
    %6 = vector.broadcast %cst : f32 to vector<18x18x3xf32>
    %c0_5 = arith.constant 0 : index
    %c0_6 = arith.constant 0 : index
    %c0_7 = arith.constant 0 : index
    %7 = vector.load %arg8[%c0_5, %c0_6, %c0_7] : memref<18x18x3xf32, #tpu.memory_space<vmem>>, vector<18x18x3xf32>
    tpu.vector_store %arg8[%c0_5, %c0_6, %c0_7], %6 {strides = array<i32>} : memref<18x18x3xf32, #tpu.memory_space<vmem>>, vector<18x18x3xf32>,
    %c1 = arith.constant 1 : index
    %c1_8 = arith.constant 1 : index
    %c0_9 = arith.constant 0 : index
    %8 = vector.load %arg8[%c1, %c1_8, %c0_9] : memref<18x18x3xf32, #tpu.memory_space<vmem>>, vector<16x16x3xf32>
    tpu.vector_store %arg8[%c1, %c1_8, %c0_9], %5 {strides = array<i32>} : memref<18x18x3xf32, #tpu.memory_space<vmem>>, vector<16x16x3xf32>,
    %c0_10 = arith.constant 0 : index
    %c0_11 = arith.constant 0 : index
    %c0_12 = arith.constant 0 : index
    %9 = vector.load %arg8[%c0_10, %c0_11, %c0_12] : memref<18x18x3xf32, #tpu.memory_space<vmem>>, vector<18x18x3xf32>
    %cst_13 = arith.constant 0.000000e+00 : f32
    %10 = vector.broadcast %cst_13 : f32 to vector<256x64xf32>
    %11 = vector.extract_strided_slice %9 {offsets = [0, 0, 0], sizes = [16, 16, 3], strides = [1, 1, 1]} : vector<18x18x3xf32> to vector<16x16x3xf32>
    %12 = vector.shape_cast %11 : vector<16x16x3xf32> to vector<256x3xf32>
    %c0_14 = arith.constant 0 : index
    %c0_15 = arith.constant 0 : index
    %c0_16 = arith.constant 0 : index
    %13 = vector.load %arg3[%c0_14, %c0_15, %c0_16] : memref<9x3x64xf32, #tpu.memory_space<vmem>>, vector<1x3x64xf32>
    %14 = vector.shape_cast %13 : vector<1x3x64xf32> to vector<3x64xf32>
    %cst_17 = arith.constant dense<0.000000e+00> : vector<256x64xf32>
    %15 = tpu.matmul %12, %14, %cst_17 {dimension_numbers = #tpu.dot_dimension_numbers<[1], [0], [0], [1], [0, 0, 1, 1], [], []>} : vector<256x3xf32>, vector<3x64xf32>, vector<256x64xf32> -> vector<256x64xf32>
    %16 = arith.addf %10, %15 : vector<256x64xf32>
    %17 = vector.extract_strided_slice %9 {offsets = [0, 1, 0], sizes = [16, 16, 3], strides = [1, 1, 1]} : vector<18x18x3xf32> to vector<16x16x3xf32>
    %18 = vector.shape_cast %17 : vector<16x16x3xf32> to vector<256x3xf32>
    %c1_18 = arith.constant 1 : index
    %c0_19 = arith.constant 0 : index
    %c0_20 = arith.constant 0 : index
    %19 = vector.load %arg3[%c1_18, %c0_19, %c0_20] : memref<9x3x64xf32, #tpu.memory_space<vmem>>, vector<1x3x64xf32>
    %20 = vector.shape_cast %19 : vector<1x3x64xf32> to vector<3x64xf32>
    %cst_21 = arith.constant dense<0.000000e+00> : vector<256x64xf32>
    %21 = tpu.matmul %18, %20, %cst_21 {dimension_numbers = #tpu.dot_dimension_numbers<[1], [0], [0], [1], [0, 0, 1, 1], [], []>} : vector<256x3xf32>, vector<3x64xf32>, vector<256x64xf32> -> vector<256x64xf32>
    %22 = arith.addf %16, %21 : vector<256x64xf32>
    %23 = vector.extract_strided_slice %9 {offsets = [0, 2, 0], sizes = [16, 16, 3], strides = [1, 1, 1]} : vector<18x18x3xf32> to vector<16x16x3xf32>
    %24 = vector.shape_cast %23 : vector<16x16x3xf32> to vector<256x3xf32>
    %c2 = arith.constant 2 : index
    %c0_22 = arith.constant 0 : index
    %c0_23 = arith.constant 0 : index
    %25 = vector.load %arg3[%c2, %c0_22, %c0_23] : memref<9x3x64xf32, #tpu.memory_space<vmem>>, vector<1x3x64xf32>
    %26 = vector.shape_cast %25 : vector<1x3x64xf32> to vector<3x64xf32>
    %cst_24 = arith.constant dense<0.000000e+00> : vector<256x64xf32>
    %27 = tpu.matmul %24, %26, %cst_24 {dimension_numbers = #tpu.dot_dimension_numbers<[1], [0], [0], [1], [0, 0, 1, 1], [], []>} : vector<256x3xf32>, vector<3x64xf32>, vector<256x64xf32> -> vector<256x64xf32>
    %28 = arith.addf %22, %27 : vector<256x64xf32>
    %29 = vector.extract_strided_slice %9 {offsets = [1, 0, 0], sizes = [16, 16, 3], strides = [1, 1, 1]} : vector<18x18x3xf32> to vector<16x16x3xf32>
    %30 = vector.shape_cast %29 : vector<16x16x3xf32> to vector<256x3xf32>
    %c3 = arith.constant 3 : index
    %c0_25 = arith.constant 0 : index
    %c0_26 = arith.constant 0 : index
    %31 = vector.load %arg3[%c3, %c0_25, %c0_26] : memref<9x3x64xf32, #tpu.memory_space<vmem>>, vector<1x3x64xf32>
    %32 = vector.shape_cast %31 : vector<1x3x64xf32> to vector<3x64xf32>
    %cst_27 = arith.constant dense<0.000000e+00> : vector<256x64xf32>
    %33 = tpu.matmul %30, %32, %cst_27 {dimension_numbers = #tpu.dot_dimension_numbers<[1], [0], [0], [1], [0, 0, 1, 1], [], []>} : vector<256x3xf32>, vector<3x64xf32>, vector<256x64xf32> -> vector<256x64xf32>
    %34 = arith.addf %28, %33 : vector<256x64xf32>
    %35 = vector.extract_strided_slice %9 {offsets = [1, 1, 0], sizes = [16, 16, 3], strides = [1, 1, 1]} : vector<18x18x3xf32> to vector<16x16x3xf32>
    %36 = vector.shape_cast %35 : vector<16x16x3xf32> to vector<256x3xf32>
    %c4 = arith.constant 4 : index
    %c0_28 = arith.constant 0 : index
    %c0_29 = arith.constant 0 : index
    %37 = vector.load %arg3[%c4, %c0_28, %c0_29] : memref<9x3x64xf32, #tpu.memory_space<vmem>>, vector<1x3x64xf32>
    %38 = vector.shape_cast %37 : vector<1x3x64xf32> to vector<3x64xf32>
    %cst_30 = arith.constant dense<0.000000e+00> : vector<256x64xf32>
    %39 = tpu.matmul %36, %38, %cst_30 {dimension_numbers = #tpu.dot_dimension_numbers<[1], [0], [0], [1], [0, 0, 1, 1], [], []>} : vector<256x3xf32>, vector<3x64xf32>, vector<256x64xf32> -> vector<256x64xf32>
    %40 = arith.addf %34, %39 : vector<256x64xf32>
    %41 = vector.extract_strided_slice %9 {offsets = [1, 2, 0], sizes = [16, 16, 3], strides = [1, 1, 1]} : vector<18x18x3xf32> to vector<16x16x3xf32>
    %42 = vector.shape_cast %41 : vector<16x16x3xf32> to vector<256x3xf32>
    %c5 = arith.constant 5 : index
    %c0_31 = arith.constant 0 : index
    %c0_32 = arith.constant 0 : index
    %43 = vector.load %arg3[%c5, %c0_31, %c0_32] : memref<9x3x64xf32, #tpu.memory_space<vmem>>, vector<1x3x64xf32>
    %44 = vector.shape_cast %43 : vector<1x3x64xf32> to vector<3x64xf32>
    %cst_33 = arith.constant dense<0.000000e+00> : vector<256x64xf32>
    %45 = tpu.matmul %42, %44, %cst_33 {dimension_numbers = #tpu.dot_dimension_numbers<[1], [0], [0], [1], [0, 0, 1, 1], [], []>} : vector<256x3xf32>, vector<3x64xf32>, vector<256x64xf32> -> vector<256x64xf32>
    %46 = arith.addf %40, %45 : vector<256x64xf32>
    %47 = vector.extract_strided_slice %9 {offsets = [2, 0, 0], sizes = [16, 16, 3], strides = [1, 1, 1]} : vector<18x18x3xf32> to vector<16x16x3xf32>
    %48 = vector.shape_cast %47 : vector<16x16x3xf32> to vector<256x3xf32>
    %c6 = arith.constant 6 : index
    %c0_34 = arith.constant 0 : index
    %c0_35 = arith.constant 0 : index
    %49 = vector.load %arg3[%c6, %c0_34, %c0_35] : memref<9x3x64xf32, #tpu.memory_space<vmem>>, vector<1x3x64xf32>
    %50 = vector.shape_cast %49 : vector<1x3x64xf32> to vector<3x64xf32>
    %cst_36 = arith.constant dense<0.000000e+00> : vector<256x64xf32>
    %51 = tpu.matmul %48, %50, %cst_36 {dimension_numbers = #tpu.dot_dimension_numbers<[1], [0], [0], [1], [0, 0, 1, 1], [], []>} : vector<256x3xf32>, vector<3x64xf32>, vector<256x64xf32> -> vector<256x64xf32>
    %52 = arith.addf %46, %51 : vector<256x64xf32>
    %53 = vector.extract_strided_slice %9 {offsets = [2, 1, 0], sizes = [16, 16, 3], strides = [1, 1, 1]} : vector<18x18x3xf32> to vector<16x16x3xf32>
    %54 = vector.shape_cast %53 : vector<16x16x3xf32> to vector<256x3xf32>
    %c7 = arith.constant 7 : index
    %c0_37 = arith.constant 0 : index
    %c0_38 = arith.constant 0 : index
    %55 = vector.load %arg3[%c7, %c0_37, %c0_38] : memref<9x3x64xf32, #tpu.memory_space<vmem>>, vector<1x3x64xf32>
    %56 = vector.shape_cast %55 : vector<1x3x64xf32> to vector<3x64xf32>
    %cst_39 = arith.constant dense<0.000000e+00> : vector<256x64xf32>
    %57 = tpu.matmul %54, %56, %cst_39 {dimension_numbers = #tpu.dot_dimension_numbers<[1], [0], [0], [1], [0, 0, 1, 1], [], []>} : vector<256x3xf32>, vector<3x64xf32>, vector<256x64xf32> -> vector<256x64xf32>
    %58 = arith.addf %52, %57 : vector<256x64xf32>
    %59 = vector.extract_strided_slice %9 {offsets = [2, 2, 0], sizes = [16, 16, 3], strides = [1, 1, 1]} : vector<18x18x3xf32> to vector<16x16x3xf32>
    %60 = vector.shape_cast %59 : vector<16x16x3xf32> to vector<256x3xf32>
    %c8 = arith.constant 8 : index
    %c0_40 = arith.constant 0 : index
    %c0_41 = arith.constant 0 : index
    %61 = vector.load %arg3[%c8, %c0_40, %c0_41] : memref<9x3x64xf32, #tpu.memory_space<vmem>>, vector<1x3x64xf32>
    %62 = vector.shape_cast %61 : vector<1x3x64xf32> to vector<3x64xf32>
    %cst_42 = arith.constant dense<0.000000e+00> : vector<256x64xf32>
    %63 = tpu.matmul %60, %62, %cst_42 {dimension_numbers = #tpu.dot_dimension_numbers<[1], [0], [0], [1], [0, 0, 1, 1], [], []>} : vector<256x3xf32>, vector<3x64xf32>, vector<256x64xf32> -> vector<256x64xf32>
    %64 = arith.addf %58, %63 : vector<256x64xf32>
    %c0_43 = arith.constant 0 : index
    %c0_44 = arith.constant 0 : index
    %65 = vector.load %arg4[%c0_43, %c0_44] : memref<1x64xf32, #tpu.memory_space<vmem>>, vector<1x64xf32>
    %66 = vector.broadcast %65 : vector<1x64xf32> to vector<256x64xf32>
    %67 = arith.addf %64, %66 : vector<256x64xf32>
    %cst_45 = arith.constant 0.000000e+00 : f32
    %68 = vector.broadcast %cst_45 : f32 to vector<256x64xf32>
    %69 = arith.maximumf %67, %68 : vector<256x64xf32>
    %70 = vector.shape_cast %69 : vector<256x64xf32> to vector<16x16x64xf32>
    %cst_46 = arith.constant 0.000000e+00 : f32
    %71 = vector.broadcast %cst_46 : f32 to vector<18x18x64xf32>
    %c0_47 = arith.constant 0 : index
    %c0_48 = arith.constant 0 : index
    %c0_49 = arith.constant 0 : index
    %72 = vector.load %arg9[%c0_47, %c0_48, %c0_49] : memref<18x18x64xf32, #tpu.memory_space<vmem>>, vector<18x18x64xf32>
    tpu.vector_store %arg9[%c0_47, %c0_48, %c0_49], %71 {strides = array<i32>} : memref<18x18x64xf32, #tpu.memory_space<vmem>>, vector<18x18x64xf32>,
    %c1_50 = arith.constant 1 : index
    %c1_51 = arith.constant 1 : index
    %c0_52 = arith.constant 0 : index
    %73 = vector.load %arg9[%c1_50, %c1_51, %c0_52] : memref<18x18x64xf32, #tpu.memory_space<vmem>>, vector<16x16x64xf32>
    tpu.vector_store %arg9[%c1_50, %c1_51, %c0_52], %70 {strides = array<i32>} : memref<18x18x64xf32, #tpu.memory_space<vmem>>, vector<16x16x64xf32>,
    %c0_53 = arith.constant 0 : index
    %c0_54 = arith.constant 0 : index
    %c0_55 = arith.constant 0 : index
    %74 = vector.load %arg9[%c0_53, %c0_54, %c0_55] : memref<18x18x64xf32, #tpu.memory_space<vmem>>, vector<18x18x64xf32>
    %cst_56 = arith.constant 0.000000e+00 : f32
    %75 = vector.broadcast %cst_56 : f32 to vector<256x64xf32>
    %76 = vector.extract_strided_slice %74 {offsets = [0, 0, 0], sizes = [16, 16, 64], strides = [1, 1, 1]} : vector<18x18x64xf32> to vector<16x16x64xf32>
    %77 = vector.shape_cast %76 : vector<16x16x64xf32> to vector<256x64xf32>
    %c0_57 = arith.constant 0 : index
    %c0_58 = arith.constant 0 : index
    %c0_59 = arith.constant 0 : index
    %78 = vector.load %arg5[%c0_57, %c0_58, %c0_59] : memref<9x64x64xf32, #tpu.memory_space<vmem>>, vector<1x64x64xf32>
    %79 = vector.shape_cast %78 : vector<1x64x64xf32> to vector<64x64xf32>
    %cst_60 = arith.constant dense<0.000000e+00> : vector<256x64xf32>
    %80 = tpu.matmul %77, %79, %cst_60 {dimension_numbers = #tpu.dot_dimension_numbers<[1], [0], [0], [1], [0, 0, 1, 1], [], []>} : vector<256x64xf32>, vector<64x64xf32>, vector<256x64xf32> -> vector<256x64xf32>
    %81 = arith.addf %75, %80 : vector<256x64xf32>
    %82 = vector.extract_strided_slice %74 {offsets = [0, 1, 0], sizes = [16, 16, 64], strides = [1, 1, 1]} : vector<18x18x64xf32> to vector<16x16x64xf32>
    %83 = vector.shape_cast %82 : vector<16x16x64xf32> to vector<256x64xf32>
    %c1_61 = arith.constant 1 : index
    %c0_62 = arith.constant 0 : index
    %c0_63 = arith.constant 0 : index
    %84 = vector.load %arg5[%c1_61, %c0_62, %c0_63] : memref<9x64x64xf32, #tpu.memory_space<vmem>>, vector<1x64x64xf32>
    %85 = vector.shape_cast %84 : vector<1x64x64xf32> to vector<64x64xf32>
    %cst_64 = arith.constant dense<0.000000e+00> : vector<256x64xf32>
    %86 = tpu.matmul %83, %85, %cst_64 {dimension_numbers = #tpu.dot_dimension_numbers<[1], [0], [0], [1], [0, 0, 1, 1], [], []>} : vector<256x64xf32>, vector<64x64xf32>, vector<256x64xf32> -> vector<256x64xf32>
    %87 = arith.addf %81, %86 : vector<256x64xf32>
    %88 = vector.extract_strided_slice %74 {offsets = [0, 2, 0], sizes = [16, 16, 64], strides = [1, 1, 1]} : vector<18x18x64xf32> to vector<16x16x64xf32>
    %89 = vector.shape_cast %88 : vector<16x16x64xf32> to vector<256x64xf32>
    %c2_65 = arith.constant 2 : index
    %c0_66 = arith.constant 0 : index
    %c0_67 = arith.constant 0 : index
    %90 = vector.load %arg5[%c2_65, %c0_66, %c0_67] : memref<9x64x64xf32, #tpu.memory_space<vmem>>, vector<1x64x64xf32>
    %91 = vector.shape_cast %90 : vector<1x64x64xf32> to vector<64x64xf32>
    %cst_68 = arith.constant dense<0.000000e+00> : vector<256x64xf32>
    %92 = tpu.matmul %89, %91, %cst_68 {dimension_numbers = #tpu.dot_dimension_numbers<[1], [0], [0], [1], [0, 0, 1, 1], [], []>} : vector<256x64xf32>, vector<64x64xf32>, vector<256x64xf32> -> vector<256x64xf32>
    %93 = arith.addf %87, %92 : vector<256x64xf32>
    %94 = vector.extract_strided_slice %74 {offsets = [1, 0, 0], sizes = [16, 16, 64], strides = [1, 1, 1]} : vector<18x18x64xf32> to vector<16x16x64xf32>
    %95 = vector.shape_cast %94 : vector<16x16x64xf32> to vector<256x64xf32>
    %c3_69 = arith.constant 3 : index
    %c0_70 = arith.constant 0 : index
    %c0_71 = arith.constant 0 : index
    %96 = vector.load %arg5[%c3_69, %c0_70, %c0_71] : memref<9x64x64xf32, #tpu.memory_space<vmem>>, vector<1x64x64xf32>
    %97 = vector.shape_cast %96 : vector<1x64x64xf32> to vector<64x64xf32>
    %cst_72 = arith.constant dense<0.000000e+00> : vector<256x64xf32>
    %98 = tpu.matmul %95, %97, %cst_72 {dimension_numbers = #tpu.dot_dimension_numbers<[1], [0], [0], [1], [0, 0, 1, 1], [], []>} : vector<256x64xf32>, vector<64x64xf32>, vector<256x64xf32> -> vector<256x64xf32>
    %99 = arith.addf %93, %98 : vector<256x64xf32>
    %100 = vector.extract_strided_slice %74 {offsets = [1, 1, 0], sizes = [16, 16, 64], strides = [1, 1, 1]} : vector<18x18x64xf32> to vector<16x16x64xf32>
    %101 = vector.shape_cast %100 : vector<16x16x64xf32> to vector<256x64xf32>
    %c4_73 = arith.constant 4 : index
    %c0_74 = arith.constant 0 : index
    %c0_75 = arith.constant 0 : index
    %102 = vector.load %arg5[%c4_73, %c0_74, %c0_75] : memref<9x64x64xf32, #tpu.memory_space<vmem>>, vector<1x64x64xf32>
    %103 = vector.shape_cast %102 : vector<1x64x64xf32> to vector<64x64xf32>
    %cst_76 = arith.constant dense<0.000000e+00> : vector<256x64xf32>
    %104 = tpu.matmul %101, %103, %cst_76 {dimension_numbers = #tpu.dot_dimension_numbers<[1], [0], [0], [1], [0, 0, 1, 1], [], []>} : vector<256x64xf32>, vector<64x64xf32>, vector<256x64xf32> -> vector<256x64xf32>
    %105 = arith.addf %99, %104 : vector<256x64xf32>
    %106 = vector.extract_strided_slice %74 {offsets = [1, 2, 0], sizes = [16, 16, 64], strides = [1, 1, 1]} : vector<18x18x64xf32> to vector<16x16x64xf32>
    %107 = vector.shape_cast %106 : vector<16x16x64xf32> to vector<256x64xf32>
    %c5_77 = arith.constant 5 : index
    %c0_78 = arith.constant 0 : index
    %c0_79 = arith.constant 0 : index
    %108 = vector.load %arg5[%c5_77, %c0_78, %c0_79] : memref<9x64x64xf32, #tpu.memory_space<vmem>>, vector<1x64x64xf32>
    %109 = vector.shape_cast %108 : vector<1x64x64xf32> to vector<64x64xf32>
    %cst_80 = arith.constant dense<0.000000e+00> : vector<256x64xf32>
    %110 = tpu.matmul %107, %109, %cst_80 {dimension_numbers = #tpu.dot_dimension_numbers<[1], [0], [0], [1], [0, 0, 1, 1], [], []>} : vector<256x64xf32>, vector<64x64xf32>, vector<256x64xf32> -> vector<256x64xf32>
    %111 = arith.addf %105, %110 : vector<256x64xf32>
    %112 = vector.extract_strided_slice %74 {offsets = [2, 0, 0], sizes = [16, 16, 64], strides = [1, 1, 1]} : vector<18x18x64xf32> to vector<16x16x64xf32>
    %113 = vector.shape_cast %112 : vector<16x16x64xf32> to vector<256x64xf32>
    %c6_81 = arith.constant 6 : index
    %c0_82 = arith.constant 0 : index
    %c0_83 = arith.constant 0 : index
    %114 = vector.load %arg5[%c6_81, %c0_82, %c0_83] : memref<9x64x64xf32, #tpu.memory_space<vmem>>, vector<1x64x64xf32>
    %115 = vector.shape_cast %114 : vector<1x64x64xf32> to vector<64x64xf32>
    %cst_84 = arith.constant dense<0.000000e+00> : vector<256x64xf32>
    %116 = tpu.matmul %113, %115, %cst_84 {dimension_numbers = #tpu.dot_dimension_numbers<[1], [0], [0], [1], [0, 0, 1, 1], [], []>} : vector<256x64xf32>, vector<64x64xf32>, vector<256x64xf32> -> vector<256x64xf32>
    %117 = arith.addf %111, %116 : vector<256x64xf32>
    %118 = vector.extract_strided_slice %74 {offsets = [2, 1, 0], sizes = [16, 16, 64], strides = [1, 1, 1]} : vector<18x18x64xf32> to vector<16x16x64xf32>
    %119 = vector.shape_cast %118 : vector<16x16x64xf32> to vector<256x64xf32>
    %c7_85 = arith.constant 7 : index
    %c0_86 = arith.constant 0 : index
    %c0_87 = arith.constant 0 : index
    %120 = vector.load %arg5[%c7_85, %c0_86, %c0_87] : memref<9x64x64xf32, #tpu.memory_space<vmem>>, vector<1x64x64xf32>
    %121 = vector.shape_cast %120 : vector<1x64x64xf32> to vector<64x64xf32>
    %cst_88 = arith.constant dense<0.000000e+00> : vector<256x64xf32>
    %122 = tpu.matmul %119, %121, %cst_88 {dimension_numbers = #tpu.dot_dimension_numbers<[1], [0], [0], [1], [0, 0, 1, 1], [], []>} : vector<256x64xf32>, vector<64x64xf32>, vector<256x64xf32> -> vector<256x64xf32>
    %123 = arith.addf %117, %122 : vector<256x64xf32>
    %124 = vector.extract_strided_slice %74 {offsets = [2, 2, 0], sizes = [16, 16, 64], strides = [1, 1, 1]} : vector<18x18x64xf32> to vector<16x16x64xf32>
    %125 = vector.shape_cast %124 : vector<16x16x64xf32> to vector<256x64xf32>
    %c8_89 = arith.constant 8 : index
    %c0_90 = arith.constant 0 : index
    %c0_91 = arith.constant 0 : index
    %126 = vector.load %arg5[%c8_89, %c0_90, %c0_91] : memref<9x64x64xf32, #tpu.memory_space<vmem>>, vector<1x64x64xf32>
    %127 = vector.shape_cast %126 : vector<1x64x64xf32> to vector<64x64xf32>
    %cst_92 = arith.constant dense<0.000000e+00> : vector<256x64xf32>
    %128 = tpu.matmul %125, %127, %cst_92 {dimension_numbers = #tpu.dot_dimension_numbers<[1], [0], [0], [1], [0, 0, 1, 1], [], []>} : vector<256x64xf32>, vector<64x64xf32>, vector<256x64xf32> -> vector<256x64xf32>
    %129 = arith.addf %123, %128 : vector<256x64xf32>
    %c0_93 = arith.constant 0 : index
    %c0_94 = arith.constant 0 : index
    %130 = vector.load %arg6[%c0_93, %c0_94] : memref<1x64xf32, #tpu.memory_space<vmem>>, vector<1x64xf32>
    %131 = vector.broadcast %130 : vector<1x64xf32> to vector<256x64xf32>
    %132 = arith.addf %129, %131 : vector<256x64xf32>
    %cst_95 = arith.constant 0.000000e+00 : f32
    %133 = vector.broadcast %cst_95 : f32 to vector<256x64xf32>
    %134 = arith.maximumf %132, %133 : vector<256x64xf32>
    %135 = vector.shape_cast %134 : vector<256x64xf32> to vector<8x2x16x64xf32>
    %136 = vector.extract_strided_slice %135 {offsets = [0, 0, 0, 0], sizes = [8, 1, 16, 64], strides = [1, 1, 1, 1]} : vector<8x2x16x64xf32> to vector<8x1x16x64xf32>
    %137 = vector.shape_cast %136 : vector<8x1x16x64xf32> to vector<8x16x64xf32>
    %138 = vector.extract_strided_slice %135 {offsets = [0, 1, 0, 0], sizes = [8, 1, 16, 64], strides = [1, 1, 1, 1]} : vector<8x2x16x64xf32> to vector<8x1x16x64xf32>
    %139 = vector.shape_cast %138 : vector<8x1x16x64xf32> to vector<8x16x64xf32>
    %140 = arith.maximumf %137, %139 : vector<8x16x64xf32>
    %141 = vector.shape_cast %140 : vector<8x16x64xf32> to vector<128x64xf32>
    %c0_96 = arith.constant 0 : index
    %c0_97 = arith.constant 0 : index
    %142 = vector.load %arg10[%c0_96, %c0_97] : memref<128x64xf32, #tpu.memory_space<vmem>>, vector<128x64xf32>
    tpu.vector_store %arg10[%c0_96, %c0_97], %141 {strides = array<i32>} : memref<128x64xf32, #tpu.memory_space<vmem>>, vector<128x64xf32>,
    %c0_98 = arith.constant 0 : index
    %c0_99 = arith.constant 0 : index
    %143 = tpu.strided_load %arg10[%c0_98, %c0_99] {strides = array<i32: 2, 1>} : memref<128x64xf32, #tpu.memory_space<vmem>>, vector<64x64xf32>
    %c1_100 = arith.constant 1 : index
    %c0_101 = arith.constant 0 : index
    %144 = tpu.strided_load %arg10[%c1_100, %c0_101] {strides = array<i32: 2, 1>} : memref<128x64xf32, #tpu.memory_space<vmem>>, vector<64x64xf32>
    %145 = arith.maximumf %143, %144 : vector<64x64xf32>
    %146 = vector.shape_cast %145 : vector<64x64xf32> to vector<1x8x8x64xf32>
    %c0_102 = arith.constant 0 : index
    %c0_103 = arith.constant 0 : index
    %c0_104 = arith.constant 0 : index
    %c0_105 = arith.constant 0 : index
    %147 = vector.load %arg7[%c0_102, %c0_103, %c0_104, %c0_105] : memref<1x8x8x64xf32, #tpu.memory_space<vmem>>, vector<1x8x8x64xf32>
    tpu.vector_store %arg7[%c0_102, %c0_103, %c0_104, %c0_105], %146 {strides = array<i32>} : memref<1x8x8x64xf32, #tpu.memory_space<vmem>>, vector<1x8x8x64xf32>,
    return
  }
  func.func @transform_0(%arg0: i32) -> (i32, i32, i32, i32) {
    %c0_i32 = arith.constant 0 : i32
    %c0_i32_0 = arith.constant 0 : i32
    %c0_i32_1 = arith.constant 0 : i32
    %c0_i32_2 = arith.constant 0 : i32
    return %arg0, %c0_i32, %c0_i32_0, %c0_i32_1 : i32, i32, i32, i32
  }
  func.func @transform_1(%arg0: i32) -> (i32, i32) {
    %c0_i32 = arith.constant 0 : i32
    %c0_i32_0 = arith.constant 0 : i32
    %c0_i32_1 = arith.constant 0 : i32
    return %c0_i32, %c0_i32_0 : i32, i32
  }
  func.func @transform_2(%arg0: i32) -> (i32, i32, i32) {
    %c0_i32 = arith.constant 0 : i32
    %c0_i32_0 = arith.constant 0 : i32
    %c0_i32_1 = arith.constant 0 : i32
    %c0_i32_2 = arith.constant 0 : i32
    return %c0_i32, %c0_i32_0, %c0_i32_1 : i32, i32, i32
  }
  func.func @transform_3(%arg0: i32) -> (i32, i32) {
    %c0_i32 = arith.constant 0 : i32
    %c0_i32_0 = arith.constant 0 : i32
    %c0_i32_1 = arith.constant 0 : i32
    return %c0_i32, %c0_i32_0 : i32, i32
  }
  func.func @transform_4(%arg0: i32) -> (i32, i32, i32) {
    %c0_i32 = arith.constant 0 : i32
    %c0_i32_0 = arith.constant 0 : i32
    %c0_i32_1 = arith.constant 0 : i32
    %c0_i32_2 = arith.constant 0 : i32
    return %c0_i32, %c0_i32_0, %c0_i32_1 : i32, i32, i32
  }
  func.func @transform_5(%arg0: i32) -> (i32, i32) {
    %c0_i32 = arith.constant 0 : i32
    %c0_i32_0 = arith.constant 0 : i32
    %c0_i32_1 = arith.constant 0 : i32
    return %c0_i32, %c0_i32_0 : i32, i32
  }
  func.func @transform_6(%arg0: i32) -> (i32, i32, i32, i32) {
    %c0_i32 = arith.constant 0 : i32
    %c0_i32_0 = arith.constant 0 : i32
    %c0_i32_1 = arith.constant 0 : i32
    %c0_i32_2 = arith.constant 0 : i32
    return %arg0, %c0_i32, %c0_i32_0, %c0_i32_1 : i32, i32, i32, i32
  }
}

module attributes {stable_mosaic.version = 11 : i64} {
  func.func @_head_kernel(%arg0: i32, %arg1: memref<1x8x8x64xf32, #tpu.memory_space<vmem>>, %arg2: memref<1x8x8x64xf32, #tpu.memory_space<vmem>>, %arg3: memref<9x64x128xf32, #tpu.memory_space<vmem>>, %arg4: memref<1x128xf32, #tpu.memory_space<vmem>>, %arg5: memref<9x128x128xf32, #tpu.memory_space<vmem>>, %arg6: memref<1x128xf32, #tpu.memory_space<vmem>>, %arg7: memref<2xf32, #tpu.memory_space<smem>>, %arg8: memref<2xf32, #tpu.memory_space<smem>>, %arg9: memref<10x10x64xf32, #tpu.memory_space<vmem>>, %arg10: memref<10x10x128xf32, #tpu.memory_space<vmem>>) attributes {dimension_semantics = [#tpu.dimension_semantics<arbitrary>], iteration_bounds = array<i64: 2>, scalar_prefetch = 0 : i64, scratch_operands = 2 : i64, tpu.core_type = #tpu.core_type<tc>, window_params = [{transform_indices = @transform_0, window_bounds = array<i64: 1, 8, 8, 64>}, {transform_indices = @transform_1, window_bounds = array<i64: 1, 8, 8, 64>}, {pipeline_mode = #tpu.pipeline_mode<synchronous>, transform_indices = @transform_2, window_bounds = array<i64: 9, 64, 128>}, {pipeline_mode = #tpu.pipeline_mode<synchronous>, transform_indices = @transform_3, window_bounds = array<i64: 1, 128>}, {pipeline_mode = #tpu.pipeline_mode<synchronous>, transform_indices = @transform_4, window_bounds = array<i64: 9, 128, 128>}, {pipeline_mode = #tpu.pipeline_mode<synchronous>, transform_indices = @transform_5, window_bounds = array<i64: 1, 128>}, {transform_indices = @transform_6, window_bounds = array<i64: 2>}, {transform_indices = @transform_7, window_bounds = array<i64: 2>}]} {
    %c0 = arith.constant 0 : index
    %c0_0 = arith.constant 0 : index
    %c0_1 = arith.constant 0 : index
    %c0_2 = arith.constant 0 : index
    %0 = vector.load %arg1[%c0, %c0_0, %c0_1, %c0_2] : memref<1x8x8x64xf32, #tpu.memory_space<vmem>>, vector<1x8x8x64xf32>
    %1 = vector.shape_cast %0 : vector<1x8x8x64xf32> to vector<8x8x64xf32>
    %cst = arith.constant 0.000000e+00 : f32
    %2 = vector.broadcast %cst : f32 to vector<10x10x64xf32>
    %c0_3 = arith.constant 0 : index
    %c0_4 = arith.constant 0 : index
    %c0_5 = arith.constant 0 : index
    %3 = vector.load %arg9[%c0_3, %c0_4, %c0_5] : memref<10x10x64xf32, #tpu.memory_space<vmem>>, vector<10x10x64xf32>
    tpu.vector_store %arg9[%c0_3, %c0_4, %c0_5], %2 {strides = array<i32>} : memref<10x10x64xf32, #tpu.memory_space<vmem>>, vector<10x10x64xf32>,
    %c1 = arith.constant 1 : index
    %c1_6 = arith.constant 1 : index
    %c0_7 = arith.constant 0 : index
    %4 = vector.load %arg9[%c1, %c1_6, %c0_7] : memref<10x10x64xf32, #tpu.memory_space<vmem>>, vector<8x8x64xf32>
    tpu.vector_store %arg9[%c1, %c1_6, %c0_7], %1 {strides = array<i32>} : memref<10x10x64xf32, #tpu.memory_space<vmem>>, vector<8x8x64xf32>,
    %c0_8 = arith.constant 0 : index
    %c0_9 = arith.constant 0 : index
    %c0_10 = arith.constant 0 : index
    %5 = vector.load %arg9[%c0_8, %c0_9, %c0_10] : memref<10x10x64xf32, #tpu.memory_space<vmem>>, vector<10x10x64xf32>
    %cst_11 = arith.constant 0.000000e+00 : f32
    %6 = vector.broadcast %cst_11 : f32 to vector<64x128xf32>
    %7 = vector.extract_strided_slice %5 {offsets = [0, 0, 0], sizes = [8, 8, 64], strides = [1, 1, 1]} : vector<10x10x64xf32> to vector<8x8x64xf32>
    %8 = vector.shape_cast %7 : vector<8x8x64xf32> to vector<64x64xf32>
    %c0_12 = arith.constant 0 : index
    %c0_13 = arith.constant 0 : index
    %c0_14 = arith.constant 0 : index
    %9 = vector.load %arg3[%c0_12, %c0_13, %c0_14] : memref<9x64x128xf32, #tpu.memory_space<vmem>>, vector<1x64x128xf32>
    %10 = vector.shape_cast %9 : vector<1x64x128xf32> to vector<64x128xf32>
    %cst_15 = arith.constant dense<0.000000e+00> : vector<64x128xf32>
    %11 = tpu.matmul %8, %10, %cst_15 {dimension_numbers = #tpu.dot_dimension_numbers<[1], [0], [0], [1], [0, 0, 1, 1], [], []>} : vector<64x64xf32>, vector<64x128xf32>, vector<64x128xf32> -> vector<64x128xf32>
    %12 = arith.addf %6, %11 : vector<64x128xf32>
    %13 = vector.extract_strided_slice %5 {offsets = [0, 1, 0], sizes = [8, 8, 64], strides = [1, 1, 1]} : vector<10x10x64xf32> to vector<8x8x64xf32>
    %14 = vector.shape_cast %13 : vector<8x8x64xf32> to vector<64x64xf32>
    %c1_16 = arith.constant 1 : index
    %c0_17 = arith.constant 0 : index
    %c0_18 = arith.constant 0 : index
    %15 = vector.load %arg3[%c1_16, %c0_17, %c0_18] : memref<9x64x128xf32, #tpu.memory_space<vmem>>, vector<1x64x128xf32>
    %16 = vector.shape_cast %15 : vector<1x64x128xf32> to vector<64x128xf32>
    %cst_19 = arith.constant dense<0.000000e+00> : vector<64x128xf32>
    %17 = tpu.matmul %14, %16, %cst_19 {dimension_numbers = #tpu.dot_dimension_numbers<[1], [0], [0], [1], [0, 0, 1, 1], [], []>} : vector<64x64xf32>, vector<64x128xf32>, vector<64x128xf32> -> vector<64x128xf32>
    %18 = arith.addf %12, %17 : vector<64x128xf32>
    %19 = vector.extract_strided_slice %5 {offsets = [0, 2, 0], sizes = [8, 8, 64], strides = [1, 1, 1]} : vector<10x10x64xf32> to vector<8x8x64xf32>
    %20 = vector.shape_cast %19 : vector<8x8x64xf32> to vector<64x64xf32>
    %c2 = arith.constant 2 : index
    %c0_20 = arith.constant 0 : index
    %c0_21 = arith.constant 0 : index
    %21 = vector.load %arg3[%c2, %c0_20, %c0_21] : memref<9x64x128xf32, #tpu.memory_space<vmem>>, vector<1x64x128xf32>
    %22 = vector.shape_cast %21 : vector<1x64x128xf32> to vector<64x128xf32>
    %cst_22 = arith.constant dense<0.000000e+00> : vector<64x128xf32>
    %23 = tpu.matmul %20, %22, %cst_22 {dimension_numbers = #tpu.dot_dimension_numbers<[1], [0], [0], [1], [0, 0, 1, 1], [], []>} : vector<64x64xf32>, vector<64x128xf32>, vector<64x128xf32> -> vector<64x128xf32>
    %24 = arith.addf %18, %23 : vector<64x128xf32>
    %25 = vector.extract_strided_slice %5 {offsets = [1, 0, 0], sizes = [8, 8, 64], strides = [1, 1, 1]} : vector<10x10x64xf32> to vector<8x8x64xf32>
    %26 = vector.shape_cast %25 : vector<8x8x64xf32> to vector<64x64xf32>
    %c3 = arith.constant 3 : index
    %c0_23 = arith.constant 0 : index
    %c0_24 = arith.constant 0 : index
    %27 = vector.load %arg3[%c3, %c0_23, %c0_24] : memref<9x64x128xf32, #tpu.memory_space<vmem>>, vector<1x64x128xf32>
    %28 = vector.shape_cast %27 : vector<1x64x128xf32> to vector<64x128xf32>
    %cst_25 = arith.constant dense<0.000000e+00> : vector<64x128xf32>
    %29 = tpu.matmul %26, %28, %cst_25 {dimension_numbers = #tpu.dot_dimension_numbers<[1], [0], [0], [1], [0, 0, 1, 1], [], []>} : vector<64x64xf32>, vector<64x128xf32>, vector<64x128xf32> -> vector<64x128xf32>
    %30 = arith.addf %24, %29 : vector<64x128xf32>
    %31 = vector.extract_strided_slice %5 {offsets = [1, 1, 0], sizes = [8, 8, 64], strides = [1, 1, 1]} : vector<10x10x64xf32> to vector<8x8x64xf32>
    %32 = vector.shape_cast %31 : vector<8x8x64xf32> to vector<64x64xf32>
    %c4 = arith.constant 4 : index
    %c0_26 = arith.constant 0 : index
    %c0_27 = arith.constant 0 : index
    %33 = vector.load %arg3[%c4, %c0_26, %c0_27] : memref<9x64x128xf32, #tpu.memory_space<vmem>>, vector<1x64x128xf32>
    %34 = vector.shape_cast %33 : vector<1x64x128xf32> to vector<64x128xf32>
    %cst_28 = arith.constant dense<0.000000e+00> : vector<64x128xf32>
    %35 = tpu.matmul %32, %34, %cst_28 {dimension_numbers = #tpu.dot_dimension_numbers<[1], [0], [0], [1], [0, 0, 1, 1], [], []>} : vector<64x64xf32>, vector<64x128xf32>, vector<64x128xf32> -> vector<64x128xf32>
    %36 = arith.addf %30, %35 : vector<64x128xf32>
    %37 = vector.extract_strided_slice %5 {offsets = [1, 2, 0], sizes = [8, 8, 64], strides = [1, 1, 1]} : vector<10x10x64xf32> to vector<8x8x64xf32>
    %38 = vector.shape_cast %37 : vector<8x8x64xf32> to vector<64x64xf32>
    %c5 = arith.constant 5 : index
    %c0_29 = arith.constant 0 : index
    %c0_30 = arith.constant 0 : index
    %39 = vector.load %arg3[%c5, %c0_29, %c0_30] : memref<9x64x128xf32, #tpu.memory_space<vmem>>, vector<1x64x128xf32>
    %40 = vector.shape_cast %39 : vector<1x64x128xf32> to vector<64x128xf32>
    %cst_31 = arith.constant dense<0.000000e+00> : vector<64x128xf32>
    %41 = tpu.matmul %38, %40, %cst_31 {dimension_numbers = #tpu.dot_dimension_numbers<[1], [0], [0], [1], [0, 0, 1, 1], [], []>} : vector<64x64xf32>, vector<64x128xf32>, vector<64x128xf32> -> vector<64x128xf32>
    %42 = arith.addf %36, %41 : vector<64x128xf32>
    %43 = vector.extract_strided_slice %5 {offsets = [2, 0, 0], sizes = [8, 8, 64], strides = [1, 1, 1]} : vector<10x10x64xf32> to vector<8x8x64xf32>
    %44 = vector.shape_cast %43 : vector<8x8x64xf32> to vector<64x64xf32>
    %c6 = arith.constant 6 : index
    %c0_32 = arith.constant 0 : index
    %c0_33 = arith.constant 0 : index
    %45 = vector.load %arg3[%c6, %c0_32, %c0_33] : memref<9x64x128xf32, #tpu.memory_space<vmem>>, vector<1x64x128xf32>
    %46 = vector.shape_cast %45 : vector<1x64x128xf32> to vector<64x128xf32>
    %cst_34 = arith.constant dense<0.000000e+00> : vector<64x128xf32>
    %47 = tpu.matmul %44, %46, %cst_34 {dimension_numbers = #tpu.dot_dimension_numbers<[1], [0], [0], [1], [0, 0, 1, 1], [], []>} : vector<64x64xf32>, vector<64x128xf32>, vector<64x128xf32> -> vector<64x128xf32>
    %48 = arith.addf %42, %47 : vector<64x128xf32>
    %49 = vector.extract_strided_slice %5 {offsets = [2, 1, 0], sizes = [8, 8, 64], strides = [1, 1, 1]} : vector<10x10x64xf32> to vector<8x8x64xf32>
    %50 = vector.shape_cast %49 : vector<8x8x64xf32> to vector<64x64xf32>
    %c7 = arith.constant 7 : index
    %c0_35 = arith.constant 0 : index
    %c0_36 = arith.constant 0 : index
    %51 = vector.load %arg3[%c7, %c0_35, %c0_36] : memref<9x64x128xf32, #tpu.memory_space<vmem>>, vector<1x64x128xf32>
    %52 = vector.shape_cast %51 : vector<1x64x128xf32> to vector<64x128xf32>
    %cst_37 = arith.constant dense<0.000000e+00> : vector<64x128xf32>
    %53 = tpu.matmul %50, %52, %cst_37 {dimension_numbers = #tpu.dot_dimension_numbers<[1], [0], [0], [1], [0, 0, 1, 1], [], []>} : vector<64x64xf32>, vector<64x128xf32>, vector<64x128xf32> -> vector<64x128xf32>
    %54 = arith.addf %48, %53 : vector<64x128xf32>
    %55 = vector.extract_strided_slice %5 {offsets = [2, 2, 0], sizes = [8, 8, 64], strides = [1, 1, 1]} : vector<10x10x64xf32> to vector<8x8x64xf32>
    %56 = vector.shape_cast %55 : vector<8x8x64xf32> to vector<64x64xf32>
    %c8 = arith.constant 8 : index
    %c0_38 = arith.constant 0 : index
    %c0_39 = arith.constant 0 : index
    %57 = vector.load %arg3[%c8, %c0_38, %c0_39] : memref<9x64x128xf32, #tpu.memory_space<vmem>>, vector<1x64x128xf32>
    %58 = vector.shape_cast %57 : vector<1x64x128xf32> to vector<64x128xf32>
    %cst_40 = arith.constant dense<0.000000e+00> : vector<64x128xf32>
    %59 = tpu.matmul %56, %58, %cst_40 {dimension_numbers = #tpu.dot_dimension_numbers<[1], [0], [0], [1], [0, 0, 1, 1], [], []>} : vector<64x64xf32>, vector<64x128xf32>, vector<64x128xf32> -> vector<64x128xf32>
    %60 = arith.addf %54, %59 : vector<64x128xf32>
    %c0_41 = arith.constant 0 : index
    %c0_42 = arith.constant 0 : index
    %61 = vector.load %arg4[%c0_41, %c0_42] : memref<1x128xf32, #tpu.memory_space<vmem>>, vector<1x128xf32>
    %62 = vector.broadcast %61 : vector<1x128xf32> to vector<64x128xf32>
    %63 = arith.addf %60, %62 : vector<64x128xf32>
    %c0_43 = arith.constant 0 : index
    %c0_44 = arith.constant 0 : index
    %c0_45 = arith.constant 0 : index
    %c0_46 = arith.constant 0 : index
    %64 = vector.load %arg2[%c0_43, %c0_44, %c0_45, %c0_46] : memref<1x8x8x64xf32, #tpu.memory_space<vmem>>, vector<1x8x8x64xf32>
    %65 = vector.shape_cast %64 : vector<1x8x8x64xf32> to vector<8x8x64xf32>
    %cst_47 = arith.constant 0.000000e+00 : f32
    %66 = vector.broadcast %cst_47 : f32 to vector<10x10x64xf32>
    %c0_48 = arith.constant 0 : index
    %c0_49 = arith.constant 0 : index
    %c0_50 = arith.constant 0 : index
    %67 = vector.load %arg9[%c0_48, %c0_49, %c0_50] : memref<10x10x64xf32, #tpu.memory_space<vmem>>, vector<10x10x64xf32>
    tpu.vector_store %arg9[%c0_48, %c0_49, %c0_50], %66 {strides = array<i32>} : memref<10x10x64xf32, #tpu.memory_space<vmem>>, vector<10x10x64xf32>,
    %c1_51 = arith.constant 1 : index
    %c1_52 = arith.constant 1 : index
    %c0_53 = arith.constant 0 : index
    %68 = vector.load %arg9[%c1_51, %c1_52, %c0_53] : memref<10x10x64xf32, #tpu.memory_space<vmem>>, vector<8x8x64xf32>
    tpu.vector_store %arg9[%c1_51, %c1_52, %c0_53], %65 {strides = array<i32>} : memref<10x10x64xf32, #tpu.memory_space<vmem>>, vector<8x8x64xf32>,
    %c0_54 = arith.constant 0 : index
    %c0_55 = arith.constant 0 : index
    %c0_56 = arith.constant 0 : index
    %69 = vector.load %arg9[%c0_54, %c0_55, %c0_56] : memref<10x10x64xf32, #tpu.memory_space<vmem>>, vector<10x10x64xf32>
    %cst_57 = arith.constant 0.000000e+00 : f32
    %70 = vector.broadcast %cst_57 : f32 to vector<64x128xf32>
    %71 = vector.extract_strided_slice %69 {offsets = [0, 0, 0], sizes = [8, 8, 64], strides = [1, 1, 1]} : vector<10x10x64xf32> to vector<8x8x64xf32>
    %72 = vector.shape_cast %71 : vector<8x8x64xf32> to vector<64x64xf32>
    %c0_58 = arith.constant 0 : index
    %c0_59 = arith.constant 0 : index
    %c0_60 = arith.constant 0 : index
    %73 = vector.load %arg3[%c0_58, %c0_59, %c0_60] : memref<9x64x128xf32, #tpu.memory_space<vmem>>, vector<1x64x128xf32>
    %74 = vector.shape_cast %73 : vector<1x64x128xf32> to vector<64x128xf32>
    %cst_61 = arith.constant dense<0.000000e+00> : vector<64x128xf32>
    %75 = tpu.matmul %72, %74, %cst_61 {dimension_numbers = #tpu.dot_dimension_numbers<[1], [0], [0], [1], [0, 0, 1, 1], [], []>} : vector<64x64xf32>, vector<64x128xf32>, vector<64x128xf32> -> vector<64x128xf32>
    %76 = arith.addf %70, %75 : vector<64x128xf32>
    %77 = vector.extract_strided_slice %69 {offsets = [0, 1, 0], sizes = [8, 8, 64], strides = [1, 1, 1]} : vector<10x10x64xf32> to vector<8x8x64xf32>
    %78 = vector.shape_cast %77 : vector<8x8x64xf32> to vector<64x64xf32>
    %c1_62 = arith.constant 1 : index
    %c0_63 = arith.constant 0 : index
    %c0_64 = arith.constant 0 : index
    %79 = vector.load %arg3[%c1_62, %c0_63, %c0_64] : memref<9x64x128xf32, #tpu.memory_space<vmem>>, vector<1x64x128xf32>
    %80 = vector.shape_cast %79 : vector<1x64x128xf32> to vector<64x128xf32>
    %cst_65 = arith.constant dense<0.000000e+00> : vector<64x128xf32>
    %81 = tpu.matmul %78, %80, %cst_65 {dimension_numbers = #tpu.dot_dimension_numbers<[1], [0], [0], [1], [0, 0, 1, 1], [], []>} : vector<64x64xf32>, vector<64x128xf32>, vector<64x128xf32> -> vector<64x128xf32>
    %82 = arith.addf %76, %81 : vector<64x128xf32>
    %83 = vector.extract_strided_slice %69 {offsets = [0, 2, 0], sizes = [8, 8, 64], strides = [1, 1, 1]} : vector<10x10x64xf32> to vector<8x8x64xf32>
    %84 = vector.shape_cast %83 : vector<8x8x64xf32> to vector<64x64xf32>
    %c2_66 = arith.constant 2 : index
    %c0_67 = arith.constant 0 : index
    %c0_68 = arith.constant 0 : index
    %85 = vector.load %arg3[%c2_66, %c0_67, %c0_68] : memref<9x64x128xf32, #tpu.memory_space<vmem>>, vector<1x64x128xf32>
    %86 = vector.shape_cast %85 : vector<1x64x128xf32> to vector<64x128xf32>
    %cst_69 = arith.constant dense<0.000000e+00> : vector<64x128xf32>
    %87 = tpu.matmul %84, %86, %cst_69 {dimension_numbers = #tpu.dot_dimension_numbers<[1], [0], [0], [1], [0, 0, 1, 1], [], []>} : vector<64x64xf32>, vector<64x128xf32>, vector<64x128xf32> -> vector<64x128xf32>
    %88 = arith.addf %82, %87 : vector<64x128xf32>
    %89 = vector.extract_strided_slice %69 {offsets = [1, 0, 0], sizes = [8, 8, 64], strides = [1, 1, 1]} : vector<10x10x64xf32> to vector<8x8x64xf32>
    %90 = vector.shape_cast %89 : vector<8x8x64xf32> to vector<64x64xf32>
    %c3_70 = arith.constant 3 : index
    %c0_71 = arith.constant 0 : index
    %c0_72 = arith.constant 0 : index
    %91 = vector.load %arg3[%c3_70, %c0_71, %c0_72] : memref<9x64x128xf32, #tpu.memory_space<vmem>>, vector<1x64x128xf32>
    %92 = vector.shape_cast %91 : vector<1x64x128xf32> to vector<64x128xf32>
    %cst_73 = arith.constant dense<0.000000e+00> : vector<64x128xf32>
    %93 = tpu.matmul %90, %92, %cst_73 {dimension_numbers = #tpu.dot_dimension_numbers<[1], [0], [0], [1], [0, 0, 1, 1], [], []>} : vector<64x64xf32>, vector<64x128xf32>, vector<64x128xf32> -> vector<64x128xf32>
    %94 = arith.addf %88, %93 : vector<64x128xf32>
    %95 = vector.extract_strided_slice %69 {offsets = [1, 1, 0], sizes = [8, 8, 64], strides = [1, 1, 1]} : vector<10x10x64xf32> to vector<8x8x64xf32>
    %96 = vector.shape_cast %95 : vector<8x8x64xf32> to vector<64x64xf32>
    %c4_74 = arith.constant 4 : index
    %c0_75 = arith.constant 0 : index
    %c0_76 = arith.constant 0 : index
    %97 = vector.load %arg3[%c4_74, %c0_75, %c0_76] : memref<9x64x128xf32, #tpu.memory_space<vmem>>, vector<1x64x128xf32>
    %98 = vector.shape_cast %97 : vector<1x64x128xf32> to vector<64x128xf32>
    %cst_77 = arith.constant dense<0.000000e+00> : vector<64x128xf32>
    %99 = tpu.matmul %96, %98, %cst_77 {dimension_numbers = #tpu.dot_dimension_numbers<[1], [0], [0], [1], [0, 0, 1, 1], [], []>} : vector<64x64xf32>, vector<64x128xf32>, vector<64x128xf32> -> vector<64x128xf32>
    %100 = arith.addf %94, %99 : vector<64x128xf32>
    %101 = vector.extract_strided_slice %69 {offsets = [1, 2, 0], sizes = [8, 8, 64], strides = [1, 1, 1]} : vector<10x10x64xf32> to vector<8x8x64xf32>
    %102 = vector.shape_cast %101 : vector<8x8x64xf32> to vector<64x64xf32>
    %c5_78 = arith.constant 5 : index
    %c0_79 = arith.constant 0 : index
    %c0_80 = arith.constant 0 : index
    %103 = vector.load %arg3[%c5_78, %c0_79, %c0_80] : memref<9x64x128xf32, #tpu.memory_space<vmem>>, vector<1x64x128xf32>
    %104 = vector.shape_cast %103 : vector<1x64x128xf32> to vector<64x128xf32>
    %cst_81 = arith.constant dense<0.000000e+00> : vector<64x128xf32>
    %105 = tpu.matmul %102, %104, %cst_81 {dimension_numbers = #tpu.dot_dimension_numbers<[1], [0], [0], [1], [0, 0, 1, 1], [], []>} : vector<64x64xf32>, vector<64x128xf32>, vector<64x128xf32> -> vector<64x128xf32>
    %106 = arith.addf %100, %105 : vector<64x128xf32>
    %107 = vector.extract_strided_slice %69 {offsets = [2, 0, 0], sizes = [8, 8, 64], strides = [1, 1, 1]} : vector<10x10x64xf32> to vector<8x8x64xf32>
    %108 = vector.shape_cast %107 : vector<8x8x64xf32> to vector<64x64xf32>
    %c6_82 = arith.constant 6 : index
    %c0_83 = arith.constant 0 : index
    %c0_84 = arith.constant 0 : index
    %109 = vector.load %arg3[%c6_82, %c0_83, %c0_84] : memref<9x64x128xf32, #tpu.memory_space<vmem>>, vector<1x64x128xf32>
    %110 = vector.shape_cast %109 : vector<1x64x128xf32> to vector<64x128xf32>
    %cst_85 = arith.constant dense<0.000000e+00> : vector<64x128xf32>
    %111 = tpu.matmul %108, %110, %cst_85 {dimension_numbers = #tpu.dot_dimension_numbers<[1], [0], [0], [1], [0, 0, 1, 1], [], []>} : vector<64x64xf32>, vector<64x128xf32>, vector<64x128xf32> -> vector<64x128xf32>
    %112 = arith.addf %106, %111 : vector<64x128xf32>
    %113 = vector.extract_strided_slice %69 {offsets = [2, 1, 0], sizes = [8, 8, 64], strides = [1, 1, 1]} : vector<10x10x64xf32> to vector<8x8x64xf32>
    %114 = vector.shape_cast %113 : vector<8x8x64xf32> to vector<64x64xf32>
    %c7_86 = arith.constant 7 : index
    %c0_87 = arith.constant 0 : index
    %c0_88 = arith.constant 0 : index
    %115 = vector.load %arg3[%c7_86, %c0_87, %c0_88] : memref<9x64x128xf32, #tpu.memory_space<vmem>>, vector<1x64x128xf32>
    %116 = vector.shape_cast %115 : vector<1x64x128xf32> to vector<64x128xf32>
    %cst_89 = arith.constant dense<0.000000e+00> : vector<64x128xf32>
    %117 = tpu.matmul %114, %116, %cst_89 {dimension_numbers = #tpu.dot_dimension_numbers<[1], [0], [0], [1], [0, 0, 1, 1], [], []>} : vector<64x64xf32>, vector<64x128xf32>, vector<64x128xf32> -> vector<64x128xf32>
    %118 = arith.addf %112, %117 : vector<64x128xf32>
    %119 = vector.extract_strided_slice %69 {offsets = [2, 2, 0], sizes = [8, 8, 64], strides = [1, 1, 1]} : vector<10x10x64xf32> to vector<8x8x64xf32>
    %120 = vector.shape_cast %119 : vector<8x8x64xf32> to vector<64x64xf32>
    %c8_90 = arith.constant 8 : index
    %c0_91 = arith.constant 0 : index
    %c0_92 = arith.constant 0 : index
    %121 = vector.load %arg3[%c8_90, %c0_91, %c0_92] : memref<9x64x128xf32, #tpu.memory_space<vmem>>, vector<1x64x128xf32>
    %122 = vector.shape_cast %121 : vector<1x64x128xf32> to vector<64x128xf32>
    %cst_93 = arith.constant dense<0.000000e+00> : vector<64x128xf32>
    %123 = tpu.matmul %120, %122, %cst_93 {dimension_numbers = #tpu.dot_dimension_numbers<[1], [0], [0], [1], [0, 0, 1, 1], [], []>} : vector<64x64xf32>, vector<64x128xf32>, vector<64x128xf32> -> vector<64x128xf32>
    %124 = arith.addf %118, %123 : vector<64x128xf32>
    %c0_94 = arith.constant 0 : index
    %c0_95 = arith.constant 0 : index
    %125 = vector.load %arg4[%c0_94, %c0_95] : memref<1x128xf32, #tpu.memory_space<vmem>>, vector<1x128xf32>
    %126 = vector.broadcast %125 : vector<1x128xf32> to vector<64x128xf32>
    %127 = arith.addf %124, %126 : vector<64x128xf32>
    %128 = arith.subf %63, %127 : vector<64x128xf32>
    %129 = arith.mulf %128, %128 : vector<64x128xf32>
    %130 = vector.shape_cast %129 : vector<64x128xf32> to vector<1x64x128xf32>
    %cst_96 = arith.constant dense<0.000000e+00> : vector<1xf32>
    %131 = vector.multi_reduction <add>, %130, %cst_96 [1, 2] : vector<1x64x128xf32> to vector<1xf32>
    %132 = vector.shape_cast %131 : vector<1xf32> to vector<1x1x1xf32>
    %133 = vector.extract %132[0, 0, 0] : f32 from vector<1x1x1xf32>
    %134 = arith.index_cast %arg0 : i32 to index
    %135 = memref.load %arg7[%134] : memref<2xf32, #tpu.memory_space<smem>>
    memref.store %133, %arg7[%134] : memref<2xf32, #tpu.memory_space<smem>>
    %cst_97 = arith.constant 0.000000e+00 : f32
    %136 = vector.broadcast %cst_97 : f32 to vector<64x128xf32>
    %137 = arith.maximumf %63, %136 : vector<64x128xf32>
    %138 = vector.shape_cast %137 : vector<64x128xf32> to vector<8x8x128xf32>
    %cst_98 = arith.constant 0.000000e+00 : f32
    %139 = vector.broadcast %cst_98 : f32 to vector<10x10x128xf32>
    %c0_99 = arith.constant 0 : index
    %c0_100 = arith.constant 0 : index
    %c0_101 = arith.constant 0 : index
    %140 = vector.load %arg10[%c0_99, %c0_100, %c0_101] : memref<10x10x128xf32, #tpu.memory_space<vmem>>, vector<10x10x128xf32>
    tpu.vector_store %arg10[%c0_99, %c0_100, %c0_101], %139 {strides = array<i32>} : memref<10x10x128xf32, #tpu.memory_space<vmem>>, vector<10x10x128xf32>,
    %c1_102 = arith.constant 1 : index
    %c1_103 = arith.constant 1 : index
    %c0_104 = arith.constant 0 : index
    %141 = vector.load %arg10[%c1_102, %c1_103, %c0_104] : memref<10x10x128xf32, #tpu.memory_space<vmem>>, vector<8x8x128xf32>
    tpu.vector_store %arg10[%c1_102, %c1_103, %c0_104], %138 {strides = array<i32>} : memref<10x10x128xf32, #tpu.memory_space<vmem>>, vector<8x8x128xf32>,
    %c0_105 = arith.constant 0 : index
    %c0_106 = arith.constant 0 : index
    %c0_107 = arith.constant 0 : index
    %142 = vector.load %arg10[%c0_105, %c0_106, %c0_107] : memref<10x10x128xf32, #tpu.memory_space<vmem>>, vector<10x10x128xf32>
    %cst_108 = arith.constant 0.000000e+00 : f32
    %143 = vector.broadcast %cst_108 : f32 to vector<64x128xf32>
    %144 = vector.extract_strided_slice %142 {offsets = [0, 0, 0], sizes = [8, 8, 128], strides = [1, 1, 1]} : vector<10x10x128xf32> to vector<8x8x128xf32>
    %145 = vector.shape_cast %144 : vector<8x8x128xf32> to vector<64x128xf32>
    %c0_109 = arith.constant 0 : index
    %c0_110 = arith.constant 0 : index
    %c0_111 = arith.constant 0 : index
    %146 = vector.load %arg5[%c0_109, %c0_110, %c0_111] : memref<9x128x128xf32, #tpu.memory_space<vmem>>, vector<1x128x128xf32>
    %147 = vector.shape_cast %146 : vector<1x128x128xf32> to vector<128x128xf32>
    %cst_112 = arith.constant dense<0.000000e+00> : vector<64x128xf32>
    %148 = tpu.matmul %145, %147, %cst_112 {dimension_numbers = #tpu.dot_dimension_numbers<[1], [0], [0], [1], [0, 0, 1, 1], [], []>} : vector<64x128xf32>, vector<128x128xf32>, vector<64x128xf32> -> vector<64x128xf32>
    %149 = arith.addf %143, %148 : vector<64x128xf32>
    %150 = vector.extract_strided_slice %142 {offsets = [0, 1, 0], sizes = [8, 8, 128], strides = [1, 1, 1]} : vector<10x10x128xf32> to vector<8x8x128xf32>
    %151 = vector.shape_cast %150 : vector<8x8x128xf32> to vector<64x128xf32>
    %c1_113 = arith.constant 1 : index
    %c0_114 = arith.constant 0 : index
    %c0_115 = arith.constant 0 : index
    %152 = vector.load %arg5[%c1_113, %c0_114, %c0_115] : memref<9x128x128xf32, #tpu.memory_space<vmem>>, vector<1x128x128xf32>
    %153 = vector.shape_cast %152 : vector<1x128x128xf32> to vector<128x128xf32>
    %cst_116 = arith.constant dense<0.000000e+00> : vector<64x128xf32>
    %154 = tpu.matmul %151, %153, %cst_116 {dimension_numbers = #tpu.dot_dimension_numbers<[1], [0], [0], [1], [0, 0, 1, 1], [], []>} : vector<64x128xf32>, vector<128x128xf32>, vector<64x128xf32> -> vector<64x128xf32>
    %155 = arith.addf %149, %154 : vector<64x128xf32>
    %156 = vector.extract_strided_slice %142 {offsets = [0, 2, 0], sizes = [8, 8, 128], strides = [1, 1, 1]} : vector<10x10x128xf32> to vector<8x8x128xf32>
    %157 = vector.shape_cast %156 : vector<8x8x128xf32> to vector<64x128xf32>
    %c2_117 = arith.constant 2 : index
    %c0_118 = arith.constant 0 : index
    %c0_119 = arith.constant 0 : index
    %158 = vector.load %arg5[%c2_117, %c0_118, %c0_119] : memref<9x128x128xf32, #tpu.memory_space<vmem>>, vector<1x128x128xf32>
    %159 = vector.shape_cast %158 : vector<1x128x128xf32> to vector<128x128xf32>
    %cst_120 = arith.constant dense<0.000000e+00> : vector<64x128xf32>
    %160 = tpu.matmul %157, %159, %cst_120 {dimension_numbers = #tpu.dot_dimension_numbers<[1], [0], [0], [1], [0, 0, 1, 1], [], []>} : vector<64x128xf32>, vector<128x128xf32>, vector<64x128xf32> -> vector<64x128xf32>
    %161 = arith.addf %155, %160 : vector<64x128xf32>
    %162 = vector.extract_strided_slice %142 {offsets = [1, 0, 0], sizes = [8, 8, 128], strides = [1, 1, 1]} : vector<10x10x128xf32> to vector<8x8x128xf32>
    %163 = vector.shape_cast %162 : vector<8x8x128xf32> to vector<64x128xf32>
    %c3_121 = arith.constant 3 : index
    %c0_122 = arith.constant 0 : index
    %c0_123 = arith.constant 0 : index
    %164 = vector.load %arg5[%c3_121, %c0_122, %c0_123] : memref<9x128x128xf32, #tpu.memory_space<vmem>>, vector<1x128x128xf32>
    %165 = vector.shape_cast %164 : vector<1x128x128xf32> to vector<128x128xf32>
    %cst_124 = arith.constant dense<0.000000e+00> : vector<64x128xf32>
    %166 = tpu.matmul %163, %165, %cst_124 {dimension_numbers = #tpu.dot_dimension_numbers<[1], [0], [0], [1], [0, 0, 1, 1], [], []>} : vector<64x128xf32>, vector<128x128xf32>, vector<64x128xf32> -> vector<64x128xf32>
    %167 = arith.addf %161, %166 : vector<64x128xf32>
    %168 = vector.extract_strided_slice %142 {offsets = [1, 1, 0], sizes = [8, 8, 128], strides = [1, 1, 1]} : vector<10x10x128xf32> to vector<8x8x128xf32>
    %169 = vector.shape_cast %168 : vector<8x8x128xf32> to vector<64x128xf32>
    %c4_125 = arith.constant 4 : index
    %c0_126 = arith.constant 0 : index
    %c0_127 = arith.constant 0 : index
    %170 = vector.load %arg5[%c4_125, %c0_126, %c0_127] : memref<9x128x128xf32, #tpu.memory_space<vmem>>, vector<1x128x128xf32>
    %171 = vector.shape_cast %170 : vector<1x128x128xf32> to vector<128x128xf32>
    %cst_128 = arith.constant dense<0.000000e+00> : vector<64x128xf32>
    %172 = tpu.matmul %169, %171, %cst_128 {dimension_numbers = #tpu.dot_dimension_numbers<[1], [0], [0], [1], [0, 0, 1, 1], [], []>} : vector<64x128xf32>, vector<128x128xf32>, vector<64x128xf32> -> vector<64x128xf32>
    %173 = arith.addf %167, %172 : vector<64x128xf32>
    %174 = vector.extract_strided_slice %142 {offsets = [1, 2, 0], sizes = [8, 8, 128], strides = [1, 1, 1]} : vector<10x10x128xf32> to vector<8x8x128xf32>
    %175 = vector.shape_cast %174 : vector<8x8x128xf32> to vector<64x128xf32>
    %c5_129 = arith.constant 5 : index
    %c0_130 = arith.constant 0 : index
    %c0_131 = arith.constant 0 : index
    %176 = vector.load %arg5[%c5_129, %c0_130, %c0_131] : memref<9x128x128xf32, #tpu.memory_space<vmem>>, vector<1x128x128xf32>
    %177 = vector.shape_cast %176 : vector<1x128x128xf32> to vector<128x128xf32>
    %cst_132 = arith.constant dense<0.000000e+00> : vector<64x128xf32>
    %178 = tpu.matmul %175, %177, %cst_132 {dimension_numbers = #tpu.dot_dimension_numbers<[1], [0], [0], [1], [0, 0, 1, 1], [], []>} : vector<64x128xf32>, vector<128x128xf32>, vector<64x128xf32> -> vector<64x128xf32>
    %179 = arith.addf %173, %178 : vector<64x128xf32>
    %180 = vector.extract_strided_slice %142 {offsets = [2, 0, 0], sizes = [8, 8, 128], strides = [1, 1, 1]} : vector<10x10x128xf32> to vector<8x8x128xf32>
    %181 = vector.shape_cast %180 : vector<8x8x128xf32> to vector<64x128xf32>
    %c6_133 = arith.constant 6 : index
    %c0_134 = arith.constant 0 : index
    %c0_135 = arith.constant 0 : index
    %182 = vector.load %arg5[%c6_133, %c0_134, %c0_135] : memref<9x128x128xf32, #tpu.memory_space<vmem>>, vector<1x128x128xf32>
    %183 = vector.shape_cast %182 : vector<1x128x128xf32> to vector<128x128xf32>
    %cst_136 = arith.constant dense<0.000000e+00> : vector<64x128xf32>
    %184 = tpu.matmul %181, %183, %cst_136 {dimension_numbers = #tpu.dot_dimension_numbers<[1], [0], [0], [1], [0, 0, 1, 1], [], []>} : vector<64x128xf32>, vector<128x128xf32>, vector<64x128xf32> -> vector<64x128xf32>
    %185 = arith.addf %179, %184 : vector<64x128xf32>
    %186 = vector.extract_strided_slice %142 {offsets = [2, 1, 0], sizes = [8, 8, 128], strides = [1, 1, 1]} : vector<10x10x128xf32> to vector<8x8x128xf32>
    %187 = vector.shape_cast %186 : vector<8x8x128xf32> to vector<64x128xf32>
    %c7_137 = arith.constant 7 : index
    %c0_138 = arith.constant 0 : index
    %c0_139 = arith.constant 0 : index
    %188 = vector.load %arg5[%c7_137, %c0_138, %c0_139] : memref<9x128x128xf32, #tpu.memory_space<vmem>>, vector<1x128x128xf32>
    %189 = vector.shape_cast %188 : vector<1x128x128xf32> to vector<128x128xf32>
    %cst_140 = arith.constant dense<0.000000e+00> : vector<64x128xf32>
    %190 = tpu.matmul %187, %189, %cst_140 {dimension_numbers = #tpu.dot_dimension_numbers<[1], [0], [0], [1], [0, 0, 1, 1], [], []>} : vector<64x128xf32>, vector<128x128xf32>, vector<64x128xf32> -> vector<64x128xf32>
    %191 = arith.addf %185, %190 : vector<64x128xf32>
    %192 = vector.extract_strided_slice %142 {offsets = [2, 2, 0], sizes = [8, 8, 128], strides = [1, 1, 1]} : vector<10x10x128xf32> to vector<8x8x128xf32>
    %193 = vector.shape_cast %192 : vector<8x8x128xf32> to vector<64x128xf32>
    %c8_141 = arith.constant 8 : index
    %c0_142 = arith.constant 0 : index
    %c0_143 = arith.constant 0 : index
    %194 = vector.load %arg5[%c8_141, %c0_142, %c0_143] : memref<9x128x128xf32, #tpu.memory_space<vmem>>, vector<1x128x128xf32>
    %195 = vector.shape_cast %194 : vector<1x128x128xf32> to vector<128x128xf32>
    %cst_144 = arith.constant dense<0.000000e+00> : vector<64x128xf32>
    %196 = tpu.matmul %193, %195, %cst_144 {dimension_numbers = #tpu.dot_dimension_numbers<[1], [0], [0], [1], [0, 0, 1, 1], [], []>} : vector<64x128xf32>, vector<128x128xf32>, vector<64x128xf32> -> vector<64x128xf32>
    %197 = arith.addf %191, %196 : vector<64x128xf32>
    %c0_145 = arith.constant 0 : index
    %c0_146 = arith.constant 0 : index
    %198 = vector.load %arg6[%c0_145, %c0_146] : memref<1x128xf32, #tpu.memory_space<vmem>>, vector<1x128xf32>
    %199 = vector.broadcast %198 : vector<1x128xf32> to vector<64x128xf32>
    %200 = arith.addf %197, %199 : vector<64x128xf32>
    %cst_147 = arith.constant 0.000000e+00 : f32
    %201 = vector.broadcast %cst_147 : f32 to vector<64x128xf32>
    %202 = arith.maximumf %127, %201 : vector<64x128xf32>
    %203 = vector.shape_cast %202 : vector<64x128xf32> to vector<8x8x128xf32>
    %cst_148 = arith.constant 0.000000e+00 : f32
    %204 = vector.broadcast %cst_148 : f32 to vector<10x10x128xf32>
    %c0_149 = arith.constant 0 : index
    %c0_150 = arith.constant 0 : index
    %c0_151 = arith.constant 0 : index
    %205 = vector.load %arg10[%c0_149, %c0_150, %c0_151] : memref<10x10x128xf32, #tpu.memory_space<vmem>>, vector<10x10x128xf32>
    tpu.vector_store %arg10[%c0_149, %c0_150, %c0_151], %204 {strides = array<i32>} : memref<10x10x128xf32, #tpu.memory_space<vmem>>, vector<10x10x128xf32>,
    %c1_152 = arith.constant 1 : index
    %c1_153 = arith.constant 1 : index
    %c0_154 = arith.constant 0 : index
    %206 = vector.load %arg10[%c1_152, %c1_153, %c0_154] : memref<10x10x128xf32, #tpu.memory_space<vmem>>, vector<8x8x128xf32>
    tpu.vector_store %arg10[%c1_152, %c1_153, %c0_154], %203 {strides = array<i32>} : memref<10x10x128xf32, #tpu.memory_space<vmem>>, vector<8x8x128xf32>,
    %c0_155 = arith.constant 0 : index
    %c0_156 = arith.constant 0 : index
    %c0_157 = arith.constant 0 : index
    %207 = vector.load %arg10[%c0_155, %c0_156, %c0_157] : memref<10x10x128xf32, #tpu.memory_space<vmem>>, vector<10x10x128xf32>
    %cst_158 = arith.constant 0.000000e+00 : f32
    %208 = vector.broadcast %cst_158 : f32 to vector<64x128xf32>
    %209 = vector.extract_strided_slice %207 {offsets = [0, 0, 0], sizes = [8, 8, 128], strides = [1, 1, 1]} : vector<10x10x128xf32> to vector<8x8x128xf32>
    %210 = vector.shape_cast %209 : vector<8x8x128xf32> to vector<64x128xf32>
    %c0_159 = arith.constant 0 : index
    %c0_160 = arith.constant 0 : index
    %c0_161 = arith.constant 0 : index
    %211 = vector.load %arg5[%c0_159, %c0_160, %c0_161] : memref<9x128x128xf32, #tpu.memory_space<vmem>>, vector<1x128x128xf32>
    %212 = vector.shape_cast %211 : vector<1x128x128xf32> to vector<128x128xf32>
    %cst_162 = arith.constant dense<0.000000e+00> : vector<64x128xf32>
    %213 = tpu.matmul %210, %212, %cst_162 {dimension_numbers = #tpu.dot_dimension_numbers<[1], [0], [0], [1], [0, 0, 1, 1], [], []>} : vector<64x128xf32>, vector<128x128xf32>, vector<64x128xf32> -> vector<64x128xf32>
    %214 = arith.addf %208, %213 : vector<64x128xf32>
    %215 = vector.extract_strided_slice %207 {offsets = [0, 1, 0], sizes = [8, 8, 128], strides = [1, 1, 1]} : vector<10x10x128xf32> to vector<8x8x128xf32>
    %216 = vector.shape_cast %215 : vector<8x8x128xf32> to vector<64x128xf32>
    %c1_163 = arith.constant 1 : index
    %c0_164 = arith.constant 0 : index
    %c0_165 = arith.constant 0 : index
    %217 = vector.load %arg5[%c1_163, %c0_164, %c0_165] : memref<9x128x128xf32, #tpu.memory_space<vmem>>, vector<1x128x128xf32>
    %218 = vector.shape_cast %217 : vector<1x128x128xf32> to vector<128x128xf32>
    %cst_166 = arith.constant dense<0.000000e+00> : vector<64x128xf32>
    %219 = tpu.matmul %216, %218, %cst_166 {dimension_numbers = #tpu.dot_dimension_numbers<[1], [0], [0], [1], [0, 0, 1, 1], [], []>} : vector<64x128xf32>, vector<128x128xf32>, vector<64x128xf32> -> vector<64x128xf32>
    %220 = arith.addf %214, %219 : vector<64x128xf32>
    %221 = vector.extract_strided_slice %207 {offsets = [0, 2, 0], sizes = [8, 8, 128], strides = [1, 1, 1]} : vector<10x10x128xf32> to vector<8x8x128xf32>
    %222 = vector.shape_cast %221 : vector<8x8x128xf32> to vector<64x128xf32>
    %c2_167 = arith.constant 2 : index
    %c0_168 = arith.constant 0 : index
    %c0_169 = arith.constant 0 : index
    %223 = vector.load %arg5[%c2_167, %c0_168, %c0_169] : memref<9x128x128xf32, #tpu.memory_space<vmem>>, vector<1x128x128xf32>
    %224 = vector.shape_cast %223 : vector<1x128x128xf32> to vector<128x128xf32>
    %cst_170 = arith.constant dense<0.000000e+00> : vector<64x128xf32>
    %225 = tpu.matmul %222, %224, %cst_170 {dimension_numbers = #tpu.dot_dimension_numbers<[1], [0], [0], [1], [0, 0, 1, 1], [], []>} : vector<64x128xf32>, vector<128x128xf32>, vector<64x128xf32> -> vector<64x128xf32>
    %226 = arith.addf %220, %225 : vector<64x128xf32>
    %227 = vector.extract_strided_slice %207 {offsets = [1, 0, 0], sizes = [8, 8, 128], strides = [1, 1, 1]} : vector<10x10x128xf32> to vector<8x8x128xf32>
    %228 = vector.shape_cast %227 : vector<8x8x128xf32> to vector<64x128xf32>
    %c3_171 = arith.constant 3 : index
    %c0_172 = arith.constant 0 : index
    %c0_173 = arith.constant 0 : index
    %229 = vector.load %arg5[%c3_171, %c0_172, %c0_173] : memref<9x128x128xf32, #tpu.memory_space<vmem>>, vector<1x128x128xf32>
    %230 = vector.shape_cast %229 : vector<1x128x128xf32> to vector<128x128xf32>
    %cst_174 = arith.constant dense<0.000000e+00> : vector<64x128xf32>
    %231 = tpu.matmul %228, %230, %cst_174 {dimension_numbers = #tpu.dot_dimension_numbers<[1], [0], [0], [1], [0, 0, 1, 1], [], []>} : vector<64x128xf32>, vector<128x128xf32>, vector<64x128xf32> -> vector<64x128xf32>
    %232 = arith.addf %226, %231 : vector<64x128xf32>
    %233 = vector.extract_strided_slice %207 {offsets = [1, 1, 0], sizes = [8, 8, 128], strides = [1, 1, 1]} : vector<10x10x128xf32> to vector<8x8x128xf32>
    %234 = vector.shape_cast %233 : vector<8x8x128xf32> to vector<64x128xf32>
    %c4_175 = arith.constant 4 : index
    %c0_176 = arith.constant 0 : index
    %c0_177 = arith.constant 0 : index
    %235 = vector.load %arg5[%c4_175, %c0_176, %c0_177] : memref<9x128x128xf32, #tpu.memory_space<vmem>>, vector<1x128x128xf32>
    %236 = vector.shape_cast %235 : vector<1x128x128xf32> to vector<128x128xf32>
    %cst_178 = arith.constant dense<0.000000e+00> : vector<64x128xf32>
    %237 = tpu.matmul %234, %236, %cst_178 {dimension_numbers = #tpu.dot_dimension_numbers<[1], [0], [0], [1], [0, 0, 1, 1], [], []>} : vector<64x128xf32>, vector<128x128xf32>, vector<64x128xf32> -> vector<64x128xf32>
    %238 = arith.addf %232, %237 : vector<64x128xf32>
    %239 = vector.extract_strided_slice %207 {offsets = [1, 2, 0], sizes = [8, 8, 128], strides = [1, 1, 1]} : vector<10x10x128xf32> to vector<8x8x128xf32>
    %240 = vector.shape_cast %239 : vector<8x8x128xf32> to vector<64x128xf32>
    %c5_179 = arith.constant 5 : index
    %c0_180 = arith.constant 0 : index
    %c0_181 = arith.constant 0 : index
    %241 = vector.load %arg5[%c5_179, %c0_180, %c0_181] : memref<9x128x128xf32, #tpu.memory_space<vmem>>, vector<1x128x128xf32>
    %242 = vector.shape_cast %241 : vector<1x128x128xf32> to vector<128x128xf32>
    %cst_182 = arith.constant dense<0.000000e+00> : vector<64x128xf32>
    %243 = tpu.matmul %240, %242, %cst_182 {dimension_numbers = #tpu.dot_dimension_numbers<[1], [0], [0], [1], [0, 0, 1, 1], [], []>} : vector<64x128xf32>, vector<128x128xf32>, vector<64x128xf32> -> vector<64x128xf32>
    %244 = arith.addf %238, %243 : vector<64x128xf32>
    %245 = vector.extract_strided_slice %207 {offsets = [2, 0, 0], sizes = [8, 8, 128], strides = [1, 1, 1]} : vector<10x10x128xf32> to vector<8x8x128xf32>
    %246 = vector.shape_cast %245 : vector<8x8x128xf32> to vector<64x128xf32>
    %c6_183 = arith.constant 6 : index
    %c0_184 = arith.constant 0 : index
    %c0_185 = arith.constant 0 : index
    %247 = vector.load %arg5[%c6_183, %c0_184, %c0_185] : memref<9x128x128xf32, #tpu.memory_space<vmem>>, vector<1x128x128xf32>
    %248 = vector.shape_cast %247 : vector<1x128x128xf32> to vector<128x128xf32>
    %cst_186 = arith.constant dense<0.000000e+00> : vector<64x128xf32>
    %249 = tpu.matmul %246, %248, %cst_186 {dimension_numbers = #tpu.dot_dimension_numbers<[1], [0], [0], [1], [0, 0, 1, 1], [], []>} : vector<64x128xf32>, vector<128x128xf32>, vector<64x128xf32> -> vector<64x128xf32>
    %250 = arith.addf %244, %249 : vector<64x128xf32>
    %251 = vector.extract_strided_slice %207 {offsets = [2, 1, 0], sizes = [8, 8, 128], strides = [1, 1, 1]} : vector<10x10x128xf32> to vector<8x8x128xf32>
    %252 = vector.shape_cast %251 : vector<8x8x128xf32> to vector<64x128xf32>
    %c7_187 = arith.constant 7 : index
    %c0_188 = arith.constant 0 : index
    %c0_189 = arith.constant 0 : index
    %253 = vector.load %arg5[%c7_187, %c0_188, %c0_189] : memref<9x128x128xf32, #tpu.memory_space<vmem>>, vector<1x128x128xf32>
    %254 = vector.shape_cast %253 : vector<1x128x128xf32> to vector<128x128xf32>
    %cst_190 = arith.constant dense<0.000000e+00> : vector<64x128xf32>
    %255 = tpu.matmul %252, %254, %cst_190 {dimension_numbers = #tpu.dot_dimension_numbers<[1], [0], [0], [1], [0, 0, 1, 1], [], []>} : vector<64x128xf32>, vector<128x128xf32>, vector<64x128xf32> -> vector<64x128xf32>
    %256 = arith.addf %250, %255 : vector<64x128xf32>
    %257 = vector.extract_strided_slice %207 {offsets = [2, 2, 0], sizes = [8, 8, 128], strides = [1, 1, 1]} : vector<10x10x128xf32> to vector<8x8x128xf32>
    %258 = vector.shape_cast %257 : vector<8x8x128xf32> to vector<64x128xf32>
    %c8_191 = arith.constant 8 : index
    %c0_192 = arith.constant 0 : index
    %c0_193 = arith.constant 0 : index
    %259 = vector.load %arg5[%c8_191, %c0_192, %c0_193] : memref<9x128x128xf32, #tpu.memory_space<vmem>>, vector<1x128x128xf32>
    %260 = vector.shape_cast %259 : vector<1x128x128xf32> to vector<128x128xf32>
    %cst_194 = arith.constant dense<0.000000e+00> : vector<64x128xf32>
    %261 = tpu.matmul %258, %260, %cst_194 {dimension_numbers = #tpu.dot_dimension_numbers<[1], [0], [0], [1], [0, 0, 1, 1], [], []>} : vector<64x128xf32>, vector<128x128xf32>, vector<64x128xf32> -> vector<64x128xf32>
    %262 = arith.addf %256, %261 : vector<64x128xf32>
    %c0_195 = arith.constant 0 : index
    %c0_196 = arith.constant 0 : index
    %263 = vector.load %arg6[%c0_195, %c0_196] : memref<1x128xf32, #tpu.memory_space<vmem>>, vector<1x128xf32>
    %264 = vector.broadcast %263 : vector<1x128xf32> to vector<64x128xf32>
    %265 = arith.addf %262, %264 : vector<64x128xf32>
    %266 = arith.subf %200, %265 : vector<64x128xf32>
    %267 = arith.mulf %266, %266 : vector<64x128xf32>
    %268 = vector.shape_cast %267 : vector<64x128xf32> to vector<1x64x128xf32>
    %cst_197 = arith.constant dense<0.000000e+00> : vector<1xf32>
    %269 = vector.multi_reduction <add>, %268, %cst_197 [1, 2] : vector<1x64x128xf32> to vector<1xf32>
    %270 = vector.shape_cast %269 : vector<1xf32> to vector<1x1x1xf32>
    %271 = vector.extract %270[0, 0, 0] : f32 from vector<1x1x1xf32>
    %272 = arith.index_cast %arg0 : i32 to index
    %273 = memref.load %arg8[%272] : memref<2xf32, #tpu.memory_space<smem>>
    memref.store %271, %arg8[%272] : memref<2xf32, #tpu.memory_space<smem>>
    return
  }
  func.func @transform_0(%arg0: i32) -> (i32, i32, i32, i32) {
    %c0_i32 = arith.constant 0 : i32
    %c0_i32_0 = arith.constant 0 : i32
    %c0_i32_1 = arith.constant 0 : i32
    %c0_i32_2 = arith.constant 0 : i32
    return %arg0, %c0_i32, %c0_i32_0, %c0_i32_1 : i32, i32, i32, i32
  }
  func.func @transform_1(%arg0: i32) -> (i32, i32, i32, i32) {
    %c2_i32 = arith.constant 2 : i32
    %0 = arith.addi %arg0, %c2_i32 : i32
    %c0_i32 = arith.constant 0 : i32
    %c0_i32_0 = arith.constant 0 : i32
    %c0_i32_1 = arith.constant 0 : i32
    %c0_i32_2 = arith.constant 0 : i32
    return %0, %c0_i32, %c0_i32_0, %c0_i32_1 : i32, i32, i32, i32
  }
  func.func @transform_2(%arg0: i32) -> (i32, i32, i32) {
    %c0_i32 = arith.constant 0 : i32
    %c0_i32_0 = arith.constant 0 : i32
    %c0_i32_1 = arith.constant 0 : i32
    %c0_i32_2 = arith.constant 0 : i32
    return %c0_i32, %c0_i32_0, %c0_i32_1 : i32, i32, i32
  }
  func.func @transform_3(%arg0: i32) -> (i32, i32) {
    %c0_i32 = arith.constant 0 : i32
    %c0_i32_0 = arith.constant 0 : i32
    %c0_i32_1 = arith.constant 0 : i32
    return %c0_i32, %c0_i32_0 : i32, i32
  }
  func.func @transform_4(%arg0: i32) -> (i32, i32, i32) {
    %c0_i32 = arith.constant 0 : i32
    %c0_i32_0 = arith.constant 0 : i32
    %c0_i32_1 = arith.constant 0 : i32
    %c0_i32_2 = arith.constant 0 : i32
    return %c0_i32, %c0_i32_0, %c0_i32_1 : i32, i32, i32
  }
  func.func @transform_5(%arg0: i32) -> (i32, i32) {
    %c0_i32 = arith.constant 0 : i32
    %c0_i32_0 = arith.constant 0 : i32
    %c0_i32_1 = arith.constant 0 : i32
    return %c0_i32, %c0_i32_0 : i32, i32
  }
  func.func @transform_6(%arg0: i32) -> i32 {
    %c0_i32 = arith.constant 0 : i32
    %c0_i32_0 = arith.constant 0 : i32
    return %c0_i32 : i32
  }
  func.func @transform_7(%arg0: i32) -> i32 {
    %c0_i32 = arith.constant 0 : i32
    %c0_i32_0 = arith.constant 0 : i32
    return %c0_i32 : i32
  }
}

</mosaic_0001>

<bundles_post_ra>
// kernel: perceptual_loss.3
= control target key start
LH: loop header
LB: loop body
LE: loop exit
PB: predicated region body
PF: predicated region fallthrough
CT: control target
= control target key end

     0   :  { %13 = vsyncpa [#allocation5], 0  ;;  %s11405_s0 = inlined_call_operand.vmem [shape: f32[4,8,8,64], index: 0, kind: input, shape index: {}, may-alias: {0,1}]   ;;  %s11406_s1 = inlined_call_operand.vmem [shape: f32[4,8,8,64], index: 1, kind: input, shape index: {}, may-alias: {0,1}]   ;;  %s11407_s2 = inlined_call_operand.vmem [shape: f32[9,64,128], index: 2, kind: input, shape index: {}]   ;;  %s11408_s3 = inlined_call_operand.vmem [shape: f32[1,128], index: 3, kind: input, shape index: {}]   ;;  %s11409_s4 = inlined_call_operand.vmem [shape: f32[9,128,128], index: 4, kind: input, shape index: {}]   ;;  %s11410_s5 = inlined_call_operand.vmem [shape: f32[1,128], index: 5, kind: input, shape index: {}]   ;;  %s11411_s6 = inlined_call_operand.vmem [shape: f32[2], index: 6, kind: output, shape index: {0}]   ;;  %s11412_s7 = inlined_call_operand.vmem [shape: f32[2], index: 7, kind: output, shape index: {1}]  }
   0x1   :  { %14 = vsyncpa [#allocation7], 0  ;;  %s9476_s24 = smov 0  }
   0x2 LB: > { %s9482_s25 = sadd.s32 4294967295, %s9431_s24   ;;  %p5667_p0 = scmp.ge.s32.totalorder %s9431_s24, 1  ;;  %s9431_s24 = sphi %s9476_s24, %s20_s24  }
   0x3   : > { %p246_p1 = scmp.lt.s32.totalorder %s9431_s24, 3 }
   0x5   : > { %p247_p2 = pnand %p5667_p0, %p246_p1 }
   0x6   : > { %v5672_v0 = vld [vmem:[%s11407_s2 + $0x40] sm:$0xff] (!%p247_p2)  ;;  %v5673_v1 = vld [vmem:[%s11407_s2 + $0x48] sm:$0xff] (!%p247_p2)  ;;  %v5674_v2 = vld [vmem:[%s11407_s2 + $0x50] sm:$0xff] (!%p247_p2)  ;;  %vm299_vm0 = vcmask (!%p247_p2), 523264   ;;  %vm301_vm1 = vcmask (!%p247_p2), 517120   ;;  %v9433_v5 = vmov (!%p247_p2), 0.0  }
   0x7   : > { %250 = sbr.rel (%p247_p2) target bundleno = 1112 (0x458), region = 44  ;;  %v8234_v3 = vpack.c.bf16 (!%p247_p2), %v5673_v1, %v5672_v0  ;;  %v5675_v4 = vld [vmem:[%s11407_s2 + $0x58] sm:$0xff] (!%p247_p2)  ;;  %300 = vst.msk [vmem:[#allocation2] sm:$0xff] (!%p247_p2), %vm299_vm0, %v9433_v5  ;;  %303 = vst.msk [vmem:[#allocation2 + $0x10] sm:$0xff] (!%p247_p2), %vm299_vm0, %v9433_v5  ;;  %p279_p3 = scmp.lt.s32.totalorder (!%p247_p2), %s9482_s25, 3  ;;  %v5676_v7 = vld [vmem:[%s11407_s2 + $0x60] sm:$0xff] (!%p247_p2) }
   0x8   : > { %302 = vst.msk [vmem:[#allocation2 + $0x8] sm:$0x3] (!%p247_p2), %vm301_vm1, %v9433_v5  ;;  %304 = vst.msk [vmem:[#allocation2 + $0x18] sm:$0x3] (!%p247_p2), %vm301_vm1, %v9433_v5  ;;  %s284_s11 = sadd.s32 (!%p247_p2), 2, %s9482_s25  ;;  %v8238_v6 = vpack.c.bf16 (!%p247_p2), %v5675_v4, %v5674_v2  ;;  %v5677_v8 = vld [vmem:[%s11407_s2 + $0x68] sm:$0xff] (!%p247_p2) }
   0x9   : > { %305 = vst.msk [vmem:[#allocation2 + $0x20] sm:$0xff] (!%p247_p2), %vm299_vm0, %v9433_v5  ;;  %307 = vst.msk [vmem:[#allocation2 + $0x30] sm:$0xff] (!%p247_p2), %vm299_vm0, %v9433_v5  ;;  %p285_p4 = scmp.lt.s32.totalorder (!%p247_p2), %s284_s11, 3  ;;  %8235 = vmatprep.subr.bf16.mxu0 (!%p247_p2), %v8234_v3  ;;  %8379 = vmatprep.subr.bf16.mxu1 (!%p247_p2), %v8234_v3  ;;  %v8242_v9 = vpack.c.bf16 (!%p247_p2), %v5677_v8, %v5676_v7  ;;  %v5678_v10 = vld [vmem:[%s11407_s2 + $0x70] sm:$0xff] (!%p247_p2)  ;;  %v5679_v11 = vld [vmem:[%s11407_s2 + $0x78] sm:$0xff] (!%p247_p2)  ;;  %vm374_vm2 = vcmask (!%p247_p2), 1046528  }
   0xa   : > { %306 = vst.msk [vmem:[#allocation2 + $0x28] sm:$0x3] (!%p247_p2), %vm301_vm1, %v9433_v5  ;;  %308 = vst.msk [vmem:[#allocation2 + $0x38] sm:$0x3] (!%p247_p2), %vm301_vm1, %v9433_v5  ;;  %8237 = vmatpush3.bf16.msra.mxu0 (!%p247_p2), %v8234_v3  ;;  %8381 = vmatpush3.bf16.msra.mxu1 (!%p247_p2), %v8234_v3  ;;  %v8246_v17 = vpack.c.bf16 (!%p247_p2), %v5679_v11, %v5678_v10  ;;  %v350_v21 = vld [vmem:[%s11407_s2] sm:$0xff] (!%p247_p2)  ;;  %v351_v22 = vld [vmem:[%s11407_s2 + $0x8] sm:$0xff] (!%p247_p2) }
   0xb   : > { %309 = vst.msk [vmem:[#allocation2 + $0x40] sm:$0xff] (!%p247_p2), %vm299_vm0, %v9433_v5  ;;  %311 = vst.msk [vmem:[#allocation2 + $0x50] sm:$0xff] (!%p247_p2), %vm299_vm0, %v9433_v5  ;;  %8239 = vmatprep.subr.bf16.mxu0 (!%p247_p2), %v8238_v6  ;;  %8383 = vmatprep.subr.bf16.mxu1 (!%p247_p2), %v8238_v6  ;;  %v9617_v27 = vpack.c.bf16 (!%p247_p2), %v351_v22, %v350_v21  ;;  %v352_v28 = vld [vmem:[%s11407_s2 + $0x10] sm:$0xff] (!%p247_p2)  ;;  %v353_v29 = vld [vmem:[%s11407_s2 + $0x18] sm:$0xff] (!%p247_p2)  ;;  %vm650_vm3 = vcmask (!%p247_p2), 1045504   ;;  %s6214_s20 = scalar_lea.smem (!%p247_p2), [#allocation4], %s9431_s24 }
   0xc   : > { %310 = vst.msk [vmem:[#allocation2 + $0x48] sm:$0x3] (!%p247_p2), %vm301_vm1, %v9433_v5  ;;  %312 = vst.msk [vmem:[#allocation2 + $0x58] sm:$0x3] (!%p247_p2), %vm301_vm1, %v9433_v5  ;;  %v354_v43 = vld [vmem:[%s11407_s2 + $0x20] sm:$0xff] (!%p247_p2)  ;;  %v355_v44 = vld [vmem:[%s11407_s2 + $0x28] sm:$0xff] (!%p247_p2)  ;;  %v9665_v48 = vpack.c.bf16 (!%p247_p2), %v353_v29, %v352_v28 }
   0xd   : > { %313 = vst.msk [vmem:[#allocation2 + $0x60] sm:$0xff] (!%p247_p2), %vm299_vm0, %v9433_v5  ;;  %315 = vst.msk [vmem:[#allocation2 + $0x70] sm:$0xff] (!%p247_p2), %vm299_vm0, %v9433_v5  ;;  %v9726_v8 = vpack.c.bf16 (!%p247_p2), %v355_v44, %v354_v43  ;;  %v5697_v44 = vld [vmem:[%s11407_s2 + $0x88] sm:$0xff] (!%p247_p2)  ;;  %s6215_s21 = scalar_lea.smem (!%p247_p2), %s6214_s20, 4294967295 [#allocation4]  ;;  %p9366_p5 = scmp.eq.s32.totalorder (!%p247_p2), %s9482_s25, 1 }
   0xe   : > { %314 = vst.msk [vmem:[#allocation2 + $0x68] sm:$0x3] %vm301_vm1, %v9433_v5  ;;  %316 = vst.msk [vmem:[#allocation2 + $0x78] sm:$0x3] %vm301_vm1, %v9433_v5  ;;  %s280_s16 = scalar_select %p279_p3, %s9482_s25, 3  ;;  %8241 = vmatpush3.bf16.msra.mxu0 %v8238_v6  ;;  %8385 = vmatpush3.bf16.msra.mxu1 %v8238_v6  ;;  %v9582_v15 = vld [vmem:[#allocation2] sm:$0xff] }
   0xf   : > { %317 = vst.msk [vmem:[#allocation2 + $0x80] sm:$0xff] %vm299_vm0, %v9433_v5  ;;  %319 = vst.msk [vmem:[#allocation2 + $0x90] sm:$0xff] %vm299_vm0, %v9433_v5  ;;  %s11414_s11 = smov (!%p285_p4, %s284_s11), 3  ;;  %v9584_v16 = vld [vmem:[#allocation2 + $0x8] sm:$0x3]  ;;  %8243 = vmatprep.subr.bf16.mxu0 %v8242_v9  ;;  %v375_v18 = vrot.slane %v9582_v15, 1  ;;  %8387 = vmatprep.subr.bf16.mxu1 %v8242_v9 }
  0x10   : > { %318 = vst.msk [vmem:[#allocation2 + $0x88] sm:$0x3] %vm301_vm1, %v9433_v5  ;;  %320 = vst.msk [vmem:[#allocation2 + $0x98] sm:$0x3] %vm301_vm1, %v9433_v5  ;;  %s6212_s17 = sshll.u32 %s280_s16, 6  ;;  %s6213_s27 = sshll.u32 %s11414_s11, 6 }
  0x11   : > { %2915 = vst [vmem:[#allocation3 + $0x8] sm:$0x3] %v9433_v5  ;;  %2916 = vst [vmem:[#allocation3 + $0x10] sm:$0xff] %v9433_v5  ;;  %s9577_s26 = scalar_lea.vmem %s11405_s0, %s6212_s17  ;;  %v376_v19 = vrot.slane %v9584_v16, 1  ;;  %s9609_s11 = scalar_lea.vmem %s11406_s1, %s6213_s27 }
  0x12   : > { %2917 = vst [vmem:[#allocation3 + $0x18] sm:$0x3] %v9433_v5  ;;  %2918 = vst [vmem:[#allocation3 + $0x20] sm:$0xff] %v9433_v5  ;;  %v291_v12 = vld [vmem:[%s9577_s26] sm:$0xff]  ;;  %v292_v13 = vld [vmem:[%s9577_s26 + $0x8] sm:$0xff]  ;;  %8245 = vmatpush3.bf16.msra.mxu0 %v8242_v9  ;;  %8389 = vmatpush3.bf16.msra.mxu1 %v8242_v9  ;;  %s5588_s14 = sshll.u32 %s11411_s6, 4  ;;  %s5589_s14 = int_to_ptr.vmem [resolvable:$true] %s5588_s14 }
  0x13   : > { %2919 = vst [vmem:[#allocation3 + $0x28] sm:$0x3] %v9433_v5  ;;  %2920 = vst [vmem:[#allocation3 + $0x30] sm:$0xff] %v9433_v5  ;;  %v293_v14 = vld [vmem:[%s9577_s26 + $0x10] sm:$0xff]  ;;  %v294_v20 = vld [vmem:[%s9577_s26 + $0x18] sm:$0xff]  ;;  %v377_v24 = vsel %vm374_vm2, %v375_v18, %v376_v19  ;;  %8247 = vmatprep.subr.bf16.mxu0 %v8246_v17  ;;  %8391 = vmatprep.subr.bf16.mxu1 %v8246_v17  ;;  %s9389_s15 = scalar_lea.vmem %s5589_s14, 16  ;;  %p9396_p9 = scmp.lt.s32.totalorder %s5589_s14, %s5589_s14 }
  0x14   : > { %2921 = vst [vmem:[#allocation3 + $0x38] sm:$0x3] %v9433_v5  ;;  %2922 = vst [vmem:[#allocation3 + $0x40] sm:$0xff] %v9433_v5  ;;  %v295_v23 = vld [vmem:[%s9577_s26 + $0x20] sm:$0xff]  ;;  %v296_v25 = vld [vmem:[%s9577_s26 + $0x28] sm:$0xff]  ;;  %6954 = vmatprep.mubr.msk.f32.mxu0 %vm299_vm0, %v377_v24  ;;  %p9390_p6 = scmp.ne.s32.totalorder %s5589_s14, %s9389_s15  ;;  %p9397_p10 = scmp.lt.s32.totalorder %s9389_s15, %s9389_s15 }
  0x15   : > { %2923 = vst [vmem:[#allocation3 + $0x48] sm:$0x3] %v9433_v5  ;;  %2924 = vst [vmem:[#allocation3 + $0x50] sm:$0xff] %v9433_v5  ;;  %v297_v26 = vld [vmem:[%s9577_s26 + $0x30] sm:$0xff]  ;;  %v1588_v30 = vld [vmem:[%s9609_s11] sm:$0xff] }
  0x16   : > { %2925 = vst [vmem:[#allocation3 + $0x58] sm:$0x3] %v9433_v5  ;;  %2926 = vst [vmem:[#allocation3 + $0x60] sm:$0xff] %v9433_v5  ;;  %v1589_v31 = vld [vmem:[%s9609_s11 + $0x8] sm:$0xff]  ;;  %v1590_v32 = vld [vmem:[%s9609_s11 + $0x10] sm:$0xff]  ;;  %8249 = vmatpush3.bf16.msra.mxu0 %v8246_v17  ;;  %8393 = vmatpush3.bf16.msra.mxu1 %v8246_v17  ;;  %p9391_p7 = pnand %p9390_p6, %p9366_p5  ;;  %p9398_p11 = por %p9397_p10, %p9396_p9 }
  0x17   : > { %2927 = vst [vmem:[#allocation3 + $0x68] sm:$0x3] %v9433_v5  ;;  %2928 = vst [vmem:[#allocation3 + $0x70] sm:$0xff] %v9433_v5  ;;  %v1591_v36 = vld [vmem:[%s9609_s11 + $0x18] sm:$0xff]  ;;  %v1592_v42 = vld [vmem:[%s9609_s11 + $0x20] sm:$0xff]  ;;  %8251 = vmatprep.subr.bf16.mxu0 %v9617_v27  ;;  %8395 = vmatprep.subr.bf16.mxu1 %v9617_v27 }
  0x18   : > { %2929 = vst [vmem:[#allocation3 + $0x78] sm:$0x3] %v9433_v5  ;;  %2930 = vst [vmem:[#allocation3 + $0x80] sm:$0xff] %v9433_v5  ;;  %v1593_v51 = vld [vmem:[%s9609_s11 + $0x28] sm:$0xff]  ;;  %v1594_v4 = vld [vmem:[%s9609_s11 + $0x30] sm:$0xff]  ;;  %p9392_p8 = pneg %p9391_p7 }
  0x19   : > { %2931 = vst [vmem:[#allocation3 + $0x88] sm:$0x3] %v9433_v5  ;;  %2933 = vst [vmem:[#allocation3 + $0x98] sm:$0x3] %v9433_v5 }
  0x1a   : > { %4239 = vst [vmem:[#allocation3] sm:$0xff] %v9433_v5  ;;  %322 = vst.msk [vmem:[#allocation2 + $0x11] sm:$0xff] %vm299_vm0, %v291_v12  ;;  %p9399_p12 = pnand %p9398_p11, %p9392_p8 }
  0x1b   : > { %323 = vst.msk [vmem:[#allocation2 + $0x21] sm:$0xff] %vm299_vm0, %v292_v13  ;;  %324 = vst.msk [vmem:[#allocation2 + $0x31] sm:$0xff] %vm299_vm0, %v293_v14  ;;  %v356_v13 = vld [vmem:[%s11407_s2 + $0x30] sm:$0xff]  ;;  %v357_v14 = vld [vmem:[%s11407_s2 + $0x38] sm:$0xff] }
  0x1c   : > { %1596 = vst.msk [vmem:[#allocation2] sm:$0xff] %vm299_vm0, %v9433_v5  ;;  %325 = vst.msk [vmem:[#allocation2 + $0x41] sm:$0xff] %vm299_vm0, %v294_v20 }
  0x1d   : > { %1597 = vst.msk [vmem:[#allocation2 + $0x8] sm:$0x3] %vm301_vm1, %v9433_v5 }
  0x1e   : > { %326 = vst.msk [vmem:[#allocation2 + $0x51] sm:$0xff] %vm299_vm0, %v295_v23  ;;  %327 = vst.msk [vmem:[#allocation2 + $0x61] sm:$0xff] %vm299_vm0, %v296_v25 }
  0x1f   : > { %328 = vst.msk [vmem:[#allocation2 + $0x71] sm:$0xff] %vm299_vm0, %v297_v26 }
  0x21   : > { %v9628_v33 = vld [vmem:[#allocation2 + $0x10] sm:$0xff]  ;;  %v9630_v34 = vld [vmem:[#allocation2 + $0x18] sm:$0x3] }
  0x22   : > { %v9632_v35 = vld [vmem:[#allocation2 + $0x20] sm:$0xff]  ;;  %v378_v37 = vrot.slane %v9628_v33, 1  ;;  %v379_v38 = vrot.slane %v9630_v34, 1  ;;  %1598 = vst.msk [vmem:[#allocation2 + $0x10] sm:$0xff] %vm299_vm0, %v9433_v5  ;;  %v9641_v39 = vld [vmem:[#allocation2 + $0x28] sm:$0x3] }
  0x23   : > { %1599 = vst.msk [vmem:[#allocation2 + $0x18] sm:$0x3] %vm301_vm1, %v9433_v5  ;;  %v381_v40 = vrot.slane %v9632_v35, 1  ;;  %v9646_v41 = vld [vmem:[#allocation2 + $0x30] sm:$0xff]  ;;  %v382_v45 = vrot.slane %v9641_v39, 1  ;;  %v9667_v49 = vld [vmem:[#allocation2 + $0x40] sm:$0xff] }
  0x24   : > { %1600 = vst.msk [vmem:[#allocation2 + $0x20] sm:$0xff] %vm299_vm0, %v9433_v5  ;;  %1616 = vst.msk [vmem:[#allocation2 + $0x11] sm:$0xff] %vm299_vm0, %v1588_v30  ;;  %v9660_v46 = vld [vmem:[#allocation2 + $0x38] sm:$0x3]  ;;  %v384_v47 = vrot.slane %v9646_v41, 1  ;;  %v9669_v50 = vld [vmem:[#allocation2] sm:$0xff]  ;;  %v9673_v52 = vsel %vm374_vm2, %v378_v37, %v379_v38  ;;  %v9777_v30 = vpack.c.bf16 %v357_v14, %v356_v13 }
  0x25   : > { %1601 = vst.msk [vmem:[#allocation2 + $0x28] sm:$0x3] %vm301_vm1, %v9433_v5  ;;  %v385_v53 = vrot.slane %v9660_v46, 1  ;;  %1603 = vst.msk [vmem:[#allocation2 + $0x38] sm:$0x3] %vm301_vm1, %v9433_v5  ;;  %v387_v55 = vrot.slane %v9667_v49, 1  ;;  %6955 = vmatmul.mubr.msk.f32.vlgmr.msra.gmra.mrb[0].mxu0 %vm299_vm0, %v9673_v52  ;;  %v9690_v57 = vsel %vm374_vm2, %v381_v40, %v382_v45 }
  0x26   : > { %1602 = vst.msk [vmem:[#allocation2 + $0x30] sm:$0xff] %vm299_vm0, %v9433_v5  ;;  %1617 = vst.msk [vmem:[#allocation2 + $0x21] sm:$0xff] %vm299_vm0, %v1589_v31  ;;  %v9679_v54 = vld [vmem:[#allocation2 + $0x48] sm:$0x3]  ;;  %v1668_v59 = vrot.slane %v9669_v50, 1  ;;  %v9698_v61 = vld [vmem:[#allocation2 + $0x50] sm:$0xff]  ;;  %8253 = vmatpush3.bf16.msra.mxu0 %v9617_v27  ;;  %6957 = vmatprep.mubr.msk.f32.mxu0 %vm299_vm0, %v9690_v57 }
  0x27   : > { %1604 = vst.msk [vmem:[#allocation2 + $0x40] sm:$0xff] %vm299_vm0, %v9433_v5  ;;  %v9684_v56 = vld [vmem:[#allocation2 + $0x8] sm:$0x3]  ;;  %1618 = vst.msk [vmem:[#allocation2 + $0x31] sm:$0xff] %vm299_vm0, %v1590_v32  ;;  %v388_v58 = vrot.slane %v9679_v54, 1  ;;  %v9706_v63 = vsel %vm374_vm2, %v384_v47, %v385_v53  ;;  %v390_v0 = vrot.slane %v9698_v61, 1  ;;  %8255 = vmatprep.subr.bf16.mxu0 %v9665_v48 }
  0x28   : > { %1605 = vst.msk [vmem:[#allocation2 + $0x48] sm:$0x3] %vm301_vm1, %v9433_v5  ;;  %v1669_v60 = vrot.slane %v9684_v56, 1  ;;  %v9700_v62 = vld [vmem:[#allocation2 + $0x58] sm:$0x3]  ;;  %v9715_v2 = vld [vmem:[#allocation2 + $0x60] sm:$0xff] }
  0x29   : > { %1619 = vst.msk [vmem:[#allocation2 + $0x41] sm:$0xff] %vm299_vm0, %v1591_v36  ;;  %v391_v1 = vrot.slane %v9700_v62, 1  ;;  %1606 = vst.msk [vmem:[#allocation2 + $0x50] sm:$0xff] %vm299_vm0, %v9433_v5  ;;  %v9717_v3 = vld [vmem:[#allocation2 + $0x68] sm:$0x3]  ;;  %v9722_v6 = vsel %vm374_vm2, %v387_v55, %v388_v58  ;;  %v9732_v9 = vld [vmem:[#allocation2 + $0x70] sm:$0xff]  ;;  %6958 = vmatmul.mubr.msk.f32.gmra.mrb[2].mxu0 %vm299_vm0, %v9706_v63 }
  0x2a   : > { %1607 = vst.msk [vmem:[#allocation2 + $0x58] sm:$0x3] %vm301_vm1, %v9433_v5  ;;  %v1670_v7 = vsel %vm374_vm2, %v1668_v59, %v1669_v60  ;;  %1609 = vst.msk [vmem:[#allocation2 + $0x68] sm:$0x3] %vm301_vm1, %v9433_v5  ;;  %v9734_v10 = vld [vmem:[#allocation2 + $0x78] sm:$0x3]  ;;  %8257 = vmatpush3.bf16.msra.mxu0 %v9665_v48  ;;  %6960 = vmatprep.mubr.msk.f32.mxu0 %vm299_vm0, %v9722_v6 }
  0x2b   : > { %1620 = vst.msk [vmem:[#allocation2 + $0x51] sm:$0xff] %vm299_vm0, %v1592_v42  ;;  %1608 = vst.msk [vmem:[#allocation2 + $0x60] sm:$0xff] %vm299_vm0, %v9433_v5  ;;  %7206 = vmatprep.mubr.msk.f32.mxu1 %vm299_vm0, %v1670_v7  ;;  %v393_v11 = vrot.slane %v9715_v2, 1  ;;  %v394_v12 = vrot.slane %v9717_v3, 1  ;;  %v9757_v17 = vsel %vm374_vm2, %v390_v0, %v391_v1  ;;  %v9759_v18 = vld [vmem:[#allocation2 + $0x10] sm:$0xff]  ;;  %v396_v20 = vrot.slane %v9732_v9, 1  ;;  %8259 = vmatprep.subr.bf16.mxu0 %v9726_v8 }
  0x2c   : > { %1621 = vst.msk [vmem:[#allocation2 + $0x61] sm:$0xff] %vm299_vm0, %v1593_v51  ;;  %1610 = vst.msk [vmem:[#allocation2 + $0x70] sm:$0xff] %vm299_vm0, %v9433_v5  ;;  %v9761_v19 = vld [vmem:[#allocation2 + $0x18] sm:$0x3]  ;;  %v397_v21 = vrot.slane %v9734_v10, 1  ;;  %v1671_v22 = vrot.slane %v9759_v18, 1 }
  0x2d   : > { %1611 = vst.msk [vmem:[#allocation2 + $0x78] sm:$0x3] %vm301_vm1, %v9433_v5  ;;  %v1672_v23 = vrot.slane %v9761_v19, 1  ;;  %v9768_v24 = vld [vmem:[#allocation2 + $0x20] sm:$0xff]  ;;  %v9770_v25 = vld [vmem:[#allocation2 + $0x28] sm:$0x3]  ;;  %v9773_v26 = vsel %vm374_vm2, %v393_v11, %v394_v12  ;;  %6961 = vmatmul.mubr.msk.f32.gmra.mrb[4].mxu0 %vm299_vm0, %v9757_v17 }
  0x2e   : > { %1622 = vst.msk [vmem:[#allocation2 + $0x71] sm:$0xff] %vm299_vm0, %v1594_v4  ;;  %v1674_v28 = vrot.slane %v9768_v24, 1  ;;  %v1675_v29 = vrot.slane %v9770_v25, 1  ;;  %v9779_v31 = vld [vmem:[#allocation2 + $0x30] sm:$0xff]  ;;  %v9781_v32 = vld [vmem:[#allocation2 + $0x38] sm:$0x3]  ;;  %8261 = vmatpush3.bf16.msra.mxu0 %v9726_v8  ;;  %v9807_v47 = vsel %vm374_vm2, %v396_v20, %v397_v21  ;;  %6963 = vmatprep.mubr.msk.f32.mxu0 %vm299_vm0, %v9773_v26 }
  0x2f   : > { %v5696_v36 = vld [vmem:[%s11407_s2 + $0x80] sm:$0xff]  ;;  %v9789_v37 = vsel %vm374_vm2, %v1671_v22, %v1672_v23  ;;  %v1677_v38 = vrot.slane %v9779_v31, 1  ;;  %v1678_v40 = vrot.slane %v9781_v32, 1  ;;  %8263 = vmatprep.subr.bf16.mxu0 %v9777_v30  ;;  %v298_v12 = vld [vmem:[%s9577_s26 + $0x38] sm:$0xff]  ;;  %v5698_v21 = vld [vmem:[%s11407_s2 + $0x90] sm:$0xff] }
  0x30   : > { %v9793_v42 = vld [vmem:[#allocation2 + $0x40] sm:$0xff]  ;;  %v9795_v43 = vld [vmem:[#allocation2 + $0x48] sm:$0x3]  ;;  %7207 = vmatmul.mubr.msk.f32.vlgmr.msra.gmra.mrb[0].mxu1 %vm299_vm0, %v9789_v37  ;;  %v9804_v45 = vsel %vm374_vm2, %v1674_v28, %v1675_v29  ;;  %v5699_v22 = vld [vmem:[%s11407_s2 + $0x98] sm:$0xff]  ;;  %329 = vst.msk [vmem:[#allocation2 + $0x81] sm:$0xff] %vm299_vm0, %v298_v12 }
  0x31   : > { %v1680_v51 = vrot.slane %v9793_v42, 1  ;;  %v1681_v53 = vrot.slane %v9795_v43, 1  ;;  %8397 = vmatpush3.bf16.msra.mxu1 %v9617_v27  ;;  %v9819_v59 = vsel %vm374_vm2, %v1677_v38, %v1678_v40  ;;  %7209 = vmatprep.mubr.msk.f32.mxu1 %vm299_vm0, %v9804_v45  ;;  %v9830_v27 = vpack.c.bf16 %v5697_v44, %v5696_v36  ;;  %v5700_v38 = vld [vmem:[%s11407_s2 + $0xa0] sm:$0xff]  ;;  %v5701_v40 = vld [vmem:[%s11407_s2 + $0xa8] sm:$0xff]  ;;  %v5703_v12 = vld [vmem:[%s11407_s2 + $0xb8] sm:$0xff] }
  0x32   : > { %v9811_v55 = vld [vmem:[#allocation2 + $0x50] sm:$0xff]  ;;  %v9813_v58 = vld [vmem:[#allocation2 + $0x58] sm:$0x3]  ;;  %6964 = vmatmul.mubr.msk.f32.gmra.mrb[6].mxu0 %vm299_vm0, %v9807_v47  ;;  %8399 = vmatprep.subr.bf16.mxu1 %v9665_v48  ;;  %v8270_v36 = vpack.c.bf16 %v5699_v22, %v5698_v21  ;;  %v651_v21 = vrot.slane %v9582_v15, 2  ;;  %v652_v22 = vrot.slane %v9584_v16, 2  ;;  %v655_v16 = vrot.slane %v9630_v34, 2 }
  0x33   : > { %v1683_v60 = vrot.slane %v9811_v55, 1  ;;  %v1684_v0 = vrot.slane %v9813_v58, 1  ;;  %v9823_v1 = vld [vmem:[#allocation2 + $0x60] sm:$0xff]  ;;  %v9825_v4 = vld [vmem:[#allocation2 + $0x68] sm:$0x3]  ;;  %v9841_v13 = vsel %vm374_vm2, %v1680_v51, %v1681_v53  ;;  %8265 = vmatpush3.bf16.msra.mxu0 %v9777_v30  ;;  %6982 = vmatprep.mubr.msk.f32.mxu0 %vm299_vm0, %v9582_v15  ;;  %v1595_v51 = vld [vmem:[%s9609_s11 + $0x38] sm:$0xff]  ;;  %v9890_v53 = vpack.c.bf16 %v5701_v40, %v5700_v38 }
  0x34   : > { %v1686_v14 = vrot.slane %v9823_v1, 1  ;;  %v1687_v20 = vrot.slane %v9825_v4, 1  ;;  %7210 = vmatmul.mubr.msk.f32.gmra.mrb[2].mxu1 %vm299_vm0, %v9819_v59  ;;  %8267 = vmatprep.subr.bf16.mxu0 %v9830_v27  ;;  %v654_v15 = vrot.slane %v9628_v33, 2  ;;  %v653_v38 = vsel %vm650_vm3, %v651_v21, %v652_v22 }
  0x35   : > { %v9832_v7 = vld [vmem:[#allocation2 + $0x70] sm:$0xff]  ;;  %v9834_v11 = vld [vmem:[#allocation2 + $0x78] sm:$0x3]  ;;  %8401 = vmatpush3.bf16.msra.mxu1 %v9665_v48  ;;  %v9859_v23 = vsel %vm374_vm2, %v1683_v60, %v1684_v0  ;;  %7212 = vmatprep.mubr.msk.f32.mxu1 %vm299_vm0, %v9841_v13  ;;  %v658_v34 = vrot.slane %v9641_v39, 2  ;;  %v660_v39 = vrot.slane %v9646_v41, 2 }
  0x36   : > { %v1689_v28 = vrot.slane %v9832_v7, 1  ;;  %v1690_v29 = vrot.slane %v9834_v11, 1  ;;  %6983 = vmatmul.mubr.msk.f32.vlgmr.msra.gmra.mrb[0].mxu0 %vm299_vm0, %v9628_v33  ;;  %8403 = vmatprep.subr.bf16.mxu1 %v9726_v8  ;;  %v9870_v48 = vsel %vm374_vm2, %v1686_v14, %v1687_v20  ;;  %v9912_v14 = vld [vmem:[#allocation2 + $0x90] sm:$0xff] }
  0x37   : > { %8269 = vmatpush3.bf16.msra.mxu0 %v9830_v27  ;;  %6985 = vmatprep.mubr.msk.f32.mxu0 %vm299_vm0, %v9632_v35  ;;  %v9892_v60 = vld [vmem:[#allocation2 + $0x80] sm:$0xff]  ;;  %v9894_v0 = vld [vmem:[#allocation2 + $0x88] sm:$0x3]  ;;  %1614 = vst.msk [vmem:[#allocation2 + $0x90] sm:$0xff] %vm299_vm0, %v9433_v5 }
  0x38   : > { %7213 = vmatmul.mubr.msk.f32.gmra.mrb[4].mxu1 %vm299_vm0, %v9859_v23  ;;  %v9885_v44 = vsel %vm374_vm2, %v1689_v28, %v1690_v29  ;;  %8271 = vmatprep.subr.bf16.mxu0 %v8270_v36  ;;  %1612 = vst.msk [vmem:[#allocation2 + $0x80] sm:$0xff] %vm299_vm0, %v9433_v5  ;;  %v5713_v28 = vld [vmem:[%s11407_s2 + $0xc8] sm:$0xff]  ;;  %v9935_v29 = vld [vmem:[#allocation2 + $0x98] sm:$0x3] }
  0x39   : > { %8405 = vmatpush3.bf16.msra.mxu1 %v9726_v8  ;;  %7215 = vmatprep.mubr.msk.f32.mxu1 %vm299_vm0, %v9870_v48  ;;  %v5702_v8 = vld [vmem:[%s11407_s2 + $0xb0] sm:$0xff]  ;;  %1613 = vst.msk [vmem:[#allocation2 + $0x88] sm:$0x3] %vm301_vm1, %v9433_v5  ;;  %1615 = vst.msk [vmem:[#allocation2 + $0x98] sm:$0x3] %vm301_vm1, %v9433_v5 }
  0x3a   : > { %6986 = vmatmul.mubr.msk.f32.gmra.mrb[2].mxu0 %vm299_vm0, %v9646_v41  ;;  %8407 = vmatprep.subr.bf16.mxu1 %v9777_v30  ;;  %1623 = vst.msk [vmem:[#allocation2 + $0x81] sm:$0xff] %vm299_vm0, %v1595_v51  ;;  %v9922_v20 = vpack.c.bf16 %v5703_v12, %v5702_v8  ;;  %v657_v51 = vrot.slane %v9632_v35, 2  ;;  %v5714_v5 = vld [vmem:[%s11407_s2 + $0xd0] sm:$0xff]  ;;  %v9967_v8 = vsel %vm650_vm3, %v654_v15, %v655_v16  ;;  %v661_v12 = vrot.slane %v9660_v46, 2  ;;  %v5717_v16 = vld [vmem:[%s11407_s2 + $0xe8] sm:$0xff] }
  0x3b   : > { %8273 = vmatpush3.bf16.msra.mxu0 %v8270_v36  ;;  %6988 = vmatprep.mubr.msk.f32.mxu0 %vm299_vm0, %v9667_v49  ;;  %v1943_v15 = vrot.slane %v9684_v56, 2  ;;  %v1942_v46 = vrot.slane %v9669_v50, 2  ;;  %v666_v56 = vrot.slane %v9698_v61, 2 }
  0x3c   : > { %7216 = vmatmul.mubr.msk.f32.gmra.mrb[6].mxu1 %vm299_vm0, %v9885_v44  ;;  %8275 = vmatprep.subr.bf16.mxu0 %v9890_v53  ;;  %v9976_v21 = vsel %vm650_vm3, %v657_v51, %v658_v34  ;;  %v1945_v51 = vrot.slane %v9759_v18, 2 }
  0x3d   : > { %8409 = vmatpush3.bf16.msra.mxu1 %v9777_v30  ;;  %7234 = vmatprep.mubr.msk.f32.mxu1 %vm299_vm0, %v9669_v50  ;;  %v5712_v30 = vld [vmem:[%s11407_s2 + $0xc0] sm:$0xff]  ;;  %v667_v50 = vrot.slane %v9700_v62, 2  ;;  %v669_v62 = vrot.slane %v9715_v2, 2 }
  0x3e   : > { %6989 = vmatmul.mubr.msk.f32.gmra.mrb[4].mxu0 %vm299_vm0, %v9698_v61  ;;  %8411 = vmatprep.subr.bf16.mxu1 %v9830_v27  ;;  %v9951_v40 = vpack.c.bf16 %v5713_v28, %v5712_v30  ;;  %v663_v30 = vrot.slane %v9667_v49, 2  ;;  %v664_v28 = vrot.slane %v9679_v54, 2  ;;  %v9997_v54 = vsel %vm650_vm3, %v660_v39, %v661_v12  ;;  %v5718_v12 = vld [vmem:[%s11407_s2 + $0xf0] sm:$0xff] }
  0x3f   : > { %8277 = vmatpush3.bf16.msra.mxu0 %v9890_v53  ;;  %6991 = vmatprep.mubr.msk.f32.mxu0 %vm299_vm0, %v9715_v2  ;;  %v1949_v39 = vrot.slane %v9770_v25, 2  ;;  %v673_v25 = vrot.slane %v9734_v10, 2 }
  0x40   : > { %7235 = vmatmul.mubr.msk.f32.vlgmr.msra.gmra.mrb[0].mxu1 %vm299_vm0, %v9759_v18  ;;  %8279 = vmatprep.subr.bf16.mxu0 %v9922_v20  ;;  %v10010_v34 = vsel %vm650_vm3, %v663_v30, %v664_v28  ;;  %v5719_v30 = vld [vmem:[%s11407_s2 + $0xf8] sm:$0xff]  ;;  %v672_v28 = vrot.slane %v9732_v9, 2 }
  0x41   : > { %8413 = vmatpush3.bf16.msra.mxu1 %v9830_v27  ;;  %7237 = vmatprep.mubr.msk.f32.mxu1 %vm299_vm0, %v9768_v24  ;;  %v5715_v27 = vld [vmem:[%s11407_s2 + $0xd8] sm:$0xff]  ;;  %v8294_v10 = vpack.c.bf16 %v5719_v30, %v5718_v12 }
  0x42   : > { %6992 = vmatmul.mubr.msk.f32.gmra.mrb[6].mxu0 %vm299_vm0, %v9732_v9  ;;  %8415 = vmatprep.subr.bf16.mxu1 %v8270_v36  ;;  %v9978_v22 = vpack.c.bf16 %v5715_v27, %v5714_v5  ;;  %v1948_v27 = vrot.slane %v9768_v24, 2  ;;  %v5731_v12 = vld [vmem:[%s11407_s2 + $0x118] sm:$0xff] }
  0x43   : > { %8281 = vmatpush3.bf16.msra.mxu0 %v9922_v20  ;;  %7010 = vmatprep.mubr.msk.f32.mxu0 %vm299_vm0, %v653_v38  ;;  %v1946_v38 = vrot.slane %v9761_v19, 2  ;;  %v670_v19 = vrot.slane %v9717_v3, 2  ;;  %v10032_v3 = vsel %vm650_vm3, %v666_v56, %v667_v50  ;;  %v1954_v56 = vrot.slane %v9793_v42, 2  ;;  %v5728_v50 = vld [vmem:[%s11407_s2 + $0x100] sm:$0xff] }
  0x44   : > { %7238 = vmatmul.mubr.msk.f32.gmra.mrb[2].mxu1 %vm299_vm0, %v9779_v31  ;;  %8283 = vmatprep.subr.bf16.mxu0 %v9951_v40 }
  0x45   : > { %8417 = vmatpush3.bf16.msra.mxu1 %v8270_v36  ;;  %7240 = vmatprep.mubr.msk.f32.mxu1 %vm299_vm0, %v9793_v42  ;;  %v5716_v36 = vld [vmem:[%s11407_s2 + $0xe0] sm:$0xff] }
  0x46   : > { %7011 = vmatmul.mubr.msk.f32.vlgmr.msra.gmra.mrb[0].mxu0 %vm299_vm0, %v9967_v8  ;;  %8419 = vmatprep.subr.bf16.mxu1 %v9890_v53  ;;  %v10012_v5 = vpack.c.bf16 %v5717_v16, %v5716_v36  ;;  %v1952_v36 = vrot.slane %v9781_v32, 2  ;;  %v10047_v16 = vsel %vm650_vm3, %v669_v62, %v670_v19  ;;  %v1955_v32 = vrot.slane %v9795_v43, 2 }
  0x47   : > { %8285 = vmatpush3.bf16.msra.mxu0 %v9951_v40  ;;  %7013 = vmatprep.mubr.msk.f32.mxu0 %vm299_vm0, %v9976_v21  ;;  %v1957_v62 = vrot.slane %v9811_v55, 2  ;;  %v1958_v19 = vrot.slane %v9813_v58, 2  ;;  %v5730_v58 = vld [vmem:[%s11407_s2 + $0x110] sm:$0xff] }
  0x48   : > { %7241 = vmatmul.mubr.msk.f32.gmra.mrb[4].mxu1 %vm299_vm0, %v9811_v55  ;;  %8287 = vmatprep.subr.bf16.mxu0 %v9978_v22 }
  0x49   : > { %8421 = vmatpush3.bf16.msra.mxu1 %v9890_v53  ;;  %7243 = vmatprep.mubr.msk.f32.mxu1 %vm299_vm0, %v9823_v1  ;;  %v1944_v53 = vsel %vm650_vm3, %v1942_v46, %v1943_v15  ;;  %v10040_v15 = vsel %vm650_vm3, %v1945_v51, %v1946_v38  ;;  %v1951_v46 = vrot.slane %v9779_v31, 2  ;;  %v5729_v38 = vld [vmem:[%s11407_s2 + $0x108] sm:$0xff]  ;;  %v10067_v51 = vsel %vm650_vm3, %v672_v28, %v673_v25 }
  0x4a   : > { %7014 = vmatmul.mubr.msk.f32.gmra.mrb[2].mxu0 %vm299_vm0, %v9997_v54  ;;  %8423 = vmatprep.subr.bf16.mxu1 %v9922_v20  ;;  %v10099_v30 = vsel %vm650_vm3, %v1957_v62, %v1958_v19  ;;  %v1964_v28 = vrot.slane %v9834_v11, 2  ;;  %v8302_v25 = vpack.c.bf16 %v5731_v12, %v5730_v58  ;;  %v5733_v11 = vld [vmem:[%s11407_s2 + $0x128] sm:$0xff]  ;;  %v5747_v62 = vld [vmem:[%s11407_s2 + $0x158] sm:$0xff]  ;;  %v5750_v58 = vld [vmem:[%s11407_s2 + $0x170] sm:$0xff] }
  0x4b   : > { %8289 = vmatpush3.bf16.msra.mxu0 %v9978_v22  ;;  %7016 = vmatprep.mubr.msk.f32.mxu0 %vm299_vm0, %v10010_v34  ;;  %v10073_v43 = vsel %vm650_vm3, %v1951_v46, %v1952_v36  ;;  %v5751_v12 = vld [vmem:[%s11407_s2 + $0x178] sm:$0xff] }
  0x4c   : > { %7244 = vmatmul.mubr.msk.f32.gmra.mrb[6].mxu1 %vm299_vm0, %v9832_v7  ;;  %8291 = vmatprep.subr.bf16.mxu0 %v10012_v5 }
  0x4d   : > { %8425 = vmatpush3.bf16.msra.mxu1 %v9922_v20  ;;  %7262 = vmatprep.mubr.msk.f32.mxu1 %vm299_vm0, %v1944_v53  ;;  %v10053_v20 = vsel %vm650_vm3, %v1948_v27, %v1949_v39  ;;  %v8298_v53 = vpack.c.bf16 %v5729_v38, %v5728_v50  ;;  %v1960_v27 = vrot.slane %v9823_v1, 2  ;;  %v1961_v39 = vrot.slane %v9825_v4, 2  ;;  %v5744_v50 = vld [vmem:[%s11407_s2 + $0x140] sm:$0xff]  ;;  %v5746_v38 = vld [vmem:[%s11407_s2 + $0x150] sm:$0xff] }
  0x4e   : > { %7017 = vmatmul.mubr.msk.f32.gmra.mrb[4].mxu0 %vm299_vm0, %v10032_v3  ;;  %8427 = vmatprep.subr.bf16.mxu1 %v9951_v40  ;;  %v1963_v4 = vrot.slane %v9832_v7, 2  ;;  %v8318_v19 = vpack.c.bf16 %v5747_v62, %v5746_v38  ;;  %v5764_v38 = vld [vmem:[%s11407_s2 + $0x1a0] sm:$0xff]  ;;  %v5765_v62 = vld [vmem:[%s11407_s2 + $0x1a8] sm:$0xff] }
  0x4f   : > { %8293 = vmatpush3.bf16.msra.mxu0 %v10012_v5  ;;  %7019 = vmatprep.mubr.msk.f32.mxu0 %vm299_vm0, %v10047_v16 }
  0x50   : > { %7263 = vmatmul.mubr.msk.f32.vlgmr.msra.gmra.mrb[0].mxu1 %vm299_vm0, %v10040_v15  ;;  %8295 = vmatprep.subr.bf16.mxu0 %v8294_v10  ;;  %v10123_v46 = vsel %vm650_vm3, %v1963_v4, %v1964_v28  ;;  %v939_v4 = vrot.slane %v9892_v60, 1  ;;  %v940_v28 = vrot.slane %v9894_v0, 1 }
  0x51   : > { %8429 = vmatpush3.bf16.msra.mxu1 %v9951_v40  ;;  %7265 = vmatprep.mubr.msk.f32.mxu1 %vm299_vm0, %v10053_v20  ;;  %v10083_v40 = vsel %vm650_vm3, %v1954_v56, %v1955_v32  ;;  %v5734_v56 = vld [vmem:[%s11407_s2 + $0x130] sm:$0xff] }
  0x52   : > { %7020 = vmatmul.mubr.msk.f32.gmra.mrb[6].mxu0 %vm299_vm0, %v10067_v51  ;;  %8431 = vmatprep.subr.bf16.mxu1 %v9978_v22 }
  0x53   : > { %8297 = vmatpush3.bf16.msra.mxu0 %v8294_v10  ;;  %7038 = vmatprep.mubr.msk.f32.mxu0 %vm299_vm0, %v9628_v33  ;;  %v5732_v33 = vld [vmem:[%s11407_s2 + $0x120] sm:$0xff] }
  0x54   : > { %7266 = vmatmul.mubr.msk.f32.gmra.mrb[2].mxu1 %vm299_vm0, %v10073_v43  ;;  %8299 = vmatprep.subr.bf16.mxu0 %v8298_v53  ;;  %v8306_v36 = vpack.c.bf16 %v5733_v11, %v5732_v33  ;;  %v5760_v33 = vld [vmem:[%s11407_s2 + $0x180] sm:$0xff]  ;;  %v5761_v11 = vld [vmem:[%s11407_s2 + $0x188] sm:$0xff] }
  0x55   : > { %8433 = vmatpush3.bf16.msra.mxu1 %v9978_v22  ;;  %7268 = vmatprep.mubr.msk.f32.mxu1 %vm299_vm0, %v10083_v40  ;;  %v10109_v22 = vsel %vm650_vm3, %v1960_v27, %v1961_v39  ;;  %v5749_v27 = vld [vmem:[%s11407_s2 + $0x168] sm:$0xff] }
  0x56   : > { %7039 = vmatmul.mubr.msk.f32.vlgmr.msra.gmra.mrb[0].mxu0 %vm299_vm0, %v9632_v35  ;;  %8435 = vmatprep.subr.bf16.mxu1 %v10012_v5 }
  0x57   : > { %8301 = vmatpush3.bf16.msra.mxu0 %v8298_v53  ;;  %7041 = vmatprep.mubr.msk.f32.mxu0 %vm299_vm0, %v9646_v41 }
  0x58   : > { %7269 = vmatmul.mubr.msk.f32.gmra.mrb[4].mxu1 %vm299_vm0, %v10099_v30  ;;  %8303 = vmatprep.subr.bf16.mxu0 %v8302_v25 }
  0x59   : > { %8437 = vmatpush3.bf16.msra.mxu1 %v10012_v5  ;;  %7271 = vmatprep.mubr.msk.f32.mxu1 %vm299_vm0, %v10109_v22  ;;  %v5735_v5 = vld [vmem:[%s11407_s2 + $0x138] sm:$0xff] }
  0x5a   : > { %7042 = vmatmul.mubr.msk.f32.gmra.mrb[2].mxu0 %vm299_vm0, %v9667_v49  ;;  %8439 = vmatprep.subr.bf16.mxu1 %v8294_v10  ;;  %v8310_v32 = vpack.c.bf16 %v5735_v5, %v5734_v56  ;;  %v10218_v56 = vld [vmem:[#allocation2 + $0x88] sm:$0x3]  ;;  %v5762_v5 = vld [vmem:[%s11407_s2 + $0x190] sm:$0xff] }
  0x5b   : > { %8305 = vmatpush3.bf16.msra.mxu0 %v8302_v25  ;;  %7044 = vmatprep.mubr.msk.f32.mxu0 %vm299_vm0, %v9698_v61 }
  0x5c   : > { %7272 = vmatmul.mubr.msk.f32.gmra.mrb[6].mxu1 %vm299_vm0, %v10123_v46  ;;  %8307 = vmatprep.subr.bf16.mxu0 %v8306_v36 }
  0x5d   : > { %8441 = vmatpush3.bf16.msra.mxu1 %v8294_v10  ;;  %7290 = vmatprep.mubr.msk.f32.mxu1 %vm299_vm0, %v9759_v18  ;;  %v5745_v10 = vld [vmem:[%s11407_s2 + $0x148] sm:$0xff] }
  0x5e   : > { %7045 = vmatmul.mubr.msk.f32.gmra.mrb[4].mxu0 %vm299_vm0, %v9715_v2  ;;  %8443 = vmatprep.subr.bf16.mxu1 %v8298_v53  ;;  %v8314_v18 = vpack.c.bf16 %v5745_v10, %v5744_v50  ;;  %v2229_v10 = vrot.slane %v10218_v56, 1 }
  0x5f   : > { %8309 = vmatpush3.bf16.msra.mxu0 %v8306_v36  ;;  %7047 = vmatprep.mubr.msk.f32.mxu0 %vm299_vm0, %v9732_v9 }
  0x60   : > { %7291 = vmatmul.mubr.msk.f32.vlgmr.msra.gmra.mrb[0].mxu1 %vm299_vm0, %v9768_v24  ;;  %8311 = vmatprep.subr.bf16.mxu0 %v8310_v32 }
  0x61   : > { %8445 = vmatpush3.bf16.msra.mxu1 %v8298_v53  ;;  %7293 = vmatprep.mubr.msk.f32.mxu1 %vm299_vm0, %v9779_v31  ;;  %v5748_v53 = vld [vmem:[%s11407_s2 + $0x160] sm:$0xff] }
  0x62   : > { %7048 = vmatmul.mubr.msk.f32.gmra.mrb[6].mxu0 %vm299_vm0, %v9892_v60  ;;  %8447 = vmatprep.subr.bf16.mxu1 %v8302_v25  ;;  %v8322_v39 = vpack.c.bf16 %v5749_v27, %v5748_v53  ;;  %v5766_v53 = vld [vmem:[%s11407_s2 + $0x1b0] sm:$0xff]  ;;  %v5767_v27 = vld [vmem:[%s11407_s2 + $0x1b8] sm:$0xff] }
  0x63   : > { %8313 = vmatpush3.bf16.msra.mxu0 %v8310_v32  ;;  %7066 = vmatprep.mubr.msk.f32.mxu0 %vm299_vm0, %v9673_v52  ;;  %v10181_v52 = vld [vmem:[#allocation2 + $0x80] sm:$0xff] }
  0x64   : > { %7294 = vmatmul.mubr.msk.f32.gmra.mrb[2].mxu1 %vm299_vm0, %v9793_v42  ;;  %8315 = vmatprep.subr.bf16.mxu0 %v8314_v18  ;;  %v2228_v50 = vrot.slane %v10181_v52, 1 }
  0x65   : > { %8449 = vmatpush3.bf16.msra.mxu1 %v8302_v25  ;;  %7296 = vmatprep.mubr.msk.f32.mxu1 %vm299_vm0, %v9811_v55  ;;  %v8326_v25 = vpack.c.bf16 %v5751_v12, %v5750_v58  ;;  %v1067_v58 = vrot.slane %v9894_v0, 2  ;;  %v8342_v12 = vpack.c.bf16 %v5767_v27, %v5766_v53  ;;  %v5777_v0 = vld [vmem:[%s11407_s2 + $0x1c8] sm:$0xff]  ;;  %v5954_v53 = vld [vmem:[%s11409_s4 + $0xb8] sm:$0xff]  ;;  %v5959_v27 = vld [vmem:[%s11409_s4 + $0xe0] sm:$0xff] }
  0x66   : > { %7067 = vmatmul.mubr.msk.f32.vlgmr.msra.gmra.mrb[0].mxu0 %vm299_vm0, %v9690_v57  ;;  %8451 = vmatprep.subr.bf16.mxu1 %v8306_v36 }
  0x67   : > { %8317 = vmatpush3.bf16.msra.mxu0 %v8314_v18  ;;  %7069 = vmatprep.mubr.msk.f32.mxu0 %vm299_vm0, %v9706_v63 }
  0x68   : > { %7297 = vmatmul.mubr.msk.f32.gmra.mrb[4].mxu1 %vm299_vm0, %v9823_v1  ;;  %8319 = vmatprep.subr.bf16.mxu0 %v8318_v19 }
  0x69   : > { %8453 = vmatpush3.bf16.msra.mxu1 %v8306_v36  ;;  %7299 = vmatprep.mubr.msk.f32.mxu1 %vm299_vm0, %v9832_v7  ;;  %v8330_v36 = vpack.c.bf16 %v5761_v11, %v5760_v33  ;;  %v5779_v33 = vld [vmem:[%s11407_s2 + $0x1d8] sm:$0xff]  ;;  %v2354_v11 = vrot.slane %v10181_v52, 2 }
  0x6a   : > { %7070 = vmatmul.mubr.msk.f32.gmra.mrb[2].mxu0 %vm299_vm0, %v9722_v6  ;;  %8455 = vmatprep.subr.bf16.mxu1 %v8310_v32 }
  0x6b   : > { %8321 = vmatpush3.bf16.msra.mxu0 %v8318_v19  ;;  %7072 = vmatprep.mubr.msk.f32.mxu0 %vm299_vm0, %v9757_v17 }
  0x6c   : > { %7300 = vmatmul.mubr.msk.f32.gmra.mrb[6].mxu1 %vm299_vm0, %v10181_v52  ;;  %8323 = vmatprep.subr.bf16.mxu0 %v8322_v39 }
  0x6d   : > { %8457 = vmatpush3.bf16.msra.mxu1 %v8310_v32  ;;  %7318 = vmatprep.mubr.msk.f32.mxu1 %vm299_vm0, %v9789_v37  ;;  %v10212_v37 = vsel %vm374_vm2, %v939_v4, %v940_v28  ;;  %v5763_v32 = vld [vmem:[%s11407_s2 + $0x198] sm:$0xff]  ;;  %v5776_v4 = vld [vmem:[%s11407_s2 + $0x1c0] sm:$0xff] }
  0x6e   : > { %7073 = vmatmul.mubr.msk.f32.gmra.mrb[4].mxu0 %vm299_vm0, %v9773_v26  ;;  %8459 = vmatprep.subr.bf16.mxu1 %v8314_v18  ;;  %v8346_v28 = vpack.c.bf16 %v5777_v0, %v5776_v4  ;;  %v5962_v4 = vld [vmem:[%s11409_s4 + $0xf8] sm:$0xff] }
  0x6f   : > { %8325 = vmatpush3.bf16.msra.mxu0 %v8322_v39  ;;  %7075 = vmatprep.mubr.msk.f32.mxu0 %vm299_vm0, %v9807_v47 }
  0x70   : > { %7319 = vmatmul.mubr.msk.f32.vlgmr.msra.gmra.mrb[0].mxu1 %vm299_vm0, %v9804_v45  ;;  %8327 = vmatprep.subr.bf16.mxu0 %v8326_v25 }
  0x71   : > { %8461 = vmatpush3.bf16.msra.mxu1 %v8314_v18  ;;  %7321 = vmatprep.mubr.msk.f32.mxu1 %vm299_vm0, %v9819_v59  ;;  %v8334_v18 = vpack.c.bf16 %v5763_v32, %v5762_v5  ;;  %v5780_v32 = vld [vmem:[%s11407_s2 + $0x1e0] sm:$0xff] }
  0x72   : > { %7076 = vmatmul.mubr.msk.f32.gmra.mrb[6].mxu0 %vm299_vm0, %v10212_v37  ;;  %8463 = vmatprep.subr.bf16.mxu1 %v8318_v19 }
  0x73   : > { %8329 = vmatpush3.bf16.msra.mxu0 %v8326_v25  ;;  %7094 = vmatprep.mubr.msk.f32.mxu0 %vm299_vm0, %v9967_v8  ;;  %v10249_v8 = vsel %vm374_vm2, %v2228_v50, %v2229_v10  ;;  %v5781_v50 = vld [vmem:[%s11407_s2 + $0x1e8] sm:$0xff]  ;;  %v5792_v10 = vld [vmem:[%s11407_s2 + $0x200] sm:$0xff] }
  0x74   : > { %7322 = vmatmul.mubr.msk.f32.gmra.mrb[2].mxu1 %vm299_vm0, %v9841_v13  ;;  %8331 = vmatprep.subr.bf16.mxu0 %v8330_v36 }
  0x75   : > { %8465 = vmatpush3.bf16.msra.mxu1 %v8318_v19  ;;  %7324 = vmatprep.mubr.msk.f32.mxu1 %vm299_vm0, %v9859_v23  ;;  %v8338_v19 = vpack.c.bf16 %v5765_v62, %v5764_v38  ;;  %v5947_v38 = vld [vmem:[%s11409_s4 + $0x80] sm:$0xff] }
  0x76   : > { %7095 = vmatmul.mubr.msk.f32.vlgmr.msra.gmra.mrb[0].mxu0 %vm299_vm0, %v9976_v21  ;;  %8467 = vmatprep.subr.bf16.mxu1 %v8322_v39 }
  0x77   : > { %8333 = vmatpush3.bf16.msra.mxu0 %v8330_v36  ;;  %7097 = vmatprep.mubr.msk.f32.mxu0 %vm299_vm0, %v9997_v54 }
  0x78   : > { %7325 = vmatmul.mubr.msk.f32.gmra.mrb[4].mxu1 %vm299_vm0, %v9870_v48  ;;  %8335 = vmatprep.subr.bf16.mxu0 %v8334_v18 }
  0x79   : > { %8469 = vmatpush3.bf16.msra.mxu1 %v8322_v39  ;;  %7327 = vmatprep.mubr.msk.f32.mxu1 %vm299_vm0, %v9885_v44  ;;  %v1066_v39 = vrot.slane %v9892_v60, 2 }
  0x7a   : > { %7098 = vmatmul.mubr.msk.f32.gmra.mrb[2].mxu0 %vm299_vm0, %v10010_v34  ;;  %8471 = vmatprep.subr.bf16.mxu1 %v8326_v25 }
  0x7b   : > { %8337 = vmatpush3.bf16.msra.mxu0 %v8334_v18  ;;  %7100 = vmatprep.mubr.msk.f32.mxu0 %vm299_vm0, %v10032_v3 }
  0x7c   : > { %7328 = vmatmul.mubr.msk.f32.gmra.mrb[6].mxu1 %vm299_vm0, %v10249_v8  ;;  %8339 = vmatprep.subr.bf16.mxu0 %v8338_v19 }
  0x7d   : > { %8473 = vmatpush3.bf16.msra.mxu1 %v8326_v25  ;;  %7346 = vmatprep.mubr.msk.f32.mxu1 %vm299_vm0, %v10040_v15  ;;  %v10280_v15 = vsel %vm650_vm3, %v1066_v39, %v1067_v58  ;;  %v5778_v25 = vld [vmem:[%s11407_s2 + $0x1d0] sm:$0xff]  ;;  %v5960_v39 = vld [vmem:[%s11409_s4 + $0xe8] sm:$0xff] }
  0x7e   : > { %7101 = vmatmul.mubr.msk.f32.gmra.mrb[4].mxu0 %vm299_vm0, %v10047_v16  ;;  %8475 = vmatprep.subr.bf16.mxu1 %v8330_v36  ;;  %v8350_v5 = vpack.c.bf16 %v5779_v33, %v5778_v25  ;;  %v8546_v58 = vpack.c.bf16 %v5960_v39, %v5959_v27 }
  0x7f   : > { %8341 = vmatpush3.bf16.msra.mxu0 %v8338_v19  ;;  %7103 = vmatprep.mubr.msk.f32.mxu0 %vm299_vm0, %v10067_v51 }
  0x80   : > { %7347 = vmatmul.mubr.msk.f32.vlgmr.msra.gmra.mrb[0].mxu1 %vm299_vm0, %v10053_v20  ;;  %8343 = vmatprep.subr.bf16.mxu0 %v8342_v12 }
  0x81   : > { %8477 = vmatpush3.bf16.msra.mxu1 %v8330_v36  ;;  %7349 = vmatprep.mubr.msk.f32.mxu1 %vm299_vm0, %v10073_v43  ;;  %v2355_v36 = vrot.slane %v10218_v56, 2  ;;  %v5782_v56 = vld [vmem:[%s11407_s2 + $0x1f0] sm:$0xff] }
  0x82   : > { %7104 = vmatmul.mubr.msk.f32.gmra.mrb[6].mxu0 %vm299_vm0, %v10280_v15  ;;  %8479 = vmatprep.subr.bf16.mxu1 %v8334_v18 }
  0x83   : > { %8345 = vmatpush3.bf16.msra.mxu0 %v8342_v12  ;;  %7122 = vmatprep.mubr.msk.f32.mxu0 %vm299_vm0, %v9632_v35  ;;  %v10315_v35 = vsel %vm650_vm3, %v2354_v11, %v2355_v36  ;;  %v2963_v11 = vld [vmem:[%s11409_s4] sm:$0xff]  ;;  %v2964_v36 = vld [vmem:[%s11409_s4 + $0x8] sm:$0xff] }
  0x84   : > { %7350 = vmatmul.mubr.msk.f32.gmra.mrb[2].mxu1 %vm299_vm0, %v10083_v40  ;;  %8347 = vmatprep.subr.bf16.mxu0 %v8346_v28 }
  0x85   : > { %8481 = vmatpush3.bf16.msra.mxu1 %v8334_v18  ;;  %7352 = vmatprep.mubr.msk.f32.mxu1 %vm299_vm0, %v10099_v30  ;;  %v5793_v18 = vld [vmem:[%s11407_s2 + $0x208] sm:$0xff] }
  0x86   : > { %7123 = vmatmul.mubr.msk.f32.vlgmr.msra.gmra.mrb[0].mxu0 %vm299_vm0, %v9646_v41  ;;  %8483 = vmatprep.subr.bf16.mxu1 %v8338_v19  ;;  %v8354_v41 = vpack.c.bf16 %v5781_v50, %v5780_v32 }
  0x87   : > { %8349 = vmatpush3.bf16.msra.mxu0 %v8346_v28  ;;  %7125 = vmatprep.mubr.msk.f32.mxu0 %vm299_vm0, %v9667_v49  ;;  %v5783_v49 = vld [vmem:[%s11407_s2 + $0x1f8] sm:$0xff] }
  0x88   : > { %7353 = vmatmul.mubr.msk.f32.gmra.mrb[4].mxu1 %vm299_vm0, %v10109_v22  ;;  %8351 = vmatprep.subr.bf16.mxu0 %v8350_v5 }
  0x89   : > { %8485 = vmatpush3.bf16.msra.mxu1 %v8338_v19  ;;  %7355 = vmatprep.mubr.msk.f32.mxu1 %vm299_vm0, %v10123_v46  ;;  %v1447_v19 = vrot.slane %v9935_v29, 2 }
  0x8a   : > { %7126 = vmatmul.mubr.msk.f32.gmra.mrb[2].mxu0 %vm299_vm0, %v9698_v61  ;;  %8487 = vmatprep.subr.bf16.mxu1 %v8342_v12  ;;  %v8358_v61 = vpack.c.bf16 %v5783_v49, %v5782_v56  ;;  %v10522_v56 = vld [vmem:[%s11408_s3] ss:$0 sm:$0xff] }
  0x8b   : > { %8353 = vmatpush3.bf16.msra.mxu0 %v8350_v5  ;;  %7128 = vmatprep.mubr.msk.f32.mxu0 %vm299_vm0, %v9715_v2  ;;  %v8362_v2 = vpack.c.bf16 %v5793_v18, %v5792_v10 }
  0x8c   : > { %7356 = vmatmul.mubr.msk.f32.gmra.mrb[6].mxu1 %vm299_vm0, %v10315_v35  ;;  %8355 = vmatprep.subr.bf16.mxu0 %v8354_v41 }
  0x8d   : > { %8489 = vmatpush3.bf16.msra.mxu1 %v8342_v12  ;;  %7374 = vmatprep.mubr.msk.f32.mxu1 %vm299_vm0, %v9768_v24  ;;  %v5795_v24 = vld [vmem:[%s11407_s2 + $0x218] sm:$0xff]  ;;  %v5961_v12 = vld [vmem:[%s11409_s4 + $0xf0] sm:$0xff] }
  0x8e   : > { %7129 = vmatmul.mubr.msk.f32.gmra.mrb[4].mxu0 %vm299_vm0, %v9732_v9  ;;  %8491 = vmatprep.subr.bf16.mxu1 %v8346_v28  ;;  %v5794_v9 = vld [vmem:[%s11407_s2 + $0x210] sm:$0xff]  ;;  %v8550_v0 = vpack.c.bf16 %v5962_v4, %v5961_v12 }
  0x8f   : > { %8357 = vmatpush3.bf16.msra.mxu0 %v8354_v41  ;;  %7131 = vmatprep.mubr.msk.f32.mxu0 %vm299_vm0, %v9892_v60  ;;  %v1320_v60 = vrot.slane %v9935_v29, 1 }
  0x90   : > { %7375 = vmatmul.mubr.msk.f32.vlgmr.msra.gmra.mrb[0].mxu1 %vm299_vm0, %v9779_v31  ;;  %8359 = vmatprep.subr.bf16.mxu0 %v8358_v61  ;;  %v8366_v31 = vpack.c.bf16 %v5795_v24, %v5794_v9 }
  0x91   : > { %8493 = vmatpush3.bf16.msra.mxu1 %v8346_v28  ;;  %7377 = vmatprep.mubr.msk.f32.mxu1 %vm299_vm0, %v9793_v42  ;;  %v5796_v42 = vld [vmem:[%s11407_s2 + $0x220] sm:$0xff]  ;;  %v10499_v28 = vld [vmem:[#allocation3 + $0x10] sm:$0xff] }
  0x92   : > { %7132 = vmatmul.mubr.msk.f32.gmra.mrb[6].mxu0 %vm299_vm0, %v9912_v14  ;;  %8495 = vmatprep.subr.bf16.mxu1 %v8350_v5  ;;  %v2995_v25 = vrot.slane %v10499_v28, 1 }
  0x93   : > { %8361 = vmatpush3.bf16.msra.mxu0 %v8358_v61  ;;  %7150 = vmatprep.mubr.msk.f32.mxu0 %vm299_vm0, %v9690_v57  ;;  %v10373_v57 = vld [vmem:[#allocation2 + $0x90] sm:$0xff] }
  0x94   : > { %7378 = vmatmul.mubr.msk.f32.gmra.mrb[2].mxu1 %vm299_vm0, %v9811_v55  ;;  %8363 = vmatprep.subr.bf16.mxu0 %v8362_v2  ;;  %v5797_v55 = vld [vmem:[%s11407_s2 + $0x228] sm:$0xff] }
  0x95   : > { %8497 = vmatpush3.bf16.msra.mxu1 %v8350_v5  ;;  %7380 = vmatprep.mubr.msk.f32.mxu1 %vm299_vm0, %v9823_v1  ;;  %v5798_v1 = vld [vmem:[%s11407_s2 + $0x230] sm:$0xff]  ;;  %v10510_v5 = vpack.c.bf16 %v2964_v36, %v2963_v11 }
  0x96   : > { %7151 = vmatmul.mubr.msk.f32.vlgmr.msra.gmra.mrb[0].mxu0 %vm299_vm0, %v9706_v63  ;;  %8499 = vmatprep.subr.bf16.mxu1 %v8354_v41  ;;  %v8370_v63 = vpack.c.bf16 %v5797_v55, %v5796_v42 }
  0x97   : > { %8365 = vmatpush3.bf16.msra.mxu0 %v8362_v2  ;;  %7153 = vmatprep.mubr.msk.f32.mxu0 %vm299_vm0, %v9722_v6  ;;  %v1319_v6 = vrot.slane %v9912_v14, 1 }
  0x98   : > { %7381 = vmatmul.mubr.msk.f32.gmra.mrb[4].mxu1 %vm299_vm0, %v9832_v7  ;;  %8367 = vmatprep.subr.bf16.mxu0 %v8366_v31  ;;  %v5799_v7 = vld [vmem:[%s11407_s2 + $0x238] sm:$0xff] }
  0x99   : > { %8501 = vmatpush3.bf16.msra.mxu1 %v8354_v41  ;;  %7383 = vmatprep.mubr.msk.f32.mxu1 %vm299_vm0, %v10181_v52  ;;  %v1321_v52 = vsel %vm374_vm2, %v1319_v6, %v1320_v60  ;;  %v2966_v6 = vld [vmem:[%s11409_s4 + $0x18] sm:$0xff]  ;;  %v2967_v60 = vld [vmem:[%s11409_s4 + $0x20] sm:$0xff] }
  0x9a   : > { %7154 = vmatmul.mubr.msk.f32.gmra.mrb[2].mxu0 %vm299_vm0, %v9757_v17  ;;  %8503 = vmatprep.subr.bf16.mxu1 %v8358_v61  ;;  %v8374_v17 = vpack.c.bf16 %v5799_v7, %v5798_v1 }
  0x9b   : > { %8369 = vmatpush3.bf16.msra.mxu0 %v8366_v31  ;;  %7156 = vmatprep.mubr.msk.f32.mxu0 %vm299_vm0, %v9773_v26  ;;  %v5948_v26 = vld [vmem:[%s11409_s4 + $0x88] sm:$0xff] }
  0x9c   : > { %7384 = vmatmul.mubr.msk.f32.gmra.mrb[6].mxu1 %vm299_vm0, %v10373_v57  ;;  %8371 = vmatprep.subr.bf16.mxu0 %v8370_v63 }
  0x9d   : > { %8505 = vmatpush3.bf16.msra.mxu1 %v8358_v61  ;;  %7402 = vmatprep.mubr.msk.f32.mxu1 %vm299_vm0, %v9804_v45  ;;  %v1643_v45 = vld [vmem:[#allocation2 + $0x98] sm:$0x3] }
  0x9e   : > { %7157 = vmatmul.mubr.msk.f32.gmra.mrb[4].mxu0 %vm299_vm0, %v9807_v47  ;;  %8507 = vmatprep.subr.bf16.mxu1 %v8362_v2  ;;  %v8522_v47 = vpack.c.bf16 %v5948_v26, %v5947_v38  ;;  %v2606_v62 = vrot.slane %v1643_v45, 1 }
  0x9f   : > { %8373 = vmatpush3.bf16.msra.mxu0 %v8370_v63  ;;  %7159 = vmatprep.mubr.msk.f32.mxu0 %vm299_vm0, %v10212_v37  ;;  %v5950_v37 = vld [vmem:[%s11409_s4 + $0x98] sm:$0xff] }
  0xa0   : > { %7403 = vmatmul.mubr.msk.f32.vlgmr.msra.gmra.mrb[0].mxu1 %vm299_vm0, %v9819_v59  ;;  %8375 = vmatprep.subr.bf16.mxu0 %v8374_v17  ;;  %v5949_v59 = vld [vmem:[%s11409_s4 + $0x90] sm:$0xff] }
  0xa1   : > { %8509 = vmatpush3.bf16.msra.mxu1 %v8362_v2  ;;  %7405 = vmatprep.mubr.msk.f32.mxu1 %vm299_vm0, %v9841_v13  ;;  %v2605_v13 = vrot.slane %v10373_v57, 1 }
  0xa2   : > { %7160 = vmatmul.mubr.msk.f32.gmra.mrb[6].mxu0 %vm299_vm0, %v1321_v52  ;;  %8511 = vmatprep.subr.bf16.mxu1 %v8366_v31 }
  0xa3   : > { %8377 = vmatpush3.bf16.msra.mxu0 %v8374_v17  ;;  %7178 = vmatprep.mubr.msk.f32.mxu0 %vm299_vm0, %v9976_v21  ;;  %v5951_v21 = vld [vmem:[%s11409_s4 + $0xa0] sm:$0xff] }
  0xa4   : > { %7406 = vmatmul.mubr.msk.f32.gmra.mrb[2].mxu1 %vm299_vm0, %v9859_v23  ;;  %8523 = vmatprep.subr.bf16.mxu0 %v8522_v47  ;;  %v8526_v23 = vpack.c.bf16 %v5950_v37, %v5949_v59 }
  0xa5   : > { %8513 = vmatpush3.bf16.msra.mxu1 %v8366_v31  ;;  %7408 = vmatprep.mubr.msk.f32.mxu1 %vm299_vm0, %v9870_v48  ;;  %v5952_v48 = vld [vmem:[%s11409_s4 + $0xa8] sm:$0xff] }
  0xa6   : > { %8515 = vmatprep.subr.bf16.mxu1 %v8370_v63  ;;  %7179 = vmatmul.mubr.msk.f32.vlgmr.msra.gmra.mrb[0].mxu0 %vm299_vm0, %v9997_v54  ;;  %v2607_v54 = vsel %vm374_vm2, %v2605_v13, %v2606_v62  ;;  %v2971_v62 = vld [vmem:[%s11409_s4 + $0x40] sm:$0xff] }
  0xa7   : > { %7181 = vmatprep.mubr.msk.f32.mxu0 %vm299_vm0, %v10010_v34  ;;  %8525 = vmatpush3.bf16.msra.mxu0 %v8522_v47  ;;  %v1446_v34 = vrot.slane %v9912_v14, 2 }
  0xa8   : > { %7409 = vmatmul.mubr.msk.f32.gmra.mrb[4].mxu1 %vm299_vm0, %v9885_v44  ;;  %8527 = vmatprep.subr.bf16.mxu0 %v8526_v23  ;;  %v8530_v44 = vpack.c.bf16 %v5952_v48, %v5951_v21 }
  0xa9   : > { %8517 = vmatpush3.bf16.msra.mxu1 %v8370_v63  ;;  %7411 = vmatprep.mubr.msk.f32.mxu1 %vm299_vm0, %v10249_v8  ;;  %v5953_v8 = vld [vmem:[%s11409_s4 + $0xb0] sm:$0xff]  ;;  %v1448_v29 = vsel %vm650_vm3, %v1446_v34, %v1447_v19 }
  0xaa   : > { %8519 = vmatprep.subr.bf16.mxu1 %v8374_v17  ;;  %7182 = vmatmul.mubr.msk.f32.gmra.mrb[2].mxu0 %vm299_vm0, %v10032_v3  ;;  %v8534_v14 = vpack.c.bf16 %v5954_v53, %v5953_v8  ;;  %v2731_v3 = vrot.slane %v10373_v57, 2  ;;  %v2965_v63 = vld [vmem:[%s11409_s4 + $0x10] sm:$0xff] }
  0xab   : > { %7184 = vmatprep.mubr.msk.f32.mxu0 %vm299_vm0, %v10047_v16  ;;  %8529 = vmatpush3.bf16.msra.mxu0 %v8526_v23  ;;  %v2732_v16 = vrot.slane %v1643_v45, 2  ;;  %v2969_v45 = vld [vmem:[%s11409_s4 + $0x30] sm:$0xff] }
  0xac   : > { %7412 = vmatmul.mubr.msk.f32.gmra.mrb[6].mxu1 %vm299_vm0, %v2607_v54  ;;  %8531 = vmatprep.subr.bf16.mxu0 %v8530_v44  ;;  %v10564_v54 = vpack.c.bf16 %v2966_v6, %v2965_v63 }
  0xad   : > { %8521 = vmatpush3.bf16.msra.mxu1 %v8374_v17  ;;  %7430 = vmatprep.mubr.msk.f32.mxu1 %vm299_vm0, %v10053_v20  ;;  %v2733_v20 = vsel %vm650_vm3, %v2731_v3, %v2732_v16  ;;  %v2968_v17 = vld [vmem:[%s11409_s4 + $0x28] sm:$0xff] }
  0xae   : > { %8811 = vmatprep.subr.bf16.mxu1 %v8522_v47  ;;  %7185 = vmatmul.mubr.msk.f32.gmra.mrb[4].mxu0 %vm299_vm0, %v10067_v51  ;;  %v5955_v51 = vld [vmem:[%s11409_s4 + $0xc0] sm:$0xff] }
  0xaf   : > { %7187 = vmatprep.mubr.msk.f32.mxu0 %vm299_vm0, %v10280_v15  ;;  %8533 = vmatpush3.bf16.msra.mxu0 %v8530_v44  ;;  %v10497_v15 = vld [vmem:[#allocation3 + $0x8] sm:$0x3] }
  0xb0   : > { %7431 = vmatmul.mubr.msk.f32.vlgmr.msra.gmra.mrb[0].mxu1 %vm299_vm0, %v10073_v43  ;;  %8535 = vmatprep.subr.bf16.mxu0 %v8534_v14  ;;  %v5956_v43 = vld [vmem:[%s11409_s4 + $0xc8] sm:$0xff]  ;;  %v2996_v33 = vrot.slane %v10497_v15, 1  ;;  %4240 = vst [vmem:[#allocation3 + $0x8] sm:$0x3] %v10499_v28 }
  0xb1   : > { %7433 = vmatprep.mubr.msk.f32.mxu1 %vm299_vm0, %v10083_v40  ;;  %8813 = vmatpush3.bf16.msra.mxu1 %v8522_v47  ;;  %v8538_v40 = vpack.c.bf16 %v5956_v43, %v5955_v51  ;;  %v2970_v47 = vld [vmem:[%s11409_s4 + $0x38] sm:$0xff] }
  0xb2   : > { %8815 = vmatprep.subr.bf16.mxu1 %v8526_v23  ;;  %7188 = vmatmul.mubr.msk.f32.gmra.mrb[6].mxu0 %vm299_vm0, %v1448_v29  ;;  %v2997_v32 = vsel %vm374_vm2, %v2995_v25, %v2996_v33  ;;  %v10573_v3 = vpack.c.bf16 %v2970_v47, %v2969_v45 }
  0xb3   : > { %8537 = vmatpush3.bf16.msra.mxu0 %v8534_v14  ;;  %7474 = vmatprep.mubr.f32.mxu0 %v2997_v32 }
  0xb4   : > { %7434 = vmatmul.mubr.msk.f32.gmra.mrb[2].mxu1 %vm299_vm0, %v10099_v30  ;;  %8539 = vmatprep.subr.bf16.mxu0 %v8538_v40  ;;  %v5957_v30 = vld [vmem:[%s11409_s4 + $0xd0] sm:$0xff] }
  0xb5   : > { %7436 = vmatprep.mubr.msk.f32.mxu1 %vm299_vm0, %v10109_v22  ;;  %8817 = vmatpush3.bf16.msra.mxu1 %v8526_v23  ;;  %v5958_v22 = vld [vmem:[%s11409_s4 + $0xd8] sm:$0xff]  ;;  %v2972_v23 = vld [vmem:[%s11409_s4 + $0x48] sm:$0xff] }
  0xb6   : > { %8819 = vmatprep.subr.bf16.mxu1 %v8530_v44 }
  0xb7   : > { %8541 = vmatpush3.bf16.msra.mxu0 %v8538_v40  ;;  %v10515_v50 = vld [vmem:[#allocation3 + $0x8] sm:$0x3] }
  0xb8   : > { %7437 = vmatmul.mubr.msk.f32.gmra.mrb[4].mxu1 %vm299_vm0, %v10123_v46  ;;  %v8542_v46 = vpack.c.bf16 %v5958_v22, %v5957_v30 }
  0xb9   : > { %7439 = vmatprep.mubr.msk.f32.mxu1 %vm299_vm0, %v10315_v35  ;;  %8821 = vmatpush3.bf16.msra.mxu1 %v8530_v44  ;;  %v4320_v35 = vrot.slane %v10515_v50, 1  ;;  %v10566_v44 = vpack.c.bf16 %v2968_v17, %v2967_v60 }
  0xba   : > { %8823 = vmatprep.subr.bf16.mxu1 %v8534_v14  ;;  %8543 = vmatprep.subr.bf16.mxu0 %v8542_v46 }
  0xbb   : > { %8545 = vmatpush3.bf16.msra.mxu0 %v8542_v46  ;;  %v4321_v41 = vsel %vm374_vm2, %v2995_v25, %v4320_v35 }
  0xbc   : > { %7440 = vmatmul.mubr.msk.f32.gmra.mrb[6].mxu1 %vm299_vm0, %v2733_v20  ;;  %8547 = vmatprep.subr.bf16.mxu0 %v8546_v58 }
  0xbd   : > { %8825 = vmatpush3.bf16.msra.mxu1 %v8534_v14  ;;  %7870 = vmatprep.mubr.f32.mxu1 %v4321_v41 }
  0xbe   : > { %8827 = vmatprep.subr.bf16.mxu1 %v8538_v40 }
  0xbf   : > { %8549 = vmatpush3.bf16.msra.mxu0 %v8546_v58 }
  0xc0   : > { %8551 = vmatprep.subr.bf16.mxu0 %v8550_v0 }
  0xc1   : > { %8829 = vmatpush3.bf16.msra.mxu1 %v8538_v40 }
  0xc2   : > { %8831 = vmatprep.subr.bf16.mxu1 %v8542_v46 }
  0xc3   : > { %8553 = vmatpush3.bf16.msra.mxu0 %v8550_v0 }
  0xc4   : > { %8555 = vmatprep.subr.bf16.mxu0 %v10510_v5 }
  0xc5   : > { %8833 = vmatpush3.bf16.msra.mxu1 %v8542_v46  ;;  %v10584_v46 = vpack.c.bf16 %v2972_v23, %v2971_v62 }
  0xc6   : > { %8835 = vmatprep.subr.bf16.mxu1 %v8546_v58 }
  0xc9   : > { %8837 = vmatpush3.bf16.msra.mxu1 %v8546_v58 }
  0xca   : > { %8839 = vmatprep.subr.bf16.mxu1 %v8550_v0 }
  0xcd   : > { %8841 = vmatpush3.bf16.msra.mxu1 %v8550_v0 }
  0xce   : > { %8843 = vmatprep.subr.bf16.mxu1 %v10510_v5 }
 0x179   : > { %v7180_v49 = vpop.f32.mrb[0].mxu0 }
 0x17a   : > { %v1581_v61 = vadd.f32 %v7180_v49, %v10522_v56  ;;  %v1526_v10 = vpop.f32.mrb[1].mxu0 }
 0x17b   : > { %v1580_v18 = vadd.f32 %v10522_v56, %v1526_v10 }
 0x17c   : > { %v2907_v2 = vmax.f32 %v1581_v61, 0.0 }
 0x17d   : > { %v2906_v9 = vmax.f32 %v1580_v18, 0.0  ;;  %v7183_v24 = vpop.f32.mrb[2].mxu0 }
 0x17e   : > { %2936 = vst [vmem:[#allocation3 + $0x21] sm:$0xff] %v2907_v2  ;;  %v1583_v31 = vadd.f32 %v7183_v24, %v10522_v56  ;;  %v1536_v42 = vpop.f32.mrb[3].mxu0 }
 0x17f   : > { %2935 = vst [vmem:[#allocation3 + $0x11] sm:$0xff] %v2906_v9  ;;  %v10528_v55 = vadd.f32 %v10522_v56, %v1536_v42 }
 0x180   : > { %v2909_v57 = vmax.f32 %v1583_v31, 0.0 }
 0x181   : > { %v2908_v1 = vmax.f32 %v10528_v55, 0.0  ;;  %v7186_v7 = vpop.f32.mrb[4].mxu0 }
 0x182   : > { %2938 = vst [vmem:[#allocation3 + $0x41] sm:$0xff] %v2909_v57  ;;  %v10544_v52 = vadd.f32 %v7186_v7, %v10522_v56  ;;  %v1546_v26 = vpop.f32.mrb[5].mxu0 }
 0x183   : > { %v7432_v38 = vpop.f32.mrb[0].mxu1  ;;  %2937 = vst [vmem:[#allocation3 + $0x31] sm:$0xff] %v2908_v1  ;;  %v10554_v37 = vadd.f32 %v10522_v56, %v1546_v26 }
 0x184   : > { %v2865_v59 = vadd.f32 %v7432_v38, %v10522_v56  ;;  %v2810_v13 = vpop.f32.mrb[1].mxu1  ;;  %v2911_v21 = vmax.f32 %v10544_v52, 0.0 }
 0x185   : > { %v2864_v48 = vadd.f32 %v10522_v56, %v2810_v13  ;;  %v10568_v34 = vld [vmem:[#allocation3 + $0x20] sm:$0xff]  ;;  %v2910_v53 = vmax.f32 %v10554_v37, 0.0  ;;  %v7189_v14 = vpop.f32.mrb[6].mxu0  ;;  %v10571_v29 = vld [vmem:[#allocation3 + $0x28] sm:$0x3] }
 0x186   : > { %v2873_v19 = vsub.f32 %v1581_v61, %v2865_v59  ;;  %v4232_v8 = vmax.f32 %v2865_v59, 0.0  ;;  %4243 = vst [vmem:[#allocation3 + $0x20] sm:$0xff] %v10499_v28  ;;  %v10576_v16 = vld [vmem:[#allocation3 + $0x10] sm:$0xff]  ;;  %v10578_v20 = vld [vmem:[#allocation3 + $0x18] sm:$0x3]  ;;  %2940 = vst [vmem:[#allocation3 + $0x61] sm:$0xff] %v2911_v21  ;;  %v10581_v40 = vadd.f32 %v7189_v14, %v10522_v56 }
 0x187   : > { %v2872_v51 = vsub.f32 %v1580_v18, %v2864_v48  ;;  %v4231_v43 = vmax.f32 %v2864_v48, 0.0  ;;  %v7435_v30 = vpop.f32.mrb[2].mxu1  ;;  %v1556_v22 = vpop.f32.mrb[7].mxu0  ;;  %4244 = vst [vmem:[#allocation3 + $0x28] sm:$0x3] %v10499_v28  ;;  %4241 = vst [vmem:[#allocation3 + $0x10] sm:$0xff] %v10499_v28 }
 0x188   : > { %4242 = vst [vmem:[#allocation3 + $0x18] sm:$0x3] %v10499_v28  ;;  %v2881_v27 = vmul.f32 %v2873_v19, %v2873_v19  ;;  %2939 = vst [vmem:[#allocation3 + $0x51] sm:$0xff] %v2910_v53  ;;  %v2867_v39 = vadd.f32 %v7435_v30, %v10522_v56  ;;  %v10590_v58 = vadd.f32 %v10522_v56, %v1556_v22  ;;  %v2820_v12 = vpop.f32.mrb[3].mxu1  ;;  %v2998_v4 = vrot.slane %v10576_v16, 1 }
 0x189   : > { %4260 = vst [vmem:[#allocation3 + $0x21] sm:$0xff] %v4232_v8  ;;  %v2880_v0 = vmul.f32 %v2872_v51, %v2872_v51  ;;  %4259 = vst [vmem:[#allocation3 + $0x11] sm:$0xff] %v4231_v43  ;;  %v2913_v25 = vmax.f32 %v10581_v40, 0.0  ;;  %v2866_v33 = vadd.f32 %v10522_v56, %v2820_v12  ;;  %v2999_v11 = vrot.slane %v10578_v20, 1  ;;  %v10596_v36 = vld [vmem:[#allocation3 + $0x40] sm:$0xff] }
 0x18a   : > { %v2875_v32 = vsub.f32 %v1583_v31, %v2867_v39  ;;  %v4234_v35 = vmax.f32 %v2867_v39, 0.0  ;;  %v2912_v41 = vmax.f32 %v10590_v58, 0.0  ;;  %v3001_v49 = vrot.slane %v10568_v34, 1  ;;  %v10600_v61 = vld [vmem:[#allocation3 + $0x48] sm:$0x3]  ;;  %4247 = vst [vmem:[#allocation3 + $0x40] sm:$0xff] %v10499_v28 }
 0x18b   : > { %v10603_v10 = vld [vmem:[#allocation3 + $0x30] sm:$0xff]  ;;  %v2888_v18 = vadd.f32 %v2881_v27, %v2880_v0  ;;  %2942 = vst [vmem:[#allocation3 + $0x81] sm:$0xff] %v2913_v25  ;;  %v2874_v2 = vsub.f32 %v10528_v55, %v2866_v33  ;;  %v4233_v9 = vmax.f32 %v2866_v33, 0.0  ;;  %v7438_v24 = vpop.f32.mrb[4].mxu1  ;;  %v10607_v42 = vsel %vm374_vm2, %v2998_v4, %v2999_v11  ;;  %v10609_v31 = vld [vmem:[#allocation3 + $0x38] sm:$0x3] }
 0x18c   : > { %4248 = vst [vmem:[#allocation3 + $0x48] sm:$0x3] %v10499_v28  ;;  %4245 = vst [vmem:[#allocation3 + $0x30] sm:$0xff] %v10499_v28  ;;  %v2883_v57 = vmul.f32 %v2875_v32, %v2875_v32  ;;  %v2869_v63 = vadd.f32 %v7438_v24, %v10522_v56  ;;  %v2830_v1 = vpop.f32.mrb[5].mxu1  ;;  %7475 = vmatmul.mubr.f32.vlgmr.msra.gmra.mrb[8].mxu0 %v10607_v42  ;;  %v3002_v55 = vrot.slane %v10571_v29, 1  ;;  %v3004_v7 = vrot.slane %v10603_v10, 1 }
 0x18d   : > { %2941 = vst [vmem:[#allocation3 + $0x71] sm:$0xff] %v2912_v41  ;;  %4246 = vst [vmem:[#allocation3 + $0x38] sm:$0x3] %v10499_v28  ;;  %v2882_v6 = vmul.f32 %v2874_v2, %v2874_v2  ;;  %v2868_v60 = vadd.f32 %v10522_v56, %v2830_v1  ;;  %8557 = vmatpush3.bf16.msra.mxu0 %v10510_v5  ;;  %v3005_v17 = vrot.slane %v10609_v31, 1  ;;  %v3007_v38 = vrot.slane %v10596_v36, 1  ;;  %v10622_v26 = vld [vmem:[#allocation3 + $0x60] sm:$0xff] }
 0x18e   : > { %4262 = vst [vmem:[#allocation3 + $0x41] sm:$0xff] %v4234_v35  ;;  %4261 = vst [vmem:[#allocation3 + $0x31] sm:$0xff] %v4233_v9  ;;  %v2877_v45 = vsub.f32 %v10544_v52, %v2869_v63  ;;  %v4236_v47 = vmax.f32 %v2869_v63, 0.0  ;;  %v10626_v59 = vsel %vm374_vm2, %v3001_v49, %v3002_v55  ;;  %8559 = vmatprep.subr.bf16.mxu0 %v10564_v54  ;;  %v3008_v13 = vrot.slane %v10600_v61, 1  ;;  %v10630_v62 = vld [vmem:[#allocation3 + $0x68] sm:$0x3] }
 0x18f   : > { %4251 = vst [vmem:[#allocation3 + $0x60] sm:$0xff] %v10499_v28  ;;  %v10633_v23 = vld [vmem:[#allocation3 + $0x50] sm:$0xff]  ;;  %v2889_v21 = vadd.f32 %v2888_v18, %v2882_v6  ;;  %v2876_v48 = vsub.f32 %v10554_v37, %v2868_v60  ;;  %v4235_v19 = vmax.f32 %v2868_v60, 0.0  ;;  %7477 = vmatprep.mubr.f32.mxu0 %v10626_v59  ;;  %v7441_v52 = vpop.f32.mrb[6].mxu1  ;;  %v10638_v8 = vsel %vm374_vm2, %v3004_v7, %v3005_v17  ;;  %v10640_v53 = vld [vmem:[#allocation3 + $0x58] sm:$0x3] }
 0x190   : > { %4252 = vst [vmem:[#allocation3 + $0x68] sm:$0x3] %v10499_v28  ;;  %4249 = vst [vmem:[#allocation3 + $0x50] sm:$0xff] %v10499_v28  ;;  %v2885_v14 = vmul.f32 %v2877_v45, %v2877_v45  ;;  %v10645_v51 = vadd.f32 %v7441_v52, %v10522_v56  ;;  %v2840_v43 = vpop.f32.mrb[7].mxu1  ;;  %7478 = vmatmul.mubr.f32.gmra.mrb[10].mxu0 %v10638_v8  ;;  %v10649_v37 = vsel %vm374_vm2, %v3007_v38, %v3008_v13  ;;  %v10653_v22 = vld [vmem:[#allocation3 + $0x10] sm:$0xff]  ;;  %v10661_v25 = vld [vmem:[#allocation3 + $0x20] sm:$0xff] }
 0x191   : > { %v3010_v30 = vrot.slane %v10633_v23, 1  ;;  %4250 = vst [vmem:[#allocation3 + $0x58] sm:$0x3] %v10499_v28  ;;  %4264 = vst [vmem:[#allocation3 + $0x61] sm:$0xff] %v4236_v47  ;;  %v2884_v27 = vmul.f32 %v2876_v48, %v2876_v48  ;;  %v2890_v39 = vadd.f32 %v2889_v21, %v2883_v57  ;;  %v2870_v12 = vadd.f32 %v10522_v56, %v2840_v43  ;;  %v10659_v0 = vld [vmem:[#allocation3 + $0x18] sm:$0x3] }
 0x192   : > { %8561 = vmatpush3.bf16.msra.mxu0 %v10564_v54  ;;  %7480 = vmatprep.mubr.f32.mxu0 %v10649_v37  ;;  %v3011_v4 = vrot.slane %v10640_v53, 1  ;;  %4263 = vst [vmem:[#allocation3 + $0x51] sm:$0xff] %v4235_v19  ;;  %v10663_v33 = vld [vmem:[#allocation3 + $0x28] sm:$0x3]  ;;  %v4238_v32 = vmax.f32 %v10645_v51, 0.0  ;;  %v3013_v56 = vrot.slane %v10622_v26, 1 }
 0x193   : > { %v10665_v11 = vld [vmem:[#allocation3 + $0x88] sm:$0x3]  ;;  %8563 = vmatprep.subr.bf16.mxu0 %v10566_v44  ;;  %v3014_v35 = vrot.slane %v10630_v62, 1  ;;  %v4322_v41 = vrot.slane %v10653_v22, 1  ;;  %v2891_v18 = vadd.f32 %v2890_v39, %v2884_v27  ;;  %v2878_v2 = vsub.f32 %v10590_v58, %v2870_v12  ;;  %v10703_v21 = vld [vmem:[#allocation3 + $0x80] sm:$0xff] }
 0x194   : > { %4256 = vst [vmem:[#allocation3 + $0x88] sm:$0x3] %v10499_v28  ;;  %v10673_v49 = vld [vmem:[#allocation3 + $0x70] sm:$0xff]  ;;  %v4237_v9 = vmax.f32 %v2870_v12, 0.0  ;;  %v10677_v24 = vsel %vm374_vm2, %v3010_v30, %v3011_v4  ;;  %v10679_v57 = vld [vmem:[#allocation3 + $0x78] sm:$0x3]  ;;  %v2879_v39 = vsub.f32 %v10581_v40, %v10645_v51 }
 0x195   : > { %v10681_v63 = vld [vmem:[#allocation3 + $0x40] sm:$0xff]  ;;  %4253 = vst [vmem:[#allocation3 + $0x70] sm:$0xff] %v10499_v28  ;;  %7481 = vmatmul.mubr.f32.gmra.mrb[12].mxu0 %v10677_v24  ;;  %v10686_v1 = vsel %vm374_vm2, %v3013_v56, %v3014_v35  ;;  %v4323_v55 = vrot.slane %v10659_v0, 1  ;;  %v4325_v7 = vrot.slane %v10661_v25, 1  ;;  %v4326_v58 = vrot.slane %v10663_v33, 1  ;;  %v10692_v6 = vld [vmem:[#allocation3 + $0x30] sm:$0xff] }
 0x196   : > { %4254 = vst [vmem:[#allocation3 + $0x78] sm:$0x3] %v10499_v28  ;;  %v10694_v60 = vld [vmem:[#allocation3 + $0x38] sm:$0x3]  ;;  %v2886_v17 = vmul.f32 %v2878_v2, %v2878_v2  ;;  %8565 = vmatpush3.bf16.msra.mxu0 %v10566_v44  ;;  %7483 = vmatprep.mubr.f32.mxu0 %v10686_v1  ;;  %v3016_v38 = vrot.slane %v10673_v49, 1  ;;  %v3017_v45 = vrot.slane %v10679_v57, 1  ;;  %v2892_v12 = vadd.f32 %v2891_v18, %v2885_v14 }
 0x197   : > { %4265 = vst [vmem:[#allocation3 + $0x71] sm:$0xff] %v4237_v9  ;;  %v4328_v47 = vrot.slane %v10692_v6, 1  ;;  %v10701_v13 = vld [vmem:[#allocation3 + $0x48] sm:$0x3]  ;;  %v10706_v48 = vsel %vm374_vm2, %v4322_v41, %v4323_v55  ;;  %v10709_v19 = vsel %vm374_vm2, %v4325_v7, %v4326_v58  ;;  %8567 = vmatprep.subr.bf16.mxu0 %v10573_v3  ;;  %v4329_v52 = vrot.slane %v10694_v60, 1  ;;  %4255 = vst [vmem:[#allocation3 + $0x80] sm:$0xff] %v10499_v28 }
 0x198   : > { %v4331_v43 = vrot.slane %v10681_v63, 1  ;;  %7871 = vmatmul.mubr.f32.vlgmr.msra.gmra.mrb[8].mxu1 %v10706_v48  ;;  %v10717_v30 = vsel %vm374_vm2, %v3016_v38, %v3017_v45  ;;  %v4332_v27 = vrot.slane %v10701_v13, 1  ;;  %v10722_v4 = vld [vmem:[#allocation3 + $0x60] sm:$0xff]  ;;  %v2973_v56 = vld [vmem:[%s11409_s4 + $0x50] sm:$0xff]  ;;  %v2974_v35 = vld [vmem:[%s11409_s4 + $0x58] sm:$0xff]  ;;  %4266 = vst [vmem:[#allocation3 + $0x81] sm:$0xff] %v4238_v32  ;;  %v2887_v18 = vmul.f32 %v2879_v39, %v2879_v39 }
 0x199   : > { %8845 = vmatpush3.bf16.msra.mxu1 %v10510_v5  ;;  %7873 = vmatprep.mubr.f32.mxu1 %v10709_v19  ;;  %v10733_v41 = vsel %vm374_vm2, %v4328_v47, %v4329_v52  ;;  %v10735_v40 = vld [vmem:[#allocation3 + $0x50] sm:$0xff]  ;;  %v10737_v14 = vld [vmem:[#allocation3 + $0x58] sm:$0x3]  ;;  %v10739_v51 = vld [vmem:[#allocation3 + $0x68] sm:$0x3]  ;;  %v2893_v2 = vadd.f32 %v2892_v12, %v2886_v17  ;;  %v8574_v9 = vpack.c.bf16 %v2974_v35, %v2973_v56  ;;  %v4337_v58 = vrot.slane %v10722_v4, 1 }
 0x19a   : > { %7484 = vmatmul.mubr.f32.gmra.mrb[14].mxu0 %v10717_v30  ;;  %8847 = vmatprep.subr.bf16.mxu1 %v10564_v54  ;;  %v4334_v32 = vrot.slane %v10735_v40, 1  ;;  %v4335_v5 = vrot.slane %v10737_v14, 1  ;;  %v10749_v55 = vsel %vm374_vm2, %v4331_v43, %v4332_v27  ;;  %v4338_v17 = vrot.slane %v10739_v51, 1  ;;  %v2975_v38 = vld [vmem:[%s11409_s4 + $0x60] sm:$0xff]  ;;  %v2976_v43 = vld [vmem:[%s11409_s4 + $0x68] sm:$0xff]  ;;  %v2977_v35 = vld [vmem:[%s11409_s4 + $0x70] sm:$0xff] }
 0x19b   : > { %8569 = vmatpush3.bf16.msra.mxu0 %v10573_v3  ;;  %7518 = vmatprep.mubr.f32.mxu0 %v10499_v28  ;;  %v2894_v7 = vadd.f32 %v2893_v2, %v2887_v18  ;;  %v8578_v12 = vpack.c.bf16 %v2976_v43, %v2975_v38  ;;  %v2978_v18 = vld [vmem:[%s11409_s4 + $0x78] sm:$0xff]  ;;  %v5963_v2 = vld [vmem:[%s11409_s4 + $0x100] sm:$0xff] }
 0x19c   : > { %7874 = vmatmul.mubr.f32.gmra.mrb[10].mxu1 %v10733_v41  ;;  %8571 = vmatprep.subr.bf16.mxu0 %v10584_v46  ;;  %v10760_v45 = vsel %vm374_vm2, %v4334_v32, %v4335_v5  ;;  %v10775_v39 = vsel %vm374_vm2, %v4337_v58, %v4338_v17  ;;  %v5964_v32 = vld [vmem:[%s11409_s4 + $0x108] sm:$0xff]  ;;  %v5967_v17 = vld [vmem:[%s11409_s4 + $0x120] sm:$0xff]  ;;  %v5970_v43 = vld [vmem:[%s11409_s4 + $0x138] sm:$0xff] }
 0x19d   : > { %8849 = vmatpush3.bf16.msra.mxu1 %v10564_v54  ;;  %7876 = vmatprep.mubr.f32.mxu1 %v10749_v55  ;;  %v8586_v5 = vpack.c.bf16 %v5964_v32, %v5963_v2  ;;  %v5974_v32 = vld [vmem:[%s11409_s4 + $0x158] sm:$0xff] }
 0x19e   : > { %v10762_v47 = vld [vmem:[#allocation3 + $0x70] sm:$0xff]  ;;  %v10764_v52 = vld [vmem:[#allocation3 + $0x78] sm:$0x3]  ;;  %2895 = vadd.xlane.f32.xlu0 %v2894_v7  ;;  %8851 = vmatprep.subr.bf16.mxu1 %v10566_v44 }
 0x19f   : > { %v4340_v27 = vrot.slane %v10762_v47, 1  ;;  %v4341_v54 = vrot.slane %v10764_v52, 1  ;;  %8573 = vmatpush3.bf16.msra.mxu0 %v10584_v46  ;;  %v5966_v7 = vld [vmem:[%s11409_s4 + $0x118] sm:$0xff] }
 0x1a0   : > { %7877 = vmatmul.mubr.f32.gmra.mrb[12].mxu1 %v10760_v45  ;;  %8575 = vmatprep.subr.bf16.mxu0 %v8574_v9 }
 0x1a1   : > { %8853 = vmatpush3.bf16.msra.mxu1 %v10566_v44  ;;  %7879 = vmatprep.mubr.f32.mxu1 %v10775_v39  ;;  %v10780_v56 = vsel %vm374_vm2, %v4340_v27, %v4341_v54  ;;  %v8582_v44 = vpack.c.bf16 %v2978_v18, %v2977_v35  ;;  %v3254_v54 = vrot.slane %v10499_v28, 2  ;;  %v5971_v35 = vld [vmem:[%s11409_s4 + $0x140] sm:$0xff]  ;;  %v5972_v18 = vld [vmem:[%s11409_s4 + $0x148] sm:$0xff] }
 0x1a2   : > { %8855 = vmatprep.subr.bf16.mxu1 %v10573_v3  ;;  %v8602_v2 = vpack.c.bf16 %v5972_v18, %v5971_v35  ;;  %v3258_v18 = vrot.slane %v10578_v20, 2 }
 0x1a3   : > { %8577 = vmatpush3.bf16.msra.mxu0 %v8574_v9 }
 0x1a4   : > { %7880 = vmatmul.mubr.f32.gmra.mrb[14].mxu1 %v10780_v56  ;;  %8579 = vmatprep.subr.bf16.mxu0 %v8578_v12 }
 0x1a5   : > { %8857 = vmatpush3.bf16.msra.mxu1 %v10573_v3  ;;  %7914 = vmatprep.mubr.f32.mxu1 %v10499_v28  ;;  %v5965_v3 = vld [vmem:[%s11409_s4 + $0x110] sm:$0xff] }
 0x1a6   : > { %8859 = vmatprep.subr.bf16.mxu1 %v10584_v46  ;;  %v8590_v58 = vpack.c.bf16 %v5966_v7, %v5965_v3  ;;  %v5976_v7 = vld [vmem:[%s11409_s4 + $0x168] sm:$0xff] }
 0x1a7   : > { %8581 = vmatpush3.bf16.msra.mxu0 %v8578_v12 }
 0x1a8   : > { %8583 = vmatprep.subr.bf16.mxu0 %v8582_v44 }
 0x1a9   : > { %8861 = vmatpush3.bf16.msra.mxu1 %v10584_v46  ;;  %v5968_v46 = vld [vmem:[%s11409_s4 + $0x128] sm:$0xff] }
 0x1aa   : > { %8863 = vmatprep.subr.bf16.mxu1 %v8574_v9  ;;  %v8594_v38 = vpack.c.bf16 %v5968_v46, %v5967_v17  ;;  %v4578_v17 = vrot.slane %v10515_v50, 2 }
 0x1ab   : > { %8585 = vmatpush3.bf16.msra.mxu0 %v8582_v44 }
 0x1ac   : > { %8587 = vmatprep.subr.bf16.mxu0 %v8586_v5 }
 0x1ad   : > { %8865 = vmatpush3.bf16.msra.mxu1 %v8574_v9  ;;  %v5969_v9 = vld [vmem:[%s11409_s4 + $0x130] sm:$0xff] }
 0x1ae   : > { %7519 = vmatmul.mubr.f32.vlgmr.msra.gmra.mrb[8].mxu0 %v10576_v16  ;;  %8867 = vmatprep.subr.bf16.mxu1 %v8578_v12  ;;  %v8598_v27 = vpack.c.bf16 %v5970_v43, %v5969_v9  ;;  %v5978_v9 = vld [vmem:[%s11409_s4 + $0x178] sm:$0xff]  ;;  %v4579_v43 = vsel %vm650_vm3, %v3254_v54, %v4578_v17  ;;  %v5983_v17 = vld [vmem:[%s11409_s4 + $0x1a0] sm:$0xff] }
 0x1af   : > { %7521 = vmatprep.mubr.f32.mxu0 %v10568_v34  ;;  %8589 = vmatpush3.bf16.msra.mxu0 %v8586_v5 }
 0x1b0   : > { %8591 = vmatprep.subr.bf16.mxu0 %v8590_v58 }
 0x1b1   : > { %8869 = vmatpush3.bf16.msra.mxu1 %v8578_v12  ;;  %v3255_v12 = vrot.slane %v10497_v15, 2 }
 0x1b2   : > { %7522 = vmatmul.mubr.f32.gmra.mrb[10].mxu0 %v10603_v10  ;;  %8871 = vmatprep.subr.bf16.mxu1 %v8582_v44 }
 0x1b3   : > { %7524 = vmatprep.mubr.f32.mxu0 %v10596_v36  ;;  %8593 = vmatpush3.bf16.msra.mxu0 %v8590_v58  ;;  %v3256_v15 = vsel %vm650_vm3, %v3254_v54, %v3255_v12  ;;  %v5980_v12 = vld [vmem:[%s11409_s4 + $0x188] sm:$0xff]  ;;  %v3257_v54 = vrot.slane %v10576_v16, 2 }
 0x1b4   : > { %8595 = vmatprep.subr.bf16.mxu0 %v8594_v38 }
 0x1b5   : > { %8873 = vmatpush3.bf16.msra.mxu1 %v8582_v44  ;;  %v5973_v44 = vld [vmem:[%s11409_s4 + $0x150] sm:$0xff]  ;;  %v10883_v20 = vsel %vm650_vm3, %v3257_v54, %v3258_v18  ;;  %v5986_v54 = vld [vmem:[%s11409_s4 + $0x1b8] sm:$0xff] }
 0x1b6   : > { %7525 = vmatmul.mubr.f32.gmra.mrb[12].mxu0 %v10633_v23  ;;  %8875 = vmatprep.subr.bf16.mxu1 %v8586_v5  ;;  %v8606_v3 = vpack.c.bf16 %v5974_v32, %v5973_v44  ;;  %v3260_v44 = vrot.slane %v10568_v34, 2  ;;  %v3261_v32 = vrot.slane %v10571_v29, 2  ;;  %v5984_v29 = vld [vmem:[%s11409_s4 + $0x1a8] sm:$0xff] }
 0x1b7   : > { %7527 = vmatprep.mubr.f32.mxu0 %v10622_v26  ;;  %8597 = vmatpush3.bf16.msra.mxu0 %v8594_v38 }
 0x1b8   : > { %7915 = vmatmul.mubr.f32.vlgmr.msra.gmra.mrb[8].mxu1 %v10653_v22  ;;  %8599 = vmatprep.subr.bf16.mxu0 %v8598_v27 }
 0x1b9   : > { %7917 = vmatprep.mubr.f32.mxu1 %v10661_v25  ;;  %8877 = vmatpush3.bf16.msra.mxu1 %v8586_v5  ;;  %v5975_v5 = vld [vmem:[%s11409_s4 + $0x160] sm:$0xff] }
 0x1ba   : > { %7528 = vmatmul.mubr.f32.gmra.mrb[14].mxu0 %v10673_v49  ;;  %8879 = vmatprep.subr.bf16.mxu1 %v8590_v58  ;;  %v8610_v46 = vpack.c.bf16 %v5976_v7, %v5975_v5  ;;  %v3263_v5 = vrot.slane %v10603_v10, 2  ;;  %v3264_v7 = vrot.slane %v10609_v31, 2  ;;  %v10902_v31 = vpack.c.bf16 %v5984_v29, %v5983_v17  ;;  %v5987_v29 = vld [vmem:[%s11409_s4 + $0x1c0] sm:$0xff] }
 0x1bb   : > { %8601 = vmatpush3.bf16.msra.mxu0 %v8598_v27  ;;  %7562 = vmatprep.mubr.f32.mxu0 %v3256_v15  ;;  %v5982_v15 = vld [vmem:[%s11409_s4 + $0x198] sm:$0xff]  ;;  %v3276_v17 = vrot.slane %v10679_v57, 2 }
 0x1bc   : > { %7918 = vmatmul.mubr.f32.gmra.mrb[10].mxu1 %v10692_v6  ;;  %8603 = vmatprep.subr.bf16.mxu0 %v8602_v2 }
 0x1bd   : > { %7920 = vmatprep.mubr.f32.mxu1 %v10681_v63  ;;  %8881 = vmatpush3.bf16.msra.mxu1 %v8590_v58  ;;  %v5977_v58 = vld [vmem:[%s11409_s4 + $0x170] sm:$0xff] }
 0x1be   : > { %8883 = vmatprep.subr.bf16.mxu1 %v8594_v38  ;;  %v8614_v50 = vpack.c.bf16 %v5978_v9, %v5977_v58  ;;  %v10895_v58 = vsel %vm650_vm3, %v3260_v44, %v3261_v32  ;;  %v3267_v9 = vrot.slane %v10600_v61, 2  ;;  %v5985_v61 = vld [vmem:[%s11409_s4 + $0x1b0] sm:$0xff]  ;;  %v4583_v44 = vrot.slane %v10661_v25, 2 }
 0x1bf   : > { %8605 = vmatpush3.bf16.msra.mxu0 %v8602_v2  ;;  %v4584_v32 = vrot.slane %v10663_v33, 2 }
 0x1c0   : > { %7921 = vmatmul.mubr.f32.gmra.mrb[12].mxu1 %v10735_v40  ;;  %8607 = vmatprep.subr.bf16.mxu0 %v8606_v3 }
 0x1c1   : > { %7923 = vmatprep.mubr.f32.mxu1 %v10722_v4  ;;  %8885 = vmatpush3.bf16.msra.mxu1 %v8594_v38  ;;  %v5979_v38 = vld [vmem:[%s11409_s4 + $0x180] sm:$0xff] }
 0x1c2   : > { %8887 = vmatprep.subr.bf16.mxu1 %v8598_v27  ;;  %v10867_v35 = vpack.c.bf16 %v5980_v12, %v5979_v38  ;;  %v3269_v38 = vrot.slane %v10633_v23, 2  ;;  %v3270_v12 = vrot.slane %v10640_v53, 2  ;;  %v4580_v53 = vrot.slane %v10653_v22, 2 }
 0x1c3   : > { %8609 = vmatpush3.bf16.msra.mxu0 %v8606_v3 }
 0x1c4   : > { %7924 = vmatmul.mubr.f32.gmra.mrb[14].mxu1 %v10762_v47  ;;  %8611 = vmatprep.subr.bf16.mxu0 %v8610_v46 }
 0x1c5   : > { %8889 = vmatpush3.bf16.msra.mxu1 %v8598_v27  ;;  %7958 = vmatprep.mubr.f32.mxu1 %v4579_v43  ;;  %v5981_v27 = vld [vmem:[%s11409_s4 + $0x190] sm:$0xff]  ;;  %v10905_v43 = vsel %vm650_vm3, %v3263_v5, %v3264_v7  ;;  %v8630_v5 = vpack.c.bf16 %v5986_v54, %v5985_v61  ;;  %v10929_v7 = vsel %vm650_vm3, %v3269_v38, %v3270_v12  ;;  %v4589_v38 = vrot.slane %v10681_v63, 2 }
 0x1c6   : > { %8891 = vmatprep.subr.bf16.mxu1 %v8602_v2  ;;  %v4590_v12 = vrot.slane %v10701_v13, 2 }
 0x1c7   : > { %8613 = vmatpush3.bf16.msra.mxu0 %v8610_v46 }
 0x1c8   : > { %8615 = vmatprep.subr.bf16.mxu0 %v8614_v50 }
 0x1c9   : > { %8893 = vmatpush3.bf16.msra.mxu1 %v8602_v2  ;;  %v10880_v2 = vpack.c.bf16 %v5982_v15, %v5981_v27  ;;  %v3273_v27 = vrot.slane %v10630_v62, 2  ;;  %v4581_v15 = vrot.slane %v10659_v0, 2  ;;  %v3275_v62 = vrot.slane %v10673_v49, 2  ;;  %v5988_v0 = vld [vmem:[%s11409_s4 + $0x1c8] sm:$0xff] }
 0x1ca   : > { %8895 = vmatprep.subr.bf16.mxu1 %v8606_v3  ;;  %v8634_v61 = vpack.c.bf16 %v5988_v0, %v5987_v29  ;;  %v5993_v0 = vld [vmem:[%s11409_s4 + $0x1f0] sm:$0xff] }
 0x1cb   : > { %8617 = vmatpush3.bf16.msra.mxu0 %v8614_v50  ;;  %v10947_v57 = vsel %vm650_vm3, %v4580_v53, %v4581_v15  ;;  %v10960_v54 = vsel %vm650_vm3, %v3275_v62, %v3276_v17  ;;  %v10978_v53 = vsel %vm650_vm3, %v4589_v38, %v4590_v12  ;;  %v4595_v15 = vrot.slane %v10722_v4, 2  ;;  %v5996_v38 = vld [vmem:[%s11409_s4 + $0x208] sm:$0xff] }
 0x1cc   : > { %8619 = vmatprep.subr.bf16.mxu0 %v10867_v35  ;;  %v4599_v17 = vrot.slane %v10764_v52, 2 }
 0x1cd   : > { %8897 = vmatpush3.bf16.msra.mxu1 %v8606_v3  ;;  %v3266_v3 = vrot.slane %v10596_v36, 2 }
 0x1ce   : > { %7563 = vmatmul.mubr.f32.vlgmr.msra.gmra.mrb[8].mxu0 %v10883_v20  ;;  %8899 = vmatprep.subr.bf16.mxu1 %v8610_v46 }
 0x1cf   : > { %7565 = vmatprep.mubr.f32.mxu0 %v10895_v58  ;;  %8621 = vmatpush3.bf16.msra.mxu0 %v10867_v35  ;;  %v10917_v18 = vsel %vm650_vm3, %v3266_v3, %v3267_v9  ;;  %v4587_v3 = vrot.slane %v10694_v60, 2  ;;  %v10953_v9 = vsel %vm650_vm3, %v4583_v44, %v4584_v32  ;;  %v5989_v60 = vld [vmem:[%s11409_s4 + $0x1d0] sm:$0xff]  ;;  %v4596_v44 = vrot.slane %v10739_v51, 2 }
 0x1d0   : > { %8623 = vmatprep.subr.bf16.mxu0 %v10880_v2  ;;  %v4598_v51 = vrot.slane %v10762_v47, 2 }
 0x1d1   : > { %8901 = vmatpush3.bf16.msra.mxu1 %v8610_v46  ;;  %v3272_v46 = vrot.slane %v10622_v26, 2 }
 0x1d2   : > { %7566 = vmatmul.mubr.f32.gmra.mrb[10].mxu0 %v10905_v43  ;;  %8903 = vmatprep.subr.bf16.mxu1 %v8614_v50  ;;  %v11009_v52 = vsel %vm650_vm3, %v4598_v51, %v4599_v17  ;;  %v6005_v51 = vld [vmem:[%s11409_s4 + $0x250] sm:$0xff]  ;;  %v6006_v17 = vld [vmem:[%s11409_s4 + $0x258] sm:$0xff] }
 0x1d3   : > { %7568 = vmatprep.mubr.f32.mxu0 %v10917_v18  ;;  %8625 = vmatpush3.bf16.msra.mxu0 %v10880_v2  ;;  %v10941_v33 = vsel %vm650_vm3, %v3272_v46, %v3273_v27  ;;  %v5990_v46 = vld [vmem:[%s11409_s4 + $0x1d8] sm:$0xff]  ;;  %v4593_v27 = vrot.slane %v10737_v14, 2  ;;  %v5992_v14 = vld [vmem:[%s11409_s4 + $0x1e8] sm:$0xff] }
 0x1d4   : > { %8627 = vmatprep.subr.bf16.mxu0 %v10902_v31  ;;  %v8638_v32 = vpack.c.bf16 %v5990_v46, %v5989_v60  ;;  %v5997_v60 = vld [vmem:[%s11409_s4 + $0x210] sm:$0xff]  ;;  %v5999_v46 = vld [vmem:[%s11409_s4 + $0x220] sm:$0xff] }
 0x1d5   : > { %8905 = vmatpush3.bf16.msra.mxu1 %v8614_v50  ;;  %v4586_v50 = vrot.slane %v10692_v6, 2 }
 0x1d6   : > { %7569 = vmatmul.mubr.f32.gmra.mrb[12].mxu0 %v10929_v7  ;;  %8907 = vmatprep.subr.bf16.mxu1 %v10867_v35 }
 0x1d7   : > { %7571 = vmatprep.mubr.f32.mxu0 %v10941_v33  ;;  %8629 = vmatpush3.bf16.msra.mxu0 %v10902_v31  ;;  %v10972_v13 = vsel %vm650_vm3, %v4586_v50, %v4587_v3  ;;  %v5994_v50 = vld [vmem:[%s11409_s4 + $0x1f8] sm:$0xff] }
 0x1d8   : > { %7959 = vmatmul.mubr.f32.vlgmr.msra.gmra.mrb[8].mxu1 %v10947_v57  ;;  %8631 = vmatprep.subr.bf16.mxu0 %v8630_v5  ;;  %v8646_v3 = vpack.c.bf16 %v5994_v50, %v5993_v0  ;;  %v6008_v0 = vld [vmem:[%s11409_s4 + $0x268] sm:$0xff] }
 0x1d9   : > { %7961 = vmatprep.mubr.f32.mxu1 %v10953_v9  ;;  %8909 = vmatpush3.bf16.msra.mxu1 %v10867_v35  ;;  %v4592_v35 = vrot.slane %v10735_v40, 2  ;;  %v6012_v50 = vld [vmem:[%s11409_s4 + $0x288] sm:$0xff] }
 0x1da   : > { %7572 = vmatmul.mubr.f32.gmra.mrb[14].mxu0 %v10960_v54  ;;  %8911 = vmatprep.subr.bf16.mxu1 %v10880_v2 }
 0x1db   : > { %8633 = vmatpush3.bf16.msra.mxu0 %v8630_v5  ;;  %7606 = vmatprep.mubr.f32.mxu0 %v10576_v16  ;;  %v5991_v16 = vld [vmem:[%s11409_s4 + $0x1e0] sm:$0xff]  ;;  %v10992_v62 = vsel %vm650_vm3, %v4592_v35, %v4593_v27  ;;  %v6001_v27 = vld [vmem:[%s11409_s4 + $0x230] sm:$0xff] }
 0x1dc   : > { %7962 = vmatmul.mubr.f32.gmra.mrb[10].mxu1 %v10972_v13  ;;  %8635 = vmatprep.subr.bf16.mxu0 %v8634_v61  ;;  %v8642_v29 = vpack.c.bf16 %v5992_v14, %v5991_v16  ;;  %v6004_v16 = vld [vmem:[%s11409_s4 + $0x248] sm:$0xff] }
 0x1dd   : > { %7964 = vmatprep.mubr.f32.mxu1 %v10978_v53  ;;  %8913 = vmatpush3.bf16.msra.mxu1 %v10880_v2  ;;  %v10998_v2 = vsel %vm650_vm3, %v4595_v15, %v4596_v44  ;;  %v6002_v15 = vld [vmem:[%s11409_s4 + $0x238] sm:$0xff] }
 0x1de   : > { %8915 = vmatprep.subr.bf16.mxu1 %v10902_v31  ;;  %v8662_v44 = vpack.c.bf16 %v6002_v15, %v6001_v27  ;;  %v3549_v27 = vrot.slane %v10665_v11, 1  ;;  %v6019_v15 = vld [vmem:[%s11409_s4 + $0x2c0] sm:$0xff] }
 0x1df   : > { %8637 = vmatpush3.bf16.msra.mxu0 %v8634_v61 }
 0x1e0   : > { %7965 = vmatmul.mubr.f32.gmra.mrb[12].mxu1 %v10992_v62  ;;  %8639 = vmatprep.subr.bf16.mxu0 %v8638_v32 }
 0x1e1   : > { %7967 = vmatprep.mubr.f32.mxu1 %v10998_v2  ;;  %8917 = vmatpush3.bf16.msra.mxu1 %v10902_v31  ;;  %v5995_v31 = vld [vmem:[%s11409_s4 + $0x200] sm:$0xff] }
 0x1e2   : > { %8919 = vmatprep.subr.bf16.mxu1 %v8630_v5  ;;  %v8650_v12 = vpack.c.bf16 %v5996_v38, %v5995_v31  ;;  %v6013_v31 = vld [vmem:[%s11409_s4 + $0x290] sm:$0xff] }
 0x1e3   : > { %8641 = vmatpush3.bf16.msra.mxu0 %v8638_v32 }
 0x1e4   : > { %7968 = vmatmul.mubr.f32.gmra.mrb[14].mxu1 %v11009_v52  ;;  %8643 = vmatprep.subr.bf16.mxu0 %v8642_v29 }
 0x1e5   : > { %8921 = vmatpush3.bf16.msra.mxu1 %v8630_v5  ;;  %8002 = vmatprep.mubr.f32.mxu1 %v10653_v22  ;;  %v5998_v22 = vld [vmem:[%s11409_s4 + $0x218] sm:$0xff] }
 0x1e6   : > { %8923 = vmatprep.subr.bf16.mxu1 %v8634_v61  ;;  %v8654_v5 = vpack.c.bf16 %v5998_v22, %v5997_v60  ;;  %v6016_v60 = vld [vmem:[%s11409_s4 + $0x2a8] sm:$0xff] }
 0x1e7   : > { %8645 = vmatpush3.bf16.msra.mxu0 %v8642_v29 }
 0x1e8   : > { %8647 = vmatprep.subr.bf16.mxu0 %v8646_v3 }
 0x1e9   : > { %8925 = vmatpush3.bf16.msra.mxu1 %v8634_v61  ;;  %v6000_v61 = vld [vmem:[%s11409_s4 + $0x228] sm:$0xff] }
 0x1ea   : > { %8927 = vmatprep.subr.bf16.mxu1 %v8638_v32  ;;  %v8658_v35 = vpack.c.bf16 %v6000_v61, %v5999_v46  ;;  %v6018_v46 = vld [vmem:[%s11409_s4 + $0x2b8] sm:$0xff] }
 0x1eb   : > { %8649 = vmatpush3.bf16.msra.mxu0 %v8646_v3 }
 0x1ec   : > { %8651 = vmatprep.subr.bf16.mxu0 %v8650_v12 }
 0x1ed   : > { %8929 = vmatpush3.bf16.msra.mxu1 %v8638_v32  ;;  %v6003_v32 = vld [vmem:[%s11409_s4 + $0x240] sm:$0xff] }
 0x1ee   : > { %7607 = vmatmul.mubr.f32.vlgmr.msra.gmra.mrb[8].mxu0 %v10568_v34  ;;  %8931 = vmatprep.subr.bf16.mxu1 %v8642_v29  ;;  %v8666_v14 = vpack.c.bf16 %v6004_v16, %v6003_v32 }
 0x1ef   : > { %7609 = vmatprep.mubr.f32.mxu0 %v10603_v10  ;;  %8653 = vmatpush3.bf16.msra.mxu0 %v8650_v12 }
 0x1f0   : > { %8655 = vmatprep.subr.bf16.mxu0 %v8654_v5 }
 0x1f1   : > { %8933 = vmatpush3.bf16.msra.mxu1 %v8642_v29  ;;  %v11057_v29 = vld [vmem:[#allocation3 + $0x98] sm:$0x3] }
 0x1f2   : > { %7610 = vmatmul.mubr.f32.gmra.mrb[10].mxu0 %v10596_v36  ;;  %8935 = vmatprep.subr.bf16.mxu1 %v8646_v3  ;;  %4258 = vst [vmem:[#allocation3 + $0x98] sm:$0x3] %v10499_v28 }
 0x1f3   : > { %7612 = vmatprep.mubr.f32.mxu0 %v10633_v23  ;;  %8657 = vmatpush3.bf16.msra.mxu0 %v8654_v5 }
 0x1f4   : > { %8659 = vmatprep.subr.bf16.mxu0 %v8658_v35 }
 0x1f5   : > { %8937 = vmatpush3.bf16.msra.mxu1 %v8646_v3 }
 0x1f6   : > { %7613 = vmatmul.mubr.f32.gmra.mrb[12].mxu0 %v10622_v26  ;;  %8939 = vmatprep.subr.bf16.mxu1 %v8650_v12 }
 0x1f7   : > { %7615 = vmatprep.mubr.f32.mxu0 %v10673_v49  ;;  %8661 = vmatpush3.bf16.msra.mxu0 %v8658_v35 }
 0x1f8   : > { %8003 = vmatmul.mubr.f32.vlgmr.msra.gmra.mrb[8].mxu1 %v10661_v25  ;;  %8663 = vmatprep.subr.bf16.mxu0 %v8662_v44  ;;  %v8670_v25 = vpack.c.bf16 %v6006_v17, %v6005_v51  ;;  %v6022_v51 = vld [vmem:[%s11409_s4 + $0x2d8] sm:$0xff] }
 0x1f9   : > { %8005 = vmatprep.mubr.f32.mxu1 %v10692_v6  ;;  %8941 = vmatpush3.bf16.msra.mxu1 %v8650_v12  ;;  %v6007_v6 = vld [vmem:[%s11409_s4 + $0x260] sm:$0xff] }
 0x1fa   : > { %7616 = vmatmul.mubr.f32.gmra.mrb[14].mxu0 %v10703_v21  ;;  %8943 = vmatprep.subr.bf16.mxu1 %v8654_v5  ;;  %v8674_v28 = vpack.c.bf16 %v6008_v0, %v6007_v6  ;;  %v6015_v12 = vld [vmem:[%s11409_s4 + $0x2a0] sm:$0xff]  ;;  %v6024_v0 = vld [vmem:[%s11409_s4 + $0x2e8] sm:$0xff] }
 0x1fb   : > { %8665 = vmatpush3.bf16.msra.mxu0 %v8662_v44  ;;  %7650 = vmatprep.mubr.f32.mxu0 %v10607_v42  ;;  %v6009_v42 = vld [vmem:[%s11409_s4 + $0x270] sm:$0xff]  ;;  %v8690_v22 = vpack.c.bf16 %v6016_v60, %v6015_v12  ;;  %v6023_v6 = vld [vmem:[%s11409_s4 + $0x2e0] sm:$0xff] }
 0x1fc   : > { %8006 = vmatmul.mubr.f32.gmra.mrb[10].mxu1 %v10681_v63  ;;  %8667 = vmatprep.subr.bf16.mxu0 %v8666_v14  ;;  %v6010_v63 = vld [vmem:[%s11409_s4 + $0x278] sm:$0xff] }
 0x1fd   : > { %8008 = vmatprep.mubr.f32.mxu1 %v10735_v40  ;;  %8945 = vmatpush3.bf16.msra.mxu1 %v8654_v5  ;;  %v11078_v40 = vld [vmem:[#allocation3 + $0x80] sm:$0xff]  ;;  %v6017_v5 = vld [vmem:[%s11409_s4 + $0x2b0] sm:$0xff] }
 0x1fe   : > { %8947 = vmatprep.subr.bf16.mxu1 %v8658_v35  ;;  %v8694_v61 = vpack.c.bf16 %v6018_v46, %v6017_v5  ;;  %v6031_v5 = vld [vmem:[%s11409_s4 + $0x320] sm:$0xff]  ;;  %v6032_v46 = vld [vmem:[%s11409_s4 + $0x328] sm:$0xff] }
 0x1ff   : > { %8669 = vmatpush3.bf16.msra.mxu0 %v8666_v14 }
 0x200   : > { %8009 = vmatmul.mubr.f32.gmra.mrb[12].mxu1 %v10722_v4  ;;  %8671 = vmatprep.subr.bf16.mxu0 %v8670_v25  ;;  %v8678_v4 = vpack.c.bf16 %v6010_v63, %v6009_v42  ;;  %v8706_v42 = vpack.c.bf16 %v6024_v0, %v6023_v6  ;;  %v6025_v63 = vld [vmem:[%s11409_s4 + $0x2f0] sm:$0xff]  ;;  %v3683_v6 = vrot.slane %v10665_v11, 2  ;;  %v6035_v0 = vld [vmem:[%s11409_s4 + $0x340] sm:$0xff] }
 0x201   : > { %8011 = vmatprep.mubr.f32.mxu1 %v10762_v47  ;;  %8949 = vmatpush3.bf16.msra.mxu1 %v8658_v35  ;;  %v6011_v47 = vld [vmem:[%s11409_s4 + $0x280] sm:$0xff]  ;;  %v3548_v35 = vrot.slane %v10703_v21, 1 }
 0x202   : > { %8951 = vmatprep.subr.bf16.mxu1 %v8662_v44  ;;  %v8682_v3 = vpack.c.bf16 %v6012_v50, %v6011_v47 }
 0x203   : > { %8673 = vmatpush3.bf16.msra.mxu0 %v8670_v25  ;;  %v11123_v16 = vsel %vm374_vm2, %v3548_v35, %v3549_v27  ;;  %v8722_v27 = vpack.c.bf16 %v6032_v46, %v6031_v5  ;;  %v6043_v5 = vld [vmem:[%s11409_s4 + $0x380] sm:$0xff]  ;;  %v6044_v46 = vld [vmem:[%s11409_s4 + $0x388] sm:$0xff] }
 0x204   : > { %8012 = vmatmul.mubr.f32.gmra.mrb[14].mxu1 %v11078_v40  ;;  %8675 = vmatprep.subr.bf16.mxu0 %v8674_v28 }
 0x205   : > { %8953 = vmatpush3.bf16.msra.mxu1 %v8662_v44  ;;  %8046 = vmatprep.mubr.f32.mxu1 %v10706_v48  ;;  %v6014_v48 = vld [vmem:[%s11409_s4 + $0x298] sm:$0xff]  ;;  %v6020_v44 = vld [vmem:[%s11409_s4 + $0x2c8] sm:$0xff] }
 0x206   : > { %8955 = vmatprep.subr.bf16.mxu1 %v8666_v14  ;;  %v8686_v38 = vpack.c.bf16 %v6014_v48, %v6013_v31  ;;  %v8698_v32 = vpack.c.bf16 %v6020_v44, %v6019_v15  ;;  %v6028_v31 = vld [vmem:[%s11409_s4 + $0x308] sm:$0xff]  ;;  %v6033_v15 = vld [vmem:[%s11409_s4 + $0x330] sm:$0xff]  ;;  %v6034_v44 = vld [vmem:[%s11409_s4 + $0x338] sm:$0xff] }
 0x207   : > { %8677 = vmatpush3.bf16.msra.mxu0 %v8674_v28 }
 0x208   : > { %8679 = vmatprep.subr.bf16.mxu0 %v8678_v4 }
 0x209   : > { %8957 = vmatpush3.bf16.msra.mxu1 %v8666_v14  ;;  %v6021_v14 = vld [vmem:[%s11409_s4 + $0x2d0] sm:$0xff] }
 0x20a   : > { %8959 = vmatprep.subr.bf16.mxu1 %v8670_v25  ;;  %v8702_v17 = vpack.c.bf16 %v6022_v51, %v6021_v14  ;;  %v8726_v51 = vpack.c.bf16 %v6034_v44, %v6033_v15  ;;  %v6047_v44 = vld [vmem:[%s11409_s4 + $0x3a0] sm:$0xff] }
 0x20b   : > { %8681 = vmatpush3.bf16.msra.mxu0 %v8678_v4 }
 0x20c   : > { %8683 = vmatprep.subr.bf16.mxu0 %v8682_v3 }
 0x20d   : > { %8961 = vmatpush3.bf16.msra.mxu1 %v8670_v25  ;;  %v11134_v25 = vld [vmem:[#allocation3 + $0x88] sm:$0x3] }
 0x20e   : > { %7651 = vmatmul.mubr.f32.vlgmr.msra.gmra.mrb[8].mxu0 %v10626_v59  ;;  %8963 = vmatprep.subr.bf16.mxu1 %v8674_v28 }
 0x20f   : > { %7653 = vmatprep.mubr.f32.mxu0 %v10638_v8  ;;  %8685 = vmatpush3.bf16.msra.mxu0 %v8682_v3 }
 0x210   : > { %8687 = vmatprep.subr.bf16.mxu0 %v8686_v38 }
 0x211   : > { %8965 = vmatpush3.bf16.msra.mxu1 %v8674_v28  ;;  %v4870_v28 = vrot.slane %v11134_v25, 1 }
 0x212   : > { %7654 = vmatmul.mubr.f32.gmra.mrb[10].mxu0 %v10649_v37  ;;  %8967 = vmatprep.subr.bf16.mxu1 %v8678_v4 }
 0x213   : > { %7656 = vmatprep.mubr.f32.mxu0 %v10677_v24  ;;  %8689 = vmatpush3.bf16.msra.mxu0 %v8686_v38 }
 0x214   : > { %8691 = vmatprep.subr.bf16.mxu0 %v8690_v22 }
 0x215   : > { %8969 = vmatpush3.bf16.msra.mxu1 %v8678_v4  ;;  %v6026_v4 = vld [vmem:[%s11409_s4 + $0x2f8] sm:$0xff] }
 0x216   : > { %7657 = vmatmul.mubr.f32.gmra.mrb[12].mxu0 %v10686_v1  ;;  %8971 = vmatprep.subr.bf16.mxu1 %v8682_v3  ;;  %v8710_v50 = vpack.c.bf16 %v6026_v4, %v6025_v63  ;;  %v6037_v63 = vld [vmem:[%s11409_s4 + $0x350] sm:$0xff]  ;;  %v6038_v4 = vld [vmem:[%s11409_s4 + $0x358] sm:$0xff] }
 0x217   : > { %7659 = vmatprep.mubr.f32.mxu0 %v10717_v30  ;;  %8693 = vmatpush3.bf16.msra.mxu0 %v8690_v22 }
 0x218   : > { %8047 = vmatmul.mubr.f32.vlgmr.msra.gmra.mrb[8].mxu1 %v10709_v19  ;;  %8695 = vmatprep.subr.bf16.mxu0 %v8694_v61 }
 0x219   : > { %8049 = vmatprep.mubr.f32.mxu1 %v10733_v41  ;;  %8973 = vmatpush3.bf16.msra.mxu1 %v8682_v3  ;;  %v6027_v3 = vld [vmem:[%s11409_s4 + $0x300] sm:$0xff] }
 0x21a   : > { %7660 = vmatmul.mubr.f32.gmra.mrb[14].mxu0 %v11123_v16  ;;  %8975 = vmatprep.subr.bf16.mxu1 %v8686_v38  ;;  %v8714_v48 = vpack.c.bf16 %v6028_v31, %v6027_v3  ;;  %v6039_v3 = vld [vmem:[%s11409_s4 + $0x360] sm:$0xff]  ;;  %v6040_v31 = vld [vmem:[%s11409_s4 + $0x368] sm:$0xff] }
 0x21b   : > { %8697 = vmatpush3.bf16.msra.mxu0 %v8694_v61  ;;  %7694 = vmatprep.mubr.f32.mxu0 %v10883_v20  ;;  %v4869_v20 = vrot.slane %v11078_v40, 1 }
 0x21c   : > { %8050 = vmatmul.mubr.f32.gmra.mrb[10].mxu1 %v10749_v55  ;;  %8699 = vmatprep.subr.bf16.mxu0 %v8698_v32 }
 0x21d   : > { %8052 = vmatprep.mubr.f32.mxu1 %v10760_v45  ;;  %8977 = vmatpush3.bf16.msra.mxu1 %v8686_v38  ;;  %v11154_v47 = vsel %vm374_vm2, %v4869_v20, %v4870_v28  ;;  %v6029_v38 = vld [vmem:[%s11409_s4 + $0x310] sm:$0xff]  ;;  %v6036_v20 = vld [vmem:[%s11409_s4 + $0x348] sm:$0xff] }
 0x21e   : > { %8979 = vmatprep.subr.bf16.mxu1 %v8690_v22  ;;  %v8730_v11 = vpack.c.bf16 %v6036_v20, %v6035_v0  ;;  %v9384_v0 = vld [vmem:[#allocation3 + $0x40] sm:$0xff]  ;;  %v6053_v20 = vld [vmem:[%s11409_s4 + $0x3d0] sm:$0xff] }
 0x21f   : > { %8701 = vmatpush3.bf16.msra.mxu0 %v8698_v32 }
 0x220   : > { %8053 = vmatmul.mubr.f32.gmra.mrb[12].mxu1 %v10775_v39  ;;  %8703 = vmatprep.subr.bf16.mxu0 %v8702_v17 }
 0x221   : > { %8055 = vmatprep.mubr.f32.mxu1 %v10780_v56  ;;  %8981 = vmatpush3.bf16.msra.mxu1 %v8690_v22 }
 0x222   : > { %8983 = vmatprep.subr.bf16.mxu1 %v8694_v61 }
 0x223   : > { %8705 = vmatpush3.bf16.msra.mxu0 %v8702_v17 }
 0x224   : > { %8056 = vmatmul.mubr.f32.gmra.mrb[14].mxu1 %v11154_v47  ;;  %8707 = vmatprep.subr.bf16.mxu0 %v8706_v42 }
 0x225   : > { %8985 = vmatpush3.bf16.msra.mxu1 %v8694_v61  ;;  %8090 = vmatprep.mubr.f32.mxu1 %v10947_v57  ;;  %v6030_v57 = vld [vmem:[%s11409_s4 + $0x318] sm:$0xff] }
 0x226   : > { %8987 = vmatprep.subr.bf16.mxu1 %v8698_v32  ;;  %v8718_v22 = vpack.c.bf16 %v6030_v57, %v6029_v38  ;;  %v8738_v38 = vpack.c.bf16 %v6040_v31, %v6039_v3  ;;  %v6041_v57 = vld [vmem:[%s11409_s4 + $0x370] sm:$0xff] }
 0x227   : > { %8709 = vmatpush3.bf16.msra.mxu0 %v8706_v42  ;;  %v9388_v3 = vld [vmem:[#allocation3 + $0x70] sm:$0xff] }
 0x228   : > { %8711 = vmatprep.subr.bf16.mxu0 %v8710_v50  ;;  %v6057_v31 = vld [vmem:[%s11409_s4 + $0x3f0] sm:$0xff] }
 0x229   : > { %8989 = vmatpush3.bf16.msra.mxu1 %v8698_v32 }
 0x22a   : > { %8991 = vmatprep.subr.bf16.mxu1 %v8702_v17 }
 0x22b   : > { %8713 = vmatpush3.bf16.msra.mxu0 %v8710_v50  ;;  %v2896_v12 = vpop.xlane.xlu0 %2895 }
 0x22c   : > { %v2897_v60 = vrot.slane %v2896_v12, 4  ;;  %8715 = vmatprep.subr.bf16.mxu0 %v8714_v48 }
 0x22d   : > { %8993 = vmatpush3.bf16.msra.mxu1 %v8702_v17  ;;  %v3682_v17 = vrot.slane %v10703_v21, 2 }
 0x22e   : > { %v2898_v61 = vadd.f32 %v2897_v60, %v2896_v12  ;;  %7695 = vmatmul.mubr.f32.vlgmr.msra.gmra.mrb[8].mxu0 %v10895_v58  ;;  %8995 = vmatprep.subr.bf16.mxu1 %v8706_v42  ;;  %v6042_v12 = vld [vmem:[%s11409_s4 + $0x378] sm:$0xff] }
 0x22f   : > { %7697 = vmatprep.mubr.f32.mxu0 %v10905_v43  ;;  %8717 = vmatpush3.bf16.msra.mxu0 %v8714_v48 }
 0x230   : > { %v2899_v35 = vrot.slane %v2898_v61, 2  ;;  %8719 = vmatprep.subr.bf16.mxu0 %v8718_v22 }
 0x231   : > { %8997 = vmatpush3.bf16.msra.mxu1 %v8706_v42  ;;  %v11199_v42 = vsel %vm650_vm3, %v3682_v17, %v3683_v6  ;;  %v6050_v17 = vld [vmem:[%s11409_s4 + $0x3b8] sm:$0xff]  ;;  %v6052_v6 = vld [vmem:[%s11409_s4 + $0x3c8] sm:$0xff] }
 0x232   : > { %7698 = vmatmul.mubr.f32.gmra.mrb[10].mxu0 %v10917_v18  ;;  %8999 = vmatprep.subr.bf16.mxu1 %v8710_v50  ;;  %v2900_v32 = vadd.f32 %v2899_v35, %v2898_v61  ;;  %v8746_v61 = vpack.c.bf16 %v6044_v46, %v6043_v5  ;;  %v6045_v35 = vld [vmem:[%s11409_s4 + $0x390] sm:$0xff]  ;;  %v6064_v5 = vld [vmem:[%s11409_s4 + $0x428] sm:$0xff] }
 0x233   : > { %7700 = vmatprep.mubr.f32.mxu0 %v10929_v7  ;;  %8721 = vmatpush3.bf16.msra.mxu0 %v8718_v22 }
 0x234   : > { %8723 = vmatprep.subr.bf16.mxu0 %v8722_v27  ;;  %v2901_v14 = vrot.slane %v2900_v32, 1 }
 0x235   : > { %9001 = vmatpush3.bf16.msra.mxu1 %v8710_v50  ;;  %v8734_v50 = vpack.c.bf16 %v6038_v4, %v6037_v63  ;;  %v9387_v63 = vld [vmem:[#allocation3 + $0x60] sm:$0xff] }
 0x236   : > { %7701 = vmatmul.mubr.f32.gmra.mrb[12].mxu0 %v10941_v33  ;;  %9003 = vmatprep.subr.bf16.mxu1 %v8714_v48  ;;  %v2902_v28 = vadd.f32 %v2901_v14, %v2900_v32  ;;  %v6048_v32 = vld [vmem:[%s11409_s4 + $0x3a8] sm:$0xff]  ;;  %v6055_v4 = vld [vmem:[%s11409_s4 + $0x3e0] sm:$0xff] }
 0x237   : > { %7703 = vmatprep.mubr.f32.mxu0 %v10960_v54  ;;  %8725 = vmatpush3.bf16.msra.mxu0 %v8722_v27  ;;  %v8754_v14 = vpack.c.bf16 %v6048_v32, %v6047_v44  ;;  %v6068_v44 = vld [vmem:[%s11409_s4 + $0x448] sm:$0xff]  ;;  %v6069_v32 = vld [vmem:[%s11409_s4 + $0x450] sm:$0xff] }
 0x238   : > { %8091 = vmatmul.mubr.f32.vlgmr.msra.gmra.mrb[8].mxu1 %v10953_v9  ;;  %9354 = vpush %v2902_v28  ;;  %8727 = vmatprep.subr.bf16.mxu0 %v8726_v51  ;;  %v6054_v28 = vld [vmem:[%s11409_s4 + $0x3d8] sm:$0xff] }
 0x239   : > { %8093 = vmatprep.mubr.f32.mxu1 %v10972_v13  ;;  %9005 = vmatpush3.bf16.msra.mxu1 %v8714_v48  ;;  %v5002_v48 = vrot.slane %v11078_v40, 2 }
 0x23a   : > { %7704 = vmatmul.mubr.f32.gmra.mrb[14].mxu0 %v11199_v42  ;;  %9007 = vmatprep.subr.bf16.mxu1 %v8718_v22 }
 0x23b   : > { %8729 = vmatpush3.bf16.msra.mxu0 %v8726_v51  ;;  %7738 = vmatprep.mubr.f32.mxu0 %v10568_v34  ;;  %v5003_v34 = vrot.slane %v11134_v25, 2  ;;  %v8742_v25 = vpack.c.bf16 %v6042_v12, %v6041_v57  ;;  %v6062_v12 = vld [vmem:[%s11409_s4 + $0x418] sm:$0xff] }
 0x23c   : > { %8094 = vmatmul.mubr.f32.gmra.mrb[10].mxu1 %v10978_v53  ;;  %8731 = vmatprep.subr.bf16.mxu0 %v8730_v11 }
 0x23d   : > { %8096 = vmatprep.mubr.f32.mxu1 %v10992_v62  ;;  %9009 = vmatpush3.bf16.msra.mxu1 %v8718_v22  ;;  %v11228_v60 = vsel %vm650_vm3, %v5002_v48, %v5003_v34  ;;  %v9382_v22 = vld [vmem:[#allocation3 + $0x20] sm:$0xff]  ;;  %v6058_v48 = vld [vmem:[%s11409_s4 + $0x3f8] sm:$0xff] }
 0x23e   : > { %9011 = vmatprep.subr.bf16.mxu1 %v8722_v27  ;;  %v8774_v34 = vpack.c.bf16 %v6058_v48, %v6057_v31 }
 0x23f   : > { %8733 = vmatpush3.bf16.msra.mxu0 %v8730_v11 }
 0x240   : > { %8097 = vmatmul.mubr.f32.gmra.mrb[12].mxu1 %v10998_v2  ;;  %8735 = vmatprep.subr.bf16.mxu0 %v8734_v50 }
 0x241   : > { %8099 = vmatprep.mubr.f32.mxu1 %v11009_v52  ;;  %9013 = vmatpush3.bf16.msra.mxu1 %v8722_v27  ;;  %v6046_v27 = vld [vmem:[%s11409_s4 + $0x398] sm:$0xff] }
 0x242   : > { %9015 = vmatprep.subr.bf16.mxu1 %v8726_v51  ;;  %v8750_v15 = vpack.c.bf16 %v6046_v27, %v6045_v35  ;;  %v6066_v35 = vld [vmem:[%s11409_s4 + $0x438] sm:$0xff] }
 0x243   : > { %8737 = vmatpush3.bf16.msra.mxu0 %v8734_v50 }
 0x244   : > { %8100 = vmatmul.mubr.f32.gmra.mrb[14].mxu1 %v11228_v60  ;;  %8739 = vmatprep.subr.bf16.mxu0 %v8738_v38 }
 0x245   : > { %9017 = vmatpush3.bf16.msra.mxu1 %v8726_v51  ;;  %8134 = vmatprep.mubr.f32.mxu1 %v9382_v22  ;;  %v6049_v51 = vld [vmem:[%s11409_s4 + $0x3b0] sm:$0xff]  ;;  %v6063_v22 = vld [vmem:[%s11409_s4 + $0x420] sm:$0xff] }
 0x246   : > { %9019 = vmatprep.subr.bf16.mxu1 %v8730_v11  ;;  %v8786_v46 = vpack.c.bf16 %v6064_v5, %v6063_v22 }
 0x247   : > { %8741 = vmatpush3.bf16.msra.mxu0 %v8738_v38 }
 0x248   : > { %8743 = vmatprep.subr.bf16.mxu0 %v8742_v25 }
 0x249   : > { %9021 = vmatpush3.bf16.msra.mxu1 %v8730_v11  ;;  %v8766_v11 = vpack.c.bf16 %v6054_v28, %v6053_v20 }
 0x24a   : > { %9023 = vmatprep.subr.bf16.mxu1 %v8734_v50 }
 0x24b   : > { %8745 = vmatpush3.bf16.msra.mxu0 %v8742_v25 }
 0x24c   : > { %8747 = vmatprep.subr.bf16.mxu0 %v8746_v61 }
 0x24d   : > { %9025 = vmatpush3.bf16.msra.mxu1 %v8734_v50  ;;  %v6056_v50 = vld [vmem:[%s11409_s4 + $0x3e8] sm:$0xff] }
 0x24e   : > { %7739 = vmatmul.mubr.f32.vlgmr.msra.gmra.mrb[8].mxu0 %v10603_v10  ;;  %9027 = vmatprep.subr.bf16.mxu1 %v8738_v38  ;;  %v6051_v10 = vld [vmem:[%s11409_s4 + $0x3c0] sm:$0xff] }
 0x24f   : > { %7741 = vmatprep.mubr.f32.mxu0 %v10596_v36  ;;  %8749 = vmatpush3.bf16.msra.mxu0 %v8746_v61  ;;  %v8758_v36 = vpack.c.bf16 %v6050_v17, %v6049_v51  ;;  %v6072_v51 = vld [vmem:[%s11409_s4 + $0x468] sm:$0xff]  ;;  %v6074_v17 = vld [vmem:[%s11409_s4 + $0x478] sm:$0xff] }
 0x250   : > { %8751 = vmatprep.subr.bf16.mxu0 %v8750_v15 }
 0x251   : > { %9029 = vmatpush3.bf16.msra.mxu1 %v8738_v38  ;;  %v6060_v38 = vld [vmem:[%s11409_s4 + $0x408] sm:$0xff] }
 0x252   : > { %7742 = vmatmul.mubr.f32.gmra.mrb[10].mxu0 %v10633_v23  ;;  %9031 = vmatprep.subr.bf16.mxu1 %v8742_v25  ;;  %v9383_v23 = vld [vmem:[#allocation3 + $0x30] sm:$0xff] }
 0x253   : > { %7744 = vmatprep.mubr.f32.mxu0 %v10622_v26  ;;  %8753 = vmatpush3.bf16.msra.mxu0 %v8750_v15  ;;  %v8762_v26 = vpack.c.bf16 %v6052_v6, %v6051_v10 }
 0x254   : > { %8755 = vmatprep.subr.bf16.mxu0 %v8754_v14 }
 0x255   : > { %9033 = vmatpush3.bf16.msra.mxu1 %v8742_v25 }
 0x256   : > { %7745 = vmatmul.mubr.f32.gmra.mrb[12].mxu0 %v10673_v49  ;;  %9035 = vmatprep.subr.bf16.mxu1 %v8746_v61  ;;  %v11273_v49 = vld [vmem:[#allocation3] sm:$0xff] }
 0x257   : > { %7747 = vmatprep.mubr.f32.mxu0 %v10703_v21  ;;  %8757 = vmatpush3.bf16.msra.mxu0 %v8754_v14  ;;  %v9386_v21 = vld [vmem:[#allocation3 + $0x50] sm:$0xff] }
 0x258   : > { %8135 = vmatmul.mubr.f32.vlgmr.msra.gmra.mrb[8].mxu1 %v9383_v23  ;;  %8759 = vmatprep.subr.bf16.mxu0 %v8758_v36 }
 0x259   : > { %8137 = vmatprep.mubr.f32.mxu1 %v9384_v0  ;;  %9037 = vmatpush3.bf16.msra.mxu1 %v8746_v61  ;;  %v6065_v61 = vld [vmem:[%s11409_s4 + $0x430] sm:$0xff] }
 0x25a   : > { %7748 = vmatmul.mubr.f32.gmra.mrb[14].mxu0 %v11273_v49  ;;  %9039 = vmatprep.subr.bf16.mxu1 %v8750_v15  ;;  %v8790_v27 = vpack.c.bf16 %v6066_v35, %v6065_v61 }
 0x25b   : > { %8761 = vmatpush3.bf16.msra.mxu0 %v8758_v36  ;;  %7782 = vmatprep.mubr.f32.mxu0 %v10626_v59  ;;  %v8770_v59 = vpack.c.bf16 %v6056_v50, %v6055_v4 }
 0x25c   : > { %8138 = vmatmul.mubr.f32.gmra.mrb[10].mxu1 %v9386_v21  ;;  %8763 = vmatprep.subr.bf16.mxu0 %v8762_v26 }
 0x25d   : > { %8140 = vmatprep.mubr.f32.mxu1 %v9387_v63  ;;  %9041 = vmatpush3.bf16.msra.mxu1 %v8750_v15  ;;  %v6067_v15 = vld [vmem:[%s11409_s4 + $0x440] sm:$0xff] }
 0x25e   : > { %9043 = vmatprep.subr.bf16.mxu1 %v8754_v14 }
 0x25f   : > { %8765 = vmatpush3.bf16.msra.mxu0 %v8762_v26 }
 0x260   : > { %8141 = vmatmul.mubr.f32.gmra.mrb[12].mxu1 %v9388_v3  ;;  %8767 = vmatprep.subr.bf16.mxu0 %v8766_v11 }
 0x261   : > { %8143 = vmatprep.mubr.f32.mxu1 %v11078_v40  ;;  %9045 = vmatpush3.bf16.msra.mxu1 %v8754_v14  ;;  %v6059_v40 = vld [vmem:[%s11409_s4 + $0x400] sm:$0xff] }
 0x262   : > { %9047 = vmatprep.subr.bf16.mxu1 %v8758_v36  ;;  %v8778_v57 = vpack.c.bf16 %v6060_v38, %v6059_v40  ;;  %v6071_v14 = vld [vmem:[%s11409_s4 + $0x460] sm:$0xff] }
 0x263   : > { %8769 = vmatpush3.bf16.msra.mxu0 %v8766_v11 }
 0x264   : > { %8144 = vmatmul.mubr.f32.gmra.mrb[14].mxu1 %v11273_v49  ;;  %8771 = vmatprep.subr.bf16.mxu0 %v8770_v59 }
 0x265   : > { %9049 = vmatpush3.bf16.msra.mxu1 %v8758_v36  ;;  %8178 = vmatprep.mubr.f32.mxu1 %v10709_v19  ;;  %v6061_v19 = vld [vmem:[%s11409_s4 + $0x410] sm:$0xff] }
 0x266   : > { %9051 = vmatprep.subr.bf16.mxu1 %v8762_v26  ;;  %v8782_v25 = vpack.c.bf16 %v6062_v12, %v6061_v19 }
 0x267   : > { %8773 = vmatpush3.bf16.msra.mxu0 %v8770_v59 }
 0x268   : > { %8775 = vmatprep.subr.bf16.mxu0 %v8774_v34 }
 0x269   : > { %9053 = vmatpush3.bf16.msra.mxu1 %v8762_v26  ;;  %s9355_s22 = spop %9354 }
 0x26a   : > { %2905 = sst [smem:[%s6215_s21]] %s9355_s22  ;;  %9055 = vmatprep.subr.bf16.mxu1 %v8766_v11 }
 0x26b   : > { %8777 = vmatpush3.bf16.msra.mxu0 %v8774_v34 }
 0x26c   : > { %8779 = vmatprep.subr.bf16.mxu0 %v8778_v57 }
 0x26d   : > { %9057 = vmatpush3.bf16.msra.mxu1 %v8766_v11 }
 0x26e   : > { %7783 = vmatmul.mubr.f32.vlgmr.msra.gmra.mrb[8].mxu0 %v10638_v8  ;;  %9059 = vmatprep.subr.bf16.mxu1 %v8770_v59  ;;  %v5266_v8 = vrot.slane %v11273_v49, 1 }
 0x26f   : > { %7785 = vmatprep.mubr.f32.mxu0 %v10649_v37  ;;  %8781 = vmatpush3.bf16.msra.mxu0 %v8778_v57  ;;  %v3949_v37 = vrot.slane %v11057_v29, 1 }
 0x270   : > { %8783 = vmatprep.subr.bf16.mxu0 %v8782_v25 }
 0x271   : > { %9061 = vmatpush3.bf16.msra.mxu1 %v8770_v59 }
 0x272   : > { %7786 = vmatmul.mubr.f32.gmra.mrb[10].mxu0 %v10677_v24  ;;  %9063 = vmatprep.subr.bf16.mxu1 %v8774_v34  ;;  %v3950_v24 = vsel %vm374_vm2, %v5266_v8, %v3949_v37 }
 0x273   : > { %7788 = vmatprep.mubr.f32.mxu0 %v10686_v1  ;;  %8785 = vmatpush3.bf16.msra.mxu0 %v8782_v25  ;;  %v8794_v1 = vpack.c.bf16 %v6068_v44, %v6067_v15 }
 0x274   : > { %8787 = vmatprep.subr.bf16.mxu0 %v8786_v46 }
 0x275   : > { %9065 = vmatpush3.bf16.msra.mxu1 %v8774_v34 }
 0x276   : > { %7789 = vmatmul.mubr.f32.gmra.mrb[12].mxu0 %v10717_v30  ;;  %9067 = vmatprep.subr.bf16.mxu1 %v8778_v57  ;;  %v6070_v30 = vld [vmem:[%s11409_s4 + $0x458] sm:$0xff] }
 0x277   : > { %7791 = vmatprep.mubr.f32.mxu0 %v11123_v16  ;;  %8789 = vmatpush3.bf16.msra.mxu0 %v8786_v46  ;;  %v4286_v16 = vld [vmem:[#allocation3 + $0x98] sm:$0x3] }
 0x278   : > { %8179 = vmatmul.mubr.f32.vlgmr.msra.gmra.mrb[8].mxu1 %v10733_v41  ;;  %8791 = vmatprep.subr.bf16.mxu0 %v8790_v27  ;;  %v8798_v41 = vpack.c.bf16 %v6070_v30, %v6069_v32 }
 0x279   : > { %8181 = vmatprep.mubr.f32.mxu1 %v10749_v55  ;;  %9069 = vmatpush3.bf16.msra.mxu1 %v8778_v57  ;;  %v5267_v55 = vrot.slane %v4286_v16, 1 }
 0x27a   : > { %7792 = vmatmul.mubr.f32.gmra.mrb[14].mxu0 %v3950_v24  ;;  %9071 = vmatprep.subr.bf16.mxu1 %v8782_v25 }
 0x27b   : > { %8793 = vmatpush3.bf16.msra.mxu0 %v8790_v27  ;;  %7826 = vmatprep.mubr.f32.mxu0 %v10895_v58  ;;  %v6073_v58 = vld [vmem:[%s11409_s4 + $0x470] sm:$0xff] }
 0x27c   : > { %8182 = vmatmul.mubr.f32.gmra.mrb[10].mxu1 %v10760_v45  ;;  %8795 = vmatprep.subr.bf16.mxu0 %v8794_v1  ;;  %v8802_v45 = vpack.c.bf16 %v6072_v51, %v6071_v14 }
 0x27d   : > { %8184 = vmatprep.mubr.f32.mxu1 %v10775_v39  ;;  %9073 = vmatpush3.bf16.msra.mxu1 %v8782_v25  ;;  %v5268_v39 = vsel %vm374_vm2, %v5266_v8, %v5267_v55 }
 0x27e   : > { %9075 = vmatprep.subr.bf16.mxu1 %v8786_v46 }
 0x27f   : > { %8797 = vmatpush3.bf16.msra.mxu0 %v8794_v1 }
 0x280   : > { %8185 = vmatmul.mubr.f32.gmra.mrb[12].mxu1 %v10780_v56  ;;  %8799 = vmatprep.subr.bf16.mxu0 %v8798_v41  ;;  %v8806_v56 = vpack.c.bf16 %v6074_v17, %v6073_v58 }
 0x281   : > { %8187 = vmatprep.mubr.f32.mxu1 %v11154_v47  ;;  %9077 = vmatpush3.bf16.msra.mxu1 %v8786_v46  ;;  %v5399_v47 = vrot.slane %v11273_v49, 2 }
 0x282   : > { %9079 = vmatprep.subr.bf16.mxu1 %v8790_v27 }
 0x283   : > { %8801 = vmatpush3.bf16.msra.mxu0 %v8798_v41 }
 0x284   : > { %8188 = vmatmul.mubr.f32.gmra.mrb[14].mxu1 %v5268_v39  ;;  %8803 = vmatprep.subr.bf16.mxu0 %v8802_v45 }
 0x285   : > { %9081 = vmatpush3.bf16.msra.mxu1 %v8790_v27  ;;  %8222 = vmatprep.mubr.f32.mxu1 %v10953_v9  ;;  %v4083_v9 = vrot.slane %v11057_v29, 2 }
 0x286   : > { %9083 = vmatprep.subr.bf16.mxu1 %v8794_v1 }
 0x287   : > { %8805 = vmatpush3.bf16.msra.mxu0 %v8802_v45 }
 0x288   : > { %8807 = vmatprep.subr.bf16.mxu0 %v8806_v56 }
 0x289   : > { %9085 = vmatpush3.bf16.msra.mxu1 %v8794_v1 }
 0x28a   : > { %9087 = vmatprep.subr.bf16.mxu1 %v8798_v41 }
 0x28b   : > { %8809 = vmatpush3.bf16.msra.mxu0 %v8806_v56 }
 0x28d   : > { %9089 = vmatpush3.bf16.msra.mxu1 %v8798_v41 }
 0x28e   : > { %7827 = vmatmul.mubr.f32.vlgmr.msra.gmra.mrb[8].mxu0 %v10905_v43  ;;  %9091 = vmatprep.subr.bf16.mxu1 %v8802_v45  ;;  %v4084_v43 = vsel %vm650_vm3, %v5399_v47, %v4083_v9 }
 0x28f   : > { %7829 = vmatprep.mubr.f32.mxu0 %v10917_v18  ;;  %v5400_v18 = vrot.slane %v4286_v16, 2 }
 0x291   : > { %9093 = vmatpush3.bf16.msra.mxu1 %v8802_v45 }
 0x292   : > { %7830 = vmatmul.mubr.f32.gmra.mrb[10].mxu0 %v10929_v7  ;;  %9095 = vmatprep.subr.bf16.mxu1 %v8806_v56  ;;  %v5401_v7 = vsel %vm650_vm3, %v5399_v47, %v5400_v18 }
 0x293   : > { %7832 = vmatprep.mubr.f32.mxu0 %v10941_v33 }
 0x295   : > { %9097 = vmatpush3.bf16.msra.mxu1 %v8806_v56 }
 0x296   : > { %7833 = vmatmul.mubr.f32.gmra.mrb[12].mxu0 %v10960_v54 }
 0x297   : > { %7835 = vmatprep.mubr.f32.mxu0 %v11199_v42 }
 0x298   : > { %8223 = vmatmul.mubr.f32.vlgmr.msra.gmra.mrb[8].mxu1 %v10972_v13  ;;  %v6075_v13 = vld [vmem:[%s11410_s5] ss:$0 sm:$0xff] }
 0x299   : > { %8225 = vmatprep.mubr.f32.mxu1 %v10978_v53 }
 0x29a   : > { %7836 = vmatmul.mubr.f32.gmra.mrb[14].mxu0 %v4084_v43 }
 0x29c   : > { %8226 = vmatmul.mubr.f32.gmra.mrb[10].mxu1 %v10992_v62 }
 0x29d   : > { %8228 = vmatprep.mubr.f32.mxu1 %v10998_v2 }
 0x2a0   : > { %8229 = vmatmul.mubr.f32.gmra.mrb[12].mxu1 %v11009_v52 }
 0x2a1   : > { %8231 = vmatprep.mubr.f32.mxu1 %v11228_v60 }
 0x2a4   : > { %8232 = vmatmul.mubr.f32.gmra.mrb[14].mxu1 %v5401_v7 }
 0x361   : > { %v7828_v33 = vpop.f32.mrb[8].mxu0 }
 0x362   : > { %v4169_v54 = vpop.f32.mrb[9].mxu0  ;;  %v4224_v2 = vadd.f32 %v7828_v33, %v6075_v13 }
 0x363   : > { %v4223_v52 = vadd.f32 %v6075_v13, %v4169_v54 }
 0x365   : > { %v7831_v29 = vpop.f32.mrb[10].mxu0 }
 0x366   : > { %v4179_v42 = vpop.f32.mrb[11].mxu0  ;;  %v4226_v49 = vadd.f32 %v7831_v29, %v6075_v13 }
 0x367   : > { %v4225_v4 = vadd.f32 %v6075_v13, %v4179_v42 }
 0x369   : > { %v7834_v53 = vpop.f32.mrb[12].mxu0 }
 0x36a   : > { %v4189_v62 = vpop.f32.mrb[13].mxu0  ;;  %v4228_v40 = vadd.f32 %v7834_v53, %v6075_v13 }
 0x36b   : > { %v8224_v36 = vpop.f32.mrb[8].mxu1  ;;  %v4227_v19 = vadd.f32 %v6075_v13, %v4189_v62 }
 0x36c   : > { %v5540_v10 = vadd.f32 %v8224_v36, %v6075_v13  ;;  %v5485_v6 = vpop.f32.mrb[9].mxu1 }
 0x36d   : > { %v5539_v23 = vadd.f32 %v6075_v13, %v5485_v6  ;;  %v7837_v60 = vpop.f32.mrb[14].mxu0 }
 0x36e   : > { %v5548_v26 = vsub.f32 %v4224_v2, %v5540_v10  ;;  %v4199_v0 = vpop.f32.mrb[15].mxu0  ;;  %v4230_v8 = vadd.f32 %v7837_v60, %v6075_v13 }
 0x36f   : > { %v5547_v20 = vsub.f32 %v4223_v52, %v5539_v23  ;;  %v8227_v28 = vpop.f32.mrb[10].mxu1  ;;  %v4229_v15 = vadd.f32 %v6075_v13, %v4199_v0 }
 0x370   : > { %v5556_v21 = vmul.f32 %v5548_v26, %v5548_v26  ;;  %v5542_v11 = vadd.f32 %v8227_v28, %v6075_v13  ;;  %v5495_v63 = vpop.f32.mrb[11].mxu1 }
 0x371   : > { %v5555_v50 = vmul.f32 %v5547_v20, %v5547_v20  ;;  %v5541_v3 = vadd.f32 %v6075_v13, %v5495_v63 }
 0x372   : > { %v5550_v59 = vsub.f32 %v4226_v49, %v5542_v11 }
 0x373   : > { %v5563_v31 = vadd.f32 %v5556_v21, %v5555_v50  ;;  %v5549_v48 = vsub.f32 %v4225_v4, %v5541_v3  ;;  %v8230_v34 = vpop.f32.mrb[12].mxu1 }
 0x374   : > { %v5544_v38 = vadd.f32 %v8230_v34, %v6075_v13  ;;  %v5505_v57 = vpop.f32.mrb[13].mxu1  ;;  %v5558_v5 = vmul.f32 %v5550_v59, %v5550_v59 }
 0x375   : > { %v5557_v12 = vmul.f32 %v5549_v48, %v5549_v48  ;;  %v5543_v25 = vadd.f32 %v6075_v13, %v5505_v57 }
 0x376   : > { %v5552_v22 = vsub.f32 %v4228_v40, %v5544_v38 }
 0x377   : > { %v5564_v46 = vadd.f32 %v5563_v31, %v5557_v12  ;;  %v5551_v61 = vsub.f32 %v4227_v19, %v5543_v25  ;;  %v8233_v35 = vpop.f32.mrb[14].mxu1 }
 0x378   : > { %v5546_v37 = vadd.f32 %v8233_v35, %v6075_v13  ;;  %v5515_v27 = vpop.f32.mrb[15].mxu1  ;;  %v5560_v30 = vmul.f32 %v5552_v22, %v5552_v22 }
 0x379   : > { %v5559_v44 = vmul.f32 %v5551_v61, %v5551_v61  ;;  %v5565_v24 = vadd.f32 %v5564_v46, %v5558_v5  ;;  %v5545_v1 = vadd.f32 %v6075_v13, %v5515_v27 }
 0x37a   : > { %v5554_v32 = vsub.f32 %v4230_v8, %v5546_v37 }
 0x37b   : > { %v5566_v16 = vadd.f32 %v5565_v24, %v5559_v44  ;;  %v5553_v41 = vsub.f32 %v4229_v15, %v5545_v1 }
 0x37c   : > { %v5562_v51 = vmul.f32 %v5554_v32, %v5554_v32 }
 0x37d   : > { %v5561_v55 = vmul.f32 %v5553_v41, %v5553_v41  ;;  %v5567_v14 = vadd.f32 %v5566_v16, %v5560_v30 }
 0x37f   : > { %v5568_v45 = vadd.f32 %v5567_v14, %v5561_v55 }
 0x381   : > { %v5569_v39 = vadd.f32 %v5568_v45, %v5562_v51 }
 0x383   : > { %5570 = vadd.xlane.f32.xlu0 %v5569_v39 }
 0x384   : > { %9402 = shalt.err (!%p9399_p12)
}
 0x385   : > { %s9434_s16 = smov [#allocation4]   ;;  %s5599_s18 = sshll.u32 %s11412_s7, 4  ;;  %s5600_s18 = int_to_ptr.vmem [resolvable:$true] %s5599_s18 }
 0x386   : > { %9359 = dma.smem_to_vmem (%p9366_p5), %s9434_s16, 16, %s5589_s14, [#allocation5]  }
 0x387   : > { %s6216_s19 = scalar_lea.smem [#allocation6], %s9431_s24  ;;  %s9403_s22 = scalar_lea.vmem %s5600_s18, 16 }
 0x388   : > { %s6217_s20 = scalar_lea.smem %s6216_s19, 4294967295 [#allocation6]  ;;  %p9404_p13 = scmp.ne.s32.totalorder %s5600_s18, %s9403_s22 }
 0x389   : > { %p9410_p2 = scmp.lt.s32.totalorder %s5600_s18, %s5600_s18  ;;  %p9411_p3 = scmp.lt.s32.totalorder %s9403_s22, %s9403_s22 }
 0x38a   : > { %p9405_p0 = pnand %p9404_p13, %p9366_p5 }
 0x38b   : > { %p9412_p4 = por %p9411_p3, %p9410_p2 }
 0x38c   : > { %p9406_p1 = pneg %p9405_p0 }
 0x38e   : > { %p9413_p6 = pnand %p9412_p4, %p9406_p1 }
 0x410   : > { %v5571_v58 = vpop.xlane.xlu0 %5570 }
 0x411   : > { %v5572_v17 = vrot.slane %v5571_v58, 4 }
 0x413   : > { %v5573_v56 = vadd.f32 %v5572_v17, %v5571_v58 }
 0x415   : > { %v5574_v47 = vrot.slane %v5573_v56, 2 }
 0x417   : > { %v5575_v9 = vadd.f32 %v5574_v47, %v5573_v56 }
 0x419   : > { %v5576_v43 = vrot.slane %v5575_v9, 1 }
 0x41b   : > { %v5577_v18 = vadd.f32 %v5576_v43, %v5575_v9 }
 0x41d   : > { %9356 = vpush %v5577_v18 }
 0x44e   : > { %s9357_s21 = spop %9356 }
 0x44f   : > { %5580 = sst [smem:[%s6217_s20]] %s9357_s21 }
 0x450   : > { %9416 = shalt.err (!%p9413_p6)
}
 0x451   : > { %s9435_s23 = smov [#allocation6]  }
 0x452   : > { %9361 = dma.smem_to_vmem (%p9366_p5), %s9435_s23, 16, %s5600_s18, [#allocation7]  }
 0x453   : > { %9422 = dma.done.wait (%p9366_p5), [#allocation5], 16  }
 0x454   : > { %9424 = vsyncadd (%p9366_p5), [#allocation5], 4294967280 }
 0x455   : > { %9426 = dma.done.wait (%p9366_p5), [#allocation7], 16  }
 0x456   : > { %9428 = vsyncadd (%p9366_p5), [#allocation7], 4294967280 }
 0x457   : > { %5611 = sfence }
 0x458 PF: > { %s20_s24 = sadd.s32 1, %s9431_s24  }
 0x459   : > { %p17_p7 = scmp.ge.s32.totalorder %s20_s24, 4  }
 0x45b   :  { %19 = sbr.rel (!%p17_p7) target bundleno = 2 (0x2), region = 102 }
 0x462   :  { %5617 = vsyncpa [#allocation5], 1 }
 0x463   :  { %5619 = vsyncpa [#allocation5 + $0x1], 1 }
 0x464   :  { %5620 = vsyncpa [#allocation7], 1 }

// kernel: perceptual_loss.2
= control target key start
LH: loop header
LB: loop body
LE: loop exit
PB: predicated region body
PF: predicated region fallthrough
CT: control target
= control target key end

     0   :  { %s9497_s21 = smov 0   ;;  %s12210_s0 = inlined_call_operand.vmem [shape: f32[4,16,16,3], index: 0, kind: input, shape index: {}]   ;;  %s12211_s1 = inlined_call_operand.vmem [shape: f32[1,3], index: 1, kind: input, shape index: {}]   ;;  %s12212_s2 = inlined_call_operand.vmem [shape: f32[9,3,64], index: 2, kind: input, shape index: {}]   ;;  %s12213_s3 = inlined_call_operand.vmem [shape: f32[1,64], index: 3, kind: input, shape index: {}]   ;;  %s12214_s4 = inlined_call_operand.vmem [shape: f32[9,64,64], index: 4, kind: input, shape index: {}]   ;;  %s12215_s5 = inlined_call_operand.vmem [shape: f32[1,64], index: 5, kind: input, shape index: {}]   ;;  %s12216_s6 = inlined_call_operand.vmem [shape: f32[4,8,8,64], index: 6, kind: output, shape index: {}]  }
   0x1 LB: > { %s6410_s22 = sadd.s32 4294967295, %s9459_s21   ;;  %p6414_p0 = scmp.ge.s32.totalorder %s9459_s21, 1  ;;  %s9459_s21 = sphi %s9497_s21, %s16_s21  }
   0x2   : > { %p212_p1 = scmp.lt.s32.totalorder %s9459_s21, 5 }
   0x4   : > { %p213_p2 = pnand %p6414_p0, %p212_p1 }
   0x6   : > { %216 = sbr.rel (%p213_p2) target bundleno = 1589 (0x635), region = 44 }
   0xd   : > { %v6420_v0 = vld [vmem:[%s12212_s2 + $0x4] sm:$0x7]  ;;  %vm662_vm0 = vcmask 1042432   ;;  %vm323_vm1 = vcmask 23552   ;;  %v12217_v1 = vmov 0.0   ;;  %vm326_vm2 = vcmask 17408  }
   0xe   : > { %7740 = vmatprep.subr.msk.mxu0 %vm662_vm0, %v6420_v0  ;;  %324 = vst.msk [vmem:[#allocation2] sm:$0xff] %vm323_vm1, %v12217_v1  ;;  %325 = vst.msk [vmem:[#allocation2 + $0x8] sm:$0xff] %vm323_vm1, %v12217_v1  ;;  %v9584_v2 = vld [vmem:[%s12212_s2] sm:$0x7]  ;;  %p9588_p3 = scmp.lt.s32.totalorder %s6410_s22, 3  ;;  %vm515_vm3 = vcmask 1046528  }
   0xf   : > { %328 = vst.msk [vmem:[#allocation2 + $0x18] sm:$0xff] %vm323_vm1, %v12217_v1  ;;  %329 = vst.msk [vmem:[#allocation2 + $0x20] sm:$0xff] %vm323_vm1, %v12217_v1  ;;  %7741 = vmatpush3.msk.msra.mxu0 %vm662_vm0, %v6420_v0  ;;  %v9641_v3 = vld [vmem:[%s12211_s1] ss:$0 sm:$0xff]  ;;  %v9678_v25 = vld [vmem:[%s12212_s2 + $0x8] sm:$0x7] }
  0x10   : > { %331 = vst.msk [vmem:[#allocation2 + $0x30] sm:$0xff] %vm323_vm1, %v12217_v1  ;;  %332 = vst.msk [vmem:[#allocation2 + $0x38] sm:$0xff] %vm323_vm1, %v12217_v1  ;;  %7790 = vmatprep.subr.msk.mxu0 %vm662_vm0, %v9584_v2  ;;  %s12597_s22 = smov (!%p9588_p3, %s6410_s22), 3  ;;  %vm1183_vm4 = vcmask 1045504   ;;  %vm3283_vm5 = vcmask 523264   ;;  %vm3286_vm6 = vcmask 517120  }
  0x11   : > { %334 = vst.msk [vmem:[#allocation2 + $0x48] sm:$0xff] %vm323_vm1, %v12217_v1  ;;  %335 = vst.msk [vmem:[#allocation2 + $0x50] sm:$0xff] %vm323_vm1, %v12217_v1  ;;  %s7081_s28 = sshll.u32 %s12597_s22, 8  ;;  %s7082_s18 = sshll.u32 %s12597_s22, 6 }
  0x12   : > { %337 = vst.msk [vmem:[#allocation2 + $0x60] sm:$0xff] %vm323_vm1, %v12217_v1  ;;  %338 = vst.msk [vmem:[#allocation2 + $0x68] sm:$0xff] %vm323_vm1, %v12217_v1  ;;  %s9646_s9 = scalar_lea.vmem %s12210_s0, %s7081_s28  ;;  %s12151_s23 = scalar_lea.vmem %s12216_s6, %s7082_s18 }
  0x13   : > { %340 = vst.msk [vmem:[#allocation2 + $0x78] sm:$0xff] %vm323_vm1, %v12217_v1  ;;  %341 = vst.msk [vmem:[#allocation2 + $0x80] sm:$0xff] %vm323_vm1, %v12217_v1  ;;  %v252_v4 = vld [vmem:[%s9646_s9] sm:$0xff]  ;;  %v253_v5 = vld [vmem:[%s9646_s9 + $0x8] sm:$0xff] }
  0x14   : > { %343 = vst.msk [vmem:[#allocation2 + $0x90] sm:$0xff] %vm323_vm1, %v12217_v1  ;;  %344 = vst.msk [vmem:[#allocation2 + $0x98] sm:$0xff] %vm323_vm1, %v12217_v1  ;;  %v254_v6 = vld [vmem:[%s9646_s9 + $0x10] sm:$0xff]  ;;  %v291_v9 = vsub.f32 %v252_v4, %v9641_v3  ;;  %v292_v10 = vsub.f32 %v253_v5, %v9641_v3  ;;  %v255_v11 = vld [vmem:[%s9646_s9 + $0x18] sm:$0xff] }
  0x15   : > { %346 = vst.msk [vmem:[#allocation2 + $0xa8] sm:$0xff] %vm323_vm1, %v12217_v1  ;;  %347 = vst.msk [vmem:[#allocation2 + $0xb0] sm:$0xff] %vm323_vm1, %v12217_v1  ;;  %v9651_v7 = vld [vmem:[#allocation2] sm:$0xff]  ;;  %v9653_v8 = vld [vmem:[#allocation2 + $0x8] sm:$0xff]  ;;  %v293_v12 = vsub.f32 %v254_v6, %v9641_v3  ;;  %v294_v16 = vsub.f32 %v255_v11, %v9641_v3 }
  0x16   : > { %349 = vst.msk [vmem:[#allocation2 + $0xc0] sm:$0xff] %vm323_vm1, %v12217_v1  ;;  %350 = vst.msk [vmem:[#allocation2 + $0xc8] sm:$0xff] %vm323_vm1, %v12217_v1  ;;  %v516_v13 = vrot.slane %v9651_v7, 1  ;;  %v517_v14 = vrot.slane %v9653_v8, 1  ;;  %v256_v17 = vld [vmem:[%s9646_s9 + $0x20] sm:$0xff]  ;;  %v257_v18 = vld [vmem:[%s9646_s9 + $0x28] sm:$0xff] }
  0x17   : > { %352 = vst.msk [vmem:[#allocation2 + $0xd8] sm:$0xff] %vm323_vm1, %v12217_v1  ;;  %353 = vst.msk [vmem:[#allocation2 + $0xe0] sm:$0xff] %vm323_vm1, %v12217_v1  ;;  %v295_v20 = vsub.f32 %v256_v17, %v9641_v3  ;;  %v296_v21 = vsub.f32 %v257_v18, %v9641_v3  ;;  %v258_v22 = vld [vmem:[%s9646_s9 + $0x30] sm:$0xff]  ;;  %v259_v23 = vld [vmem:[%s9646_s9 + $0x38] sm:$0xff] }
  0x18   : > { %355 = vst.msk [vmem:[#allocation2 + $0xf0] sm:$0xff] %vm323_vm1, %v12217_v1  ;;  %356 = vst.msk [vmem:[#allocation2 + $0xf8] sm:$0xff] %vm323_vm1, %v12217_v1  ;;  %v260_v24 = vld [vmem:[%s9646_s9 + $0x40] sm:$0xff]  ;;  %v518_v26 = vsel %vm515_vm3, %v516_v13, %v517_v14  ;;  %v297_v27 = vsub.f32 %v258_v22, %v9641_v3  ;;  %v298_v28 = vsub.f32 %v259_v23, %v9641_v3  ;;  %v261_v29 = vld [vmem:[%s9646_s9 + $0x48] sm:$0xff] }
  0x19   : > { %358 = vst.msk [vmem:[#allocation2 + $0x108] sm:$0xff] %vm323_vm1, %v12217_v1  ;;  %359 = vst.msk [vmem:[#allocation2 + $0x110] sm:$0xff] %vm323_vm1, %v12217_v1  ;;  %v299_v30 = vsub.f32 %v260_v24, %v9641_v3  ;;  %v262_v31 = vld [vmem:[%s9646_s9 + $0x50] sm:$0xff]  ;;  %v263_v32 = vld [vmem:[%s9646_s9 + $0x58] sm:$0xff]  ;;  %7742 = vmatprep.mubr.msk.f32.mxu0 %vm323_vm1, %v518_v26  ;;  %v300_v34 = vsub.f32 %v261_v29, %v9641_v3 }
  0x1a   : > { %361 = vst.msk [vmem:[#allocation2 + $0x120] sm:$0xff] %vm323_vm1, %v12217_v1  ;;  %362 = vst.msk [vmem:[#allocation2 + $0x128] sm:$0xff] %vm323_vm1, %v12217_v1  ;;  %v301_v35 = vsub.f32 %v262_v31, %v9641_v3  ;;  %v302_v36 = vsub.f32 %v263_v32, %v9641_v3  ;;  %v264_v37 = vld [vmem:[%s9646_s9 + $0x60] sm:$0xff]  ;;  %v265_v38 = vld [vmem:[%s9646_s9 + $0x68] sm:$0xff] }
  0x1b   : > { %364 = vst.msk [vmem:[#allocation2 + $0x138] sm:$0xff] %vm323_vm1, %v12217_v1  ;;  %365 = vst.msk [vmem:[#allocation2 + $0x140] sm:$0xff] %vm323_vm1, %v12217_v1  ;;  %v266_v39 = vld [vmem:[%s9646_s9 + $0x70] sm:$0xff]  ;;  %v303_v40 = vsub.f32 %v264_v37, %v9641_v3  ;;  %v304_v41 = vsub.f32 %v265_v38, %v9641_v3  ;;  %v267_v42 = vld [vmem:[%s9646_s9 + $0x78] sm:$0xff] }
  0x1c   : > { %367 = vst.msk [vmem:[#allocation2 + $0x150] sm:$0xff] %vm323_vm1, %v12217_v1  ;;  %368 = vst.msk [vmem:[#allocation2 + $0x158] sm:$0xff] %vm323_vm1, %v12217_v1  ;;  %v305_v43 = vsub.f32 %v266_v39, %v9641_v3  ;;  %v268_v44 = vld [vmem:[%s9646_s9 + $0x80] sm:$0xff]  ;;  %v269_v45 = vld [vmem:[%s9646_s9 + $0x88] sm:$0xff]  ;;  %v306_v46 = vsub.f32 %v267_v42, %v9641_v3 }
  0x1d   : > { %370 = vst.msk [vmem:[#allocation2 + $0x168] sm:$0xff] %vm323_vm1, %v12217_v1  ;;  %371 = vst.msk [vmem:[#allocation2 + $0x170] sm:$0xff] %vm323_vm1, %v12217_v1  ;;  %v307_v47 = vsub.f32 %v268_v44, %v9641_v3  ;;  %v308_v48 = vsub.f32 %v269_v45, %v9641_v3  ;;  %v270_v49 = vld [vmem:[%s9646_s9 + $0x90] sm:$0xff]  ;;  %v271_v50 = vld [vmem:[%s9646_s9 + $0x98] sm:$0xff] }
  0x1e   : > { %373 = vst.msk [vmem:[#allocation2 + $0x180] sm:$0xff] %vm323_vm1, %v12217_v1  ;;  %374 = vst.msk [vmem:[#allocation2 + $0x188] sm:$0xff] %vm323_vm1, %v12217_v1  ;;  %v272_v51 = vld [vmem:[%s9646_s9 + $0xa0] sm:$0xff]  ;;  %v309_v52 = vsub.f32 %v270_v49, %v9641_v3  ;;  %v310_v53 = vsub.f32 %v271_v50, %v9641_v3  ;;  %v273_v54 = vld [vmem:[%s9646_s9 + $0xa8] sm:$0xff] }
  0x1f   : > { %376 = vst.msk [vmem:[#allocation2 + $0x198] sm:$0xff] %vm323_vm1, %v12217_v1  ;;  %377 = vst.msk [vmem:[#allocation2 + $0x1a0] sm:$0xff] %vm323_vm1, %v12217_v1  ;;  %v311_v55 = vsub.f32 %v272_v51, %v9641_v3  ;;  %v274_v56 = vld [vmem:[%s9646_s9 + $0xb0] sm:$0xff]  ;;  %v275_v57 = vld [vmem:[%s9646_s9 + $0xb8] sm:$0xff]  ;;  %v312_v58 = vsub.f32 %v273_v54, %v9641_v3 }
  0x20   : > { %327 = vst.msk [vmem:[#allocation2 + $0x10] sm:$0x3] %vm326_vm2, %v12217_v1  ;;  %330 = vst.msk [vmem:[#allocation2 + $0x28] sm:$0x3] %vm326_vm2, %v12217_v1  ;;  %v313_v59 = vsub.f32 %v274_v56, %v9641_v3  ;;  %v314_v60 = vsub.f32 %v275_v57, %v9641_v3  ;;  %v276_v61 = vld [vmem:[%s9646_s9 + $0xc0] sm:$0xff]  ;;  %v277_v62 = vld [vmem:[%s9646_s9 + $0xc8] sm:$0xff] }
  0x21   : > { %333 = vst.msk [vmem:[#allocation2 + $0x40] sm:$0x3] %vm326_vm2, %v12217_v1  ;;  %336 = vst.msk [vmem:[#allocation2 + $0x58] sm:$0x3] %vm326_vm2, %v12217_v1  ;;  %v278_v63 = vld [vmem:[%s9646_s9 + $0xd0] sm:$0xff]  ;;  %v315_v5 = vsub.f32 %v276_v61, %v9641_v3  ;;  %v316_v6 = vsub.f32 %v277_v62, %v9641_v3  ;;  %v280_v57 = vld [vmem:[%s9646_s9 + $0xe0] sm:$0xff] }
  0x22   : > { %339 = vst.msk [vmem:[#allocation2 + $0x70] sm:$0x3] %vm326_vm2, %v12217_v1  ;;  %342 = vst.msk [vmem:[#allocation2 + $0x88] sm:$0x3] %vm326_vm2, %v12217_v1  ;;  %v319_v61 = vsub.f32 %v280_v57, %v9641_v3 }
  0x23   : > { %345 = vst.msk [vmem:[#allocation2 + $0xa0] sm:$0x3] %vm326_vm2, %v12217_v1  ;;  %348 = vst.msk [vmem:[#allocation2 + $0xb8] sm:$0x3] %vm326_vm2, %v12217_v1 }
  0x24   : > { %351 = vst.msk [vmem:[#allocation2 + $0xd0] sm:$0x3] %vm326_vm2, %v12217_v1  ;;  %354 = vst.msk [vmem:[#allocation2 + $0xe8] sm:$0x3] %vm326_vm2, %v12217_v1 }
  0x25   : > { %357 = vst.msk [vmem:[#allocation2 + $0x100] sm:$0x3] %vm326_vm2, %v12217_v1  ;;  %360 = vst.msk [vmem:[#allocation2 + $0x118] sm:$0x3] %vm326_vm2, %v12217_v1 }
  0x26   : > { %363 = vst.msk [vmem:[#allocation2 + $0x130] sm:$0x3] %vm326_vm2, %v12217_v1  ;;  %366 = vst.msk [vmem:[#allocation2 + $0x148] sm:$0x3] %vm326_vm2, %v12217_v1 }
  0x27   : > { %369 = vst.msk [vmem:[#allocation2 + $0x160] sm:$0x3] %vm326_vm2, %v12217_v1  ;;  %372 = vst.msk [vmem:[#allocation2 + $0x178] sm:$0x3] %vm326_vm2, %v12217_v1  ;;  %v9661_v15 = vld [vmem:[#allocation2 + $0x10] sm:$0x3] }
  0x28   : > { %375 = vst.msk [vmem:[#allocation2 + $0x190] sm:$0x3] %vm326_vm2, %v12217_v1  ;;  %378 = vst.msk [vmem:[#allocation2 + $0x1a8] sm:$0x3] %vm326_vm2, %v12217_v1  ;;  %v519_v19 = vrot.slane %v9661_v15, 1 }
  0x29   : > { %380 = vst.msk [vmem:[#allocation2 + $0x19] sm:$0xff] %vm323_vm1, %v291_v9  ;;  %381 = vst.msk [vmem:[#allocation2 + $0x21] sm:$0xff] %vm323_vm1, %v292_v10  ;;  %v317_v9 = vsub.f32 %v278_v63, %v9641_v3 }
  0x2a   : > { %382 = vst.msk [vmem:[#allocation2 + $0x31] sm:$0xff] %vm323_vm1, %v293_v12  ;;  %383 = vst.msk [vmem:[#allocation2 + $0x39] sm:$0xff] %vm323_vm1, %v294_v16  ;;  %v520_v33 = vsel %vm515_vm3, %v517_v14, %v519_v19  ;;  %v279_v16 = vld [vmem:[%s9646_s9 + $0xd8] sm:$0xff] }
  0x2b   : > { %384 = vst.msk [vmem:[#allocation2 + $0x49] sm:$0xff] %vm323_vm1, %v295_v20  ;;  %385 = vst.msk [vmem:[#allocation2 + $0x51] sm:$0xff] %vm323_vm1, %v296_v21  ;;  %7743 = vmatmul.mubr.msk.f32.vlgmr.msra.gmra.mrb[0].mxu0 %vm323_vm1, %v520_v33  ;;  %v318_v22 = vsub.f32 %v279_v16, %v9641_v3 }
  0x2c   : > { %386 = vst.msk [vmem:[#allocation2 + $0x61] sm:$0xff] %vm323_vm1, %v297_v27  ;;  %387 = vst.msk [vmem:[#allocation2 + $0x69] sm:$0xff] %vm323_vm1, %v298_v28  ;;  %7791 = vmatpush3.msk.msra.mxu0 %vm662_vm0, %v9584_v2 }
  0x2d   : > { %388 = vst.msk [vmem:[#allocation2 + $0x79] sm:$0xff] %vm323_vm1, %v299_v30  ;;  %389 = vst.msk [vmem:[#allocation2 + $0x81] sm:$0xff] %vm323_vm1, %v300_v34  ;;  %7840 = vmatprep.subr.msk.mxu0 %vm662_vm0, %v9678_v25 }
  0x2e   : > { %390 = vst.msk [vmem:[#allocation2 + $0x91] sm:$0xff] %vm323_vm1, %v301_v35  ;;  %391 = vst.msk [vmem:[#allocation2 + $0x99] sm:$0xff] %vm323_vm1, %v302_v36 }
  0x2f   : > { %392 = vst.msk [vmem:[#allocation2 + $0xa9] sm:$0xff] %vm323_vm1, %v303_v40  ;;  %393 = vst.msk [vmem:[#allocation2 + $0xb1] sm:$0xff] %vm323_vm1, %v304_v41 }
  0x30   : > { %394 = vst.msk [vmem:[#allocation2 + $0xc1] sm:$0xff] %vm323_vm1, %v305_v43  ;;  %395 = vst.msk [vmem:[#allocation2 + $0xc9] sm:$0xff] %vm323_vm1, %v306_v46  ;;  %v9739_v0 = vld [vmem:[#allocation2 + $0x18] sm:$0xff]  ;;  %v9741_v2 = vld [vmem:[#allocation2 + $0x20] sm:$0xff] }
  0x31   : > { %396 = vst.msk [vmem:[#allocation2 + $0xd9] sm:$0xff] %vm323_vm1, %v307_v47  ;;  %397 = vst.msk [vmem:[#allocation2 + $0xe1] sm:$0xff] %vm323_vm1, %v308_v48  ;;  %v9743_v4 = vld [vmem:[#allocation2 + $0x28] sm:$0x3]  ;;  %v521_v10 = vrot.slane %v9739_v0, 1  ;;  %v522_v11 = vrot.slane %v9741_v2, 1 }
  0x32   : > { %398 = vst.msk [vmem:[#allocation2 + $0xf1] sm:$0xff] %vm323_vm1, %v309_v52  ;;  %399 = vst.msk [vmem:[#allocation2 + $0xf9] sm:$0xff] %vm323_vm1, %v310_v53  ;;  %v524_v12 = vrot.slane %v9743_v4, 1  ;;  %v9754_v13 = vld [vmem:[#allocation2 + $0x30] sm:$0xff]  ;;  %v9756_v14 = vld [vmem:[#allocation2 + $0x38] sm:$0xff] }
  0x33   : > { %400 = vst.msk [vmem:[#allocation2 + $0x109] sm:$0xff] %vm323_vm1, %v311_v55  ;;  %401 = vst.msk [vmem:[#allocation2 + $0x111] sm:$0xff] %vm323_vm1, %v312_v58  ;;  %v526_v17 = vrot.slane %v9754_v13, 1  ;;  %v527_v18 = vrot.slane %v9756_v14, 1  ;;  %v9764_v19 = vld [vmem:[#allocation2 + $0x40] sm:$0x3]  ;;  %v9775_v23 = vsel %vm515_vm3, %v521_v10, %v522_v11 }
  0x34   : > { %402 = vst.msk [vmem:[#allocation2 + $0x121] sm:$0xff] %vm323_vm1, %v313_v59  ;;  %403 = vst.msk [vmem:[#allocation2 + $0x129] sm:$0xff] %vm323_vm1, %v314_v60  ;;  %v9766_v20 = vld [vmem:[#allocation2 + $0x48] sm:$0xff]  ;;  %v9768_v21 = vld [vmem:[#allocation2 + $0x50] sm:$0xff]  ;;  %v9778_v24 = vsel %vm515_vm3, %v522_v11, %v524_v12  ;;  %v529_v26 = vrot.slane %v9764_v19, 1  ;;  %7745 = vmatprep.mubr.msk.f32.mxu0 %vm323_vm1, %v9775_v23 }
  0x35   : > { %404 = vst.msk [vmem:[#allocation2 + $0x139] sm:$0xff] %vm323_vm1, %v315_v5  ;;  %405 = vst.msk [vmem:[#allocation2 + $0x141] sm:$0xff] %vm323_vm1, %v316_v6  ;;  %v531_v27 = vrot.slane %v9766_v20, 1  ;;  %v9782_v28 = vld [vmem:[#allocation2 + $0x58] sm:$0x3]  ;;  %v9787_v29 = vsel %vm515_vm3, %v526_v17, %v527_v18  ;;  %v532_v30 = vrot.slane %v9768_v21, 1  ;;  %7746 = vmatmul.mubr.msk.f32.gmra.mrb[2].mxu0 %vm323_vm1, %v9778_v24 }
  0x36   : > { %406 = vst.msk [vmem:[#allocation2 + $0x151] sm:$0xff] %vm323_vm1, %v317_v9  ;;  %v9790_v31 = vld [vmem:[#allocation2 + $0x60] sm:$0xff]  ;;  %v9792_v32 = vld [vmem:[#allocation2 + $0x68] sm:$0xff]  ;;  %407 = vst.msk [vmem:[#allocation2 + $0x159] sm:$0xff] %vm323_vm1, %v318_v22  ;;  %7748 = vmatprep.mubr.msk.f32.mxu0 %vm323_vm1, %v9787_v29  ;;  %v9800_v33 = vsel %vm515_vm3, %v527_v18, %v529_v26  ;;  %v534_v34 = vrot.slane %v9782_v28, 1 }
  0x37   : > { %12377 = vst [vmem:[#allocation5_spill] sm:$0xff] %v9800_v33  ;;  %v9804_v35 = vsel %vm515_vm3, %v531_v27, %v532_v30  ;;  %v536_v36 = vrot.slane %v9790_v31, 1  ;;  %v537_v37 = vrot.slane %v9792_v32, 1  ;;  %v9808_v38 = vld [vmem:[#allocation2 + $0x70] sm:$0x3]  ;;  %v9810_v39 = vld [vmem:[#allocation2 + $0x78] sm:$0xff] }
  0x38   : > { %12378 = vst [vmem:[#allocation6_spill] sm:$0xff] %v9804_v35  ;;  %v9812_v40 = vld [vmem:[#allocation2 + $0x80] sm:$0xff]  ;;  %v9819_v41 = vsel %vm515_vm3, %v532_v30, %v534_v34  ;;  %v539_v42 = vrot.slane %v9808_v38, 1  ;;  %v541_v44 = vrot.slane %v9810_v39, 1  ;;  %v9827_v46 = vld [vmem:[#allocation2 + $0x88] sm:$0x3] }
  0x39   : > { %7749 = vmatmul.mubr.msk.f32.gmra.mrb[4].mxu0 %vm323_vm1, %v9800_v33  ;;  %12379 = vst [vmem:[#allocation7_spill] sm:$0xff] %v9819_v41  ;;  %v9823_v43 = vsel %vm515_vm3, %v536_v36, %v537_v37  ;;  %v542_v45 = vrot.slane %v9812_v40, 1  ;;  %v9829_v47 = vld [vmem:[#allocation2 + $0x90] sm:$0xff]  ;;  %v9831_v48 = vld [vmem:[#allocation2 + $0x98] sm:$0xff]  ;;  %v544_v50 = vrot.slane %v9827_v46, 1  ;;  %v9848_v55 = vld [vmem:[#allocation2 + $0xa8] sm:$0xff] }
  0x3a   : > { %7751 = vmatprep.mubr.msk.f32.mxu0 %vm323_vm1, %v9804_v35  ;;  %12380 = vst [vmem:[#allocation8_spill] sm:$0xff] %v9823_v43  ;;  %v9838_v49 = vsel %vm515_vm3, %v537_v37, %v539_v42  ;;  %v546_v52 = vrot.slane %v9829_v47, 1  ;;  %v547_v53 = vrot.slane %v9831_v48, 1  ;;  %v9846_v54 = vld [vmem:[#allocation2 + $0xa0] sm:$0x3]  ;;  %v9850_v56 = vld [vmem:[#allocation2 + $0xb0] sm:$0xff] }
  0x3b   : > { %12381 = vst [vmem:[#allocation9_spill] sm:$0xff] %v9838_v49  ;;  %v9842_v51 = vsel %vm515_vm3, %v541_v44, %v542_v45  ;;  %v281_v58 = vld [vmem:[%s9646_s9 + $0xe8] sm:$0xff]  ;;  %v9859_v59 = vsel %vm515_vm3, %v542_v45, %v544_v50  ;;  %v549_v60 = vrot.slane %v9846_v54, 1  ;;  %v551_v63 = vrot.slane %v9848_v55, 1  ;;  %v9868_v6 = vld [vmem:[#allocation2 + $0xb8] sm:$0x3] }
  0x3c   : > { %12382 = vst [vmem:[#allocation10_spill] sm:$0xff] %v9842_v51  ;;  %12383 = vst [vmem:[#allocation11_spill] sm:$0xff] %v9859_v59  ;;  %v9864_v62 = vsel %vm515_vm3, %v546_v52, %v547_v53  ;;  %v552_v5 = vrot.slane %v9850_v56, 1  ;;  %v320_v9 = vsub.f32 %v281_v58, %v9641_v3  ;;  %v9871_v10 = vld [vmem:[#allocation2 + $0xc0] sm:$0xff]  ;;  %v9873_v11 = vld [vmem:[#allocation2 + $0xc8] sm:$0xff]  ;;  %v554_v16 = vrot.slane %v9868_v6, 1 }
  0x3d   : > { %7752 = vmatmul.mubr.msk.f32.gmra.mrb[6].mxu0 %vm323_vm1, %v9819_v41  ;;  %12384 = vst [vmem:[#allocation12_spill] sm:$0xff] %v9864_v62  ;;  %408 = vst.msk [vmem:[#allocation2 + $0x169] sm:$0xff] %vm323_vm1, %v319_v61  ;;  %v9882_v12 = vsel %vm515_vm3, %v547_v53, %v549_v60  ;;  %v556_v18 = vrot.slane %v9871_v10, 1  ;;  %v557_v22 = vrot.slane %v9873_v11, 1  ;;  %v9890_v26 = vld [vmem:[#allocation2 + $0xd0] sm:$0x3] }
  0x3e   : > { %7754 = vmatprep.mubr.msk.f32.mxu0 %vm323_vm1, %v9823_v43  ;;  %409 = vst.msk [vmem:[#allocation2 + $0x171] sm:$0xff] %vm323_vm1, %v320_v9  ;;  %12385 = vst [vmem:[#allocation13_spill] sm:$0xff] %v9882_v12  ;;  %v9886_v17 = vsel %vm515_vm3, %v551_v63, %v552_v5  ;;  %v9892_v27 = vld [vmem:[#allocation2 + $0xd8] sm:$0xff]  ;;  %v9894_v30 = vld [vmem:[#allocation2 + $0xe0] sm:$0xff]  ;;  %v9901_v34 = vsel %vm515_vm3, %v552_v5, %v554_v16  ;;  %v559_v36 = vrot.slane %v9890_v26, 1 }
  0x3f   : > { %12386 = vst [vmem:[#allocation14_spill] sm:$0xff] %v9886_v17  ;;  %12387 = vst [vmem:[#allocation15_spill] sm:$0xff] %v9901_v34  ;;  %v9905_v37 = vsel %vm515_vm3, %v556_v18, %v557_v22  ;;  %v561_v42 = vrot.slane %v9892_v27, 1  ;;  %v562_v44 = vrot.slane %v9894_v30, 1  ;;  %v9909_v45 = vld [vmem:[#allocation2 + $0xe8] sm:$0x3] }
  0x40   : > { %12388 = vst [vmem:[#allocation16_spill] sm:$0xff] %v9905_v37  ;;  %v9911_v50 = vld [vmem:[#allocation2 + $0xf0] sm:$0xff]  ;;  %v9913_v52 = vld [vmem:[#allocation2 + $0xf8] sm:$0xff]  ;;  %v9920_v53 = vsel %vm515_vm3, %v557_v22, %v559_v36  ;;  %v564_v57 = vrot.slane %v9909_v45, 1  ;;  %v9928_v63 = vld [vmem:[#allocation2 + $0x100] sm:$0x3] }
  0x41   : > { %7755 = vmatmul.mubr.msk.f32.gmra.mrb[8].mxu0 %vm323_vm1, %v9838_v49  ;;  %12389 = vst [vmem:[#allocation17_spill] sm:$0xff] %v9920_v53  ;;  %v9924_v58 = vsel %vm515_vm3, %v561_v42, %v562_v44  ;;  %v566_v60 = vrot.slane %v9911_v50, 1  ;;  %v567_v61 = vrot.slane %v9913_v52, 1  ;;  %v9930_v5 = vld [vmem:[#allocation2 + $0x108] sm:$0xff]  ;;  %v9932_v9 = vld [vmem:[#allocation2 + $0x110] sm:$0xff]  ;;  %v569_v18 = vrot.slane %v9928_v63, 1 }
  0x42   : > { %7757 = vmatprep.mubr.msk.f32.mxu0 %vm323_vm1, %v9842_v51  ;;  %12390 = vst [vmem:[#allocation18_spill] sm:$0xff] %v9924_v58  ;;  %v9939_v16 = vsel %vm515_vm3, %v562_v44, %v564_v57  ;;  %v571_v36 = vrot.slane %v9930_v5, 1  ;;  %v572_v42 = vrot.slane %v9932_v9, 1  ;;  %v9947_v1 = vld [vmem:[#allocation2 + $0x118] sm:$0x3]  ;;  %v9987_v51 = vld [vmem:[#allocation2 + $0x150] sm:$0xff] }
  0x43   : > { %12391 = vst [vmem:[#allocation19_spill] sm:$0xff] %v9939_v16  ;;  %v9943_v22 = vsel %vm515_vm3, %v566_v60, %v567_v61  ;;  %v9958_v44 = vsel %vm515_vm3, %v567_v61, %v569_v18  ;;  %v574_v57 = vrot.slane %v9947_v1, 1  ;;  %v10004_v43 = vld [vmem:[#allocation2 + $0x160] sm:$0x3] }
  0x44   : > { %12392 = vst [vmem:[#allocation20_spill] sm:$0xff] %v9943_v22  ;;  %12393 = vst [vmem:[#allocation21_spill] sm:$0xff] %v9958_v44  ;;  %v9962_v60 = vsel %vm515_vm3, %v571_v36, %v572_v42  ;;  %v10006_v41 = vld [vmem:[#allocation2 + $0x168] sm:$0xff] }
  0x45   : > { %7758 = vmatmul.mubr.msk.f32.gmra.mrb[10].mxu0 %vm323_vm1, %v9859_v59  ;;  %12394 = vst [vmem:[#allocation22_spill] sm:$0xff] %v9962_v60  ;;  %v9977_v61 = vsel %vm515_vm3, %v572_v42, %v574_v57  ;;  %v9985_v59 = vld [vmem:[#allocation2 + $0x148] sm:$0x3]  ;;  %v10023_v33 = vld [vmem:[#allocation2 + $0x178] sm:$0x3] }
  0x46   : > { %7760 = vmatprep.mubr.msk.f32.mxu0 %vm323_vm1, %v9864_v62  ;;  %12395 = vst [vmem:[#allocation23_spill] sm:$0xff] %v9977_v61 }
  0x49   : > { %7761 = vmatmul.mubr.msk.f32.gmra.mrb[12].mxu0 %vm323_vm1, %v9882_v12  ;;  %v9968_v12 = vld [vmem:[#allocation2 + $0x138] sm:$0xff] }
  0x4a   : > { %7763 = vmatprep.mubr.msk.f32.mxu0 %vm323_vm1, %v9886_v17  ;;  %v9966_v17 = vld [vmem:[#allocation2 + $0x130] sm:$0x3] }
  0x4b   : > { %v579_v18 = vrot.slane %v9966_v17, 1 }
  0x4d   : > { %7764 = vmatmul.mubr.msk.f32.gmra.mrb[14].mxu0 %vm323_vm1, %v9901_v34 }
  0x4e   : > { %7766 = vmatprep.mubr.msk.f32.mxu0 %vm323_vm1, %v9905_v37  ;;  %v9949_v37 = vld [vmem:[#allocation2 + $0x120] sm:$0xff] }
  0x51   : > { %7767 = vmatmul.mubr.msk.f32.gmra.mrb[16].mxu0 %vm323_vm1, %v9920_v53  ;;  %v9951_v53 = vld [vmem:[#allocation2 + $0x128] sm:$0xff] }
  0x52   : > { %7769 = vmatprep.mubr.msk.f32.mxu0 %vm323_vm1, %v9924_v58  ;;  %v576_v58 = vrot.slane %v9949_v37, 1  ;;  %v577_v34 = vrot.slane %v9951_v53, 1 }
  0x54   : > { %v9981_v36 = vsel %vm515_vm3, %v576_v58, %v577_v34  ;;  %v9996_v42 = vsel %vm515_vm3, %v577_v34, %v579_v18  ;;  %v584_v58 = vrot.slane %v9985_v59, 1 }
  0x55   : > { %7770 = vmatmul.mubr.msk.f32.gmra.mrb[18].mxu0 %vm323_vm1, %v9939_v16  ;;  %v9970_v16 = vld [vmem:[#allocation2 + $0x140] sm:$0xff]  ;;  %12396 = vst [vmem:[#allocation24_spill] sm:$0xff] %v9981_v36  ;;  %12397 = vst [vmem:[#allocation25_spill] sm:$0xff] %v9996_v42 }
  0x56   : > { %7772 = vmatprep.mubr.msk.f32.mxu0 %vm323_vm1, %v9943_v22  ;;  %v581_v22 = vrot.slane %v9968_v12, 1  ;;  %v582_v62 = vrot.slane %v9970_v16, 1 }
  0x58   : > { %v10000_v57 = vsel %vm515_vm3, %v581_v22, %v582_v62  ;;  %v10015_v34 = vsel %vm515_vm3, %v582_v62, %v584_v58  ;;  %v589_v22 = vrot.slane %v10004_v43, 1  ;;  %v594_v58 = vrot.slane %v10023_v33, 1 }
  0x59   : > { %7773 = vmatmul.mubr.msk.f32.gmra.mrb[20].mxu0 %vm323_vm1, %v9958_v44  ;;  %v9989_v44 = vld [vmem:[#allocation2 + $0x158] sm:$0xff]  ;;  %12398 = vst [vmem:[#allocation26_spill] sm:$0xff] %v10000_v57 }
  0x5a   : > { %7775 = vmatprep.mubr.msk.f32.mxu0 %vm323_vm1, %v9962_v60  ;;  %v586_v60 = vrot.slane %v9987_v51, 1  ;;  %v587_v49 = vrot.slane %v9989_v44, 1 }
  0x5c   : > { %v10019_v18 = vsel %vm515_vm3, %v586_v60, %v587_v49  ;;  %v10030_v62 = vsel %vm515_vm3, %v587_v49, %v589_v22  ;;  %v6521_v49 = vld [vmem:[%s12212_s2 + $0xc] sm:$0x7] }
  0x5d   : > { %7776 = vmatmul.mubr.msk.f32.gmra.mrb[22].mxu0 %vm323_vm1, %v9977_v61  ;;  %v10008_v61 = vld [vmem:[#allocation2 + $0x170] sm:$0xff]  ;;  %12399 = vst [vmem:[#allocation27_spill] sm:$0xff] %v10019_v18 }
  0x5e   : > { %7778 = vmatprep.mubr.msk.f32.mxu0 %vm323_vm1, %v9981_v36  ;;  %v591_v36 = vrot.slane %v10006_v41, 1  ;;  %v592_v35 = vrot.slane %v10008_v61, 1 }
  0x60   : > { %v10034_v60 = vsel %vm515_vm3, %v591_v36, %v592_v35  ;;  %v283_v36 = vld [vmem:[%s9646_s9 + $0xf8] sm:$0xff] }
  0x61   : > { %7779 = vmatmul.mubr.msk.f32.gmra.mrb[24].mxu0 %vm323_vm1, %v9996_v42  ;;  %12400 = vst [vmem:[#allocation28_spill] sm:$0xff] %v10034_v60  ;;  %v322_v22 = vsub.f32 %v283_v36, %v9641_v3  ;;  %v1190_v36 = vrot.slane %v9741_v2, 2 }
  0x62   : > { %7781 = vmatprep.mubr.msk.f32.mxu0 %vm323_vm1, %v10000_v57  ;;  %v10041_v57 = vsel %vm515_vm3, %v592_v35, %v594_v58  ;;  %v1184_v58 = vrot.slane %v9651_v7, 2 }
  0x63   : > { %12401 = vst [vmem:[#allocation29_spill] sm:$0xff] %v10041_v57  ;;  %411 = vst.msk [vmem:[#allocation2 + $0x189] sm:$0xff] %vm323_vm1, %v322_v22  ;;  %v1194_v22 = vrot.slane %v9754_v13, 2 }
  0x65   : > { %7782 = vmatmul.mubr.msk.f32.gmra.mrb[26].mxu0 %vm323_vm1, %v10015_v34 }
  0x66   : > { %7784 = vmatprep.mubr.msk.f32.mxu0 %vm323_vm1, %v10019_v18 }
  0x69   : > { %7785 = vmatmul.mubr.msk.f32.gmra.mrb[28].mxu0 %vm323_vm1, %v10030_v62 }
  0x6a   : > { %7787 = vmatprep.mubr.msk.f32.mxu0 %vm323_vm1, %v10034_v60  ;;  %v10138_v60 = vld [vmem:[%s12212_s2 + $0x10] sm:$0x7] }
  0x6d   : > { %7788 = vmatmul.mubr.msk.f32.gmra.mrb[30].mxu0 %vm323_vm1, %v10041_v57  ;;  %v1185_v57 = vrot.slane %v9653_v8, 2 }
  0x6e   : > { %7792 = vmatprep.mubr.msk.f32.mxu0 %vm323_vm1, %v9651_v7 }
  0x71   : > { %7793 = vmatmul.mubr.msk.f32.vlgmr.msra.gmra.mrb[0].mxu0 %vm323_vm1, %v9653_v8  ;;  %v1192_v8 = vrot.slane %v9743_v4, 2 }
  0x72   : > { %7841 = vmatpush3.msk.msra.mxu0 %vm662_vm0, %v9678_v25  ;;  %7795 = vmatprep.mubr.msk.f32.mxu0 %vm323_vm1, %v9739_v0  ;;  %v282_v25 = vld [vmem:[%s9646_s9 + $0xf0] sm:$0xff] }
  0x73   : > { %7890 = vmatprep.subr.msk.mxu0 %vm662_vm0, %v6521_v49  ;;  %v321_v35 = vsub.f32 %v282_v25, %v9641_v3  ;;  %v1187_v3 = vrot.slane %v9661_v15, 2  ;;  %v1186_v25 = vsel %vm1183_vm4, %v1184_v58, %v1185_v57  ;;  %v1195_v58 = vrot.slane %v9756_v14, 2 }
  0x74   : > { %v10145_v4 = vsel %vm1183_vm4, %v1190_v36, %v1192_v8  ;;  %v1205_v8 = vrot.slane %v9792_v32, 2 }
  0x75   : > { %7796 = vmatmul.mubr.msk.f32.gmra.mrb[2].mxu0 %vm323_vm1, %v9741_v2  ;;  %410 = vst.msk [vmem:[#allocation2 + $0x181] sm:$0xff] %vm323_vm1, %v321_v35  ;;  %v1189_v35 = vrot.slane %v9739_v0, 2  ;;  %v1188_v7 = vsel %vm1183_vm4, %v1185_v57, %v1187_v3  ;;  %v1197_v57 = vrot.slane %v9764_v19, 2  ;;  %v10149_v3 = vsel %vm1183_vm4, %v1194_v22, %v1195_v58 }
  0x76   : > { %7798 = vmatprep.mubr.msk.f32.mxu0 %vm323_vm1, %v9754_v13  ;;  %v1202_v19 = vrot.slane %v9782_v28, 2 }
  0x77   : > { %v10131_v15 = vsel %vm1183_vm4, %v1189_v35, %v1190_v36  ;;  %v1200_v35 = vrot.slane %v9768_v21, 2 }
  0x79   : > { %7799 = vmatmul.mubr.msk.f32.gmra.mrb[4].mxu0 %vm323_vm1, %v9756_v14  ;;  %v10173_v22 = vsel %vm1183_vm4, %v1200_v35, %v1202_v19  ;;  %v1214_v19 = vrot.slane %v9829_v47, 2 }
  0x7a   : > { %7801 = vmatprep.mubr.msk.f32.mxu0 %vm323_vm1, %v9766_v20 }
  0x7d   : > { %7802 = vmatmul.mubr.msk.f32.gmra.mrb[6].mxu0 %vm323_vm1, %v9768_v21 }
  0x7e   : > { %7804 = vmatprep.mubr.msk.f32.mxu0 %vm323_vm1, %v9790_v31 }
  0x81   : > { %7805 = vmatmul.mubr.msk.f32.gmra.mrb[8].mxu0 %vm323_vm1, %v9792_v32 }
  0x82   : > { %7807 = vmatprep.mubr.msk.f32.mxu0 %vm323_vm1, %v9810_v39 }
  0x85   : > { %7808 = vmatmul.mubr.msk.f32.gmra.mrb[10].mxu0 %vm323_vm1, %v9812_v40 }
  0x86   : > { %7810 = vmatprep.mubr.msk.f32.mxu0 %vm323_vm1, %v9829_v47 }
  0x89   : > { %7811 = vmatmul.mubr.msk.f32.gmra.mrb[12].mxu0 %vm323_vm1, %v9831_v48 }
  0x8a   : > { %7813 = vmatprep.mubr.msk.f32.mxu0 %vm323_vm1, %v9848_v55 }
  0x8d   : > { %7814 = vmatmul.mubr.msk.f32.gmra.mrb[14].mxu0 %vm323_vm1, %v9850_v56 }
  0x8e   : > { %7816 = vmatprep.mubr.msk.f32.mxu0 %vm323_vm1, %v9871_v10 }
  0x91   : > { %7817 = vmatmul.mubr.msk.f32.gmra.mrb[16].mxu0 %vm323_vm1, %v9873_v11 }
  0x92   : > { %7819 = vmatprep.mubr.msk.f32.mxu0 %vm323_vm1, %v9892_v27 }
  0x95   : > { %7820 = vmatmul.mubr.msk.f32.gmra.mrb[18].mxu0 %vm323_vm1, %v9894_v30 }
  0x96   : > { %7822 = vmatprep.mubr.msk.f32.mxu0 %vm323_vm1, %v9911_v50 }
  0x99   : > { %7823 = vmatmul.mubr.msk.f32.gmra.mrb[20].mxu0 %vm323_vm1, %v9913_v52 }
  0x9a   : > { %7825 = vmatprep.mubr.msk.f32.mxu0 %vm323_vm1, %v9930_v5 }
  0x9d   : > { %7826 = vmatmul.mubr.msk.f32.gmra.mrb[22].mxu0 %vm323_vm1, %v9932_v9 }
  0x9e   : > { %7828 = vmatprep.mubr.msk.f32.mxu0 %vm323_vm1, %v9949_v37 }
  0xa1   : > { %7829 = vmatmul.mubr.msk.f32.gmra.mrb[24].mxu0 %vm323_vm1, %v9951_v53 }
  0xa2   : > { %7831 = vmatprep.mubr.msk.f32.mxu0 %vm323_vm1, %v9968_v12 }
  0xa5   : > { %7832 = vmatmul.mubr.msk.f32.gmra.mrb[26].mxu0 %vm323_vm1, %v9970_v16 }
  0xa6   : > { %7834 = vmatprep.mubr.msk.f32.mxu0 %vm323_vm1, %v9987_v51 }
  0xa9   : > { %7835 = vmatmul.mubr.msk.f32.gmra.mrb[28].mxu0 %vm323_vm1, %v9989_v44 }
  0xaa   : > { %7837 = vmatprep.mubr.msk.f32.mxu0 %vm323_vm1, %v10006_v41 }
  0xad   : > { %7838 = vmatmul.mubr.msk.f32.gmra.mrb[30].mxu0 %vm323_vm1, %v10008_v61 }
  0xae   : > { %7842 = vmatprep.mubr.msk.f32.mxu0 %vm323_vm1, %v1186_v25  ;;  %v1199_v25 = vrot.slane %v9766_v20, 2 }
  0xb0   : > { %v10164_v36 = vsel %vm1183_vm4, %v1199_v25, %v1200_v35  ;;  %v1210_v25 = vrot.slane %v9812_v40, 2  ;;  %v1212_v35 = vrot.slane %v9827_v46, 2 }
  0xb1   : > { %7843 = vmatmul.mubr.msk.f32.vlgmr.msra.gmra.mrb[0].mxu0 %vm323_vm1, %v1188_v7  ;;  %12402 = vst [vmem:[#allocation30_spill] sm:$0xff] %v10164_v36  ;;  %v1204_v7 = vrot.slane %v9790_v31, 2 }
  0xb2   : > { %7891 = vmatpush3.msk.msra.mxu0 %vm662_vm0, %v6521_v49  ;;  %7845 = vmatprep.mubr.msk.f32.mxu0 %vm323_vm1, %v10131_v15  ;;  %v10160_v49 = vsel %vm1183_vm4, %v1195_v58, %v1197_v57  ;;  %v1207_v58 = vrot.slane %v9808_v38, 2  ;;  %v1209_v57 = vrot.slane %v9810_v39, 2 }
  0xb3   : > { %7940 = vmatprep.subr.msk.mxu0 %vm662_vm0, %v10138_v60  ;;  %v10177_v28 = vsel %vm1183_vm4, %v1204_v7, %v1205_v8  ;;  %v1215_v7 = vrot.slane %v9831_v48, 2 }
  0xb4   : > { %12403 = vst [vmem:[#allocation31_spill] sm:$0xff] %v10177_v28  ;;  %v10190_v38 = vsel %vm1183_vm4, %v1209_v57, %v1210_v25  ;;  %v1220_v57 = vrot.slane %v9850_v56, 2 }
  0xb5   : > { %7846 = vmatmul.mubr.msk.f32.gmra.mrb[2].mxu0 %vm323_vm1, %v10145_v4  ;;  %12404 = vst [vmem:[#allocation32_spill] sm:$0xff] %v10190_v38  ;;  %v10203_v46 = vsel %vm1183_vm4, %v1214_v19, %v1215_v7  ;;  %v1225_v19 = vrot.slane %v9873_v11, 2 }
  0xb6   : > { %7848 = vmatprep.mubr.msk.f32.mxu0 %vm323_vm1, %v10149_v3  ;;  %12405 = vst [vmem:[#allocation33_spill] sm:$0xff] %v10203_v46 }
  0xb9   : > { %7849 = vmatmul.mubr.msk.f32.gmra.mrb[4].mxu0 %vm323_vm1, %v10160_v49 }
  0xba   : > { %7851 = vmatprep.mubr.msk.f32.mxu0 %vm323_vm1, %v10164_v36  ;;  %v10186_v36 = vsel %vm1183_vm4, %v1205_v8, %v1207_v58  ;;  %v1217_v8 = vrot.slane %v9846_v54, 2  ;;  %v1219_v58 = vrot.slane %v9848_v55, 2 }
  0xbc   : > { %v10216_v54 = vsel %vm1183_vm4, %v1219_v58, %v1220_v57  ;;  %v1230_v58 = vrot.slane %v9894_v30, 2 }
  0xbd   : > { %7852 = vmatmul.mubr.msk.f32.gmra.mrb[6].mxu0 %vm323_vm1, %v10173_v22  ;;  %12406 = vst [vmem:[#allocation34_spill] sm:$0xff] %v10216_v54 }
  0xbe   : > { %7854 = vmatprep.mubr.msk.f32.mxu0 %vm323_vm1, %v10177_v28  ;;  %v10199_v28 = vsel %vm1183_vm4, %v1210_v25, %v1212_v35  ;;  %v1222_v25 = vrot.slane %v9868_v6, 2  ;;  %v1224_v35 = vrot.slane %v9871_v10, 2 }
  0xc0   : > { %v10229_v6 = vsel %vm1183_vm4, %v1224_v35, %v1225_v19  ;;  %v1235_v35 = vrot.slane %v9913_v52, 2 }
  0xc1   : > { %7855 = vmatmul.mubr.msk.f32.gmra.mrb[8].mxu0 %vm323_vm1, %v10186_v36  ;;  %12407 = vst [vmem:[#allocation35_spill] sm:$0xff] %v10229_v6 }
  0xc2   : > { %7857 = vmatprep.mubr.msk.f32.mxu0 %vm323_vm1, %v10190_v38  ;;  %v10212_v38 = vsel %vm1183_vm4, %v1215_v7, %v1217_v8  ;;  %v1227_v7 = vrot.slane %v9890_v26, 2  ;;  %v1229_v8 = vrot.slane %v9892_v27, 2 }
  0xc4   : > { %v10242_v26 = vsel %vm1183_vm4, %v1229_v8, %v1230_v58  ;;  %v1240_v8 = vrot.slane %v9932_v9, 2 }
  0xc5   : > { %7858 = vmatmul.mubr.msk.f32.gmra.mrb[10].mxu0 %vm323_vm1, %v10199_v28  ;;  %12408 = vst [vmem:[#allocation36_spill] sm:$0xff] %v10242_v26 }
  0xc6   : > { %7860 = vmatprep.mubr.msk.f32.mxu0 %vm323_vm1, %v10203_v46  ;;  %v10225_v46 = vsel %vm1183_vm4, %v1220_v57, %v1222_v25  ;;  %v1232_v57 = vrot.slane %v9909_v45, 2  ;;  %v1234_v25 = vrot.slane %v9911_v50, 2 }
  0xc8   : > { %v10255_v45 = vsel %vm1183_vm4, %v1234_v25, %v1235_v35  ;;  %v1245_v25 = vrot.slane %v9951_v53, 2 }
  0xc9   : > { %7861 = vmatmul.mubr.msk.f32.gmra.mrb[12].mxu0 %vm323_vm1, %v10212_v38  ;;  %12409 = vst [vmem:[#allocation37_spill] sm:$0xff] %v10255_v45 }
  0xca   : > { %7863 = vmatprep.mubr.msk.f32.mxu0 %vm323_vm1, %v10216_v54  ;;  %v10238_v54 = vsel %vm1183_vm4, %v1225_v19, %v1227_v7  ;;  %v1237_v19 = vrot.slane %v9928_v63, 2  ;;  %v1239_v7 = vrot.slane %v9930_v5, 2 }
  0xcc   : > { %v10268_v63 = vsel %vm1183_vm4, %v1239_v7, %v1240_v8  ;;  %v1250_v7 = vrot.slane %v9970_v16, 2 }
  0xcd   : > { %7864 = vmatmul.mubr.msk.f32.gmra.mrb[14].mxu0 %vm323_vm1, %v10225_v46  ;;  %12411 = vst [vmem:[#allocation39_spill] sm:$0xff] %v10268_v63 }
  0xce   : > { %7866 = vmatprep.mubr.msk.f32.mxu0 %vm323_vm1, %v10229_v6  ;;  %v10251_v6 = vsel %vm1183_vm4, %v1230_v58, %v1232_v57  ;;  %v1242_v58 = vrot.slane %v9947_v1, 2  ;;  %v1244_v57 = vrot.slane %v9949_v37, 2 }
  0xd0   : > { %v10281_v1 = vsel %vm1183_vm4, %v1244_v57, %v1245_v25  ;;  %v1255_v57 = vrot.slane %v9989_v44, 2 }
  0xd1   : > { %7867 = vmatmul.mubr.msk.f32.gmra.mrb[16].mxu0 %vm323_vm1, %v10238_v54  ;;  %12412 = vst [vmem:[#allocation40_spill] sm:$0xff] %v10281_v1 }
  0xd2   : > { %7869 = vmatprep.mubr.msk.f32.mxu0 %vm323_vm1, %v10242_v26  ;;  %v10264_v26 = vsel %vm1183_vm4, %v1235_v35, %v1237_v19  ;;  %v1247_v35 = vrot.slane %v9966_v17, 2  ;;  %v1249_v19 = vrot.slane %v9968_v12, 2 }
  0xd3   : > { %12410 = vst [vmem:[#allocation38_spill] sm:$0xff] %v10264_v26 }
  0xd4   : > { %v10294_v17 = vsel %vm1183_vm4, %v1249_v19, %v1250_v7  ;;  %v1260_v19 = vrot.slane %v10008_v61, 2 }
  0xd5   : > { %7870 = vmatmul.mubr.msk.f32.gmra.mrb[18].mxu0 %vm323_vm1, %v10251_v6  ;;  %12414 = vst [vmem:[#allocation42_spill] sm:$0xff] %v10294_v17 }
  0xd6   : > { %7872 = vmatprep.mubr.msk.f32.mxu0 %vm323_vm1, %v10255_v45  ;;  %v10277_v45 = vsel %vm1183_vm4, %v1240_v8, %v1242_v58  ;;  %v1252_v8 = vrot.slane %v9985_v59, 2  ;;  %v1254_v58 = vrot.slane %v9987_v51, 2 }
  0xd8   : > { %v10307_v59 = vsel %vm1183_vm4, %v1254_v58, %v1255_v57  ;;  %v12416_v58 = vld [vmem:[#allocation5_spill] sm:$0xff] }
  0xd9   : > { %7873 = vmatmul.mubr.msk.f32.gmra.mrb[20].mxu0 %vm323_vm1, %v10264_v26  ;;  %12415 = vst [vmem:[#allocation43_spill] sm:$0xff] %v10307_v59 }
  0xda   : > { %7875 = vmatprep.mubr.msk.f32.mxu0 %vm323_vm1, %v10268_v63  ;;  %v10290_v63 = vsel %vm1183_vm4, %v1245_v25, %v1247_v35  ;;  %v1257_v25 = vrot.slane %v10004_v43, 2  ;;  %v1259_v35 = vrot.slane %v10006_v41, 2 }
  0xdb   : > { %12413 = vst [vmem:[#allocation41_spill] sm:$0xff] %v10290_v63 }
  0xdc   : > { %v10320_v43 = vsel %vm1183_vm4, %v1259_v35, %v1260_v19  ;;  %v12421_v35 = vld [vmem:[#allocation10_spill] sm:$0xff] }
  0xdd   : > { %7876 = vmatmul.mubr.msk.f32.gmra.mrb[22].mxu0 %vm323_vm1, %v10277_v45 }
  0xde   : > { %7878 = vmatprep.mubr.msk.f32.mxu0 %vm323_vm1, %v10281_v1  ;;  %v10303_v1 = vsel %vm1183_vm4, %v1250_v7, %v1252_v8  ;;  %v1262_v7 = vrot.slane %v10023_v33, 2  ;;  %v6589_v33 = vld [vmem:[%s12212_s2 + $0x14] sm:$0x7] }
  0xe0   : > { %v10327_v8 = vsel %vm1183_vm4, %v1260_v19, %v1262_v7  ;;  %v12422_v19 = vld [vmem:[#allocation11_spill] sm:$0xff]  ;;  %v12423_v7 = vld [vmem:[#allocation12_spill] sm:$0xff] }
  0xe1   : > { %7879 = vmatmul.mubr.msk.f32.gmra.mrb[24].mxu0 %vm323_vm1, %v10290_v63 }
  0xe2   : > { %7881 = vmatprep.mubr.msk.f32.mxu0 %vm323_vm1, %v10294_v17  ;;  %v10316_v17 = vsel %vm1183_vm4, %v1255_v57, %v1257_v25  ;;  %v12417_v57 = vld [vmem:[#allocation6_spill] sm:$0xff]  ;;  %v12419_v25 = vld [vmem:[#allocation8_spill] sm:$0xff] }
  0xe5   : > { %7882 = vmatmul.mubr.msk.f32.gmra.mrb[26].mxu0 %vm323_vm1, %v10303_v1 }
  0xe6   : > { %7884 = vmatprep.mubr.msk.f32.mxu0 %vm323_vm1, %v10307_v59 }
  0xe9   : > { %7885 = vmatmul.mubr.msk.f32.gmra.mrb[28].mxu0 %vm323_vm1, %v10316_v17 }
  0xea   : > { %7887 = vmatprep.mubr.msk.f32.mxu0 %vm323_vm1, %v10320_v43 }
  0xed   : > { %7888 = vmatmul.mubr.msk.f32.gmra.mrb[30].mxu0 %vm323_vm1, %v10327_v8 }
  0xee   : > { %7892 = vmatprep.mubr.msk.f32.mxu0 %vm323_vm1, %v9739_v0  ;;  %v10395_v0 = vld [vmem:[#allocation2 + $0x180] sm:$0xff] }
  0xf1   : > { %7893 = vmatmul.mubr.msk.f32.vlgmr.msra.gmra.mrb[0].mxu0 %vm323_vm1, %v9741_v2  ;;  %v10401_v2 = vld [vmem:[#allocation2 + $0x188] sm:$0xff] }
  0xf2   : > { %7941 = vmatpush3.msk.msra.mxu0 %vm662_vm0, %v10138_v60  ;;  %7895 = vmatprep.mubr.msk.f32.mxu0 %vm323_vm1, %v9754_v13  ;;  %v6623_v60 = vld [vmem:[%s12212_s2 + $0x18] sm:$0x7] }
  0xf3   : > { %7990 = vmatprep.subr.msk.mxu0 %vm662_vm0, %v6589_v33 }
  0xf5   : > { %7896 = vmatmul.mubr.msk.f32.gmra.mrb[2].mxu0 %vm323_vm1, %v9756_v14 }
  0xf6   : > { %7898 = vmatprep.mubr.msk.f32.mxu0 %vm323_vm1, %v9766_v20 }
  0xf9   : > { %7899 = vmatmul.mubr.msk.f32.gmra.mrb[4].mxu0 %vm323_vm1, %v9768_v21 }
  0xfa   : > { %7901 = vmatprep.mubr.msk.f32.mxu0 %vm323_vm1, %v9790_v31 }
  0xfd   : > { %7902 = vmatmul.mubr.msk.f32.gmra.mrb[6].mxu0 %vm323_vm1, %v9792_v32 }
  0xfe   : > { %7904 = vmatprep.mubr.msk.f32.mxu0 %vm323_vm1, %v9810_v39 }
 0x101   : > { %7905 = vmatmul.mubr.msk.f32.gmra.mrb[8].mxu0 %vm323_vm1, %v9812_v40 }
 0x102   : > { %7907 = vmatprep.mubr.msk.f32.mxu0 %vm323_vm1, %v9829_v47 }
 0x105   : > { %7908 = vmatmul.mubr.msk.f32.gmra.mrb[10].mxu0 %vm323_vm1, %v9831_v48 }
 0x106   : > { %7910 = vmatprep.mubr.msk.f32.mxu0 %vm323_vm1, %v9848_v55 }
 0x109   : > { %7911 = vmatmul.mubr.msk.f32.gmra.mrb[12].mxu0 %vm323_vm1, %v9850_v56 }
 0x10a   : > { %7913 = vmatprep.mubr.msk.f32.mxu0 %vm323_vm1, %v9871_v10 }
 0x10d   : > { %7914 = vmatmul.mubr.msk.f32.gmra.mrb[14].mxu0 %vm323_vm1, %v9873_v11 }
 0x10e   : > { %7916 = vmatprep.mubr.msk.f32.mxu0 %vm323_vm1, %v9892_v27 }
 0x111   : > { %7917 = vmatmul.mubr.msk.f32.gmra.mrb[16].mxu0 %vm323_vm1, %v9894_v30 }
 0x112   : > { %7919 = vmatprep.mubr.msk.f32.mxu0 %vm323_vm1, %v9911_v50 }
 0x115   : > { %7920 = vmatmul.mubr.msk.f32.gmra.mrb[18].mxu0 %vm323_vm1, %v9913_v52 }
 0x116   : > { %7922 = vmatprep.mubr.msk.f32.mxu0 %vm323_vm1, %v9930_v5 }
 0x119   : > { %7923 = vmatmul.mubr.msk.f32.gmra.mrb[20].mxu0 %vm323_vm1, %v9932_v9 }
 0x11a   : > { %7925 = vmatprep.mubr.msk.f32.mxu0 %vm323_vm1, %v9949_v37 }
 0x11d   : > { %7926 = vmatmul.mubr.msk.f32.gmra.mrb[22].mxu0 %vm323_vm1, %v9951_v53 }
 0x11e   : > { %7928 = vmatprep.mubr.msk.f32.mxu0 %vm323_vm1, %v9968_v12 }
 0x121   : > { %7929 = vmatmul.mubr.msk.f32.gmra.mrb[24].mxu0 %vm323_vm1, %v9970_v16 }
 0x122   : > { %7931 = vmatprep.mubr.msk.f32.mxu0 %vm323_vm1, %v9987_v51 }
 0x125   : > { %7932 = vmatmul.mubr.msk.f32.gmra.mrb[26].mxu0 %vm323_vm1, %v9989_v44 }
 0x126   : > { %7934 = vmatprep.mubr.msk.f32.mxu0 %vm323_vm1, %v10006_v41 }
 0x129   : > { %7935 = vmatmul.mubr.msk.f32.gmra.mrb[28].mxu0 %vm323_vm1, %v10008_v61 }
 0x12a   : > { %7937 = vmatprep.mubr.msk.f32.mxu0 %vm323_vm1, %v10395_v0 }
 0x12d   : > { %7938 = vmatmul.mubr.msk.f32.gmra.mrb[30].mxu0 %vm323_vm1, %v10401_v2 }
 0x12e   : > { %7942 = vmatprep.mubr.msk.f32.mxu0 %vm323_vm1, %v9775_v23  ;;  %v12418_v23 = vld [vmem:[#allocation7_spill] sm:$0xff] }
 0x131   : > { %7943 = vmatmul.mubr.msk.f32.vlgmr.msra.gmra.mrb[0].mxu0 %vm323_vm1, %v9778_v24  ;;  %v12420_v24 = vld [vmem:[#allocation9_spill] sm:$0xff] }
 0x132   : > { %7991 = vmatpush3.msk.msra.mxu0 %vm662_vm0, %v6589_v33  ;;  %7945 = vmatprep.mubr.msk.f32.mxu0 %vm323_vm1, %v9787_v29  ;;  %v12424_v33 = vld [vmem:[#allocation13_spill] sm:$0xff] }
 0x133   : > { %8040 = vmatprep.subr.msk.mxu0 %vm662_vm0, %v6623_v60 }
 0x135   : > { %7946 = vmatmul.mubr.msk.f32.gmra.mrb[2].mxu0 %vm323_vm1, %v12416_v58 }
 0x136   : > { %7948 = vmatprep.mubr.msk.f32.mxu0 %vm323_vm1, %v12417_v57  ;;  %v12425_v57 = vld [vmem:[#allocation14_spill] sm:$0xff] }
 0x139   : > { %7949 = vmatmul.mubr.msk.f32.gmra.mrb[4].mxu0 %vm323_vm1, %v12418_v23  ;;  %v12426_v23 = vld [vmem:[#allocation15_spill] sm:$0xff] }
 0x13a   : > { %7951 = vmatprep.mubr.msk.f32.mxu0 %vm323_vm1, %v12419_v25  ;;  %v12427_v25 = vld [vmem:[#allocation16_spill] sm:$0xff] }
 0x13d   : > { %7952 = vmatmul.mubr.msk.f32.gmra.mrb[6].mxu0 %vm323_vm1, %v12420_v24  ;;  %v12428_v24 = vld [vmem:[#allocation17_spill] sm:$0xff] }
 0x13e   : > { %7954 = vmatprep.mubr.msk.f32.mxu0 %vm323_vm1, %v12421_v35  ;;  %v12429_v35 = vld [vmem:[#allocation18_spill] sm:$0xff] }
 0x141   : > { %7955 = vmatmul.mubr.msk.f32.gmra.mrb[8].mxu0 %vm323_vm1, %v12422_v19  ;;  %v12430_v19 = vld [vmem:[#allocation19_spill] sm:$0xff] }
 0x142   : > { %7957 = vmatprep.mubr.msk.f32.mxu0 %vm323_vm1, %v12423_v7  ;;  %v12431_v7 = vld [vmem:[#allocation20_spill] sm:$0xff] }
 0x145   : > { %7958 = vmatmul.mubr.msk.f32.gmra.mrb[10].mxu0 %vm323_vm1, %v12424_v33  ;;  %v12432_v33 = vld [vmem:[#allocation21_spill] sm:$0xff] }
 0x146   : > { %7960 = vmatprep.mubr.msk.f32.mxu0 %vm323_vm1, %v12425_v57  ;;  %v12433_v57 = vld [vmem:[#allocation22_spill] sm:$0xff] }
 0x149   : > { %7961 = vmatmul.mubr.msk.f32.gmra.mrb[12].mxu0 %vm323_vm1, %v12426_v23  ;;  %v12434_v23 = vld [vmem:[#allocation23_spill] sm:$0xff] }
 0x14a   : > { %7963 = vmatprep.mubr.msk.f32.mxu0 %vm323_vm1, %v12427_v25  ;;  %v12435_v25 = vld [vmem:[#allocation24_spill] sm:$0xff] }
 0x14d   : > { %7964 = vmatmul.mubr.msk.f32.gmra.mrb[14].mxu0 %vm323_vm1, %v12428_v24 }
 0x14e   : > { %7966 = vmatprep.mubr.msk.f32.mxu0 %vm323_vm1, %v12429_v35  ;;  %v12436_v35 = vld [vmem:[#allocation26_spill] sm:$0xff] }
 0x151   : > { %7967 = vmatmul.mubr.msk.f32.gmra.mrb[16].mxu0 %vm323_vm1, %v12430_v19 }
 0x152   : > { %7969 = vmatprep.mubr.msk.f32.mxu0 %vm323_vm1, %v12431_v7  ;;  %v12438_v7 = vld [vmem:[#allocation29_spill] sm:$0xff] }
 0x155   : > { %7970 = vmatmul.mubr.msk.f32.gmra.mrb[18].mxu0 %vm323_vm1, %v12432_v33  ;;  %v1860_v33 = vrot.slane %v10401_v2, 1 }
 0x156   : > { %7972 = vmatprep.mubr.msk.f32.mxu0 %vm323_vm1, %v12433_v57  ;;  %v1859_v57 = vrot.slane %v10395_v0, 1 }
 0x159   : > { %7973 = vmatmul.mubr.msk.f32.gmra.mrb[20].mxu0 %vm323_vm1, %v12434_v23  ;;  %v462_v23 = vld [vmem:[#allocation2 + $0x190] sm:$0x3] }
 0x15a   : > { %7975 = vmatprep.mubr.msk.f32.mxu0 %vm323_vm1, %v12435_v25  ;;  %v12437_v25 = vld [vmem:[#allocation28_spill] sm:$0xff] }
 0x15d   : > { %7976 = vmatmul.mubr.msk.f32.gmra.mrb[22].mxu0 %vm323_vm1, %v9996_v42  ;;  %v1862_v42 = vrot.slane %v462_v23, 1 }
 0x15e   : > { %7978 = vmatprep.mubr.msk.f32.mxu0 %vm323_vm1, %v12436_v35  ;;  %v10471_v35 = vsel %vm515_vm3, %v1859_v57, %v1860_v33  ;;  %v6657_v57 = vld [vmem:[%s12212_s2 + $0x1c] sm:$0x7] }
 0x161   : > { %7979 = vmatmul.mubr.msk.f32.gmra.mrb[24].mxu0 %vm323_vm1, %v10015_v34 }
 0x162   : > { %7981 = vmatprep.mubr.msk.f32.mxu0 %vm323_vm1, %v10019_v18  ;;  %v10478_v18 = vsel %vm515_vm3, %v1860_v33, %v1862_v42  ;;  %v12439_v42 = vld [vmem:[#allocation30_spill] sm:$0xff] }
 0x163   : > { %v12443_v33 = vld [vmem:[#allocation34_spill] sm:$0xff] }
 0x165   : > { %7982 = vmatmul.mubr.msk.f32.gmra.mrb[26].mxu0 %vm323_vm1, %v10030_v62 }
 0x166   : > { %7984 = vmatprep.mubr.msk.f32.mxu0 %vm323_vm1, %v12437_v25 }
 0x169   : > { %7985 = vmatmul.mubr.msk.f32.gmra.mrb[28].mxu0 %vm323_vm1, %v12438_v7 }
 0x16a   : > { %7987 = vmatprep.mubr.msk.f32.mxu0 %vm323_vm1, %v10471_v35 }
 0x16d   : > { %7988 = vmatmul.mubr.msk.f32.gmra.mrb[30].mxu0 %vm323_vm1, %v10478_v18 }
 0x16e   : > { %7992 = vmatprep.mubr.msk.f32.mxu0 %vm323_vm1, %v10131_v15  ;;  %v12440_v15 = vld [vmem:[#allocation31_spill] sm:$0xff] }
 0x171   : > { %7993 = vmatmul.mubr.msk.f32.vlgmr.msra.gmra.mrb[0].mxu0 %vm323_vm1, %v10145_v4  ;;  %v12441_v4 = vld [vmem:[#allocation32_spill] sm:$0xff] }
 0x172   : > { %8041 = vmatpush3.msk.msra.mxu0 %vm662_vm0, %v6623_v60  ;;  %7995 = vmatprep.mubr.msk.f32.mxu0 %vm323_vm1, %v10149_v3  ;;  %v12442_v60 = vld [vmem:[#allocation33_spill] sm:$0xff] }
 0x173   : > { %8090 = vmatprep.subr.msk.mxu0 %vm662_vm0, %v6657_v57 }
 0x175   : > { %7996 = vmatmul.mubr.msk.f32.gmra.mrb[2].mxu0 %vm323_vm1, %v10160_v49 }
 0x176   : > { %7998 = vmatprep.mubr.msk.f32.mxu0 %vm323_vm1, %v12439_v42 }
 0x179   : > { %7999 = vmatmul.mubr.msk.f32.gmra.mrb[4].mxu0 %vm323_vm1, %v10173_v22 }
 0x17a   : > { %8001 = vmatprep.mubr.msk.f32.mxu0 %vm323_vm1, %v12440_v15  ;;  %v12444_v15 = vld [vmem:[#allocation35_spill] sm:$0xff] }
 0x17d   : > { %8002 = vmatmul.mubr.msk.f32.gmra.mrb[6].mxu0 %vm323_vm1, %v10186_v36 }
 0x17e   : > { %8004 = vmatprep.mubr.msk.f32.mxu0 %vm323_vm1, %v12441_v4  ;;  %v12445_v4 = vld [vmem:[#allocation36_spill] sm:$0xff] }
 0x181   : > { %8005 = vmatmul.mubr.msk.f32.gmra.mrb[8].mxu0 %vm323_vm1, %v10199_v28 }
 0x182   : > { %8007 = vmatprep.mubr.msk.f32.mxu0 %vm323_vm1, %v12442_v60  ;;  %v12446_v60 = vld [vmem:[#allocation37_spill] sm:$0xff] }
 0x185   : > { %8008 = vmatmul.mubr.msk.f32.gmra.mrb[10].mxu0 %vm323_vm1, %v10212_v38 }
 0x186   : > { %8010 = vmatprep.mubr.msk.f32.mxu0 %vm323_vm1, %v12443_v33  ;;  %v12447_v33 = vld [vmem:[#allocation39_spill] sm:$0xff] }
 0x189   : > { %8011 = vmatmul.mubr.msk.f32.gmra.mrb[12].mxu0 %vm323_vm1, %v10225_v46 }
 0x18a   : > { %8013 = vmatprep.mubr.msk.f32.mxu0 %vm323_vm1, %v12444_v15  ;;  %v12448_v15 = vld [vmem:[#allocation40_spill] sm:$0xff] }
 0x18d   : > { %8014 = vmatmul.mubr.msk.f32.gmra.mrb[14].mxu0 %vm323_vm1, %v10238_v54 }
 0x18e   : > { %8016 = vmatprep.mubr.msk.f32.mxu0 %vm323_vm1, %v12445_v4  ;;  %v12449_v4 = vld [vmem:[#allocation42_spill] sm:$0xff] }
 0x191   : > { %8017 = vmatmul.mubr.msk.f32.gmra.mrb[16].mxu0 %vm323_vm1, %v10251_v6 }
 0x192   : > { %8019 = vmatprep.mubr.msk.f32.mxu0 %vm323_vm1, %v12446_v60 }
 0x195   : > { %8020 = vmatmul.mubr.msk.f32.gmra.mrb[18].mxu0 %vm323_vm1, %v10264_v26  ;;  %v2131_v26 = vrot.slane %v10401_v2, 2 }
 0x196   : > { %8022 = vmatprep.mubr.msk.f32.mxu0 %vm323_vm1, %v12447_v33  ;;  %v2130_v33 = vrot.slane %v10395_v0, 2 }
 0x199   : > { %8023 = vmatmul.mubr.msk.f32.gmra.mrb[20].mxu0 %vm323_vm1, %v10277_v45 }
 0x19a   : > { %8025 = vmatprep.mubr.msk.f32.mxu0 %vm323_vm1, %v12448_v15  ;;  %v10548_v15 = vsel %vm1183_vm4, %v2130_v33, %v2131_v26 }
 0x19d   : > { %8026 = vmatmul.mubr.msk.f32.gmra.mrb[22].mxu0 %vm323_vm1, %v10290_v63  ;;  %v2133_v63 = vrot.slane %v462_v23, 2  ;;  %v6691_v23 = vld [vmem:[%s12212_s2 + $0x20] sm:$0x7] }
 0x19e   : > { %8028 = vmatprep.mubr.msk.f32.mxu0 %vm323_vm1, %v12449_v4 }
 0x1a1   : > { %8029 = vmatmul.mubr.msk.f32.gmra.mrb[24].mxu0 %vm323_vm1, %v10303_v1 }
 0x1a2   : > { %8031 = vmatprep.mubr.msk.f32.mxu0 %vm323_vm1, %v10307_v59  ;;  %v10555_v59 = vsel %vm1183_vm4, %v2131_v26, %v2133_v63 }
 0x1a5   : > { %8032 = vmatmul.mubr.msk.f32.gmra.mrb[26].mxu0 %vm323_vm1, %v10316_v17 }
 0x1a6   : > { %8034 = vmatprep.mubr.msk.f32.mxu0 %vm323_vm1, %v10320_v43 }
 0x1a9   : > { %8035 = vmatmul.mubr.msk.f32.gmra.mrb[28].mxu0 %vm323_vm1, %v10327_v8 }
 0x1aa   : > { %8037 = vmatprep.mubr.msk.f32.mxu0 %vm323_vm1, %v10548_v15 }
 0x1ad   : > { %8038 = vmatmul.mubr.msk.f32.gmra.mrb[30].mxu0 %vm323_vm1, %v10555_v59 }
 0x1ae   : > { %8042 = vmatprep.mubr.msk.f32.mxu0 %vm323_vm1, %v9754_v13  ;;  %v10622_v13 = vld [vmem:[#allocation2 + $0x198] sm:$0xff] }
 0x1b1   : > { %8043 = vmatmul.mubr.msk.f32.vlgmr.msra.gmra.mrb[0].mxu0 %vm323_vm1, %v9756_v14  ;;  %v10628_v14 = vld [vmem:[#allocation2 + $0x1a0] sm:$0xff] }
 0x1b2   : > { %8091 = vmatpush3.msk.msra.mxu0 %vm662_vm0, %v6657_v57  ;;  %8045 = vmatprep.mubr.msk.f32.mxu0 %vm323_vm1, %v9766_v20  ;;  %v12450_v20 = vld [vmem:[#allocation6_spill] sm:$0xff]  ;;  %v3426_v57 = vld [vmem:[%s12214_s4] sm:$0xff] }
 0x1b3   : > { %8140 = vmatprep.subr.msk.mxu0 %vm662_vm0, %v6691_v23 }
 0x1b5   : > { %8046 = vmatmul.mubr.msk.f32.gmra.mrb[2].mxu0 %vm323_vm1, %v9768_v21  ;;  %v12451_v21 = vld [vmem:[#allocation7_spill] sm:$0xff] }
 0x1b6   : > { %8048 = vmatprep.mubr.msk.f32.mxu0 %vm323_vm1, %v9790_v31  ;;  %v12452_v31 = vld [vmem:[#allocation8_spill] sm:$0xff] }
 0x1b9   : > { %8049 = vmatmul.mubr.msk.f32.gmra.mrb[4].mxu0 %vm323_vm1, %v9792_v32  ;;  %v12453_v32 = vld [vmem:[#allocation9_spill] sm:$0xff] }
 0x1ba   : > { %8051 = vmatprep.mubr.msk.f32.mxu0 %vm323_vm1, %v9810_v39  ;;  %v12454_v39 = vld [vmem:[#allocation10_spill] sm:$0xff] }
 0x1bd   : > { %8052 = vmatmul.mubr.msk.f32.gmra.mrb[6].mxu0 %vm323_vm1, %v9812_v40  ;;  %v12456_v40 = vld [vmem:[#allocation12_spill] sm:$0xff] }
 0x1be   : > { %8054 = vmatprep.mubr.msk.f32.mxu0 %vm323_vm1, %v9829_v47  ;;  %v12458_v47 = vld [vmem:[#allocation14_spill] sm:$0xff] }
 0x1c1   : > { %8055 = vmatmul.mubr.msk.f32.gmra.mrb[8].mxu0 %vm323_vm1, %v9831_v48  ;;  %v12459_v48 = vld [vmem:[#allocation15_spill] sm:$0xff] }
 0x1c2   : > { %8057 = vmatprep.mubr.msk.f32.mxu0 %vm323_vm1, %v9848_v55  ;;  %v12461_v55 = vld [vmem:[#allocation18_spill] sm:$0xff] }
 0x1c5   : > { %8058 = vmatmul.mubr.msk.f32.gmra.mrb[10].mxu0 %vm323_vm1, %v9850_v56  ;;  %v12462_v56 = vld [vmem:[#allocation20_spill] sm:$0xff] }
 0x1c6   : > { %8060 = vmatprep.mubr.msk.f32.mxu0 %vm323_vm1, %v9871_v10  ;;  %v12463_v10 = vld [vmem:[#allocation21_spill] sm:$0xff] }
 0x1c9   : > { %8061 = vmatmul.mubr.msk.f32.gmra.mrb[12].mxu0 %vm323_vm1, %v9873_v11  ;;  %v12464_v11 = vld [vmem:[#allocation22_spill] sm:$0xff] }
 0x1ca   : > { %8063 = vmatprep.mubr.msk.f32.mxu0 %vm323_vm1, %v9892_v27  ;;  %v12466_v27 = vld [vmem:[#allocation24_spill] sm:$0xff] }
 0x1cd   : > { %8064 = vmatmul.mubr.msk.f32.gmra.mrb[14].mxu0 %vm323_vm1, %v9894_v30  ;;  %v12467_v30 = vld [vmem:[#allocation25_spill] sm:$0xff] }
 0x1ce   : > { %8066 = vmatprep.mubr.msk.f32.mxu0 %vm323_vm1, %v9911_v50  ;;  %v12469_v50 = vld [vmem:[#allocation27_spill] sm:$0xff] }
 0x1d1   : > { %8067 = vmatmul.mubr.msk.f32.gmra.mrb[16].mxu0 %vm323_vm1, %v9913_v52  ;;  %v2670_v52 = vrot.slane %v10622_v13, 1 }
 0x1d2   : > { %8069 = vmatprep.mubr.msk.f32.mxu0 %vm323_vm1, %v9930_v5  ;;  %v465_v5 = vld [vmem:[#allocation2 + $0x1a8] sm:$0x3] }
 0x1d3   : > { %v2944_v26 = vrot.slane %v465_v5, 2 }
 0x1d5   : > { %8070 = vmatmul.mubr.msk.f32.gmra.mrb[18].mxu0 %vm323_vm1, %v9932_v9  ;;  %v2673_v9 = vrot.slane %v465_v5, 1 }
 0x1d6   : > { %8072 = vmatprep.mubr.msk.f32.mxu0 %vm323_vm1, %v9949_v37  ;;  %v12468_v37 = vld [vmem:[#allocation26_spill] sm:$0xff] }
 0x1d9   : > { %8073 = vmatmul.mubr.msk.f32.gmra.mrb[20].mxu0 %vm323_vm1, %v9951_v53  ;;  %v2671_v53 = vrot.slane %v10628_v14, 1 }
 0x1da   : > { %8075 = vmatprep.mubr.msk.f32.mxu0 %vm323_vm1, %v9968_v12  ;;  %v12465_v12 = vld [vmem:[#allocation23_spill] sm:$0xff] }
 0x1dd   : > { %8076 = vmatmul.mubr.msk.f32.gmra.mrb[22].mxu0 %vm323_vm1, %v9970_v16  ;;  %v2672_v16 = vsel %vm515_vm3, %v2670_v52, %v2671_v53 }
 0x1de   : > { %8078 = vmatprep.mubr.msk.f32.mxu0 %vm323_vm1, %v9987_v51  ;;  %v12460_v51 = vld [vmem:[#allocation16_spill] sm:$0xff] }
 0x1e1   : > { %8079 = vmatmul.mubr.msk.f32.gmra.mrb[24].mxu0 %vm323_vm1, %v9989_v44  ;;  %v2674_v44 = vsel %vm515_vm3, %v2671_v53, %v2673_v9  ;;  %v3429_v53 = vld [vmem:[%s12214_s4 + $0x18] sm:$0xff] }
 0x1e2   : > { %8081 = vmatprep.mubr.msk.f32.mxu0 %vm323_vm1, %v10006_v41  ;;  %v12457_v41 = vld [vmem:[#allocation13_spill] sm:$0xff] }
 0x1e5   : > { %8082 = vmatmul.mubr.msk.f32.gmra.mrb[26].mxu0 %vm323_vm1, %v10008_v61  ;;  %v12470_v61 = vld [vmem:[#allocation31_spill] sm:$0xff] }
 0x1e6   : > { %8084 = vmatprep.mubr.msk.f32.mxu0 %vm323_vm1, %v10395_v0  ;;  %v12481_v0 = vmov 0.0  }
 0x1e7   : > { %3289 = vst.msk [vmem:[#allocation3 + $0x20] sm:$0xff] %vm3283_vm5, %v12481_v0  ;;  %3284 = vst.msk [vmem:[#allocation3] sm:$0xff] %vm3283_vm5, %v12481_v0 }
 0x1e8   : > { %3290 = vst.msk [vmem:[#allocation3 + $0x28] sm:$0x3] %vm3286_vm6, %v12481_v0  ;;  %3287 = vst.msk [vmem:[#allocation3 + $0x10] sm:$0x3] %vm3286_vm6, %v12481_v0 }
 0x1e9   : > { %8085 = vmatmul.mubr.msk.f32.gmra.mrb[28].mxu0 %vm323_vm1, %v10401_v2  ;;  %3285 = vst.msk [vmem:[#allocation3 + $0x8] sm:$0xff] %vm3283_vm5, %v12481_v0  ;;  %3288 = vst.msk [vmem:[#allocation3 + $0x18] sm:$0xff] %vm3283_vm5, %v12481_v0 }
 0x1ea   : > { %8087 = vmatprep.mubr.msk.f32.mxu0 %vm323_vm1, %v10622_v13  ;;  %3291 = vst.msk [vmem:[#allocation3 + $0x30] sm:$0xff] %vm3283_vm5, %v12481_v0  ;;  %3292 = vst.msk [vmem:[#allocation3 + $0x38] sm:$0xff] %vm3283_vm5, %v12481_v0 }
 0x1eb   : > { %3293 = vst.msk [vmem:[#allocation3 + $0x40] sm:$0x3] %vm3286_vm6, %v12481_v0  ;;  %3296 = vst.msk [vmem:[#allocation3 + $0x58] sm:$0x3] %vm3286_vm6, %v12481_v0 }
 0x1ec   : > { %3294 = vst.msk [vmem:[#allocation3 + $0x48] sm:$0xff] %vm3283_vm5, %v12481_v0  ;;  %3295 = vst.msk [vmem:[#allocation3 + $0x50] sm:$0xff] %vm3283_vm5, %v12481_v0 }
 0x1ed   : > { %8088 = vmatmul.mubr.msk.f32.gmra.mrb[30].mxu0 %vm323_vm1, %v10628_v14  ;;  %3297 = vst.msk [vmem:[#allocation3 + $0x60] sm:$0xff] %vm3283_vm5, %v12481_v0  ;;  %3298 = vst.msk [vmem:[#allocation3 + $0x68] sm:$0xff] %vm3283_vm5, %v12481_v0 }
 0x1ee   : > { %8092 = vmatprep.mubr.msk.f32.mxu0 %vm323_vm1, %v9787_v29  ;;  %v12455_v29 = vld [vmem:[#allocation11_spill] sm:$0xff]  ;;  %3299 = vst.msk [vmem:[#allocation3 + $0x70] sm:$0x3] %vm3286_vm6, %v12481_v0  ;;  %3302 = vst.msk [vmem:[#allocation3 + $0x88] sm:$0x3] %vm3286_vm6, %v12481_v0 }
 0x1ef   : > { %3300 = vst.msk [vmem:[#allocation3 + $0x78] sm:$0xff] %vm3283_vm5, %v12481_v0  ;;  %3301 = vst.msk [vmem:[#allocation3 + $0x80] sm:$0xff] %vm3283_vm5, %v12481_v0 }
 0x1f0   : > { %3303 = vst.msk [vmem:[#allocation3 + $0x90] sm:$0xff] %vm3283_vm5, %v12481_v0  ;;  %3304 = vst.msk [vmem:[#allocation3 + $0x98] sm:$0xff] %vm3283_vm5, %v12481_v0 }
 0x1f1   : > { %8093 = vmatmul.mubr.msk.f32.vlgmr.msra.gmra.mrb[0].mxu0 %vm323_vm1, %v12416_v58  ;;  %3305 = vst.msk [vmem:[#allocation3 + $0xa0] sm:$0x3] %vm3286_vm6, %v12481_v0  ;;  %3308 = vst.msk [vmem:[#allocation3 + $0xb8] sm:$0x3] %vm3286_vm6, %v12481_v0  ;;  %v6730_v58 = vld [vmem:[%s12214_s4 + $0x60] sm:$0xff] }
 0x1f2   : > { %8141 = vmatpush3.msk.msra.mxu0 %vm662_vm0, %v6691_v23  ;;  %8095 = vmatprep.mubr.msk.f32.mxu0 %vm323_vm1, %v12450_v20  ;;  %3306 = vst.msk [vmem:[#allocation3 + $0xa8] sm:$0xff] %vm3283_vm5, %v12481_v0  ;;  %3307 = vst.msk [vmem:[#allocation3 + $0xb0] sm:$0xff] %vm3283_vm5, %v12481_v0 }
 0x1f3   : > { %3309 = vst.msk [vmem:[#allocation3 + $0xc0] sm:$0xff] %vm3283_vm5, %v12481_v0  ;;  %3310 = vst.msk [vmem:[#allocation3 + $0xc8] sm:$0xff] %vm3283_vm5, %v12481_v0 }
 0x1f4   : > { %3311 = vst.msk [vmem:[#allocation3 + $0xd0] sm:$0x3] %vm3286_vm6, %v12481_v0  ;;  %3314 = vst.msk [vmem:[#allocation3 + $0xe8] sm:$0x3] %vm3286_vm6, %v12481_v0 }
 0x1f5   : > { %8096 = vmatmul.mubr.msk.f32.gmra.mrb[2].mxu0 %vm323_vm1, %v12451_v21  ;;  %3312 = vst.msk [vmem:[#allocation3 + $0xd8] sm:$0xff] %vm3283_vm5, %v12481_v0  ;;  %3313 = vst.msk [vmem:[#allocation3 + $0xe0] sm:$0xff] %vm3283_vm5, %v12481_v0 }
 0x1f6   : > { %8098 = vmatprep.mubr.msk.f32.mxu0 %vm323_vm1, %v12452_v31  ;;  %3315 = vst.msk [vmem:[#allocation3 + $0xf0] sm:$0xff] %vm3283_vm5, %v12481_v0  ;;  %3316 = vst.msk [vmem:[#allocation3 + $0xf8] sm:$0xff] %vm3283_vm5, %v12481_v0 }
 0x1f7   : > { %3317 = vst.msk [vmem:[#allocation3 + $0x100] sm:$0x3] %vm3286_vm6, %v12481_v0  ;;  %3320 = vst.msk [vmem:[#allocation3 + $0x118] sm:$0x3] %vm3286_vm6, %v12481_v0 }
 0x1f8   : > { %3318 = vst.msk [vmem:[#allocation3 + $0x108] sm:$0xff] %vm3283_vm5, %v12481_v0  ;;  %3319 = vst.msk [vmem:[#allocation3 + $0x110] sm:$0xff] %vm3283_vm5, %v12481_v0 }
 0x1f9   : > { %8099 = vmatmul.mubr.msk.f32.gmra.mrb[4].mxu0 %vm323_vm1, %v12453_v32  ;;  %3321 = vst.msk [vmem:[#allocation3 + $0x120] sm:$0xff] %vm3283_vm5, %v12481_v0  ;;  %3322 = vst.msk [vmem:[#allocation3 + $0x128] sm:$0xff] %vm3283_vm5, %v12481_v0 }
 0x1fa   : > { %8101 = vmatprep.mubr.msk.f32.mxu0 %vm323_vm1, %v12454_v39  ;;  %3323 = vst.msk [vmem:[#allocation3 + $0x130] sm:$0x3] %vm3286_vm6, %v12481_v0  ;;  %3326 = vst.msk [vmem:[#allocation3 + $0x148] sm:$0x3] %vm3286_vm6, %v12481_v0 }
 0x1fb   : > { %3324 = vst.msk [vmem:[#allocation3 + $0x138] sm:$0xff] %vm3283_vm5, %v12481_v0  ;;  %3325 = vst.msk [vmem:[#allocation3 + $0x140] sm:$0xff] %vm3283_vm5, %v12481_v0 }
 0x1fc   : > { %3327 = vst.msk [vmem:[#allocation3 + $0x150] sm:$0xff] %vm3283_vm5, %v12481_v0  ;;  %3328 = vst.msk [vmem:[#allocation3 + $0x158] sm:$0xff] %vm3283_vm5, %v12481_v0 }
 0x1fd   : > { %8102 = vmatmul.mubr.msk.f32.gmra.mrb[6].mxu0 %vm323_vm1, %v12455_v29  ;;  %3329 = vst.msk [vmem:[#allocation3 + $0x160] sm:$0x3] %vm3286_vm6, %v12481_v0  ;;  %3332 = vst.msk [vmem:[#allocation3 + $0x178] sm:$0x3] %vm3286_vm6, %v12481_v0 }
 0x1fe   : > { %8104 = vmatprep.mubr.msk.f32.mxu0 %vm323_vm1, %v12456_v40  ;;  %3330 = vst.msk [vmem:[#allocation3 + $0x168] sm:$0xff] %vm3283_vm5, %v12481_v0  ;;  %3331 = vst.msk [vmem:[#allocation3 + $0x170] sm:$0xff] %vm3283_vm5, %v12481_v0 }
 0x1ff   : > { %3333 = vst.msk [vmem:[#allocation3 + $0x180] sm:$0xff] %vm3283_vm5, %v12481_v0  ;;  %3334 = vst.msk [vmem:[#allocation3 + $0x188] sm:$0xff] %vm3283_vm5, %v12481_v0 }
 0x200   : > { %3335 = vst.msk [vmem:[#allocation3 + $0x190] sm:$0x3] %vm3286_vm6, %v12481_v0  ;;  %3338 = vst.msk [vmem:[#allocation3 + $0x1a8] sm:$0x3] %vm3286_vm6, %v12481_v0 }
 0x201   : > { %8105 = vmatmul.mubr.msk.f32.gmra.mrb[8].mxu0 %vm323_vm1, %v12457_v41  ;;  %3336 = vst.msk [vmem:[#allocation3 + $0x198] sm:$0xff] %vm3283_vm5, %v12481_v0  ;;  %3337 = vst.msk [vmem:[#allocation3 + $0x1a0] sm:$0xff] %vm3283_vm5, %v12481_v0 }
 0x202   : > { %8107 = vmatprep.mubr.msk.f32.mxu0 %vm323_vm1, %v12458_v47 }
 0x205   : > { %8108 = vmatmul.mubr.msk.f32.gmra.mrb[10].mxu0 %vm323_vm1, %v12459_v48 }
 0x206   : > { %8110 = vmatprep.mubr.msk.f32.mxu0 %vm323_vm1, %v12460_v51 }
 0x209   : > { %8111 = vmatmul.mubr.msk.f32.gmra.mrb[12].mxu0 %vm323_vm1, %v12428_v24 }
 0x20a   : > { %8113 = vmatprep.mubr.msk.f32.mxu0 %vm323_vm1, %v12461_v55 }
 0x20d   : > { %8114 = vmatmul.mubr.msk.f32.gmra.mrb[14].mxu0 %vm323_vm1, %v12430_v19  ;;  %v6733_v19 = vld [vmem:[%s12214_s4 + $0x78] sm:$0xff] }
 0x20e   : > { %8116 = vmatprep.mubr.msk.f32.mxu0 %vm323_vm1, %v12462_v56 }
 0x211   : > { %8117 = vmatmul.mubr.msk.f32.gmra.mrb[16].mxu0 %vm323_vm1, %v12463_v10 }
 0x212   : > { %8119 = vmatprep.mubr.msk.f32.mxu0 %vm323_vm1, %v12464_v11 }
 0x215   : > { %8120 = vmatmul.mubr.msk.f32.gmra.mrb[18].mxu0 %vm323_vm1, %v12465_v12  ;;  %v3428_v12 = vld [vmem:[%s12214_s4 + $0x10] sm:$0xff] }
 0x216   : > { %8122 = vmatprep.mubr.msk.f32.mxu0 %vm323_vm1, %v12466_v27 }
 0x219   : > { %8123 = vmatmul.mubr.msk.f32.gmra.mrb[20].mxu0 %vm323_vm1, %v12467_v30 }
 0x21a   : > { %8125 = vmatprep.mubr.msk.f32.mxu0 %vm323_vm1, %v12468_v37 }
 0x21d   : > { %8126 = vmatmul.mubr.msk.f32.gmra.mrb[22].mxu0 %vm323_vm1, %v10015_v34  ;;  %v12471_v34 = vld [vmem:[#allocation32_spill] sm:$0xff] }
 0x21e   : > { %8128 = vmatprep.mubr.msk.f32.mxu0 %vm323_vm1, %v12469_v50 }
 0x221   : > { %8129 = vmatmul.mubr.msk.f32.gmra.mrb[24].mxu0 %vm323_vm1, %v10030_v62  ;;  %v12473_v62 = vld [vmem:[#allocation34_spill] sm:$0xff] }
 0x222   : > { %8131 = vmatprep.mubr.msk.f32.mxu0 %vm323_vm1, %v12437_v25  ;;  %v6731_v25 = vld [vmem:[%s12214_s4 + $0x68] sm:$0xff] }
 0x223   : > { %v8774_v24 = vpack.c.bf16 %v6731_v25, %v6730_v58  ;;  %v3432_v58 = vld [vmem:[%s12214_s4 + $0x30] sm:$0xff] }
 0x225   : > { %8132 = vmatmul.mubr.msk.f32.gmra.mrb[26].mxu0 %vm323_vm1, %v12438_v7 }
 0x226   : > { %8134 = vmatprep.mubr.msk.f32.mxu0 %vm323_vm1, %v10471_v35  ;;  %v6732_v35 = vld [vmem:[%s12214_s4 + $0x70] sm:$0xff] }
 0x227   : > { %v8778_v7 = vpack.c.bf16 %v6733_v19, %v6732_v35 }
 0x229   : > { %8135 = vmatmul.mubr.msk.f32.gmra.mrb[28].mxu0 %vm323_vm1, %v10478_v18  ;;  %v12472_v18 = vld [vmem:[#allocation33_spill] sm:$0xff] }
 0x22a   : > { %8137 = vmatprep.mubr.msk.f32.mxu0 %vm323_vm1, %v2672_v16 }
 0x22d   : > { %8138 = vmatmul.mubr.msk.f32.gmra.mrb[30].mxu0 %vm323_vm1, %v2674_v44 }
 0x22e   : > { %8142 = vmatprep.mubr.msk.f32.mxu0 %vm323_vm1, %v10149_v3  ;;  %v12474_v3 = vld [vmem:[#allocation35_spill] sm:$0xff] }
 0x231   : > { %8143 = vmatmul.mubr.msk.f32.vlgmr.msra.gmra.mrb[0].mxu0 %vm323_vm1, %v10160_v49  ;;  %v12475_v49 = vld [vmem:[#allocation36_spill] sm:$0xff] }
 0x232   : > { %8145 = vmatprep.mubr.msk.f32.mxu0 %vm323_vm1, %v12439_v42  ;;  %v3427_v42 = vld [vmem:[%s12214_s4 + $0x8] sm:$0xff] }
 0x235   : > { %8146 = vmatmul.mubr.msk.f32.gmra.mrb[2].mxu0 %vm323_vm1, %v10173_v22  ;;  %v12477_v22 = vld [vmem:[#allocation39_spill] sm:$0xff] }
 0x236   : > { %8148 = vmatprep.mubr.msk.f32.mxu0 %vm323_vm1, %v12470_v61 }
 0x239   : > { %8149 = vmatmul.mubr.msk.f32.gmra.mrb[4].mxu0 %vm323_vm1, %v10186_v36  ;;  %v12476_v36 = vld [vmem:[#allocation38_spill] sm:$0xff] }
 0x23a   : > { %8151 = vmatprep.mubr.msk.f32.mxu0 %vm323_vm1, %v12471_v34 }
 0x23d   : > { %8152 = vmatmul.mubr.msk.f32.gmra.mrb[6].mxu0 %vm323_vm1, %v10199_v28  ;;  %v12478_v28 = vld [vmem:[#allocation40_spill] sm:$0xff] }
 0x23e   : > { %8154 = vmatprep.mubr.msk.f32.mxu0 %vm323_vm1, %v12472_v18 }
 0x241   : > { %8155 = vmatmul.mubr.msk.f32.gmra.mrb[8].mxu0 %vm323_vm1, %v10212_v38  ;;  %v12479_v38 = vld [vmem:[#allocation41_spill] sm:$0xff] }
 0x242   : > { %8157 = vmatprep.mubr.msk.f32.mxu0 %vm323_vm1, %v12473_v62 }
 0x245   : > { %8158 = vmatmul.mubr.msk.f32.gmra.mrb[10].mxu0 %vm323_vm1, %v10225_v46  ;;  %v12480_v46 = vld [vmem:[#allocation43_spill] sm:$0xff] }
 0x246   : > { %8160 = vmatprep.mubr.msk.f32.mxu0 %vm323_vm1, %v12474_v3 }
 0x249   : > { %8161 = vmatmul.mubr.msk.f32.gmra.mrb[12].mxu0 %vm323_vm1, %v10238_v54  ;;  %v2941_v54 = vrot.slane %v10622_v13, 2 }
 0x24a   : > { %8163 = vmatprep.mubr.msk.f32.mxu0 %vm323_vm1, %v12475_v49  ;;  %v8786_v49 = vpack.c.bf16 %v3429_v53, %v3428_v12 }
 0x24d   : > { %8164 = vmatmul.mubr.msk.f32.gmra.mrb[14].mxu0 %vm323_vm1, %v10251_v6  ;;  %v2942_v6 = vrot.slane %v10628_v14, 2 }
 0x24e   : > { %8166 = vmatprep.mubr.msk.f32.mxu0 %vm323_vm1, %v12446_v60 }
 0x24f   : > { %v2945_v63 = vsel %vm1183_vm4, %v2942_v6, %v2944_v26 }
 0x251   : > { %8167 = vmatmul.mubr.msk.f32.gmra.mrb[16].mxu0 %vm323_vm1, %v12476_v36  ;;  %v3430_v36 = vld [vmem:[%s12214_s4 + $0x20] sm:$0xff] }
 0x252   : > { %8169 = vmatprep.mubr.msk.f32.mxu0 %vm323_vm1, %v12477_v22 }
 0x255   : > { %8170 = vmatmul.mubr.msk.f32.gmra.mrb[18].mxu0 %vm323_vm1, %v10277_v45  ;;  %v2943_v45 = vsel %vm1183_vm4, %v2941_v54, %v2942_v6  ;;  %v3431_v6 = vld [vmem:[%s12214_s4 + $0x28] sm:$0xff] }
 0x256   : > { %8172 = vmatprep.mubr.msk.f32.mxu0 %vm323_vm1, %v12478_v28 }
 0x259   : > { %8173 = vmatmul.mubr.msk.f32.gmra.mrb[20].mxu0 %vm323_vm1, %v12479_v38 }
 0x25a   : > { %8175 = vmatprep.mubr.msk.f32.mxu0 %vm323_vm1, %v12449_v4  ;;  %v10906_v4 = vld [vmem:[%s12213_s3] ss:$0 sm:$0xff] }
 0x25d   : > { %8176 = vmatmul.mubr.msk.f32.gmra.mrb[22].mxu0 %vm323_vm1, %v10303_v1  ;;  %v6726_v1 = vld [vmem:[%s12214_s4 + $0x40] sm:$0xff] }
 0x25e   : > { %8178 = vmatprep.mubr.msk.f32.mxu0 %vm323_vm1, %v12480_v46 }
 0x261   : > { %8179 = vmatmul.mubr.msk.f32.gmra.mrb[24].mxu0 %vm323_vm1, %v10316_v17  ;;  %v6727_v17 = vld [vmem:[%s12214_s4 + $0x48] sm:$0xff] }
 0x262   : > { %8181 = vmatprep.mubr.msk.f32.mxu0 %vm323_vm1, %v10320_v43  ;;  %v8766_v43 = vpack.c.bf16 %v6727_v17, %v6726_v1 }
 0x264   : > { %8910 = vmatprep.subr.bf16.mxu1 %v8766_v43  ;;  %8767 = vmatprep.subr.bf16.mxu0 %v8766_v43 }
 0x265   : > { %8182 = vmatmul.mubr.msk.f32.gmra.mrb[26].mxu0 %vm323_vm1, %v10327_v8  ;;  %8914 = vmatpush3.bf16.msra.mxu1 %v8766_v43  ;;  %v6729_v8 = vld [vmem:[%s12214_s4 + $0x58] sm:$0xff] }
 0x266   : > { %8184 = vmatprep.mubr.msk.f32.mxu0 %vm323_vm1, %v10548_v15  ;;  %8769 = vmatpush3.bf16.msra.mxu0 %v8766_v43  ;;  %v8782_v15 = vpack.c.bf16 %v3427_v42, %v3426_v57  ;;  %v3433_v57 = vld [vmem:[%s12214_s4 + $0x38] sm:$0xff] }
 0x269   : > { %8185 = vmatmul.mubr.msk.f32.gmra.mrb[28].mxu0 %vm323_vm1, %v10555_v59  ;;  %v6728_v59 = vld [vmem:[%s12214_s4 + $0x50] sm:$0xff] }
 0x26a   : > { %8187 = vmatprep.mubr.msk.f32.mxu0 %vm323_vm1, %v2943_v45  ;;  %v8770_v2 = vpack.c.bf16 %v6729_v8, %v6728_v59 }
 0x26c   : > { %8911 = vmatprep.subr.bf16.mxu1 %v8770_v2  ;;  %8771 = vmatprep.subr.bf16.mxu0 %v8770_v2 }
 0x26d   : > { %8188 = vmatmul.mubr.msk.f32.gmra.mrb[30].mxu0 %vm323_vm1, %v2945_v63  ;;  %8915 = vmatpush3.bf16.msra.mxu1 %v8770_v2 }
 0x26e   : > { %8773 = vmatpush3.bf16.msra.mxu0 %v8770_v2  ;;  %8912 = vmatprep.subr.bf16.mxu1 %v8774_v24  ;;  %v8790_v2 = vpack.c.bf16 %v3431_v6, %v3430_v36 }
 0x26f   : > { %8775 = vmatprep.subr.bf16.mxu0 %v8774_v24 }
 0x271   : > { %8916 = vmatpush3.bf16.msra.mxu1 %v8774_v24 }
 0x272   : > { %8777 = vmatpush3.bf16.msra.mxu0 %v8774_v24  ;;  %8913 = vmatprep.subr.bf16.mxu1 %v8778_v7 }
 0x273   : > { %8779 = vmatprep.subr.bf16.mxu0 %v8778_v7 }
 0x275   : > { %8917 = vmatpush3.bf16.msra.mxu1 %v8778_v7 }
 0x276   : > { %8781 = vmatpush3.bf16.msra.mxu0 %v8778_v7  ;;  %8783 = vmatprep.subr.bf16.mxu1 %v8782_v15 }
 0x304   : > { %v8144_v60 = vpop.f32.mrb[0].mxu0 }
 0x305   : > { %v3220_v33 = vadd.f32 %v8144_v60, %v10906_v4  ;;  %v3021_v23 = vpop.f32.mrb[1].mxu0 }
 0x306   : > { %v3219_v13 = vadd.f32 %v10906_v4, %v3021_v23 }
 0x307   : > { %v3252_v14 = vmax.f32 %v3220_v33, 0.0 }
 0x308   : > { %v3251_v20 = vmax.f32 %v3219_v13, 0.0  ;;  %v8147_v21 = vpop.f32.mrb[2].mxu0 }
 0x309   : > { %3341 = vst.msk [vmem:[#allocation3 + $0x21] sm:$0xff] %vm3283_vm5, %v3252_v14  ;;  %v3222_v31 = vadd.f32 %v8147_v21, %v10906_v4  ;;  %v3031_v32 = vpop.f32.mrb[3].mxu0 }
 0x30a   : > { %3340 = vst.msk [vmem:[#allocation3 + $0x19] sm:$0xff] %vm3283_vm5, %v3251_v20  ;;  %v3221_v39 = vadd.f32 %v10906_v4, %v3031_v32  ;;  %v6798_v32 = vld [vmem:[%s12214_s4 + $0x80] sm:$0xff] }
 0x30b   : > { %v3254_v29 = vmax.f32 %v3222_v31, 0.0  ;;  %v8794_v31 = vpack.c.bf16 %v3433_v57, %v3432_v58 }
 0x30c   : > { %v3253_v40 = vmax.f32 %v3221_v39, 0.0  ;;  %v8150_v41 = vpop.f32.mrb[4].mxu0 }
 0x30d   : > { %3343 = vst.msk [vmem:[#allocation3 + $0x39] sm:$0xff] %vm3283_vm5, %v3254_v29  ;;  %v3224_v47 = vadd.f32 %v8150_v41, %v10906_v4  ;;  %v3041_v48 = vpop.f32.mrb[5].mxu0 }
 0x30e   : > { %3342 = vst.msk [vmem:[#allocation3 + $0x31] sm:$0xff] %vm3283_vm5, %v3253_v40  ;;  %v3223_v51 = vadd.f32 %v10906_v4, %v3041_v48  ;;  %v6799_v48 = vld [vmem:[%s12214_s4 + $0x88] sm:$0xff] }
 0x30f   : > { %v3256_v55 = vmax.f32 %v3224_v47, 0.0 }
 0x310   : > { %v3255_v56 = vmax.f32 %v3223_v51, 0.0  ;;  %v8153_v10 = vpop.f32.mrb[6].mxu0  ;;  %v10918_v11 = vld [vmem:[#allocation3 + $0x28] sm:$0x3] }
 0x311   : > { %3345 = vst.msk [vmem:[#allocation3 + $0x51] sm:$0xff] %vm3283_vm5, %v3256_v55  ;;  %v3226_v27 = vadd.f32 %v8153_v10, %v10906_v4  ;;  %v3051_v30 = vpop.f32.mrb[7].mxu0  ;;  %v10925_v37 = vld [vmem:[#allocation3 + $0x18] sm:$0xff]  ;;  %v10927_v50 = vld [vmem:[#allocation3 + $0x20] sm:$0xff]  ;;  %v3490_v52 = vrot.slane %v10918_v11, 1 }
 0x312   : > { %3344 = vst.msk [vmem:[#allocation3 + $0x49] sm:$0xff] %vm3283_vm5, %v3255_v56  ;;  %v3225_v5 = vadd.f32 %v10906_v4, %v3051_v30  ;;  %v3487_v9 = vrot.slane %v10925_v37, 1  ;;  %v3488_v16 = vrot.slane %v10927_v50, 1 }
 0x313   : > { %v3258_v44 = vmax.f32 %v3226_v27, 0.0 }
 0x314   : > { %v3257_v61 = vmax.f32 %v3225_v5, 0.0  ;;  %v8156_v34 = vpop.f32.mrb[8].mxu0  ;;  %v10938_v18 = vsel %vm515_vm3, %v3487_v9, %v3488_v16  ;;  %v10941_v62 = vsel %vm515_vm3, %v3488_v16, %v3490_v52  ;;  %v10943_v3 = vld [vmem:[#allocation3 + $0x40] sm:$0x3]  ;;  %v11032_v5 = vpack.c.bf16 %v6799_v48, %v6798_v32 }
 0x315   : > { %3347 = vst.msk [vmem:[#allocation3 + $0x69] sm:$0xff] %vm3283_vm5, %v3258_v44  ;;  %v3228_v22 = vadd.f32 %v8156_v34, %v10906_v4  ;;  %v3061_v28 = vpop.f32.mrb[9].mxu0  ;;  %8209 = vmatprep.mubr.msk.f32.mxu1 %vm3283_vm5, %v10938_v18  ;;  %v10952_v38 = vld [vmem:[#allocation3 + $0x30] sm:$0xff]  ;;  %v10954_v46 = vld [vmem:[#allocation3 + $0x38] sm:$0xff]  ;;  %v3495_v54 = vrot.slane %v10943_v3, 1 }
 0x316   : > { %3346 = vst.msk [vmem:[#allocation3 + $0x61] sm:$0xff] %vm3283_vm5, %v3257_v61  ;;  %v3227_v26 = vadd.f32 %v10906_v4, %v3061_v28  ;;  %8210 = vmatmul.mubr.msk.f32.vlgmr.msra.gmra.mrb[0].mxu1 %vm3283_vm5, %v10941_v62  ;;  %v3492_v45 = vrot.slane %v10952_v38, 1  ;;  %v3493_v63 = vrot.slane %v10954_v46, 1 }
 0x317   : > { %v3260_v1 = vmax.f32 %v3228_v22, 0.0  ;;  %8785 = vmatpush3.bf16.msra.mxu1 %v8782_v15 }
 0x318   : > { %v3259_v17 = vmax.f32 %v3227_v26, 0.0  ;;  %v8159_v43 = vpop.f32.mrb[10].mxu0  ;;  %v10967_v59 = vsel %vm515_vm3, %v3492_v45, %v3493_v63  ;;  %v10970_v8 = vsel %vm515_vm3, %v3493_v63, %v3495_v54  ;;  %v10972_v0 = vld [vmem:[#allocation3 + $0x58] sm:$0x3]  ;;  %8787 = vmatprep.subr.bf16.mxu1 %v8786_v49 }
 0x319   : > { %3349 = vst.msk [vmem:[#allocation3 + $0x81] sm:$0xff] %vm3283_vm5, %v3260_v1  ;;  %v3230_v25 = vadd.f32 %v8159_v43, %v10906_v4  ;;  %v3071_v24 = vpop.f32.mrb[11].mxu0  ;;  %8212 = vmatprep.mubr.msk.f32.mxu1 %vm3283_vm5, %v10967_v59  ;;  %v10981_v35 = vld [vmem:[#allocation3 + $0x48] sm:$0xff]  ;;  %v10983_v19 = vld [vmem:[#allocation3 + $0x50] sm:$0xff]  ;;  %v3500_v7 = vrot.slane %v10972_v0, 1 }
 0x31a   : > { %3348 = vst.msk [vmem:[#allocation3 + $0x79] sm:$0xff] %vm3283_vm5, %v3259_v17  ;;  %v3229_v42 = vadd.f32 %v10906_v4, %v3071_v24  ;;  %8213 = vmatmul.mubr.msk.f32.gmra.mrb[2].mxu1 %vm3283_vm5, %v10970_v8  ;;  %v3497_v15 = vrot.slane %v10981_v35, 1  ;;  %v3498_v60 = vrot.slane %v10983_v19, 1 }
 0x31b   : > { %v3262_v33 = vmax.f32 %v3230_v25, 0.0  ;;  %8789 = vmatpush3.bf16.msra.mxu1 %v8786_v49 }
 0x31c   : > { %v3261_v23 = vmax.f32 %v3229_v42, 0.0  ;;  %v8162_v13 = vpop.f32.mrb[12].mxu0  ;;  %v10996_v14 = vsel %vm515_vm3, %v3497_v15, %v3498_v60  ;;  %v10999_v20 = vsel %vm515_vm3, %v3498_v60, %v3500_v7  ;;  %v11001_v21 = vld [vmem:[#allocation3 + $0x70] sm:$0x3]  ;;  %8791 = vmatprep.subr.bf16.mxu1 %v8790_v2 }
 0x31d   : > { %12482 = vst [vmem:[#allocation5_spill] sm:$0xff] %v10999_v20  ;;  %3351 = vst.msk [vmem:[#allocation3 + $0x99] sm:$0xff] %vm3283_vm5, %v3262_v33  ;;  %v3232_v39 = vadd.f32 %v8162_v13, %v10906_v4  ;;  %v3081_v29 = vpop.f32.mrb[13].mxu0  ;;  %8215 = vmatprep.mubr.msk.f32.mxu1 %vm3283_vm5, %v10996_v14  ;;  %v11010_v40 = vld [vmem:[#allocation3 + $0x60] sm:$0xff]  ;;  %v11012_v41 = vld [vmem:[#allocation3 + $0x68] sm:$0xff]  ;;  %v3505_v47 = vrot.slane %v11001_v21, 1 }
 0x31e   : > { %3350 = vst.msk [vmem:[#allocation3 + $0x91] sm:$0xff] %vm3283_vm5, %v3261_v23  ;;  %v3231_v51 = vadd.f32 %v10906_v4, %v3081_v29  ;;  %8216 = vmatmul.mubr.msk.f32.gmra.mrb[4].mxu1 %vm3283_vm5, %v10999_v20  ;;  %v3502_v55 = vrot.slane %v11010_v40, 1  ;;  %v3503_v56 = vrot.slane %v11012_v41, 1 }
 0x31f   : > { %v3264_v10 = vmax.f32 %v3232_v39, 0.0  ;;  %8793 = vmatpush3.bf16.msra.mxu1 %v8790_v2 }
 0x320   : > { %v3263_v12 = vmax.f32 %v3231_v51, 0.0  ;;  %v8165_v27 = vpop.f32.mrb[14].mxu0  ;;  %v11025_v30 = vsel %vm515_vm3, %v3502_v55, %v3503_v56  ;;  %v11028_v52 = vsel %vm515_vm3, %v3503_v56, %v3505_v47  ;;  %v11030_v53 = vld [vmem:[#allocation3 + $0x88] sm:$0x3]  ;;  %8795 = vmatprep.subr.bf16.mxu1 %v8794_v31 }
 0x321   : > { %12483 = vst [vmem:[#allocation17_spill] sm:$0xff] %v11025_v30  ;;  %12484 = vst [vmem:[#allocation19_spill] sm:$0xff] %v11028_v52  ;;  %v3234_v9 = vadd.f32 %v8165_v27, %v10906_v4  ;;  %v3091_v16 = vpop.f32.mrb[15].mxu0  ;;  %8218 = vmatprep.mubr.msk.f32.mxu1 %vm3283_vm5, %v11025_v30  ;;  %v11038_v44 = vld [vmem:[#allocation3 + $0x78] sm:$0xff]  ;;  %v11040_v61 = vld [vmem:[#allocation3 + $0x80] sm:$0xff]  ;;  %v3510_v34 = vrot.slane %v11030_v53, 1 }
 0x322   : > { %3353 = vst.msk [vmem:[#allocation3 + $0xb1] sm:$0xff] %vm3283_vm5, %v3264_v10  ;;  %3352 = vst.msk [vmem:[#allocation3 + $0xa9] sm:$0xff] %vm3283_vm5, %v3263_v12  ;;  %v3233_v49 = vadd.f32 %v10906_v4, %v3091_v16  ;;  %8219 = vmatmul.mubr.msk.f32.gmra.mrb[6].mxu1 %vm3283_vm5, %v11028_v52  ;;  %v3507_v36 = vrot.slane %v11038_v44, 1  ;;  %v3508_v22 = vrot.slane %v11040_v61, 1  ;;  %v6842_v52 = vld [vmem:[%s12214_s4 + $0xe0] sm:$0xff]  ;;  %v6843_v30 = vld [vmem:[%s12214_s4 + $0xe8] sm:$0xff] }
 0x323   : > { %v3266_v28 = vmax.f32 %v3234_v9, 0.0  ;;  %8797 = vmatpush3.bf16.msra.mxu1 %v8794_v31 }
 0x324   : > { %v3265_v54 = vmax.f32 %v3233_v49, 0.0  ;;  %v8168_v6 = vpop.f32.mrb[16].mxu0  ;;  %v11050_v26 = vsel %vm515_vm3, %v3507_v36, %v3508_v22  ;;  %v11053_v45 = vsel %vm515_vm3, %v3508_v22, %v3510_v34  ;;  %v11055_v63 = vld [vmem:[#allocation3 + $0xa0] sm:$0x3]  ;;  %8799 = vmatprep.subr.bf16.mxu1 %v11032_v5 }
 0x325   : > { %12485 = vst [vmem:[#allocation28_spill] sm:$0xff] %v11050_v26  ;;  %12486 = vst [vmem:[#allocation29_spill] sm:$0xff] %v11053_v45  ;;  %v3236_v1 = vadd.f32 %v8168_v6, %v10906_v4  ;;  %v3101_v17 = vpop.f32.mrb[17].mxu0  ;;  %8221 = vmatprep.mubr.msk.f32.mxu1 %vm3283_vm5, %v11050_v26  ;;  %v11062_v43 = vld [vmem:[#allocation3 + $0x90] sm:$0xff]  ;;  %v11064_v2 = vld [vmem:[#allocation3 + $0x98] sm:$0xff]  ;;  %v3515_v58 = vrot.slane %v11055_v63, 1 }
 0x326   : > { %3355 = vst.msk [vmem:[#allocation3 + $0xc9] sm:$0xff] %vm3283_vm5, %v3266_v28  ;;  %3354 = vst.msk [vmem:[#allocation3 + $0xc1] sm:$0xff] %vm3283_vm5, %v3265_v54  ;;  %v3235_v25 = vadd.f32 %v10906_v4, %v3101_v17  ;;  %8222 = vmatmul.mubr.msk.f32.gmra.mrb[8].mxu1 %vm3283_vm5, %v11053_v45  ;;  %v3512_v24 = vrot.slane %v11062_v43, 1  ;;  %v3513_v7 = vrot.slane %v11064_v2, 1  ;;  %v4157_v26 = vrot.slane %v10918_v11, 2 }
 0x327   : > { %v3268_v57 = vmax.f32 %v3236_v1, 0.0  ;;  %v8822_v11 = vpack.c.bf16 %v6843_v30, %v6842_v52  ;;  %v4164_v30 = vrot.slane %v10981_v35, 2  ;;  %v4165_v52 = vrot.slane %v10983_v19, 2 }
 0x328   : > { %v3267_v42 = vmax.f32 %v3235_v25, 0.0  ;;  %v8171_v15 = vpop.f32.mrb[18].mxu0  ;;  %v11074_v60 = vsel %vm515_vm3, %v3512_v24, %v3513_v7  ;;  %v11077_v33 = vsel %vm515_vm3, %v3513_v7, %v3515_v58 }
 0x329   : > { %12487 = vst [vmem:[#allocation30_spill] sm:$0xff] %v11074_v60  ;;  %12488 = vst [vmem:[#allocation37_spill] sm:$0xff] %v11077_v33  ;;  %v11079_v23 = vld [vmem:[#allocation3 + $0xb8] sm:$0x3]  ;;  %v3238_v13 = vadd.f32 %v8171_v15, %v10906_v4  ;;  %v3111_v31 = vpop.f32.mrb[19].mxu0  ;;  %8224 = vmatprep.mubr.msk.f32.mxu1 %vm3283_vm5, %v11074_v60  ;;  %v11085_v32 = vld [vmem:[#allocation3 + $0xa8] sm:$0xff] }
 0x32a   : > { %3357 = vst.msk [vmem:[#allocation3 + $0xe1] sm:$0xff] %vm3283_vm5, %v3268_v57  ;;  %v11087_v39 = vld [vmem:[#allocation3 + $0xb0] sm:$0xff]  ;;  %v3520_v29 = vrot.slane %v11079_v23, 1  ;;  %3356 = vst.msk [vmem:[#allocation3 + $0xd9] sm:$0xff] %vm3283_vm5, %v3267_v42  ;;  %v3237_v47 = vadd.f32 %v10906_v4, %v3111_v31  ;;  %8225 = vmatmul.mubr.msk.f32.gmra.mrb[10].mxu1 %vm3283_vm5, %v11077_v33  ;;  %v3517_v48 = vrot.slane %v11085_v32, 1 }
 0x32b   : > { %v3518_v51 = vrot.slane %v11087_v39, 1  ;;  %v3270_v55 = vmax.f32 %v3238_v13, 0.0 }
 0x32c   : > { %v3269_v56 = vmax.f32 %v3237_v47, 0.0  ;;  %v8174_v10 = vpop.f32.mrb[20].mxu0 }
 0x32d   : > { %v11097_v12 = vsel %vm515_vm3, %v3517_v48, %v3518_v51  ;;  %v11100_v27 = vsel %vm515_vm3, %v3518_v51, %v3520_v29  ;;  %v11102_v9 = vld [vmem:[#allocation3 + $0xd0] sm:$0x3]  ;;  %3359 = vst.msk [vmem:[#allocation3 + $0xf9] sm:$0xff] %vm3283_vm5, %v3270_v55  ;;  %v3240_v16 = vadd.f32 %v8174_v10, %v10906_v4  ;;  %v3121_v34 = vpop.f32.mrb[21].mxu0  ;;  %v11108_v49 = vld [vmem:[#allocation3 + $0xc0] sm:$0xff]  ;;  %v11110_v36 = vld [vmem:[#allocation3 + $0xc8] sm:$0xff] }
 0x32e   : > { %12489 = vst [vmem:[#allocation42_spill] sm:$0xff] %v11097_v12  ;;  %12490 = vst [vmem:[#allocation6_spill] sm:$0xff] %v11100_v27  ;;  %8227 = vmatprep.mubr.msk.f32.mxu1 %vm3283_vm5, %v11097_v12  ;;  %v3525_v22 = vrot.slane %v11102_v9, 1  ;;  %v3239_v28 = vadd.f32 %v10906_v4, %v3121_v34  ;;  %v3522_v54 = vrot.slane %v11108_v49, 1  ;;  %v3523_v6 = vrot.slane %v11110_v36, 1 }
 0x32f   : > { %3358 = vst.msk [vmem:[#allocation3 + $0xf1] sm:$0xff] %vm3283_vm5, %v3269_v56  ;;  %8228 = vmatmul.mubr.msk.f32.gmra.mrb[12].mxu1 %vm3283_vm5, %v11100_v27  ;;  %v3272_v1 = vmax.f32 %v3240_v16, 0.0 }
 0x330   : > { %v3271_v17 = vmax.f32 %v3239_v28, 0.0  ;;  %v8177_v58 = vpop.f32.mrb[22].mxu0  ;;  %v11120_v25 = vsel %vm515_vm3, %v3522_v54, %v3523_v6  ;;  %v11123_v24 = vsel %vm515_vm3, %v3523_v6, %v3525_v22 }
 0x331   : > { %12491 = vst [vmem:[#allocation7_spill] sm:$0xff] %v11120_v25  ;;  %12492 = vst [vmem:[#allocation8_spill] sm:$0xff] %v11123_v24  ;;  %v11125_v7 = vld [vmem:[#allocation3 + $0xe8] sm:$0x3]  ;;  %v3242_v57 = vadd.f32 %v8177_v58, %v10906_v4  ;;  %v3131_v42 = vpop.f32.mrb[23].mxu0  ;;  %8230 = vmatprep.mubr.msk.f32.mxu1 %vm3283_vm5, %v11120_v25  ;;  %v11131_v15 = vld [vmem:[#allocation3 + $0xd8] sm:$0xff] }
 0x332   : > { %3361 = vst.msk [vmem:[#allocation3 + $0x111] sm:$0xff] %vm3283_vm5, %v3272_v1  ;;  %v11133_v13 = vld [vmem:[#allocation3 + $0xe0] sm:$0xff]  ;;  %v3530_v31 = vrot.slane %v11125_v7, 1  ;;  %3360 = vst.msk [vmem:[#allocation3 + $0x109] sm:$0xff] %vm3283_vm5, %v3271_v17  ;;  %v3241_v29 = vadd.f32 %v10906_v4, %v3131_v42  ;;  %v3527_v47 = vrot.slane %v11131_v15, 1 }
 0x333   : > { %8231 = vmatmul.mubr.msk.f32.gmra.mrb[14].mxu1 %vm3283_vm5, %v11123_v24  ;;  %v3528_v48 = vrot.slane %v11133_v13, 1  ;;  %v3274_v51 = vmax.f32 %v3242_v57, 0.0 }
 0x334   : > { %v3273_v55 = vmax.f32 %v3241_v29, 0.0  ;;  %v8180_v56 = vpop.f32.mrb[24].mxu0  ;;  %v11148_v34 = vld [vmem:[#allocation3 + $0x100] sm:$0x3] }
 0x335   : > { %v11143_v10 = vsel %vm515_vm3, %v3527_v47, %v3528_v48  ;;  %v11146_v16 = vsel %vm515_vm3, %v3528_v48, %v3530_v31  ;;  %3363 = vst.msk [vmem:[#allocation3 + $0x129] sm:$0xff] %vm3283_vm5, %v3274_v51  ;;  %v3244_v22 = vadd.f32 %v8180_v56, %v10906_v4  ;;  %v3141_v28 = vpop.f32.mrb[25].mxu0  ;;  %v3535_v1 = vrot.slane %v11148_v34, 1 }
 0x336   : > { %12493 = vst [vmem:[#allocation9_spill] sm:$0xff] %v11143_v10  ;;  %12494 = vst [vmem:[#allocation10_spill] sm:$0xff] %v11146_v16  ;;  %8233 = vmatprep.mubr.msk.f32.mxu1 %vm3283_vm5, %v11143_v10  ;;  %v11154_v54 = vld [vmem:[#allocation3 + $0xf0] sm:$0xff]  ;;  %v11156_v6 = vld [vmem:[#allocation3 + $0xf8] sm:$0xff]  ;;  %v3243_v17 = vadd.f32 %v10906_v4, %v3141_v28 }
 0x337   : > { %3362 = vst.msk [vmem:[#allocation3 + $0x121] sm:$0xff] %vm3283_vm5, %v3273_v55  ;;  %8234 = vmatmul.mubr.msk.f32.gmra.mrb[16].mxu1 %vm3283_vm5, %v11146_v16  ;;  %v3532_v58 = vrot.slane %v11154_v54, 1  ;;  %v3533_v57 = vrot.slane %v11156_v6, 1  ;;  %v3276_v42 = vmax.f32 %v3244_v22, 0.0 }
 0x338   : > { %v3275_v31 = vmax.f32 %v3243_v17, 0.0  ;;  %v8183_v29 = vpop.f32.mrb[26].mxu0 }
 0x339   : > { %v11166_v47 = vsel %vm515_vm3, %v3532_v58, %v3533_v57  ;;  %v11169_v48 = vsel %vm515_vm3, %v3533_v57, %v3535_v1  ;;  %v11171_v51 = vld [vmem:[#allocation3 + $0x118] sm:$0x3]  ;;  %3365 = vst.msk [vmem:[#allocation3 + $0x141] sm:$0xff] %vm3283_vm5, %v3276_v42  ;;  %v3246_v55 = vadd.f32 %v8183_v29, %v10906_v4  ;;  %v3151_v56 = vpop.f32.mrb[27].mxu0  ;;  %v11177_v28 = vld [vmem:[#allocation3 + $0x108] sm:$0xff]  ;;  %v11179_v22 = vld [vmem:[#allocation3 + $0x110] sm:$0xff] }
 0x33a   : > { %12495 = vst [vmem:[#allocation11_spill] sm:$0xff] %v11166_v47  ;;  %12496 = vst [vmem:[#allocation12_spill] sm:$0xff] %v11169_v48  ;;  %8236 = vmatprep.mubr.msk.f32.mxu1 %vm3283_vm5, %v11166_v47  ;;  %v3540_v17 = vrot.slane %v11171_v51, 1  ;;  %v3245_v1 = vadd.f32 %v10906_v4, %v3151_v56  ;;  %v3537_v58 = vrot.slane %v11177_v28, 1  ;;  %v3538_v57 = vrot.slane %v11179_v22, 1 }
 0x33b   : > { %3364 = vst.msk [vmem:[#allocation3 + $0x139] sm:$0xff] %vm3283_vm5, %v3275_v31  ;;  %8237 = vmatmul.mubr.msk.f32.gmra.mrb[18].mxu1 %vm3283_vm5, %v11169_v48  ;;  %v3278_v42 = vmax.f32 %v3246_v55, 0.0 }
 0x33c   : > { %v3277_v29 = vmax.f32 %v3245_v1, 0.0  ;;  %v8186_v47 = vpop.f32.mrb[28].mxu0  ;;  %v11189_v16 = vsel %vm515_vm3, %v3537_v58, %v3538_v57  ;;  %v11192_v10 = vsel %vm515_vm3, %v3538_v57, %v3540_v17  ;;  %v11194_v24 = vld [vmem:[#allocation3 + $0x130] sm:$0x3] }
 0x33d   : > { %12497 = vst [vmem:[#allocation13_spill] sm:$0xff] %v11189_v16  ;;  %12498 = vst [vmem:[#allocation14_spill] sm:$0xff] %v11192_v10  ;;  %v3248_v31 = vadd.f32 %v8186_v47, %v10906_v4  ;;  %v3161_v56 = vpop.f32.mrb[29].mxu0  ;;  %8239 = vmatprep.mubr.msk.f32.mxu1 %vm3283_vm5, %v11189_v16  ;;  %v3545_v1 = vrot.slane %v11194_v24, 1 }
 0x33e   : > { %3367 = vst.msk [vmem:[#allocation3 + $0x159] sm:$0xff] %vm3283_vm5, %v3278_v42  ;;  %v11200_v48 = vld [vmem:[#allocation3 + $0x120] sm:$0xff]  ;;  %v11202_v55 = vld [vmem:[#allocation3 + $0x128] sm:$0xff]  ;;  %3366 = vst.msk [vmem:[#allocation3 + $0x151] sm:$0xff] %vm3283_vm5, %v3277_v29  ;;  %v3247_v17 = vadd.f32 %v10906_v4, %v3161_v56 }
 0x33f   : > { %8240 = vmatmul.mubr.msk.f32.gmra.mrb[20].mxu1 %vm3283_vm5, %v11192_v10  ;;  %v3542_v58 = vrot.slane %v11200_v48, 1  ;;  %v3543_v47 = vrot.slane %v11202_v55, 1  ;;  %v3280_v57 = vmax.f32 %v3248_v31, 0.0 }
 0x340   : > { %v3279_v42 = vmax.f32 %v3247_v17, 0.0  ;;  %v8189_v16 = vpop.f32.mrb[30].mxu0  ;;  %v11217_v12 = vld [vmem:[#allocation3 + $0x148] sm:$0x3] }
 0x341   : > { %v11212_v25 = vsel %vm515_vm3, %v3542_v58, %v3543_v47  ;;  %v11215_v27 = vsel %vm515_vm3, %v3543_v47, %v3545_v1  ;;  %3369 = vst.msk [vmem:[#allocation3 + $0x171] sm:$0xff] %vm3283_vm5, %v3280_v57  ;;  %v3250_v29 = vadd.f32 %v8189_v16, %v10906_v4  ;;  %v3171_v56 = vpop.f32.mrb[31].mxu0  ;;  %v3550_v17 = vrot.slane %v11217_v12, 1 }
 0x342   : > { %12499 = vst [vmem:[#allocation15_spill] sm:$0xff] %v11212_v25  ;;  %12500 = vst [vmem:[#allocation16_spill] sm:$0xff] %v11215_v27  ;;  %8242 = vmatprep.mubr.msk.f32.mxu1 %vm3283_vm5, %v11212_v25  ;;  %v11223_v10 = vld [vmem:[#allocation3 + $0x138] sm:$0xff]  ;;  %v11225_v31 = vld [vmem:[#allocation3 + $0x140] sm:$0xff]  ;;  %v3249_v1 = vadd.f32 %v10906_v4, %v3171_v56 }
 0x343   : > { %3368 = vst.msk [vmem:[#allocation3 + $0x169] sm:$0xff] %vm3283_vm5, %v3279_v42  ;;  %8243 = vmatmul.mubr.msk.f32.gmra.mrb[22].mxu1 %vm3283_vm5, %v11215_v27  ;;  %v3547_v58 = vrot.slane %v11223_v10, 1  ;;  %v3548_v16 = vrot.slane %v11225_v31, 1  ;;  %v3282_v47 = vmax.f32 %v3250_v29, 0.0  ;;  %v6800_v27 = vld [vmem:[%s12214_s4 + $0x90] sm:$0xff] }
 0x344   : > { %v3281_v57 = vmax.f32 %v3249_v1, 0.0 }
 0x345   : > { %v11235_v25 = vsel %vm515_vm3, %v3547_v58, %v3548_v16  ;;  %v11238_v33 = vsel %vm515_vm3, %v3548_v16, %v3550_v17  ;;  %v11240_v60 = vld [vmem:[#allocation3 + $0x160] sm:$0x3]  ;;  %3371 = vst.msk [vmem:[#allocation3 + $0x189] sm:$0xff] %vm3283_vm5, %v3282_v47  ;;  %v11245_v4 = vld [vmem:[#allocation3 + $0x150] sm:$0xff]  ;;  %v11247_v42 = vld [vmem:[#allocation3 + $0x158] sm:$0xff] }
 0x346   : > { %12501 = vst [vmem:[#allocation18_spill] sm:$0xff] %v11235_v25  ;;  %12502 = vst [vmem:[#allocation20_spill] sm:$0xff] %v11238_v33  ;;  %8245 = vmatprep.mubr.msk.f32.mxu1 %vm3283_vm5, %v11235_v25  ;;  %v3555_v29 = vrot.slane %v11240_v60, 1  ;;  %v3552_v56 = vrot.slane %v11245_v4, 1  ;;  %v3553_v17 = vrot.slane %v11247_v42, 1 }
 0x347   : > { %3370 = vst.msk [vmem:[#allocation3 + $0x181] sm:$0xff] %vm3283_vm5, %v3281_v57  ;;  %8246 = vmatmul.mubr.msk.f32.gmra.mrb[24].mxu1 %vm3283_vm5, %v11238_v33 }
 0x348   : > { %v11256_v1 = vsel %vm515_vm3, %v3552_v56, %v3553_v17  ;;  %v11259_v58 = vsel %vm515_vm3, %v3553_v17, %v3555_v29  ;;  %v11261_v16 = vld [vmem:[#allocation3 + $0x178] sm:$0x3] }
 0x349   : > { %12503 = vst [vmem:[#allocation21_spill] sm:$0xff] %v11256_v1  ;;  %12504 = vst [vmem:[#allocation22_spill] sm:$0xff] %v11259_v58  ;;  %8248 = vmatprep.mubr.msk.f32.mxu1 %vm3283_vm5, %v11256_v1  ;;  %v3560_v33 = vrot.slane %v11261_v16, 1  ;;  %v11280_v1 = vld [vmem:[#allocation3] sm:$0xff] }
 0x34a   : > { %v11265_v47 = vld [vmem:[#allocation3 + $0x168] sm:$0xff]  ;;  %v11267_v57 = vld [vmem:[#allocation3 + $0x170] sm:$0xff]  ;;  %12507 = vst [vmem:[#allocation25_spill] sm:$0xff] %v11280_v1 }
 0x34b   : > { %8249 = vmatmul.mubr.msk.f32.gmra.mrb[26].mxu1 %vm3283_vm5, %v11259_v58  ;;  %v3557_v56 = vrot.slane %v11265_v47, 1  ;;  %v3558_v25 = vrot.slane %v11267_v57, 1  ;;  %v6801_v58 = vld [vmem:[%s12214_s4 + $0x98] sm:$0xff] }
 0x34d   : > { %v11275_v29 = vsel %vm515_vm3, %v3557_v56, %v3558_v25  ;;  %v11278_v17 = vsel %vm515_vm3, %v3558_v25, %v3560_v33  ;;  %v11294_v33 = vld [vmem:[#allocation3 + $0x8] sm:$0xff]  ;;  %v8802_v25 = vpack.c.bf16 %v6801_v58, %v6800_v27  ;;  %v6802_v56 = vld [vmem:[%s12214_s4 + $0xa0] sm:$0xff]  ;;  %v6804_v27 = vld [vmem:[%s12214_s4 + $0xb0] sm:$0xff] }
 0x34e   : > { %12505 = vst [vmem:[#allocation23_spill] sm:$0xff] %v11275_v29  ;;  %12506 = vst [vmem:[#allocation24_spill] sm:$0xff] %v11278_v17  ;;  %8251 = vmatprep.mubr.msk.f32.mxu1 %vm3283_vm5, %v11275_v29  ;;  %v6803_v29 = vld [vmem:[%s12214_s4 + $0xa8] sm:$0xff]  ;;  %v6805_v58 = vld [vmem:[%s12214_s4 + $0xb8] sm:$0xff] }
 0x34f   : > { %8252 = vmatmul.mubr.msk.f32.gmra.mrb[28].mxu1 %vm3283_vm5, %v11278_v17  ;;  %12508 = vst [vmem:[#allocation26_spill] sm:$0xff] %v11294_v33  ;;  %v8806_v17 = vpack.c.bf16 %v6803_v29, %v6802_v56  ;;  %v6838_v29 = vld [vmem:[%s12214_s4 + $0xc0] sm:$0xff]  ;;  %v6839_v56 = vld [vmem:[%s12214_s4 + $0xc8] sm:$0xff] }
 0x350   : > { %8270 = vmatprep.mubr.msk.f32.mxu1 %vm3283_vm5, %v11280_v1  ;;  %v8814_v45 = vpack.c.bf16 %v6839_v56, %v6838_v29  ;;  %v6840_v29 = vld [vmem:[%s12214_s4 + $0xd0] sm:$0xff]  ;;  %v6841_v56 = vld [vmem:[%s12214_s4 + $0xd8] sm:$0xff] }
 0x353   : > { %8271 = vmatmul.mubr.msk.f32.vlgmr.msra.gmra.mrb[30].mxu1 %vm3283_vm5, %v11294_v33 }
 0x354   : > { %8801 = vmatpush3.bf16.msra.mxu1 %v11032_v5  ;;  %8273 = vmatprep.mubr.msk.f32.mxu1 %vm3283_vm5, %v10925_v37  ;;  %v8810_v5 = vpack.c.bf16 %v6805_v58, %v6804_v27  ;;  %v11373_v27 = vld [vmem:[#allocation3 + $0x10] sm:$0x3] }
 0x355   : > { %8803 = vmatprep.subr.bf16.mxu1 %v8802_v25  ;;  %12509 = vst [vmem:[#allocation27_spill] sm:$0xff] %v11373_v27  ;;  %v4152_v58 = vrot.slane %v11373_v27, 2 }
 0x357   : > { %8274 = vmatmul.mubr.msk.f32.gmra.mrb[0].mxu1 %vm3283_vm5, %v10927_v50 }
 0x358   : > { %8276 = vmatprep.mubr.msk.f32.mxu1 %vm3283_vm5, %v10952_v38  ;;  %8805 = vmatpush3.bf16.msra.mxu1 %v8802_v25  ;;  %v4150_v25 = vrot.slane %v11294_v33, 2  ;;  %v4154_v33 = vrot.slane %v10925_v37, 2 }
 0x359   : > { %8807 = vmatprep.subr.bf16.mxu1 %v8806_v17 }
 0x35a   : > { %v4153_v27 = vsel %vm1183_vm4, %v4150_v25, %v4152_v58 }
 0x35b   : > { %8277 = vmatmul.mubr.msk.f32.gmra.mrb[2].mxu1 %vm3283_vm5, %v10954_v46 }
 0x35c   : > { %8279 = vmatprep.mubr.msk.f32.mxu1 %vm3283_vm5, %v10981_v35  ;;  %8809 = vmatpush3.bf16.msra.mxu1 %v8806_v17  ;;  %v4149_v17 = vrot.slane %v11280_v1, 2  ;;  %v4155_v1 = vrot.slane %v10927_v50, 2 }
 0x35d   : > { %8811 = vmatprep.subr.bf16.mxu1 %v8810_v5 }
 0x35e   : > { %v11402_v20 = vsel %vm1183_vm4, %v4154_v33, %v4155_v1  ;;  %v11409_v58 = vsel %vm1183_vm4, %v4155_v1, %v4157_v26  ;;  %v6844_v33 = vld [vmem:[%s12214_s4 + $0xf0] sm:$0xff]  ;;  %v4167_v1 = vrot.slane %v10972_v0, 2 }
 0x35f   : > { %8280 = vmatmul.mubr.msk.f32.gmra.mrb[4].mxu1 %vm3283_vm5, %v10983_v19 }
 0x360   : > { %8282 = vmatprep.mubr.msk.f32.mxu1 %vm3283_vm5, %v11010_v40  ;;  %8813 = vmatpush3.bf16.msra.mxu1 %v8810_v5  ;;  %v4151_v5 = vsel %vm1183_vm4, %v4149_v17, %v4150_v25  ;;  %v8818_v17 = vpack.c.bf16 %v6841_v56, %v6840_v29  ;;  %v4160_v25 = vrot.slane %v10954_v46, 2  ;;  %v4162_v29 = vrot.slane %v10943_v3, 2  ;;  %v6878_v56 = vld [vmem:[%s12214_s4 + $0x100] sm:$0xff] }
 0x361   : > { %8815 = vmatprep.subr.bf16.mxu1 %v8814_v45 }
 0x362   : > { %v11428_v26 = vsel %vm1183_vm4, %v4160_v25, %v4162_v29  ;;  %v11449_v29 = vsel %vm1183_vm4, %v4165_v52, %v4167_v1  ;;  %v4179_v1 = vrot.slane %v11062_v43, 2 }
 0x363   : > { %8283 = vmatmul.mubr.msk.f32.gmra.mrb[6].mxu1 %vm3283_vm5, %v11012_v41  ;;  %12511 = vst [vmem:[#allocation32_spill] sm:$0xff] %v11428_v26 }
 0x364   : > { %8285 = vmatprep.mubr.msk.f32.mxu1 %vm3283_vm5, %v11038_v44 }
 0x367   : > { %8286 = vmatmul.mubr.msk.f32.gmra.mrb[8].mxu1 %vm3283_vm5, %v11040_v61 }
 0x368   : > { %8288 = vmatprep.mubr.msk.f32.mxu1 %vm3283_vm5, %v11062_v43 }
 0x36b   : > { %8289 = vmatmul.mubr.msk.f32.gmra.mrb[10].mxu1 %vm3283_vm5, %v11064_v2 }
 0x36c   : > { %8291 = vmatprep.mubr.msk.f32.mxu1 %vm3283_vm5, %v11085_v32 }
 0x36f   : > { %8292 = vmatmul.mubr.msk.f32.gmra.mrb[12].mxu1 %vm3283_vm5, %v11087_v39 }
 0x370   : > { %8294 = vmatprep.mubr.msk.f32.mxu1 %vm3283_vm5, %v11108_v49 }
 0x373   : > { %8295 = vmatmul.mubr.msk.f32.gmra.mrb[14].mxu1 %vm3283_vm5, %v11110_v36 }
 0x374   : > { %8297 = vmatprep.mubr.msk.f32.mxu1 %vm3283_vm5, %v11131_v15 }
 0x377   : > { %8298 = vmatmul.mubr.msk.f32.gmra.mrb[16].mxu1 %vm3283_vm5, %v11133_v13 }
 0x378   : > { %8300 = vmatprep.mubr.msk.f32.mxu1 %vm3283_vm5, %v11154_v54 }
 0x37b   : > { %8301 = vmatmul.mubr.msk.f32.gmra.mrb[18].mxu1 %vm3283_vm5, %v11156_v6 }
 0x37c   : > { %8303 = vmatprep.mubr.msk.f32.mxu1 %vm3283_vm5, %v11177_v28 }
 0x37f   : > { %8304 = vmatmul.mubr.msk.f32.gmra.mrb[20].mxu1 %vm3283_vm5, %v11179_v22 }
 0x380   : > { %8306 = vmatprep.mubr.msk.f32.mxu1 %vm3283_vm5, %v11200_v48 }
 0x383   : > { %8307 = vmatmul.mubr.msk.f32.gmra.mrb[22].mxu1 %vm3283_vm5, %v11202_v55 }
 0x384   : > { %8309 = vmatprep.mubr.msk.f32.mxu1 %vm3283_vm5, %v11223_v10 }
 0x387   : > { %8310 = vmatmul.mubr.msk.f32.gmra.mrb[24].mxu1 %vm3283_vm5, %v11225_v31 }
 0x388   : > { %8312 = vmatprep.mubr.msk.f32.mxu1 %vm3283_vm5, %v11245_v4 }
 0x38b   : > { %8313 = vmatmul.mubr.msk.f32.gmra.mrb[26].mxu1 %vm3283_vm5, %v11247_v42 }
 0x38c   : > { %8315 = vmatprep.mubr.msk.f32.mxu1 %vm3283_vm5, %v11265_v47 }
 0x38f   : > { %8316 = vmatmul.mubr.msk.f32.gmra.mrb[28].mxu1 %vm3283_vm5, %v11267_v57 }
 0x390   : > { %8334 = vmatprep.mubr.msk.f32.mxu1 %vm3283_vm5, %v4151_v5  ;;  %v4159_v5 = vrot.slane %v10952_v38, 2 }
 0x393   : > { %8335 = vmatmul.mubr.msk.f32.vlgmr.msra.gmra.mrb[30].mxu1 %vm3283_vm5, %v4153_v27  ;;  %v6845_v27 = vld [vmem:[%s12214_s4 + $0xf8] sm:$0xff] }
 0x394   : > { %8817 = vmatpush3.bf16.msra.mxu1 %v8814_v45  ;;  %8337 = vmatprep.mubr.msk.f32.mxu1 %vm3283_vm5, %v11402_v20  ;;  %v11421_v45 = vsel %vm1183_vm4, %v4159_v5, %v4160_v25  ;;  %v8826_v3 = vpack.c.bf16 %v6845_v27, %v6844_v33  ;;  %v6879_v5 = vld [vmem:[%s12214_s4 + $0x108] sm:$0xff]  ;;  %v4169_v33 = vrot.slane %v11010_v40, 2  ;;  %v4170_v25 = vrot.slane %v11012_v41, 2 }
 0x395   : > { %8819 = vmatprep.subr.bf16.mxu1 %v8818_v17  ;;  %12510 = vst [vmem:[#allocation31_spill] sm:$0xff] %v11421_v45  ;;  %v11446_v0 = vpack.c.bf16 %v6879_v5, %v6878_v56  ;;  %v4172_v27 = vrot.slane %v11001_v21, 2  ;;  %v4177_v21 = vrot.slane %v11030_v53, 2  ;;  %v4180_v56 = vrot.slane %v11064_v2, 2 }
 0x396   : > { %v4182_v5 = vrot.slane %v11055_v63, 2 }
 0x397   : > { %8338 = vmatmul.mubr.msk.f32.gmra.mrb[0].mxu1 %vm3283_vm5, %v11409_v58  ;;  %v11482_v53 = vsel %vm1183_vm4, %v4179_v1, %v4180_v56 }
 0x398   : > { %8340 = vmatprep.mubr.msk.f32.mxu1 %vm3283_vm5, %v11421_v45  ;;  %8821 = vmatpush3.bf16.msra.mxu1 %v8818_v17  ;;  %v11440_v17 = vsel %vm1183_vm4, %v4164_v30, %v4165_v52  ;;  %v11455_v30 = vsel %vm1183_vm4, %v4169_v33, %v4170_v25  ;;  %v4175_v45 = vrot.slane %v11040_v61, 2  ;;  %v4185_v33 = vrot.slane %v11087_v39, 2 }
 0x399   : > { %8823 = vmatprep.subr.bf16.mxu1 %v8822_v11 }
 0x39b   : > { %8341 = vmatmul.mubr.msk.f32.gmra.mrb[2].mxu1 %vm3283_vm5, %v11428_v26  ;;  %v4174_v26 = vrot.slane %v11038_v44, 2 }
 0x39c   : > { %8343 = vmatprep.mubr.msk.f32.mxu1 %vm3283_vm5, %v11440_v17  ;;  %8825 = vmatpush3.bf16.msra.mxu1 %v8822_v11  ;;  %v11463_v11 = vsel %vm1183_vm4, %v4170_v25, %v4172_v27  ;;  %v11489_v25 = vsel %vm1183_vm4, %v4180_v56, %v4182_v5  ;;  %v4189_v27 = vrot.slane %v11108_v49, 2  ;;  %v4192_v56 = vrot.slane %v11102_v9, 2 }
 0x39d   : > { %8827 = vmatprep.subr.bf16.mxu1 %v8826_v3  ;;  %v11469_v52 = vsel %vm1183_vm4, %v4174_v26, %v4175_v45  ;;  %v4184_v26 = vrot.slane %v11085_v32, 2  ;;  %v4194_v5 = vrot.slane %v11131_v15, 2 }
 0x39f   : > { %8344 = vmatmul.mubr.msk.f32.gmra.mrb[4].mxu1 %vm3283_vm5, %v11449_v29  ;;  %v11495_v63 = vsel %vm1183_vm4, %v4184_v26, %v4185_v33  ;;  %v4195_v26 = vrot.slane %v11133_v13, 2 }
 0x3a0   : > { %8346 = vmatprep.mubr.msk.f32.mxu1 %vm3283_vm5, %v11455_v30  ;;  %8829 = vmatpush3.bf16.msra.mxu1 %v8826_v3  ;;  %v11476_v3 = vsel %vm1183_vm4, %v4175_v45, %v4177_v21  ;;  %v4187_v45 = vrot.slane %v11079_v23, 2  ;;  %12512 = vst [vmem:[#allocation33_spill] sm:$0xff] %v11495_v63  ;;  %v4190_v21 = vrot.slane %v11110_v36, 2 }
 0x3a1   : > { %8831 = vmatprep.subr.bf16.mxu1 %v11446_v0  ;;  %v11521_v9 = vsel %vm1183_vm4, %v4194_v5, %v4195_v26  ;;  %v4205_v5 = vrot.slane %v11179_v22, 2 }
 0x3a2   : > { %v11502_v1 = vsel %vm1183_vm4, %v4185_v33, %v4187_v45  ;;  %v11508_v23 = vsel %vm1183_vm4, %v4189_v27, %v4190_v21  ;;  %v4197_v33 = vrot.slane %v11125_v7, 2  ;;  %12514 = vst [vmem:[#allocation35_spill] sm:$0xff] %v11521_v9  ;;  %v4199_v45 = vrot.slane %v11154_v54, 2 }
 0x3a3   : > { %8347 = vmatmul.mubr.msk.f32.gmra.mrb[6].mxu1 %vm3283_vm5, %v11463_v11  ;;  %12513 = vst [vmem:[#allocation34_spill] sm:$0xff] %v11508_v23  ;;  %v4200_v27 = vrot.slane %v11156_v6, 2 }
 0x3a4   : > { %8349 = vmatprep.mubr.msk.f32.mxu1 %vm3283_vm5, %v11469_v52 }
 0x3a5   : > { %v11534_v7 = vsel %vm1183_vm4, %v4199_v45, %v4200_v27  ;;  %v4210_v45 = vrot.slane %v11202_v55, 2 }
 0x3a6   : > { %12516 = vst [vmem:[#allocation38_spill] sm:$0xff] %v11534_v7 }
 0x3a7   : > { %8350 = vmatmul.mubr.msk.f32.gmra.mrb[8].mxu1 %vm3283_vm5, %v11476_v3 }
 0x3a8   : > { %8352 = vmatprep.mubr.msk.f32.mxu1 %vm3283_vm5, %v11482_v53 }
 0x3ab   : > { %8353 = vmatmul.mubr.msk.f32.gmra.mrb[10].mxu1 %vm3283_vm5, %v11489_v25 }
 0x3ac   : > { %8355 = vmatprep.mubr.msk.f32.mxu1 %vm3283_vm5, %v11495_v63  ;;  %v11515_v63 = vsel %vm1183_vm4, %v4190_v21, %v4192_v56  ;;  %v4202_v21 = vrot.slane %v11148_v34, 2  ;;  %v4204_v56 = vrot.slane %v11177_v28, 2 }
 0x3ae   : > { %v11547_v34 = vsel %vm1183_vm4, %v4204_v56, %v4205_v5  ;;  %v4215_v56 = vrot.slane %v11225_v31, 2 }
 0x3af   : > { %8356 = vmatmul.mubr.msk.f32.gmra.mrb[12].mxu1 %vm3283_vm5, %v11502_v1  ;;  %12518 = vst [vmem:[#allocation40_spill] sm:$0xff] %v11547_v34 }
 0x3b0   : > { %8358 = vmatprep.mubr.msk.f32.mxu1 %vm3283_vm5, %v11508_v23  ;;  %v11528_v23 = vsel %vm1183_vm4, %v4195_v26, %v4197_v33  ;;  %v4207_v26 = vrot.slane %v11171_v51, 2  ;;  %v4209_v33 = vrot.slane %v11200_v48, 2 }
 0x3b1   : > { %12515 = vst [vmem:[#allocation36_spill] sm:$0xff] %v11528_v23 }
 0x3b2   : > { %v11560_v51 = vsel %vm1183_vm4, %v4209_v33, %v4210_v45  ;;  %v4220_v33 = vrot.slane %v11247_v42, 2 }
 0x3b3   : > { %8359 = vmatmul.mubr.msk.f32.gmra.mrb[14].mxu1 %vm3283_vm5, %v11515_v63  ;;  %12520 = vst [vmem:[#allocation43_spill] sm:$0xff] %v11560_v51 }
 0x3b4   : > { %8361 = vmatprep.mubr.msk.f32.mxu1 %vm3283_vm5, %v11521_v9  ;;  %v11541_v9 = vsel %vm1183_vm4, %v4200_v27, %v4202_v21  ;;  %v4212_v27 = vrot.slane %v11194_v24, 2  ;;  %v4214_v21 = vrot.slane %v11223_v10, 2 }
 0x3b5   : > { %12517 = vst [vmem:[#allocation39_spill] sm:$0xff] %v11541_v9 }
 0x3b6   : > { %v11573_v24 = vsel %vm1183_vm4, %v4214_v21, %v4215_v56  ;;  %v4225_v21 = vrot.slane %v11267_v57, 2 }
 0x3b7   : > { %8362 = vmatmul.mubr.msk.f32.gmra.mrb[16].mxu1 %vm3283_vm5, %v11528_v23  ;;  %12522 = vst [vmem:[#allocation45_spill] sm:$0xff] %v11573_v24 }
 0x3b8   : > { %8364 = vmatprep.mubr.msk.f32.mxu1 %vm3283_vm5, %v11534_v7  ;;  %v11554_v7 = vsel %vm1183_vm4, %v4205_v5, %v4207_v26  ;;  %v4217_v5 = vrot.slane %v11217_v12, 2  ;;  %v4219_v26 = vrot.slane %v11245_v4, 2 }
 0x3b9   : > { %12519 = vst [vmem:[#allocation41_spill] sm:$0xff] %v11554_v7 }
 0x3ba   : > { %v11586_v12 = vsel %vm1183_vm4, %v4219_v26, %v4220_v33  ;;  %v6880_v26 = vld [vmem:[%s12214_s4 + $0x110] sm:$0xff] }
 0x3bb   : > { %8365 = vmatmul.mubr.msk.f32.gmra.mrb[18].mxu1 %vm3283_vm5, %v11541_v9  ;;  %12524 = vst [vmem:[#allocation47_spill] sm:$0xff] %v11586_v12 }
 0x3bc   : > { %8367 = vmatprep.mubr.msk.f32.mxu1 %vm3283_vm5, %v11547_v34  ;;  %v11567_v34 = vsel %vm1183_vm4, %v4210_v45, %v4212_v27  ;;  %v4222_v45 = vrot.slane %v11240_v60, 2  ;;  %v4224_v27 = vrot.slane %v11265_v47, 2 }
 0x3bd   : > { %12521 = vst [vmem:[#allocation44_spill] sm:$0xff] %v11567_v34 }
 0x3be   : > { %v11599_v60 = vsel %vm1183_vm4, %v4224_v27, %v4225_v21  ;;  %v6883_v27 = vld [vmem:[%s12214_s4 + $0x128] sm:$0xff] }
 0x3bf   : > { %8368 = vmatmul.mubr.msk.f32.gmra.mrb[20].mxu1 %vm3283_vm5, %v11554_v7  ;;  %12526 = vst [vmem:[#allocation49_spill] sm:$0xff] %v11599_v60 }
 0x3c0   : > { %8370 = vmatprep.mubr.msk.f32.mxu1 %vm3283_vm5, %v11560_v51  ;;  %v11580_v51 = vsel %vm1183_vm4, %v4215_v56, %v4217_v5  ;;  %v4227_v56 = vrot.slane %v11261_v16, 2  ;;  %v6881_v16 = vld [vmem:[%s12214_s4 + $0x118] sm:$0xff] }
 0x3c1   : > { %12523 = vst [vmem:[#allocation46_spill] sm:$0xff] %v11580_v51 }
 0x3c2   : > { %v11604_v5 = vsel %vm1183_vm4, %v4225_v21, %v4227_v56  ;;  %v6885_v56 = vld [vmem:[%s12214_s4 + $0x138] sm:$0xff] }
 0x3c3   : > { %8371 = vmatmul.mubr.msk.f32.gmra.mrb[22].mxu1 %vm3283_vm5, %v11567_v34  ;;  %12527 = vst [vmem:[#allocation50_spill] sm:$0xff] %v11604_v5 }
 0x3c4   : > { %8373 = vmatprep.mubr.msk.f32.mxu1 %vm3283_vm5, %v11573_v24  ;;  %v11593_v24 = vsel %vm1183_vm4, %v4220_v33, %v4222_v45  ;;  %v8834_v33 = vpack.c.bf16 %v6881_v16, %v6880_v26  ;;  %v6882_v45 = vld [vmem:[%s12214_s4 + $0x120] sm:$0xff] }
 0x3c5   : > { %12525 = vst [vmem:[#allocation48_spill] sm:$0xff] %v11593_v24  ;;  %v8838_v21 = vpack.c.bf16 %v6883_v27, %v6882_v45  ;;  %v12529_v26 = vld [vmem:[#allocation17_spill] sm:$0xff]  ;;  %v12531_v45 = vld [vmem:[#allocation28_spill] sm:$0xff] }
 0x3c6   : > { %v12532_v27 = vld [vmem:[#allocation29_spill] sm:$0xff] }
 0x3c7   : > { %8374 = vmatmul.mubr.msk.f32.gmra.mrb[24].mxu1 %vm3283_vm5, %v11580_v51 }
 0x3c8   : > { %8376 = vmatprep.mubr.msk.f32.mxu1 %vm3283_vm5, %v11586_v12 }
 0x3cb   : > { %8377 = vmatmul.mubr.msk.f32.gmra.mrb[26].mxu1 %vm3283_vm5, %v11593_v24 }
 0x3cc   : > { %8379 = vmatprep.mubr.msk.f32.mxu1 %vm3283_vm5, %v11599_v60 }
 0x3cf   : > { %8380 = vmatmul.mubr.msk.f32.gmra.mrb[28].mxu1 %vm3283_vm5, %v11604_v5 }
 0x3d0   : > { %8398 = vmatprep.mubr.msk.f32.mxu1 %vm3283_vm5, %v10925_v37  ;;  %v6884_v37 = vld [vmem:[%s12214_s4 + $0x130] sm:$0xff] }
 0x3d3   : > { %8399 = vmatmul.mubr.msk.f32.vlgmr.msra.gmra.mrb[30].mxu1 %vm3283_vm5, %v10927_v50  ;;  %v8842_v50 = vpack.c.bf16 %v6885_v56, %v6884_v37  ;;  %v12534_v37 = vld [vmem:[#allocation37_spill] sm:$0xff]  ;;  %v12535_v56 = vld [vmem:[#allocation42_spill] sm:$0xff] }
 0x3d4   : > { %8833 = vmatpush3.bf16.msra.mxu1 %v11446_v0  ;;  %8401 = vmatprep.mubr.msk.f32.mxu1 %vm3283_vm5, %v10952_v38  ;;  %v6918_v38 = vld [vmem:[%s12214_s4 + $0x140] sm:$0xff]  ;;  %v6919_v0 = vld [vmem:[%s12214_s4 + $0x148] sm:$0xff] }
 0x3d5   : > { %8835 = vmatprep.subr.bf16.mxu1 %v8834_v33 }
 0x3d7   : > { %8402 = vmatmul.mubr.msk.f32.gmra.mrb[0].mxu1 %vm3283_vm5, %v10954_v46  ;;  %v8846_v46 = vpack.c.bf16 %v6919_v0, %v6918_v38  ;;  %v12537_v38 = vld [vmem:[#allocation7_spill] sm:$0xff]  ;;  %v12538_v0 = vld [vmem:[#allocation8_spill] sm:$0xff] }
 0x3d8   : > { %8404 = vmatprep.mubr.msk.f32.mxu1 %vm3283_vm5, %v10981_v35  ;;  %8837 = vmatpush3.bf16.msra.mxu1 %v8834_v33  ;;  %v11693_v35 = vld [vmem:[#allocation3 + $0x180] sm:$0xff] }
 0x3d9   : > { %8839 = vmatprep.subr.bf16.mxu1 %v8838_v21  ;;  %v12530_v33 = vld [vmem:[#allocation19_spill] sm:$0xff] }
 0x3db   : > { %8405 = vmatmul.mubr.msk.f32.gmra.mrb[2].mxu1 %vm3283_vm5, %v10983_v19  ;;  %v11697_v19 = vld [vmem:[#allocation3 + $0x188] sm:$0xff] }
 0x3dc   : > { %8407 = vmatprep.mubr.msk.f32.mxu1 %vm3283_vm5, %v11010_v40  ;;  %8841 = vmatpush3.bf16.msra.mxu1 %v8838_v21  ;;  %v6920_v40 = vld [vmem:[%s12214_s4 + $0x150] sm:$0xff]  ;;  %v12533_v21 = vld [vmem:[#allocation30_spill] sm:$0xff] }
 0x3dd   : > { %8843 = vmatprep.subr.bf16.mxu1 %v8842_v50 }
 0x3df   : > { %8408 = vmatmul.mubr.msk.f32.gmra.mrb[4].mxu1 %vm3283_vm5, %v11012_v41  ;;  %v6921_v41 = vld [vmem:[%s12214_s4 + $0x158] sm:$0xff] }
 0x3e0   : > { %8410 = vmatprep.mubr.msk.f32.mxu1 %vm3283_vm5, %v11038_v44  ;;  %8845 = vmatpush3.bf16.msra.mxu1 %v8842_v50  ;;  %v8850_v44 = vpack.c.bf16 %v6921_v41, %v6920_v40  ;;  %v12536_v50 = vld [vmem:[#allocation6_spill] sm:$0xff]  ;;  %v12541_v41 = vld [vmem:[#allocation11_spill] sm:$0xff] }
 0x3e1   : > { %8847 = vmatprep.subr.bf16.mxu1 %v8846_v46  ;;  %v12540_v40 = vld [vmem:[#allocation10_spill] sm:$0xff] }
 0x3e3   : > { %8411 = vmatmul.mubr.msk.f32.gmra.mrb[6].mxu1 %vm3283_vm5, %v11040_v61  ;;  %v6922_v61 = vld [vmem:[%s12214_s4 + $0x160] sm:$0xff] }
 0x3e4   : > { %8413 = vmatprep.mubr.msk.f32.mxu1 %vm3283_vm5, %v11062_v43  ;;  %v6923_v43 = vld [vmem:[%s12214_s4 + $0x168] sm:$0xff] }
 0x3e7   : > { %8414 = vmatmul.mubr.msk.f32.gmra.mrb[8].mxu1 %vm3283_vm5, %v11064_v2  ;;  %v8854_v2 = vpack.c.bf16 %v6923_v43, %v6922_v61  ;;  %v12543_v61 = vld [vmem:[#allocation13_spill] sm:$0xff]  ;;  %v12544_v43 = vld [vmem:[#allocation14_spill] sm:$0xff] }
 0x3e8   : > { %8416 = vmatprep.mubr.msk.f32.mxu1 %vm3283_vm5, %v11085_v32  ;;  %v6925_v32 = vld [vmem:[%s12214_s4 + $0x178] sm:$0xff] }
 0x3eb   : > { %8417 = vmatmul.mubr.msk.f32.gmra.mrb[10].mxu1 %vm3283_vm5, %v11087_v39  ;;  %v6958_v39 = vld [vmem:[%s12214_s4 + $0x180] sm:$0xff] }
 0x3ec   : > { %8419 = vmatprep.mubr.msk.f32.mxu1 %vm3283_vm5, %v11108_v49  ;;  %v6959_v49 = vld [vmem:[%s12214_s4 + $0x188] sm:$0xff] }
 0x3ed   : > { %v8862_v16 = vpack.c.bf16 %v6959_v49, %v6958_v39  ;;  %v12549_v39 = vld [vmem:[#allocation21_spill] sm:$0xff]  ;;  %v4832_v49 = vrot.slane %v11693_v35, 1 }
 0x3ef   : > { %8420 = vmatmul.mubr.msk.f32.gmra.mrb[12].mxu1 %vm3283_vm5, %v11110_v36  ;;  %v12528_v36 = vld [vmem:[#allocation5_spill] sm:$0xff] }
 0x3f0   : > { %8422 = vmatprep.mubr.msk.f32.mxu1 %vm3283_vm5, %v11131_v15 }
 0x3f3   : > { %8423 = vmatmul.mubr.msk.f32.gmra.mrb[14].mxu1 %vm3283_vm5, %v11133_v13 }
 0x3f4   : > { %8425 = vmatprep.mubr.msk.f32.mxu1 %vm3283_vm5, %v11154_v54 }
 0x3f7   : > { %8426 = vmatmul.mubr.msk.f32.gmra.mrb[16].mxu1 %vm3283_vm5, %v11156_v6 }
 0x3f8   : > { %8428 = vmatprep.mubr.msk.f32.mxu1 %vm3283_vm5, %v11177_v28 }
 0x3fb   : > { %8429 = vmatmul.mubr.msk.f32.gmra.mrb[18].mxu1 %vm3283_vm5, %v11179_v22 }
 0x3fc   : > { %8431 = vmatprep.mubr.msk.f32.mxu1 %vm3283_vm5, %v11200_v48 }
 0x3ff   : > { %8432 = vmatmul.mubr.msk.f32.gmra.mrb[20].mxu1 %vm3283_vm5, %v11202_v55 }
 0x400   : > { %8434 = vmatprep.mubr.msk.f32.mxu1 %vm3283_vm5, %v11223_v10 }
 0x403   : > { %8435 = vmatmul.mubr.msk.f32.gmra.mrb[22].mxu1 %vm3283_vm5, %v11225_v31 }
 0x404   : > { %8437 = vmatprep.mubr.msk.f32.mxu1 %vm3283_vm5, %v11245_v4 }
 0x407   : > { %8438 = vmatmul.mubr.msk.f32.gmra.mrb[24].mxu1 %vm3283_vm5, %v11247_v42 }
 0x408   : > { %8440 = vmatprep.mubr.msk.f32.mxu1 %vm3283_vm5, %v11265_v47 }
 0x40b   : > { %8441 = vmatmul.mubr.msk.f32.gmra.mrb[26].mxu1 %vm3283_vm5, %v11267_v57 }
 0x40c   : > { %8443 = vmatprep.mubr.msk.f32.mxu1 %vm3283_vm5, %v11693_v35 }
 0x40f   : > { %8444 = vmatmul.mubr.msk.f32.gmra.mrb[28].mxu1 %vm3283_vm5, %v11697_v19 }
 0x410   : > { %8462 = vmatprep.mubr.msk.f32.mxu1 %vm3283_vm5, %v10938_v18  ;;  %v6924_v18 = vld [vmem:[%s12214_s4 + $0x170] sm:$0xff] }
 0x413   : > { %8463 = vmatmul.mubr.msk.f32.vlgmr.msra.gmra.mrb[30].mxu1 %vm3283_vm5, %v10941_v62  ;;  %v8858_v62 = vpack.c.bf16 %v6925_v32, %v6924_v18  ;;  %v12546_v18 = vld [vmem:[#allocation16_spill] sm:$0xff]  ;;  %v12547_v32 = vld [vmem:[#allocation18_spill] sm:$0xff] }
 0x414   : > { %8849 = vmatpush3.bf16.msra.mxu1 %v8846_v46  ;;  %8465 = vmatprep.mubr.msk.f32.mxu1 %vm3283_vm5, %v10967_v59  ;;  %v12539_v46 = vld [vmem:[#allocation9_spill] sm:$0xff] }
 0x415   : > { %8851 = vmatprep.subr.bf16.mxu1 %v8850_v44 }
 0x417   : > { %8466 = vmatmul.mubr.msk.f32.gmra.mrb[0].mxu1 %vm3283_vm5, %v10970_v8 }
 0x418   : > { %8468 = vmatprep.mubr.msk.f32.mxu1 %vm3283_vm5, %v10996_v14  ;;  %8853 = vmatpush3.bf16.msra.mxu1 %v8850_v44  ;;  %v12542_v44 = vld [vmem:[#allocation12_spill] sm:$0xff] }
 0x419   : > { %8855 = vmatprep.subr.bf16.mxu1 %v8854_v2 }
 0x41b   : > { %8469 = vmatmul.mubr.msk.f32.gmra.mrb[2].mxu1 %vm3283_vm5, %v12528_v36 }
 0x41c   : > { %8471 = vmatprep.mubr.msk.f32.mxu1 %vm3283_vm5, %v12529_v26  ;;  %8857 = vmatpush3.bf16.msra.mxu1 %v8854_v2  ;;  %v12545_v2 = vld [vmem:[#allocation15_spill] sm:$0xff] }
 0x41d   : > { %8859 = vmatprep.subr.bf16.mxu1 %v8858_v62 }
 0x41f   : > { %8472 = vmatmul.mubr.msk.f32.gmra.mrb[4].mxu1 %vm3283_vm5, %v12530_v33 }
 0x420   : > { %8474 = vmatprep.mubr.msk.f32.mxu1 %vm3283_vm5, %v12531_v45  ;;  %8861 = vmatpush3.bf16.msra.mxu1 %v8858_v62  ;;  %v12548_v62 = vld [vmem:[#allocation20_spill] sm:$0xff] }
 0x421   : > { %8863 = vmatprep.subr.bf16.mxu1 %v8862_v16 }
 0x423   : > { %8475 = vmatmul.mubr.msk.f32.gmra.mrb[6].mxu1 %vm3283_vm5, %v12532_v27 }
 0x424   : > { %8477 = vmatprep.mubr.msk.f32.mxu1 %vm3283_vm5, %v12533_v21 }
 0x427   : > { %8478 = vmatmul.mubr.msk.f32.gmra.mrb[8].mxu1 %vm3283_vm5, %v12534_v37 }
 0x428   : > { %8480 = vmatprep.mubr.msk.f32.mxu1 %vm3283_vm5, %v12535_v56 }
 0x42b   : > { %8481 = vmatmul.mubr.msk.f32.gmra.mrb[10].mxu1 %vm3283_vm5, %v12536_v50 }
 0x42c   : > { %8483 = vmatprep.mubr.msk.f32.mxu1 %vm3283_vm5, %v12537_v38 }
 0x42f   : > { %8484 = vmatmul.mubr.msk.f32.gmra.mrb[12].mxu1 %vm3283_vm5, %v12538_v0 }
 0x430   : > { %8486 = vmatprep.mubr.msk.f32.mxu1 %vm3283_vm5, %v12539_v46 }
 0x433   : > { %8487 = vmatmul.mubr.msk.f32.gmra.mrb[14].mxu1 %vm3283_vm5, %v12540_v40 }
 0x434   : > { %8489 = vmatprep.mubr.msk.f32.mxu1 %vm3283_vm5, %v12541_v41 }
 0x437   : > { %8490 = vmatmul.mubr.msk.f32.gmra.mrb[16].mxu1 %vm3283_vm5, %v12542_v44  ;;  %v12551_v44 = vld [vmem:[#allocation23_spill] sm:$0xff] }
 0x438   : > { %8492 = vmatprep.mubr.msk.f32.mxu1 %vm3283_vm5, %v12543_v61  ;;  %v4833_v61 = vrot.slane %v11697_v19, 1 }
 0x43b   : > { %8493 = vmatmul.mubr.msk.f32.gmra.mrb[18].mxu1 %vm3283_vm5, %v12544_v43  ;;  %v12550_v43 = vld [vmem:[#allocation22_spill] sm:$0xff] }
 0x43c   : > { %8495 = vmatprep.mubr.msk.f32.mxu1 %vm3283_vm5, %v12545_v2  ;;  %v11783_v2 = vld [vmem:[#allocation3 + $0x190] sm:$0x3] }
 0x43f   : > { %8496 = vmatmul.mubr.msk.f32.gmra.mrb[20].mxu1 %vm3283_vm5, %v12546_v18  ;;  %v12552_v18 = vld [vmem:[#allocation24_spill] sm:$0xff] }
 0x440   : > { %8498 = vmatprep.mubr.msk.f32.mxu1 %vm3283_vm5, %v12547_v32  ;;  %v4835_v32 = vrot.slane %v11783_v2, 1 }
 0x443   : > { %8499 = vmatmul.mubr.msk.f32.gmra.mrb[22].mxu1 %vm3283_vm5, %v12548_v62  ;;  %v11791_v62 = vsel %vm515_vm3, %v4832_v49, %v4833_v61 }
 0x444   : > { %8501 = vmatprep.mubr.msk.f32.mxu1 %vm3283_vm5, %v12549_v39  ;;  %12553 = vst [vmem:[#allocation5_spill] sm:$0xff] %v11791_v62  ;;  %v11796_v39 = vsel %vm515_vm3, %v4833_v61, %v4835_v32  ;;  %v6962_v61 = vld [vmem:[%s12214_s4 + $0x1a0] sm:$0xff]  ;;  %v6963_v32 = vld [vmem:[%s12214_s4 + $0x1a8] sm:$0xff] }
 0x445   : > { %12554 = vst [vmem:[#allocation17_spill] sm:$0xff] %v11796_v39 }
 0x447   : > { %8502 = vmatmul.mubr.msk.f32.gmra.mrb[24].mxu1 %vm3283_vm5, %v12550_v43  ;;  %v6960_v43 = vld [vmem:[%s12214_s4 + $0x190] sm:$0xff] }
 0x448   : > { %8504 = vmatprep.mubr.msk.f32.mxu1 %vm3283_vm5, %v12551_v44  ;;  %v6961_v44 = vld [vmem:[%s12214_s4 + $0x198] sm:$0xff] }
 0x449   : > { %v8866_v49 = vpack.c.bf16 %v6961_v44, %v6960_v43  ;;  %v6965_v44 = vld [vmem:[%s12214_s4 + $0x1b8] sm:$0xff] }
 0x44a   : > { %v12556_v43 = vld [vmem:[#allocation32_spill] sm:$0xff] }
 0x44b   : > { %8505 = vmatmul.mubr.msk.f32.gmra.mrb[26].mxu1 %vm3283_vm5, %v12552_v18 }
 0x44c   : > { %8507 = vmatprep.mubr.msk.f32.mxu1 %vm3283_vm5, %v11791_v62  ;;  %v12555_v62 = vld [vmem:[#allocation31_spill] sm:$0xff] }
 0x44f   : > { %8508 = vmatmul.mubr.msk.f32.gmra.mrb[28].mxu1 %vm3283_vm5, %v11796_v39  ;;  %v8870_v39 = vpack.c.bf16 %v6963_v32, %v6962_v61  ;;  %v6999_v61 = vld [vmem:[%s12214_s4 + $0x1c8] sm:$0xff] }
 0x450   : > { %8526 = vmatprep.mubr.msk.f32.mxu1 %vm3283_vm5, %v11402_v20  ;;  %v6964_v20 = vld [vmem:[%s12214_s4 + $0x1b0] sm:$0xff] }
 0x453   : > { %8527 = vmatmul.mubr.msk.f32.vlgmr.msra.gmra.mrb[30].mxu1 %vm3283_vm5, %v11409_v58  ;;  %v8874_v58 = vpack.c.bf16 %v6965_v44, %v6964_v20  ;;  %v12559_v20 = vld [vmem:[#allocation35_spill] sm:$0xff]  ;;  %v12560_v44 = vld [vmem:[#allocation38_spill] sm:$0xff] }
 0x454   : > { %8865 = vmatpush3.bf16.msra.mxu1 %v8862_v16  ;;  %8529 = vmatprep.mubr.msk.f32.mxu1 %vm3283_vm5, %v12555_v62  ;;  %v6998_v16 = vld [vmem:[%s12214_s4 + $0x1c0] sm:$0xff] }
 0x455   : > { %8867 = vmatprep.subr.bf16.mxu1 %v8866_v49  ;;  %v8878_v32 = vpack.c.bf16 %v6999_v61, %v6998_v16  ;;  %v12562_v16 = vld [vmem:[#allocation43_spill] sm:$0xff]  ;;  %v12563_v61 = vld [vmem:[#allocation45_spill] sm:$0xff] }
 0x457   : > { %8530 = vmatmul.mubr.msk.f32.gmra.mrb[0].mxu1 %vm3283_vm5, %v12556_v43 }
 0x458   : > { %8532 = vmatprep.mubr.msk.f32.mxu1 %vm3283_vm5, %v11440_v17  ;;  %8869 = vmatpush3.bf16.msra.mxu1 %v8866_v49  ;;  %v12558_v49 = vld [vmem:[#allocation34_spill] sm:$0xff] }
 0x459   : > { %8871 = vmatprep.subr.bf16.mxu1 %v8870_v39 }
 0x45b   : > { %8533 = vmatmul.mubr.msk.f32.gmra.mrb[2].mxu1 %vm3283_vm5, %v11449_v29 }
 0x45c   : > { %8535 = vmatprep.mubr.msk.f32.mxu1 %vm3283_vm5, %v11455_v30  ;;  %8873 = vmatpush3.bf16.msra.mxu1 %v8870_v39  ;;  %v12557_v39 = vld [vmem:[#allocation33_spill] sm:$0xff] }
 0x45d   : > { %8875 = vmatprep.subr.bf16.mxu1 %v8874_v58 }
 0x45f   : > { %8536 = vmatmul.mubr.msk.f32.gmra.mrb[4].mxu1 %vm3283_vm5, %v11463_v11 }
 0x460   : > { %8538 = vmatprep.mubr.msk.f32.mxu1 %vm3283_vm5, %v11469_v52  ;;  %8877 = vmatpush3.bf16.msra.mxu1 %v8874_v58  ;;  %v12561_v58 = vld [vmem:[#allocation40_spill] sm:$0xff] }
 0x461   : > { %8879 = vmatprep.subr.bf16.mxu1 %v8878_v32 }
 0x463   : > { %8539 = vmatmul.mubr.msk.f32.gmra.mrb[6].mxu1 %vm3283_vm5, %v11476_v3 }
 0x464   : > { %8541 = vmatprep.mubr.msk.f32.mxu1 %vm3283_vm5, %v11482_v53 }
 0x467   : > { %8542 = vmatmul.mubr.msk.f32.gmra.mrb[8].mxu1 %vm3283_vm5, %v11489_v25 }
 0x468   : > { %8544 = vmatprep.mubr.msk.f32.mxu1 %vm3283_vm5, %v12557_v39 }
 0x46b   : > { %8545 = vmatmul.mubr.msk.f32.gmra.mrb[10].mxu1 %vm3283_vm5, %v11502_v1 }
 0x46c   : > { %8547 = vmatprep.mubr.msk.f32.mxu1 %vm3283_vm5, %v12558_v49 }
 0x46f   : > { %8548 = vmatmul.mubr.msk.f32.gmra.mrb[12].mxu1 %vm3283_vm5, %v11515_v63 }
 0x470   : > { %8550 = vmatprep.mubr.msk.f32.mxu1 %vm3283_vm5, %v12559_v20 }
 0x473   : > { %8551 = vmatmul.mubr.msk.f32.gmra.mrb[14].mxu1 %vm3283_vm5, %v11528_v23  ;;  %v9440_v23 = vld [vmem:[#allocation3 + $0x38] sm:$0xff] }
 0x474   : > { %8553 = vmatprep.mubr.msk.f32.mxu1 %vm3283_vm5, %v12560_v44 }
 0x477   : > { %8554 = vmatmul.mubr.msk.f32.gmra.mrb[16].mxu1 %vm3283_vm5, %v11541_v9  ;;  %v5108_v9 = vrot.slane %v11697_v19, 2 }
 0x478   : > { %8556 = vmatprep.mubr.msk.f32.mxu1 %vm3283_vm5, %v12561_v58  ;;  %v5107_v58 = vrot.slane %v11693_v35, 2 }
 0x47b   : > { %8557 = vmatmul.mubr.msk.f32.gmra.mrb[18].mxu1 %vm3283_vm5, %v11554_v7  ;;  %v7003_v7 = vld [vmem:[%s12214_s4 + $0x1e8] sm:$0xff] }
 0x47c   : > { %8559 = vmatprep.mubr.msk.f32.mxu1 %vm3283_vm5, %v12562_v16 }
 0x47f   : > { %8560 = vmatmul.mubr.msk.f32.gmra.mrb[20].mxu1 %vm3283_vm5, %v11567_v34  ;;  %v5110_v34 = vrot.slane %v11783_v2, 2  ;;  %v7001_v2 = vld [vmem:[%s12214_s4 + $0x1d8] sm:$0xff] }
 0x480   : > { %8562 = vmatprep.mubr.msk.f32.mxu1 %vm3283_vm5, %v12563_v61 }
 0x481   : > { %v11894_v16 = vsel %vm1183_vm4, %v5108_v9, %v5110_v34  ;;  %v7002_v34 = vld [vmem:[%s12214_s4 + $0x1e0] sm:$0xff] }
 0x482   : > { %12566 = vst [vmem:[#allocation28_spill] sm:$0xff] %v11894_v16 }
 0x483   : > { %8563 = vmatmul.mubr.msk.f32.gmra.mrb[22].mxu1 %vm3283_vm5, %v11580_v51  ;;  %v11888_v51 = vsel %vm1183_vm4, %v5107_v58, %v5108_v9  ;;  %v9439_v58 = vld [vmem:[#allocation3 + $0x30] sm:$0xff] }
 0x484   : > { %8565 = vmatprep.mubr.msk.f32.mxu1 %vm3283_vm5, %v11586_v12  ;;  %12564 = vst [vmem:[#allocation19_spill] sm:$0xff] %v11888_v51  ;;  %v12565_v12 = vld [vmem:[#allocation25_spill] sm:$0xff] }
 0x485   : > { %v3482_v61 = vrot.slane %v12565_v12, 1  ;;  %v12568_v12 = vld [vmem:[#allocation27_spill] sm:$0xff] }
 0x487   : > { %8566 = vmatmul.mubr.msk.f32.gmra.mrb[24].mxu1 %vm3283_vm5, %v11593_v24  ;;  %v3485_v24 = vrot.slane %v12568_v12, 1  ;;  %v9446_v12 = vld [vmem:[#allocation3 + $0x80] sm:$0xff] }
 0x488   : > { %8568 = vmatprep.mubr.msk.f32.mxu1 %vm3283_vm5, %v11599_v60  ;;  %v7000_v60 = vld [vmem:[%s12214_s4 + $0x1d0] sm:$0xff] }
 0x489   : > { %v8882_v9 = vpack.c.bf16 %v7001_v2, %v7000_v60  ;;  %v8886_v60 = vpack.c.bf16 %v7003_v7, %v7002_v34  ;;  %v7004_v2 = vld [vmem:[%s12214_s4 + $0x1f0] sm:$0xff]  ;;  %v7038_v7 = vld [vmem:[%s12214_s4 + $0x200] sm:$0xff]  ;;  %v9448_v34 = vld [vmem:[#allocation3 + $0x98] sm:$0xff] }
 0x48b   : > { %8569 = vmatmul.mubr.msk.f32.gmra.mrb[26].mxu1 %vm3283_vm5, %v11604_v5 }
 0x48c   : > { %8571 = vmatprep.mubr.msk.f32.mxu1 %vm3283_vm5, %v11888_v51  ;;  %v12567_v51 = vld [vmem:[#allocation26_spill] sm:$0xff] }
 0x48d   : > { %v3483_v5 = vrot.slane %v12567_v51, 1  ;;  %v9441_v51 = vld [vmem:[#allocation3 + $0x48] sm:$0xff] }
 0x48f   : > { %8572 = vmatmul.mubr.msk.f32.gmra.mrb[28].mxu1 %vm3283_vm5, %v11894_v16  ;;  %v3484_v44 = vsel %vm515_vm3, %v3482_v61, %v3483_v5  ;;  %v3486_v16 = vsel %vm515_vm3, %v3483_v5, %v3485_v24  ;;  %v7005_v24 = vld [vmem:[%s12214_s4 + $0x1f8] sm:$0xff]  ;;  %v9442_v5 = vld [vmem:[#allocation3 + $0x50] sm:$0xff]  ;;  %v9445_v61 = vld [vmem:[#allocation3 + $0x78] sm:$0xff] }
 0x490   : > { %8590 = vmatprep.mubr.msk.f32.mxu1 %vm3283_vm5, %v9439_v58  ;;  %8206 = vmatprep.mubr.msk.f32.mxu0 %vm3283_vm5, %v3484_v44  ;;  %v7039_v44 = vld [vmem:[%s12214_s4 + $0x208] sm:$0xff] }
 0x491   : > { %8207 = vmatmul.mubr.msk.f32.vlgmr.msra.gmra.mrb[32].mxu0 %vm3283_vm5, %v3486_v16  ;;  %v9444_v16 = vld [vmem:[#allocation3 + $0x68] sm:$0xff]  ;;  %v8894_v58 = vpack.c.bf16 %v7039_v44, %v7038_v7  ;;  %v12135_v7 = vld [vmem:[%s12215_s5] ss:$0 sm:$0xff] }
 0x493   : > { %8591 = vmatmul.mubr.msk.f32.vlgmr.msra.gmra.mrb[30].mxu1 %vm3283_vm5, %v9440_v23  ;;  %v9443_v23 = vld [vmem:[#allocation3 + $0x60] sm:$0xff] }
 0x494   : > { %8881 = vmatpush3.bf16.msra.mxu1 %v8878_v32  ;;  %8593 = vmatprep.mubr.msk.f32.mxu1 %vm3283_vm5, %v9441_v51  ;;  %v8890_v32 = vpack.c.bf16 %v7005_v24, %v7004_v2  ;;  %v9449_v51 = vld [vmem:[#allocation3 + $0xa8] sm:$0xff]  ;;  %v9450_v2 = vld [vmem:[#allocation3 + $0xb0] sm:$0xff] }
 0x495   : > { %8883 = vmatprep.subr.bf16.mxu1 %v8882_v9  ;;  %v9452_v24 = vld [vmem:[#allocation3 + $0xc8] sm:$0xff] }
 0x497   : > { %8594 = vmatmul.mubr.msk.f32.gmra.mrb[0].mxu1 %vm3283_vm5, %v9442_v5 }
 0x498   : > { %8596 = vmatprep.mubr.msk.f32.mxu1 %vm3283_vm5, %v9443_v23  ;;  %8885 = vmatpush3.bf16.msra.mxu1 %v8882_v9  ;;  %v9447_v9 = vld [vmem:[#allocation3 + $0x90] sm:$0xff] }
 0x499   : > { %8887 = vmatprep.subr.bf16.mxu1 %v8886_v60 }
 0x49b   : > { %8597 = vmatmul.mubr.msk.f32.gmra.mrb[2].mxu1 %vm3283_vm5, %v9444_v16 }
 0x49c   : > { %8599 = vmatprep.mubr.msk.f32.mxu1 %vm3283_vm5, %v9445_v61  ;;  %8889 = vmatpush3.bf16.msra.mxu1 %v8886_v60  ;;  %v9451_v60 = vld [vmem:[#allocation3 + $0xc0] sm:$0xff] }
 0x49d   : > { %8891 = vmatprep.subr.bf16.mxu1 %v8890_v32 }
 0x49f   : > { %8600 = vmatmul.mubr.msk.f32.gmra.mrb[4].mxu1 %vm3283_vm5, %v9446_v12 }
 0x4a0   : > { %8602 = vmatprep.mubr.msk.f32.mxu1 %vm3283_vm5, %v9447_v9  ;;  %8893 = vmatpush3.bf16.msra.mxu1 %v8890_v32 }
 0x4a1   : > { %8895 = vmatprep.subr.bf16.mxu1 %v8894_v58 }
 0x4a3   : > { %8603 = vmatmul.mubr.msk.f32.gmra.mrb[6].mxu1 %vm3283_vm5, %v9448_v34 }
 0x4a4   : > { %8605 = vmatprep.mubr.msk.f32.mxu1 %vm3283_vm5, %v9449_v51 }
 0x4a7   : > { %8606 = vmatmul.mubr.msk.f32.gmra.mrb[8].mxu1 %vm3283_vm5, %v9450_v2 }
 0x4a8   : > { %8608 = vmatprep.mubr.msk.f32.mxu1 %vm3283_vm5, %v9451_v60 }
 0x4ab   : > { %8609 = vmatmul.mubr.msk.f32.gmra.mrb[10].mxu1 %vm3283_vm5, %v9452_v24 }
 0x4ac   : > { %8611 = vmatprep.mubr.msk.f32.mxu1 %vm3283_vm5, %v11131_v15  ;;  %v11972_v15 = vld [vmem:[#allocation3 + $0x198] sm:$0xff] }
 0x4af   : > { %8612 = vmatmul.mubr.msk.f32.gmra.mrb[12].mxu1 %vm3283_vm5, %v11133_v13  ;;  %v11978_v13 = vld [vmem:[#allocation3 + $0x1a0] sm:$0xff] }
 0x4b0   : > { %8614 = vmatprep.mubr.msk.f32.mxu1 %vm3283_vm5, %v11154_v54  ;;  %v7041_v54 = vld [vmem:[%s12214_s4 + $0x218] sm:$0xff] }
 0x4b3   : > { %8615 = vmatmul.mubr.msk.f32.gmra.mrb[14].mxu1 %vm3283_vm5, %v11156_v6 }
 0x4b4   : > { %8617 = vmatprep.mubr.msk.f32.mxu1 %vm3283_vm5, %v11177_v28  ;;  %v7043_v28 = vld [vmem:[%s12214_s4 + $0x228] sm:$0xff] }
 0x4b7   : > { %8618 = vmatmul.mubr.msk.f32.gmra.mrb[16].mxu1 %vm3283_vm5, %v11179_v22 }
 0x4b8   : > { %8620 = vmatprep.mubr.msk.f32.mxu1 %vm3283_vm5, %v11200_v48  ;;  %v7042_v48 = vld [vmem:[%s12214_s4 + $0x220] sm:$0xff] }
 0x4b9   : > { %v8902_v22 = vpack.c.bf16 %v7043_v28, %v7042_v48 }
 0x4bb   : > { %8621 = vmatmul.mubr.msk.f32.gmra.mrb[18].mxu1 %vm3283_vm5, %v11202_v55  ;;  %v7045_v55 = vld [vmem:[%s12214_s4 + $0x238] sm:$0xff] }
 0x4bc   : > { %8623 = vmatprep.mubr.msk.f32.mxu1 %vm3283_vm5, %v11223_v10  ;;  %v7040_v10 = vld [vmem:[%s12214_s4 + $0x210] sm:$0xff] }
 0x4bd   : > { %v8898_v6 = vpack.c.bf16 %v7041_v54, %v7040_v10 }
 0x4bf   : > { %8624 = vmatmul.mubr.msk.f32.gmra.mrb[20].mxu1 %vm3283_vm5, %v11225_v31  ;;  %v12570_v31 = vld [vmem:[#allocation13_spill] sm:$0xff] }
 0x4c0   : > { %8626 = vmatprep.mubr.msk.f32.mxu1 %vm3283_vm5, %v11245_v4  ;;  %v12571_v4 = vld [vmem:[#allocation14_spill] sm:$0xff] }
 0x4c3   : > { %8627 = vmatmul.mubr.msk.f32.gmra.mrb[22].mxu1 %vm3283_vm5, %v11247_v42  ;;  %v12572_v42 = vld [vmem:[#allocation15_spill] sm:$0xff] }
 0x4c4   : > { %8629 = vmatprep.mubr.msk.f32.mxu1 %vm3283_vm5, %v11265_v47  ;;  %v12573_v47 = vld [vmem:[#allocation16_spill] sm:$0xff] }
 0x4c7   : > { %8630 = vmatmul.mubr.msk.f32.gmra.mrb[24].mxu1 %vm3283_vm5, %v11267_v57  ;;  %v12574_v57 = vld [vmem:[#allocation18_spill] sm:$0xff] }
 0x4c8   : > { %8632 = vmatprep.mubr.msk.f32.mxu1 %vm3283_vm5, %v11693_v35  ;;  %v12575_v35 = vld [vmem:[#allocation20_spill] sm:$0xff] }
 0x4cb   : > { %8633 = vmatmul.mubr.msk.f32.gmra.mrb[26].mxu1 %vm3283_vm5, %v11697_v19  ;;  %v12576_v19 = vld [vmem:[#allocation21_spill] sm:$0xff] }
 0x4cc   : > { %8635 = vmatprep.mubr.msk.f32.mxu1 %vm3283_vm5, %v11972_v15 }
 0x4cf   : > { %8636 = vmatmul.mubr.msk.f32.gmra.mrb[28].mxu1 %vm3283_vm5, %v11978_v13 }
 0x4d0   : > { %8654 = vmatprep.mubr.msk.f32.mxu1 %vm3283_vm5, %v10967_v59  ;;  %v7044_v59 = vld [vmem:[%s12214_s4 + $0x230] sm:$0xff] }
 0x4d3   : > { %8655 = vmatmul.mubr.msk.f32.vlgmr.msra.gmra.mrb[30].mxu1 %vm3283_vm5, %v10970_v8  ;;  %v8906_v8 = vpack.c.bf16 %v7045_v55, %v7044_v59 }
 0x4d4   : > { %8897 = vmatpush3.bf16.msra.mxu1 %v8894_v58  ;;  %8657 = vmatprep.mubr.msk.f32.mxu1 %vm3283_vm5, %v10996_v14  ;;  %v12569_v14 = vld [vmem:[#allocation12_spill] sm:$0xff] }
 0x4d5   : > { %8899 = vmatprep.subr.bf16.mxu1 %v8898_v6 }
 0x4d7   : > { %8658 = vmatmul.mubr.msk.f32.gmra.mrb[0].mxu1 %vm3283_vm5, %v12528_v36  ;;  %v12577_v36 = vld [vmem:[#allocation22_spill] sm:$0xff] }
 0x4d8   : > { %8660 = vmatprep.mubr.msk.f32.mxu1 %vm3283_vm5, %v12529_v26  ;;  %8901 = vmatpush3.bf16.msra.mxu1 %v8898_v6  ;;  %v12578_v26 = vld [vmem:[#allocation23_spill] sm:$0xff] }
 0x4d9   : > { %8903 = vmatprep.subr.bf16.mxu1 %v8902_v22 }
 0x4db   : > { %8661 = vmatmul.mubr.msk.f32.gmra.mrb[2].mxu1 %vm3283_vm5, %v12530_v33  ;;  %v5655_v33 = vrot.slane %v11972_v15, 1 }
 0x4dc   : > { %8663 = vmatprep.mubr.msk.f32.mxu1 %vm3283_vm5, %v12531_v45  ;;  %8905 = vmatpush3.bf16.msra.mxu1 %v8902_v22  ;;  %v5656_v45 = vrot.slane %v11978_v13, 1 }
 0x4dd   : > { %8907 = vmatprep.subr.bf16.mxu1 %v8906_v8 }
 0x4df   : > { %8664 = vmatmul.mubr.msk.f32.gmra.mrb[4].mxu1 %vm3283_vm5, %v12532_v27  ;;  %v3425_v27 = vld [vmem:[#allocation3 + $0x1a8] sm:$0x3] }
 0x4e0   : > { %8666 = vmatprep.mubr.msk.f32.mxu1 %vm3283_vm5, %v12533_v21  ;;  %8909 = vmatpush3.bf16.msra.mxu1 %v8906_v8  ;;  %v12579_v21 = vld [vmem:[#allocation5_spill] sm:$0xff] }
 0x4e3   : > { %8667 = vmatmul.mubr.msk.f32.gmra.mrb[6].mxu1 %vm3283_vm5, %v12534_v37  ;;  %v5658_v37 = vrot.slane %v3425_v27, 1 }
 0x4e4   : > { %8669 = vmatprep.mubr.msk.f32.mxu1 %vm3283_vm5, %v12535_v56  ;;  %v5657_v56 = vsel %vm515_vm3, %v5655_v33, %v5656_v45 }
 0x4e7   : > { %8670 = vmatmul.mubr.msk.f32.gmra.mrb[8].mxu1 %vm3283_vm5, %v12536_v50  ;;  %v12580_v50 = vld [vmem:[#allocation17_spill] sm:$0xff] }
 0x4e8   : > { %8672 = vmatprep.mubr.msk.f32.mxu1 %vm3283_vm5, %v12537_v38  ;;  %v5659_v38 = vsel %vm515_vm3, %v5656_v45, %v5658_v37 }
 0x4eb   : > { %8673 = vmatmul.mubr.msk.f32.gmra.mrb[10].mxu1 %vm3283_vm5, %v12538_v0  ;;  %v12591_v0 = vld [vmem:[#allocation48_spill] sm:$0xff] }
 0x4ec   : > { %8675 = vmatprep.mubr.msk.f32.mxu1 %vm3283_vm5, %v12539_v46  ;;  %v12592_v46 = vld [vmem:[#allocation49_spill] sm:$0xff] }
 0x4ef   : > { %8676 = vmatmul.mubr.msk.f32.gmra.mrb[12].mxu1 %vm3283_vm5, %v12540_v40  ;;  %v5930_v40 = vrot.slane %v11972_v15, 2 }
 0x4f0   : > { %8678 = vmatprep.mubr.msk.f32.mxu1 %vm3283_vm5, %v12541_v41  ;;  %v5931_v41 = vrot.slane %v11978_v13, 2 }
 0x4f3   : > { %8679 = vmatmul.mubr.msk.f32.gmra.mrb[14].mxu1 %vm3283_vm5, %v12569_v14 }
 0x4f4   : > { %8681 = vmatprep.mubr.msk.f32.mxu1 %vm3283_vm5, %v12570_v31 }
 0x4f7   : > { %8682 = vmatmul.mubr.msk.f32.gmra.mrb[16].mxu1 %vm3283_vm5, %v12571_v4 }
 0x4f8   : > { %8684 = vmatprep.mubr.msk.f32.mxu1 %vm3283_vm5, %v12572_v42 }
 0x4fb   : > { %8685 = vmatmul.mubr.msk.f32.gmra.mrb[18].mxu1 %vm3283_vm5, %v12573_v47 }
 0x4fc   : > { %8687 = vmatprep.mubr.msk.f32.mxu1 %vm3283_vm5, %v12574_v57 }
 0x4ff   : > { %8688 = vmatmul.mubr.msk.f32.gmra.mrb[20].mxu1 %vm3283_vm5, %v12575_v35 }
 0x500   : > { %8690 = vmatprep.mubr.msk.f32.mxu1 %vm3283_vm5, %v12576_v19 }
 0x503   : > { %8691 = vmatmul.mubr.msk.f32.gmra.mrb[22].mxu1 %vm3283_vm5, %v12577_v36 }
 0x504   : > { %8693 = vmatprep.mubr.msk.f32.mxu1 %vm3283_vm5, %v12578_v26 }
 0x507   : > { %8694 = vmatmul.mubr.msk.f32.gmra.mrb[24].mxu1 %vm3283_vm5, %v12552_v18  ;;  %v12593_v18 = vld [vmem:[#allocation50_spill] sm:$0xff] }
 0x508   : > { %8696 = vmatprep.mubr.msk.f32.mxu1 %vm3283_vm5, %v12579_v21 }
 0x50b   : > { %8697 = vmatmul.mubr.msk.f32.gmra.mrb[26].mxu1 %vm3283_vm5, %v12580_v50 }
 0x50c   : > { %8699 = vmatprep.mubr.msk.f32.mxu1 %vm3283_vm5, %v5657_v56 }
 0x50f   : > { %8700 = vmatmul.mubr.msk.f32.gmra.mrb[28].mxu1 %vm3283_vm5, %v5659_v38 }
 0x510   : > { %8718 = vmatprep.mubr.msk.f32.mxu1 %vm3283_vm5, %v12555_v62  ;;  %v12594_v62 = vld [vmem:[#allocation19_spill] sm:$0xff] }
 0x513   : > { %8719 = vmatmul.mubr.msk.f32.vlgmr.msra.gmra.mrb[30].mxu1 %vm3283_vm5, %v12556_v43  ;;  %v5933_v43 = vrot.slane %v3425_v27, 2 }
 0x514   : > { %8721 = vmatprep.mubr.msk.f32.mxu1 %vm3283_vm5, %v11440_v17  ;;  %v12581_v17 = vld [vmem:[#allocation36_spill] sm:$0xff] }
 0x517   : > { %8722 = vmatmul.mubr.msk.f32.gmra.mrb[0].mxu1 %vm3283_vm5, %v11449_v29  ;;  %v12582_v29 = vld [vmem:[#allocation38_spill] sm:$0xff] }
 0x518   : > { %8724 = vmatprep.mubr.msk.f32.mxu1 %vm3283_vm5, %v11455_v30  ;;  %v12583_v30 = vld [vmem:[#allocation39_spill] sm:$0xff] }
 0x51b   : > { %8725 = vmatmul.mubr.msk.f32.gmra.mrb[2].mxu1 %vm3283_vm5, %v11463_v11  ;;  %v12584_v11 = vld [vmem:[#allocation40_spill] sm:$0xff] }
 0x51c   : > { %8727 = vmatprep.mubr.msk.f32.mxu1 %vm3283_vm5, %v11469_v52  ;;  %v12585_v52 = vld [vmem:[#allocation41_spill] sm:$0xff] }
 0x51f   : > { %8728 = vmatmul.mubr.msk.f32.gmra.mrb[4].mxu1 %vm3283_vm5, %v11476_v3  ;;  %v12586_v3 = vld [vmem:[#allocation43_spill] sm:$0xff] }
 0x520   : > { %8730 = vmatprep.mubr.msk.f32.mxu1 %vm3283_vm5, %v11482_v53  ;;  %v12587_v53 = vld [vmem:[#allocation44_spill] sm:$0xff] }
 0x523   : > { %8731 = vmatmul.mubr.msk.f32.gmra.mrb[6].mxu1 %vm3283_vm5, %v11489_v25  ;;  %v12588_v25 = vld [vmem:[#allocation45_spill] sm:$0xff] }
 0x524   : > { %8733 = vmatprep.mubr.msk.f32.mxu1 %vm3283_vm5, %v12557_v39  ;;  %v5932_v39 = vsel %vm1183_vm4, %v5930_v40, %v5931_v41 }
 0x527   : > { %8734 = vmatmul.mubr.msk.f32.gmra.mrb[8].mxu1 %vm3283_vm5, %v11502_v1  ;;  %v12590_v1 = vld [vmem:[#allocation47_spill] sm:$0xff] }
 0x528   : > { %8736 = vmatprep.mubr.msk.f32.mxu1 %vm3283_vm5, %v12558_v49  ;;  %v12595_v49 = vld [vmem:[#allocation28_spill] sm:$0xff] }
 0x52b   : > { %8737 = vmatmul.mubr.msk.f32.gmra.mrb[10].mxu1 %vm3283_vm5, %v11515_v63  ;;  %v12589_v63 = vld [vmem:[#allocation46_spill] sm:$0xff] }
 0x52c   : > { %8739 = vmatprep.mubr.msk.f32.mxu1 %vm3283_vm5, %v12559_v20  ;;  %v5934_v20 = vsel %vm1183_vm4, %v5931_v41, %v5933_v43 }
 0x52f   : > { %8740 = vmatmul.mubr.msk.f32.gmra.mrb[12].mxu1 %vm3283_vm5, %v12581_v17 }
 0x530   : > { %8742 = vmatprep.mubr.msk.f32.mxu1 %vm3283_vm5, %v12582_v29 }
 0x533   : > { %8743 = vmatmul.mubr.msk.f32.gmra.mrb[14].mxu1 %vm3283_vm5, %v12583_v30 }
 0x534   : > { %8745 = vmatprep.mubr.msk.f32.mxu1 %vm3283_vm5, %v12584_v11 }
 0x537   : > { %8746 = vmatmul.mubr.msk.f32.gmra.mrb[16].mxu1 %vm3283_vm5, %v12585_v52 }
 0x538   : > { %8748 = vmatprep.mubr.msk.f32.mxu1 %vm3283_vm5, %v12586_v3 }
 0x53b   : > { %8749 = vmatmul.mubr.msk.f32.gmra.mrb[18].mxu1 %vm3283_vm5, %v12587_v53 }
 0x53c   : > { %8751 = vmatprep.mubr.msk.f32.mxu1 %vm3283_vm5, %v12588_v25 }
 0x53f   : > { %8752 = vmatmul.mubr.msk.f32.gmra.mrb[20].mxu1 %vm3283_vm5, %v12589_v63 }
 0x540   : > { %8754 = vmatprep.mubr.msk.f32.mxu1 %vm3283_vm5, %v12590_v1 }
 0x543   : > { %8755 = vmatmul.mubr.msk.f32.gmra.mrb[22].mxu1 %vm3283_vm5, %v12591_v0 }
 0x544   : > { %8757 = vmatprep.mubr.msk.f32.mxu1 %vm3283_vm5, %v12592_v46 }
 0x547   : > { %8758 = vmatmul.mubr.msk.f32.gmra.mrb[24].mxu1 %vm3283_vm5, %v12593_v18 }
 0x548   : > { %8760 = vmatprep.mubr.msk.f32.mxu1 %vm3283_vm5, %v12594_v62 }
 0x54b   : > { %8761 = vmatmul.mubr.msk.f32.gmra.mrb[26].mxu1 %vm3283_vm5, %v12595_v49 }
 0x54c   : > { %8763 = vmatprep.mubr.msk.f32.mxu1 %vm3283_vm5, %v5932_v39 }
 0x54f   : > { %8764 = vmatmul.mubr.msk.f32.gmra.mrb[28].mxu1 %vm3283_vm5, %v5934_v20 }
 0x564   : > { %v8208_v5 = vpop.f32.mrb[32].mxu0 }
 0x565   : > { %v3701_v23 = vpop.f32.mrb[33].mxu0 }
 0x5e6   : > { %v8720_v32 = vpop.f32.mrb[30].mxu1 }
 0x5e7   : > { %v8918_v44 = vadd.f32 %v8720_v32, %v8208_v5  ;;  %v6014_v16 = vpop.f32.mrb[31].mxu1 }
 0x5e8   : > { %v8919_v61 = vadd.f32 %v6014_v16, %v3701_v23 }
 0x5e9   : > { %v6213_v58 = vadd.f32 %v8918_v44, %v12135_v7 }
 0x5ea   : > { %v6212_v12 = vadd.f32 %v8919_v61, %v12135_v7  ;;  %v8723_v9 = vpop.f32.mrb[0].mxu1 }
 0x5eb   : > { %v6215_v34 = vadd.f32 %v8723_v9, %v12135_v7  ;;  %v6024_v51 = vpop.f32.mrb[1].mxu1  ;;  %v6245_v60 = vmax.f32 %v6213_v58, 0.0 }
 0x5ec   : > { %v6214_v2 = vadd.f32 %v12135_v7, %v6024_v51  ;;  %v6244_v15 = vmax.f32 %v6212_v12, 0.0 }
 0x5ed   : > { %v6247_v24 = vmax.f32 %v6215_v34, 0.0 }
 0x5ee   : > { %v6246_v13 = vmax.f32 %v6214_v2, 0.0  ;;  %v8726_v10 = vpop.f32.mrb[2].mxu1 }
 0x5ef   : > { %v6277_v54 = vmax.f32 %v6245_v60, %v6247_v24  ;;  %v6034_v6 = vpop.f32.mrb[3].mxu1  ;;  %v6217_v28 = vadd.f32 %v8726_v10, %v12135_v7 }
 0x5f0   : > { %v6276_v48 = vmax.f32 %v6244_v15, %v6246_v13  ;;  %v6216_v22 = vadd.f32 %v12135_v7, %v6034_v6 }
 0x5f1   : > { %6293 = vst.msk [vmem:[#allocation4 + $0x8] sm:$0xff] %vm3283_vm5, %v6277_v54  ;;  %v6249_v31 = vmax.f32 %v6217_v28, 0.0 }
 0x5f2   : > { %6292 = vst.msk [vmem:[#allocation4] sm:$0xff] %vm3283_vm5, %v6276_v48  ;;  %v8729_v59 = vpop.f32.mrb[4].mxu1  ;;  %v6248_v42 = vmax.f32 %v6216_v22, 0.0 }
 0x5f3   : > { %v6219_v55 = vadd.f32 %v8729_v59, %v12135_v7  ;;  %v6044_v8 = vpop.f32.mrb[5].mxu1 }
 0x5f4   : > { %v6218_v14 = vadd.f32 %v12135_v7, %v6044_v8 }
 0x5f5   : > { %v6251_v4 = vmax.f32 %v6219_v55, 0.0 }
 0x5f6   : > { %v6250_v47 = vmax.f32 %v6218_v14, 0.0  ;;  %v8732_v57 = vpop.f32.mrb[6].mxu1 }
 0x5f7   : > { %v6279_v35 = vmax.f32 %v6249_v31, %v6251_v4  ;;  %v6054_v19 = vpop.f32.mrb[7].mxu1  ;;  %v6221_v45 = vadd.f32 %v8732_v57, %v12135_v7 }
 0x5f8   : > { %v6278_v36 = vmax.f32 %v6248_v42, %v6250_v47  ;;  %v6220_v21 = vadd.f32 %v12135_v7, %v6054_v19 }
 0x5f9   : > { %v6308_v26 = vld [vmem:[#allocation4] ss:$2 sm:$0xff]  ;;  %v6324_v33 = vld [vmem:[#allocation4 + $0x1] ss:$2 sm:$0xff]  ;;  %6295 = vst.msk [vmem:[#allocation4 + $0x18] sm:$0xff] %vm3283_vm5, %v6279_v35  ;;  %v6253_v17 = vmax.f32 %v6221_v45, 0.0 }
 0x5fa   : > { %v6339_v27 = vmax.f32 %v6308_v26, %v6324_v33  ;;  %6294 = vst.msk [vmem:[#allocation4 + $0x10] sm:$0xff] %vm3283_vm5, %v6278_v36  ;;  %v8735_v37 = vpop.f32.mrb[8].mxu1  ;;  %v6252_v30 = vmax.f32 %v6220_v21, 0.0 }
 0x5fb   : > { %v6223_v56 = vadd.f32 %v8735_v37, %v12135_v7  ;;  %v6064_v50 = vpop.f32.mrb[9].mxu1 }
 0x5fc   : > { %6347 = vst.msk [vmem:[%s12151_s23] sm:$0xff] %vm3283_vm5, %v6339_v27  ;;  %v6222_v38 = vadd.f32 %v12135_v7, %v6064_v50 }
 0x5fd   : > { %v6255_v29 = vmax.f32 %v6223_v56, 0.0 }
 0x5fe   : > { %v6254_v11 = vmax.f32 %v6222_v38, 0.0  ;;  %v8738_v52 = vpop.f32.mrb[10].mxu1 }
 0x5ff   : > { %v6281_v3 = vmax.f32 %v6253_v17, %v6255_v29  ;;  %v6074_v53 = vpop.f32.mrb[11].mxu1  ;;  %v6225_v0 = vadd.f32 %v8738_v52, %v12135_v7 }
 0x600   : > { %v6280_v25 = vmax.f32 %v6252_v30, %v6254_v11  ;;  %v6224_v40 = vadd.f32 %v12135_v7, %v6074_v53 }
 0x601   : > { %v6310_v63 = vld [vmem:[#allocation4 + $0x10] ss:$2 sm:$0xff]  ;;  %v6326_v1 = vld [vmem:[#allocation4 + $0x11] ss:$2 sm:$0xff]  ;;  %6297 = vst.msk [vmem:[#allocation4 + $0x28] sm:$0xff] %vm3283_vm5, %v6281_v3  ;;  %v6257_v39 = vmax.f32 %v6225_v0, 0.0 }
 0x602   : > { %v6340_v46 = vmax.f32 %v6310_v63, %v6326_v1  ;;  %6296 = vst.msk [vmem:[#allocation4 + $0x20] sm:$0xff] %vm3283_vm5, %v6280_v25  ;;  %v8741_v41 = vpop.f32.mrb[12].mxu1  ;;  %v6256_v20 = vmax.f32 %v6224_v40, 0.0 }
 0x603   : > { %v6227_v18 = vadd.f32 %v8741_v41, %v12135_v7  ;;  %v6084_v62 = vpop.f32.mrb[13].mxu1 }
 0x604   : > { %6348 = vst.msk [vmem:[%s12151_s23 + $0x8] sm:$0xff] %vm3283_vm5, %v6340_v46  ;;  %v6226_v43 = vadd.f32 %v12135_v7, %v6084_v62 }
 0x605   : > { %v6259_v49 = vmax.f32 %v6227_v18, 0.0 }
 0x606   : > { %v6258_v5 = vmax.f32 %v6226_v43, 0.0  ;;  %v8744_v23 = vpop.f32.mrb[14].mxu1 }
 0x607   : > { %v6283_v32 = vmax.f32 %v6257_v39, %v6259_v49  ;;  %v6094_v44 = vpop.f32.mrb[15].mxu1  ;;  %v6229_v12 = vadd.f32 %v8744_v23, %v12135_v7 }
 0x608   : > { %v6282_v16 = vmax.f32 %v6256_v20, %v6258_v5  ;;  %v6228_v34 = vadd.f32 %v12135_v7, %v6094_v44 }
 0x609   : > { %v6312_v61 = vld [vmem:[#allocation4 + $0x20] ss:$2 sm:$0xff]  ;;  %v6328_v58 = vld [vmem:[#allocation4 + $0x21] ss:$2 sm:$0xff]  ;;  %6299 = vst.msk [vmem:[#allocation4 + $0x38] sm:$0xff] %vm3283_vm5, %v6283_v32  ;;  %v6261_v15 = vmax.f32 %v6229_v12, 0.0 }
 0x60a   : > { %v6341_v9 = vmax.f32 %v6312_v61, %v6328_v58  ;;  %6298 = vst.msk [vmem:[#allocation4 + $0x30] sm:$0xff] %vm3283_vm5, %v6282_v16  ;;  %v8747_v51 = vpop.f32.mrb[16].mxu1  ;;  %v6260_v10 = vmax.f32 %v6228_v34, 0.0 }
 0x60b   : > { %v6231_v2 = vadd.f32 %v8747_v51, %v12135_v7  ;;  %v6104_v60 = vpop.f32.mrb[17].mxu1 }
 0x60c   : > { %6349 = vst.msk [vmem:[%s12151_s23 + $0x10] sm:$0xff] %vm3283_vm5, %v6341_v9  ;;  %v6230_v24 = vadd.f32 %v12135_v7, %v6104_v60 }
 0x60d   : > { %v6263_v13 = vmax.f32 %v6231_v2, 0.0 }
 0x60e   : > { %v6262_v54 = vmax.f32 %v6230_v24, 0.0  ;;  %v8750_v6 = vpop.f32.mrb[18].mxu1 }
 0x60f   : > { %v6285_v48 = vmax.f32 %v6261_v15, %v6263_v13  ;;  %v6114_v28 = vpop.f32.mrb[19].mxu1  ;;  %v6233_v8 = vadd.f32 %v8750_v6, %v12135_v7 }
 0x610   : > { %v6284_v22 = vmax.f32 %v6260_v10, %v6262_v54  ;;  %v6232_v31 = vadd.f32 %v12135_v7, %v6114_v28 }
 0x611   : > { %v6314_v59 = vld [vmem:[#allocation4 + $0x30] ss:$2 sm:$0xff]  ;;  %v6330_v55 = vld [vmem:[#allocation4 + $0x31] ss:$2 sm:$0xff]  ;;  %6301 = vst.msk [vmem:[#allocation4 + $0x48] sm:$0xff] %vm3283_vm5, %v6285_v48  ;;  %v6265_v35 = vmax.f32 %v6233_v8, 0.0 }
 0x612   : > { %v6342_v14 = vmax.f32 %v6314_v59, %v6330_v55  ;;  %6300 = vst.msk [vmem:[#allocation4 + $0x40] sm:$0xff] %vm3283_vm5, %v6284_v22  ;;  %v8753_v4 = vpop.f32.mrb[20].mxu1  ;;  %v6264_v36 = vmax.f32 %v6232_v31, 0.0 }
 0x613   : > { %v6235_v42 = vadd.f32 %v8753_v4, %v12135_v7  ;;  %v6124_v47 = vpop.f32.mrb[21].mxu1 }
 0x614   : > { %6350 = vst.msk [vmem:[%s12151_s23 + $0x18] sm:$0xff] %vm3283_vm5, %v6342_v14  ;;  %v6234_v57 = vadd.f32 %v12135_v7, %v6124_v47 }
 0x615   : > { %v6267_v19 = vmax.f32 %v6235_v42, 0.0 }
 0x616   : > { %v6266_v26 = vmax.f32 %v6234_v57, 0.0  ;;  %v8756_v33 = vpop.f32.mrb[22].mxu1 }
 0x617   : > { %v6287_v45 = vmax.f32 %v6265_v35, %v6267_v19  ;;  %v6134_v27 = vpop.f32.mrb[23].mxu1  ;;  %v6237_v50 = vadd.f32 %v8756_v33, %v12135_v7 }
 0x618   : > { %v6286_v21 = vmax.f32 %v6264_v36, %v6266_v26  ;;  %v6236_v17 = vadd.f32 %v12135_v7, %v6134_v27 }
 0x619   : > { %v6316_v37 = vld [vmem:[#allocation4 + $0x40] ss:$2 sm:$0xff]  ;;  %v6332_v56 = vld [vmem:[#allocation4 + $0x41] ss:$2 sm:$0xff]  ;;  %6303 = vst.msk [vmem:[#allocation4 + $0x58] sm:$0xff] %vm3283_vm5, %v6287_v45  ;;  %v6269_v3 = vmax.f32 %v6237_v50, 0.0 }
 0x61a   : > { %v6343_v38 = vmax.f32 %v6316_v37, %v6332_v56  ;;  %6302 = vst.msk [vmem:[#allocation4 + $0x50] sm:$0xff] %vm3283_vm5, %v6286_v21  ;;  %v8759_v29 = vpop.f32.mrb[24].mxu1  ;;  %v6268_v25 = vmax.f32 %v6236_v17, 0.0 }
 0x61b   : > { %v6239_v30 = vadd.f32 %v8759_v29, %v12135_v7  ;;  %v6144_v11 = vpop.f32.mrb[25].mxu1 }
 0x61c   : > { %6351 = vst.msk [vmem:[%s12151_s23 + $0x20] sm:$0xff] %vm3283_vm5, %v6343_v38  ;;  %v6238_v52 = vadd.f32 %v12135_v7, %v6144_v11 }
 0x61d   : > { %v6271_v53 = vmax.f32 %v6239_v30, 0.0 }
 0x61e   : > { %v6270_v63 = vmax.f32 %v6238_v52, 0.0  ;;  %v8762_v1 = vpop.f32.mrb[26].mxu1 }
 0x61f   : > { %v6289_v0 = vmax.f32 %v6269_v3, %v6271_v53  ;;  %v6154_v46 = vpop.f32.mrb[27].mxu1  ;;  %v6241_v62 = vadd.f32 %v8762_v1, %v12135_v7 }
 0x620   : > { %v6288_v40 = vmax.f32 %v6268_v25, %v6270_v63  ;;  %v6240_v39 = vadd.f32 %v12135_v7, %v6154_v46 }
 0x621   : > { %v6318_v41 = vld [vmem:[#allocation4 + $0x50] ss:$2 sm:$0xff]  ;;  %v6334_v18 = vld [vmem:[#allocation4 + $0x51] ss:$2 sm:$0xff]  ;;  %6305 = vst.msk [vmem:[#allocation4 + $0x68] sm:$0xff] %vm3283_vm5, %v6289_v0  ;;  %v6273_v32 = vmax.f32 %v6241_v62, 0.0 }
 0x622   : > { %v6344_v43 = vmax.f32 %v6318_v41, %v6334_v18  ;;  %6304 = vst.msk [vmem:[#allocation4 + $0x60] sm:$0xff] %vm3283_vm5, %v6288_v40  ;;  %v8765_v49 = vpop.f32.mrb[28].mxu1  ;;  %v6272_v16 = vmax.f32 %v6240_v39, 0.0 }
 0x623   : > { %v6243_v20 = vadd.f32 %v8765_v49, %v12135_v7  ;;  %v6164_v5 = vpop.f32.mrb[29].mxu1 }
 0x624   : > { %6352 = vst.msk [vmem:[%s12151_s23 + $0x28] sm:$0xff] %vm3283_vm5, %v6344_v43  ;;  %v6242_v23 = vadd.f32 %v12135_v7, %v6164_v5 }
 0x625   : > { %v6275_v44 = vmax.f32 %v6243_v20, 0.0 }
 0x626   : > { %v6274_v61 = vmax.f32 %v6242_v23, 0.0 }
 0x627   : > { %v6291_v58 = vmax.f32 %v6273_v32, %v6275_v44 }
 0x628   : > { %v6290_v12 = vmax.f32 %v6272_v16, %v6274_v61 }
 0x629   : > { %v6320_v9 = vld [vmem:[#allocation4 + $0x60] ss:$2 sm:$0xff]  ;;  %v6336_v34 = vld [vmem:[#allocation4 + $0x61] ss:$2 sm:$0xff]  ;;  %6307 = vst.msk [vmem:[#allocation4 + $0x78] sm:$0xff] %vm3283_vm5, %v6291_v58 }
 0x62a   : > { %v6345_v51 = vmax.f32 %v6320_v9, %v6336_v34  ;;  %6306 = vst.msk [vmem:[#allocation4 + $0x70] sm:$0xff] %vm3283_vm5, %v6290_v12 }
 0x62c   : > { %6353 = vst.msk [vmem:[%s12151_s23 + $0x30] sm:$0xff] %vm3283_vm5, %v6345_v51 }
 0x631   : > { %v6322_v2 = vld [vmem:[#allocation4 + $0x70] ss:$2 sm:$0xff]  ;;  %v6338_v60 = vld [vmem:[#allocation4 + $0x71] ss:$2 sm:$0xff] }
 0x632   : > { %v6346_v24 = vmax.f32 %v6322_v2, %v6338_v60 }
 0x634   : > { %6354 = vst.msk [vmem:[%s12151_s23 + $0x38] sm:$0xff] %vm3283_vm5, %v6346_v24 }
 0x635 PF: > { %s16_s21 = sadd.s32 1, %s9459_s21  }
 0x636   : > { %p13_p4 = scmp.ge.s32.totalorder %s16_s21, 6  }
 0x638   :  { %15 = sbr.rel (!%p13_p4) target bundleno = 1 (0x1), region = 107 }

</bundles_post_ra>
